<compile_context>
chip_gen: v7x
topology: tpu7x:2x2x1
jax: 0.10.0
libtpu: 0.0.40
codegen_flags: <defaults>
</compile_context>

<pallas_src>
import functools

import jax
import jax.numpy as jnp
from jax.experimental import pallas as pl
from jax.experimental.pallas import tpu as pltpu

EPS_IN = 1e-3          # InstanceNorm2d eps used in the module
EPS_BN = 1e-5          # BatchNorm2d default eps
MXU_DTYPE = jnp.bfloat16
VMEM_LIMIT = 32 * 1024 * 1024   # explicit scoped-VMEM cap (v7x-safe)
TILE_N_CAP = 512                # lane tile cap for the points axis


def _pick_tile_n(n, cap=TILE_N_CAP):
  """Largest multiple of 128 that divides n, capped; else the full axis."""
  if n <= cap:
    return n
  t = cap - (cap % 128)
  while t >= 128:
    if n % t == 0:
      return t
    t -= 128
  return n   # TODO(synk): ragged N (not a multiple of 128) falls back to one tile.


def _full_spec(shape):
  nd = len(shape)
  return pl.BlockSpec(shape, lambda i, _nd=nd: (0,) * _nd)


# --------------------------------------------------------------------------
# Fused point-domain stage kernel:
#   [x*a+d -> ReLU] -> 1x1 conv (+bias) [+res | +Ws@x0+bs]  + output stats
# --------------------------------------------------------------------------
def _stage_kernel(*refs, norm_relu, res_mode):
  i = 0
  x_ref = refs[i]; i += 1
  if norm_relu:
    a_ref = refs[i]; d_ref = refs[i + 1]; i += 2
  w_ref = refs[i]; b_ref = refs[i + 1]; i += 2
  if res_mode == "conv":
    x0_ref = refs[i]; ws_ref = refs[i + 1]; bs_ref = refs[i + 2]; i += 3
  elif res_mode == "add":
    r_ref = refs[i]; i += 1
  out_ref, sum_ref, sq_ref = refs[i], refs[i + 1], refs[i + 2]

  h = x_ref[...].astype(jnp.float32)                      # (Cin, tN)
  if norm_relu:
    # a/d already fold InstanceNorm + BatchNorm(train) + gamma/beta per (b, c).
    h = jnp.maximum(h * a_ref[...] + d_ref[...], 0.0)

  z = jnp.dot(w_ref[...].astype(MXU_DTYPE), h.astype(MXU_DTYPE),
              preferred_element_type=jnp.float32) + b_ref[...]
  if res_mode == "conv":       # fused shot_cut conv of the block input x0
    z = z + jnp.dot(ws_ref[...].astype(MXU_DTYPE),
                    x0_ref[...].astype(MXU_DTYPE),
                    preferred_element_type=jnp.float32) + bs_ref[...]
  elif res_mode == "add":      # identity residual
    z = z + r_ref[...].astype(jnp.float32)
  out_ref[...] = z

  # Per-(b, out_channel) sum / sum-of-squares over points, accumulated across
  # the arbitrary N-tile grid axis (stats feed the next stage's IN/BN).
  ssum = jnp.sum(z, axis=1, keepdims=True)                # (Cout, 1)
  ssq = jnp.sum(z * z, axis=1, keepdims=True)
  n = pl.program_id(1)

  @pl.when(n == 0)
  def _():
    sum_ref[...] = ssum
    sq_ref[...] = ssq

  @pl.when(n > 0)
  def _():
    sum_ref[...] += ssum
    sq_ref[...] += ssq


def _norm_relu_conv_stage(x, w, bias, coef=None, res=None, shortcut=None,
                          tile_n=TILE_N_CAP):
  """Returns (z, sum_z, sumsq_z); sums are per (batch, out_channel) over points."""
  B, Cin, N = x.shape
  Cout = w.shape[0]
  tn = _pick_tile_n(N, tile_n)
  grid = (B, N // tn)

  in_specs = [pl.BlockSpec((None, Cin, tn), lambda bb, nn: (bb, 0, nn))]
  args = [x]
  if coef is not None:
    a, d = coef
    in_specs += [pl.BlockSpec((None, Cin, 1), lambda bb, nn: (bb, 0, 0)),
                 pl.BlockSpec((None, Cin, 1), lambda bb, nn: (bb, 0, 0))]
    args += [a, d]
  in_specs += [pl.BlockSpec((Cout, Cin), lambda bb, nn: (0, 0)),
               pl.BlockSpec((Cout, 1), lambda bb, nn: (0, 0))]
  args += [w, bias.reshape(Cout, 1)]

  res_mode = None
  flops = 2 * B * N * Cout * Cin
  bytes_accessed = 4 * (B * Cin * N + B * Cout * N + Cout * (Cin + 1))
  if shortcut is not None:
    x0, ws, bs = shortcut
    C0 = x0.shape[1]
    res_mode = "conv"
    in_specs += [pl.BlockSpec((None, C0, tn), lambda bb, nn: (bb, 0, nn)),
                 pl.BlockSpec((Cout, C0), lambda bb, nn: (0, 0)),
                 pl.BlockSpec((Cout, 1), lambda bb, nn: (0, 0))]
    args += [x0, ws, bs.reshape(Cout, 1)]
    flops += 2 * B * N * Cout * C0
    bytes_accessed += 4 * (B * C0 * N + Cout * (C0 + 1))
  elif res is not None:
    res_mode = "add"
    in_specs.append(pl.BlockSpec((None, Cout, tn), lambda bb, nn: (bb, 0, nn)))
    args.append(res)
    bytes_accessed += 4 * B * Cout * N

  out_specs = [pl.BlockSpec((None, Cout, tn), lambda bb, nn: (bb, 0, nn)),
               pl.BlockSpec((None, Cout, 1), lambda bb, nn: (bb, 0, 0)),
               pl.BlockSpec((None, Cout, 1), lambda bb, nn: (bb, 0, 0))]
  out_shape = [jax.ShapeDtypeStruct((B, Cout, N), jnp.float32),
               jax.ShapeDtypeStruct((B, Cout, 1), jnp.float32),
               jax.ShapeDtypeStruct((B, Cout, 1), jnp.float32)]

  kernel = functools.partial(_stage_kernel, norm_relu=coef is not None,
                             res_mode=res_mode)
  z, s1, s2 = pl.pallas_call(
      kernel,
      grid=grid,
      in_specs=in_specs,
      out_specs=out_specs,
      out_shape=out_shape,
      compiler_params=pltpu.CompilerParams(
          dimension_semantics=("parallel", "arbitrary"),
          vmem_limit_bytes=VMEM_LIMIT),
      cost_estimate=pl.CostEstimate(flops=int(flops), transcendentals=0,
                                    bytes_accessed=int(bytes_accessed)),
  )(*args)
  return z, s1, s2


# --------------------------------------------------------------------------
# diff_unpool: norm+ReLU+conv -> softmax over clusters -> x_down @ S  (tiled over N)
# --------------------------------------------------------------------------
def _unpool_kernel(x_ref, a_ref, d_ref, w_ref, b_ref, xd_ref,
                   out_ref, sum_ref, sq_ref):
  h = jnp.maximum(x_ref[...].astype(jnp.float32) * a_ref[...] + d_ref[...], 0.0)
  e = jnp.dot(w_ref[...].astype(MXU_DTYPE), h.astype(MXU_DTYPE),
              preferred_element_type=jnp.float32) + b_ref[...]      # (K, tN)
  e = e - jnp.max(e, axis=0, keepdims=True)
  p = jnp.exp(e)
  s = p / jnp.sum(p, axis=0, keepdims=True)                         # softmax over K
  z = jnp.dot(xd_ref[...].astype(MXU_DTYPE), s.astype(MXU_DTYPE),
              preferred_element_type=jnp.float32)                   # (C, tN)
  out_ref[...] = z

  ssum = jnp.sum(z, axis=1, keepdims=True)
  ssq = jnp.sum(z * z, axis=1, keepdims=True)
  n = pl.program_id(1)

  @pl.when(n == 0)
  def _():
    sum_ref[...] = ssum
    sq_ref[...] = ssq

  @pl.when(n > 0)
  def _():
    sum_ref[...] += ssum
    sq_ref[...] += ssq


def diff_unpool_fused(x_up, coef, w, bias, x_down, tile_n=TILE_N_CAP):
  B, C, N = x_up.shape
  K = w.shape[0]
  tn = _pick_tile_n(N, tile_n)
  a, d = coef
  return pl.pallas_call(
      _unpool_kernel,
      grid=(B, N // tn),
      in_specs=[pl.BlockSpec((None, C, tn), lambda bb, nn: (bb, 0, nn)),
                pl.BlockSpec((None, C, 1), lambda bb, nn: (bb, 0, 0)),
                pl.BlockSpec((None, C, 1), lambda bb, nn: (bb, 0, 0)),
                pl.BlockSpec((K, C), lambda bb, nn: (0, 0)),
                pl.BlockSpec((K, 1), lambda bb, nn: (0, 0)),
                pl.BlockSpec((None, C, K), lambda bb, nn: (bb, 0, 0))],
      out_specs=[pl.BlockSpec((None, C, tn), lambda bb, nn: (bb, 0, nn)),
                 pl.BlockSpec((None, C, 1), lambda bb, nn: (bb, 0, 0)),
                 pl.BlockSpec((None, C, 1), lambda bb, nn: (bb, 0, 0))],
      out_shape=[jax.ShapeDtypeStruct((B, C, N), jnp.float32),
                 jax.ShapeDtypeStruct((B, C, 1), jnp.float32),
                 jax.ShapeDtypeStruct((B, C, 1), jnp.float32)],
      compiler_params=pltpu.CompilerParams(
          dimension_semantics=("parallel", "arbitrary"),
          vmem_limit_bytes=VMEM_LIMIT),
  )(x_up, a, d, w, bias.reshape(K, 1), x_down)


# --------------------------------------------------------------------------
# diff_pool: norm+ReLU+conv -> softmax over points -> x @ S^T   (grid over batch)
# --------------------------------------------------------------------------
def _pool_kernel(x_ref, a_ref, d_ref, w_ref, b_ref, out_ref):
  x = x_ref[...].astype(jnp.float32)                                # (C, N)
  h = jnp.maximum(x * a_ref[...] + d_ref[...], 0.0)
  e = jnp.dot(w_ref[...].astype(MXU_DTYPE), h.astype(MXU_DTYPE),
              preferred_element_type=jnp.float32) + b_ref[...]      # (K, N)
  e = e - jnp.max(e, axis=1, keepdims=True)
  p = jnp.exp(e)
  s = p / jnp.sum(p, axis=1, keepdims=True)                         # softmax over N
  out_ref[...] = jax.lax.dot_general(                               # (C,N)x(K,N)->(C,K)
      x.astype(MXU_DTYPE), s.astype(MXU_DTYPE),
      (((1,), (1,)), ((), ())), preferred_element_type=jnp.float32)


def diff_pool_fused(x, coef, w, bias):
  # TODO(synk): softmax over points is global, so each batch keeps the full N
  # axis resident (fine up to a few thousand points); an online-softmax
  # reduction grid would be needed for much larger N.
  B, C, N = x.shape
  K = w.shape[0]
  a, d = coef
  return pl.pallas_call(
      _pool_kernel,
      grid=(B,),
      in_specs=[pl.BlockSpec((None, C, N), lambda bb: (bb, 0, 0)),
                pl.BlockSpec((None, C, 1), lambda bb: (bb, 0, 0)),
                pl.BlockSpec((None, C, 1), lambda bb: (bb, 0, 0)),
                pl.BlockSpec((K, C), lambda bb: (0, 0)),
                pl.BlockSpec((K, 1), lambda bb: (0, 0))],
      out_specs=pl.BlockSpec((None, C, K), lambda bb: (bb, 0, 0)),
      out_shape=jax.ShapeDtypeStruct((B, C, K), jnp.float32),
      compiler_params=pltpu.CompilerParams(
          dimension_semantics=("parallel",),
          vmem_limit_bytes=VMEM_LIMIT),
  )(x, a, d, w, bias.reshape(K, 1))


# --------------------------------------------------------------------------
# OAFilter: whole block fused in one kernel in (B, C, K) layout (no transposes).
# Cluster-domain tensors are small, so the full tensor lives in VMEM.
# --------------------------------------------------------------------------
def _oafilter_kernel(x_ref, g1_ref, be1_ref, w1_ref, cb1_ref,
                     g2_ref, be2_ref, w2_ref, cb2_ref,
                     g3_ref, be3_ref, w3_ref, cb3_ref, o_ref, h_scr, *, B):
  x = x_ref[...].astype(jnp.float32)                                # (B, C, K)

  def in_bn(h, g_ref, be_ref):
    # InstanceNorm over clusters per (b, c), then BatchNorm(train) per c.
    mu = jnp.mean(h, axis=2, keepdims=True)
    var = jnp.maximum(jnp.mean(h * h, axis=2, keepdims=True) - mu * mu, 0.0)
    h = (h - mu) * jax.lax.rsqrt(var + EPS_IN)
    bmu = jnp.mean(jnp.mean(h, axis=2, keepdims=True), axis=0, keepdims=True)
    bvar = jnp.maximum(
        jnp.mean(jnp.mean(h * h, axis=2, keepdims=True), axis=0, keepdims=True)
        - bmu * bmu, 0.0)
    h = (h - bmu) * jax.lax.rsqrt(bvar + EPS_BN)
    return h * g_ref[...] + be_ref[...]

  # conv1: IN + BN + ReLU + 1x1 conv over channels
  h1 = jnp.maximum(in_bn(x, g1_ref, be1_ref), 0.0)
  w1 = w1_ref[...].astype(MXU_DTYPE)
  for bi in range(B):
    h_scr[bi] = jnp.dot(w1, h1[bi].astype(MXU_DTYPE),
                        preferred_element_type=jnp.float32) + cb1_ref[...]

  # conv2 (acts on the "transposed" view): BN over clusters + ReLU + conv over K,
  # added back as a residual.  Contraction is over the lane (K) axis directly.
  o1 = h_scr[...]
  bmu = jnp.mean(jnp.mean(o1, axis=1, keepdims=True), axis=0, keepdims=True)
  bvar = jnp.maximum(
      jnp.mean(jnp.mean(o1 * o1, axis=1, keepdims=True), axis=0, keepdims=True)
      - bmu * bmu, 0.0)
  o1n = (o1 - bmu) * jax.lax.rsqrt(bvar + EPS_BN)
  o1n = jnp.maximum(o1n * g2_ref[...] + be2_ref[...], 0.0)
  w2 = w2_ref[...].astype(MXU_DTYPE)
  for bi in range(B):
    t = jax.lax.dot_general(                                        # (C,K)x(K',K)->(C,K')
        o1n[bi].astype(MXU_DTYPE), w2,
        (((1,), (1,)), ((), ())), preferred_element_type=jnp.float32)
    h_scr[bi] = o1[bi] + t + cb2_ref[...]

  # conv3: IN + BN + ReLU + 1x1 conv over channels, + input residual
  o12 = h_scr[...]
  h3 = jnp.maximum(in_bn(o12, g3_ref, be3_ref), 0.0)
  w3 = w3_ref[...].astype(MXU_DTYPE)
  for bi in range(B):
    o_ref[bi] = (jnp.dot(w3, h3[bi].astype(MXU_DTYPE),
                         preferred_element_type=jnp.float32)
                 + cb3_ref[...] + x[bi])


def oafilter_fused(p, x):
  B, C, K = x.shape
  args = [
      x,
      p["bn1"]["gamma"].reshape(1, C, 1), p["bn1"]["beta"].reshape(1, C, 1),
      p["conv1"]["w"], p["conv1"]["b"].reshape(C, 1),
      p["bn2"]["gamma"].reshape(1, 1, K), p["bn2"]["beta"].reshape(1, 1, K),
      p["conv2"]["w"], p["conv2"]["b"].reshape(1, K),
      p["bn3"]["gamma"].reshape(1, C, 1), p["bn3"]["beta"].reshape(1, C, 1),
      p["conv3"]["w"], p["conv3"]["b"].reshape(C, 1),
  ]
  return pl.pallas_call(
      functools.partial(_oafilter_kernel, B=B),
      grid=(1,),
      in_specs=[_full_spec(a.shape) for a in args],
      out_specs=_full_spec((B, C, K)),
      out_shape=jax.ShapeDtypeStruct((B, C, K), jnp.float32),
      scratch_shapes=[pltpu.VMEM((B, C, K), jnp.float32)],
      compiler_params=pltpu.CompilerParams(vmem_limit_bytes=VMEM_LIMIT),
  )(*args)


# --------------------------------------------------------------------------
# Norm glue: combined IN + BN(train) + gamma/beta affine from one-pass stats.
# --------------------------------------------------------------------------
def _affine_from_stats(s_sum, s_sq, gamma, beta, n_pts):
  # s_sum/s_sq: (B, C, 1) sums over the points axis.
  mu = s_sum / n_pts
  var = jnp.maximum(s_sq / n_pts - mu * mu, 0.0)          # biased variance
  in_scale = jax.lax.rsqrt(var + EPS_IN)
  # After IN the per-(b,c) mean is 0, so training-mode BN stats per channel are
  # mean 0 and variance mean_b[var/(var+eps_in)] (biased, equal counts per batch).
  bn_var = jnp.mean(var * in_scale * in_scale, axis=0, keepdims=True)
  bn_scale = jax.lax.rsqrt(bn_var + EPS_BN)
  g = gamma.reshape(1, -1, 1)
  b = beta.reshape(1, -1, 1)
  a = in_scale * bn_scale * g                             # (B, C, 1)
  d = b - mu * a
  return a, d


# --------------------------------------------------------------------------
# Parameter init (deterministic, PyTorch-default-like)
# --------------------------------------------------------------------------
def _conv_params(key, out_c, in_c, scale=0.1):
  kw, kb = jax.random.split(key)
  return {"w": jax.random.normal(kw, (out_c, in_c), jnp.float32) * scale,
          "b": jax.random.normal(kb, (out_c,), jnp.float32) * scale}


def _bn_params(c):
  return {"gamma": jnp.ones((c,), jnp.float32),
          "beta": jnp.zeros((c,), jnp.float32)}


def _pointcn_params(key, c_in, c_out):
  k1, k2, k3 = jax.random.split(key, 3)
  p = {"bn1": _bn_params(c_in), "conv_a": _conv_params(k1, c_out, c_in),
       "bn2": _bn_params(c_out), "conv_b": _conv_params(k2, c_out, c_out)}
  if c_in != c_out:
    p["shot_cut"] = _conv_params(k3, c_out, c_in)
  return p


def _oafilter_params(key, c, k_pts):
  k1, k2, k3 = jax.random.split(key, 3)
  return {"bn1": _bn_params(c), "conv1": _conv_params(k1, c, c),
          "bn2": _bn_params(k_pts), "conv2": _conv_params(k2, k_pts, k_pts),
          "bn3": _bn_params(c), "conv3": _conv_params(k3, c, c)}


def init_oanblock_params(key, net_channels, input_channel, depth, clusters):
  C = net_channels
  half = depth // 2
  ki = iter(jax.random.split(key, 64))
  nk = lambda: next(ki)
  return {
      "conv1": _conv_params(nk(), C, input_channel),
      "l1_1": [_pointcn_params(nk(), C, C) for _ in range(half)],
      "down1": {"bn": _bn_params(C), "conv": _conv_params(nk(), clusters, C)},
      "l2": [_oafilter_params(nk(), C, clusters) for _ in range(half)],
      "up1": {"bn": _bn_params(C), "conv": _conv_params(nk(), clusters, C)},
      "l1_2": ([_pointcn_params(nk(), 2 * C, C)]
               + [_pointcn_params(nk(), C, C) for _ in range(half - 1)]),
      "output": _conv_params(nk(), 1, C),
  }


# --------------------------------------------------------------------------
# Module forwards (compose the fused Pallas stages)
# --------------------------------------------------------------------------
def pointcn_forward(p, x, stats, n_pts):
  s1, s2 = stats
  a1, d1 = _affine_from_stats(s1, s2, p["bn1"]["gamma"], p["bn1"]["beta"], n_pts)
  h, hs1, hs2 = _norm_relu_conv_stage(x, p["conv_a"]["w"], p["conv_a"]["b"],
                                      coef=(a1, d1))
  a2, d2 = _affine_from_stats(hs1, hs2, p["bn2"]["gamma"], p["bn2"]["beta"], n_pts)
  if "shot_cut" in p:
    out, os1, os2 = _norm_relu_conv_stage(
        h, p["conv_b"]["w"], p["conv_b"]["b"], coef=(a2, d2),
        shortcut=(x, p["shot_cut"]["w"], p["shot_cut"]["b"]))
  else:
    out, os1, os2 = _norm_relu_conv_stage(
        h, p["conv_b"]["w"], p["conv_b"]["b"], coef=(a2, d2), res=x)
  return out, (os1, os2)


def oanblock_forward(params, data, xs=None, Ks=None):
  # data: (B, input_channel, num_pts, 1) -- NCHW, W == 1
  del xs, Ks  # unused in the reference forward
  x = data[..., 0]                                        # (B, C_in, N)
  _, _, N = x.shape

  x1_1, s1, s2 = _norm_relu_conv_stage(x, params["conv1"]["w"],
                                       params["conv1"]["b"])
  stats = (s1, s2)
  for p in params["l1_1"]:
    x1_1, stats = pointcn_forward(p, x1_1, stats, N)
  stats_x11 = stats

  a, d = _affine_from_stats(stats_x11[0], stats_x11[1],
                            params["down1"]["bn"]["gamma"],
                            params["down1"]["bn"]["beta"], N)
  x_down = diff_pool_fused(x1_1, (a, d), params["down1"]["conv"]["w"],
                           params["down1"]["conv"]["b"])   # (B, C, clusters)

  x2 = x_down
  for p in params["l2"]:
    x2 = oafilter_fused(p, x2)

  a, d = _affine_from_stats(stats_x11[0], stats_x11[1],
                            params["up1"]["bn"]["gamma"],
                            params["up1"]["bn"]["beta"], N)
  x_up, us1, us2 = diff_unpool_fused(x1_1, (a, d), params["up1"]["conv"]["w"],
                                     params["up1"]["conv"]["b"], x2)

  out = jnp.concatenate([x1_1, x_up], axis=1)             # (B, 2C, N)
  stats = (jnp.concatenate([stats_x11[0], us1], axis=1),
           jnp.concatenate([stats_x11[1], us2], axis=1))
  for p in params["l1_2"]:
    out, stats = pointcn_forward(p, out, stats, N)

  logits, _, _ = _norm_relu_conv_stage(out, params["output"]["w"],
                                       params["output"]["b"])   # (B, 1, N)
  return logits[:, 0, :], None


# --------------------------------------------------------------------------
if __name__ == "__main__":
  key = jax.random.PRNGKey(0)
  k_params, k_data = jax.random.split(key)

  B, in_ch, N = 2, 4, 1024          # small, but >1 N-tile (tile=512) and 2 batches
  net_channels, depth, clusters = 32, 4, 8

  params = init_oanblock_params(k_params, net_channels, in_ch, depth, clusters)
  data = jax.random.normal(k_data, (B, in_ch, N, 1), jnp.float32)

  fwd = jax.jit(oanblock_forward)
  logits, _ = fwd(params, data)
  logits = jax.block_until_ready(logits)
  assert logits.shape == (B, N), logits.shape
  assert bool(jnp.all(jnp.isfinite(logits)))
  print("KERNEL_OK")
</pallas_src>

<mosaic_0001>
module attributes {stable_mosaic.version = 11 : i64} {
  func.func @_stage_kernel(%arg0: i32, %arg1: i32, %arg2: memref<1x4x512xf32, #tpu.memory_space<vmem>>, %arg3: memref<32x4xf32, #tpu.memory_space<vmem>>, %arg4: memref<32x1xf32, #tpu.memory_space<vmem>>, %arg5: memref<1x32x512xf32, #tpu.memory_space<vmem>>, %arg6: memref<1x32x1xf32, #tpu.memory_space<vmem>>, %arg7: memref<1x32x1xf32, #tpu.memory_space<vmem>>) attributes {dimension_semantics = [#tpu.dimension_semantics<parallel>, #tpu.dimension_semantics<arbitrary>], iteration_bounds = array<i64: 2, 2>, scalar_prefetch = 0 : i64, scratch_operands = 0 : i64, tpu.core_type = #tpu.core_type<tc>, window_params = [{transform_indices = @transform_0, window_bounds = array<i64: 1, 4, 512>}, {pipeline_mode = #tpu.pipeline_mode<synchronous>, transform_indices = @transform_1, window_bounds = array<i64: 32, 4>}, {pipeline_mode = #tpu.pipeline_mode<synchronous>, transform_indices = @transform_2, window_bounds = array<i64: 32, 1>}, {transform_indices = @transform_3, window_bounds = array<i64: 1, 32, 512>}, {transform_indices = @transform_4, window_bounds = array<i64: 1, 32, 1>}, {transform_indices = @transform_5, window_bounds = array<i64: 1, 32, 1>}]} {
    %c0 = arith.constant 0 : index
    %c0_0 = arith.constant 0 : index
    %c0_1 = arith.constant 0 : index
    %0 = vector.load %arg2[%c0, %c0_0, %c0_1] : memref<1x4x512xf32, #tpu.memory_space<vmem>>, vector<1x4x512xf32>
    %1 = vector.shape_cast %0 : vector<1x4x512xf32> to vector<4x512xf32>
    %c0_2 = arith.constant 0 : index
    %c0_3 = arith.constant 0 : index
    %2 = vector.load %arg3[%c0_2, %c0_3] : memref<32x4xf32, #tpu.memory_space<vmem>>, vector<32x4xf32>
    %3 = arith.truncf %2 : vector<32x4xf32> to vector<32x4xbf16>
    %4 = arith.truncf %1 : vector<4x512xf32> to vector<4x512xbf16>
    %cst = arith.constant dense<0.000000e+00> : vector<32x512xf32>
    %5 = tpu.matmul %3, %4, %cst {dimension_numbers = #tpu.dot_dimension_numbers<[1], [0], [0], [1], [0, 0, 1, 1], [], []>} : vector<32x4xbf16>, vector<4x512xbf16>, vector<32x512xf32> -> vector<32x512xf32>
    %c0_4 = arith.constant 0 : index
    %c0_5 = arith.constant 0 : index
    %6 = vector.load %arg4[%c0_4, %c0_5] : memref<32x1xf32, #tpu.memory_space<vmem>>, vector<32x1xf32>
    %7 = vector.broadcast %6 : vector<32x1xf32> to vector<32x512xf32>
    %8 = arith.addf %5, %7 : vector<32x512xf32>
    %c0_6 = arith.constant 0 : index
    %c0_7 = arith.constant 0 : index
    %c0_8 = arith.constant 0 : index
    %9 = vector.load %arg5[%c0_6, %c0_7, %c0_8] : memref<1x32x512xf32, #tpu.memory_space<vmem>>, vector<1x32x512xf32>
    %10 = vector.shape_cast %9 : vector<1x32x512xf32> to vector<32x512xf32>
    %11 = vector.shape_cast %8 : vector<32x512xf32> to vector<1x32x512xf32>
    tpu.vector_store %arg5[%c0_6, %c0_7, %c0_8], %11 {strides = array<i32>} : memref<1x32x512xf32, #tpu.memory_space<vmem>>, vector<1x32x512xf32>,
    %cst_9 = arith.constant dense<0.000000e+00> : vector<32xf32>
    %12 = vector.multi_reduction <add>, %8, %cst_9 [1] : vector<32x512xf32> to vector<32xf32>
    %13 = vector.shape_cast %12 : vector<32xf32> to vector<32x1xf32>
    %14 = arith.mulf %8, %8 : vector<32x512xf32>
    %cst_10 = arith.constant dense<0.000000e+00> : vector<32xf32>
    %15 = vector.multi_reduction <add>, %14, %cst_10 [1] : vector<32x512xf32> to vector<32xf32>
    %16 = vector.shape_cast %15 : vector<32xf32> to vector<32x1xf32>
    %c0_i32 = arith.constant 0 : i32
    %17 = arith.cmpi eq, %arg1, %c0_i32 : i32
    %18 = arith.extui %17 : i1 to i32
    %c0_i32_11 = arith.constant 0 : i32
    %19 = arith.cmpi ne, %18, %c0_i32_11 : i32
    scf.if %19 {
      %c0_14 = arith.constant 0 : index
      %c0_15 = arith.constant 0 : index
      %c0_16 = arith.constant 0 : index
      %23 = vector.load %arg6[%c0_14, %c0_15, %c0_16] : memref<1x32x1xf32, #tpu.memory_space<vmem>>, vector<1x32x1xf32>
      %24 = vector.shape_cast %23 : vector<1x32x1xf32> to vector<32x1xf32>
      %25 = vector.shape_cast %13 : vector<32x1xf32> to vector<1x32x1xf32>
      tpu.vector_store %arg6[%c0_14, %c0_15, %c0_16], %25 {strides = array<i32>} : memref<1x32x1xf32, #tpu.memory_space<vmem>>, vector<1x32x1xf32>,
      %c0_17 = arith.constant 0 : index
      %c0_18 = arith.constant 0 : index
      %c0_19 = arith.constant 0 : index
      %26 = vector.load %arg7[%c0_17, %c0_18, %c0_19] : memref<1x32x1xf32, #tpu.memory_space<vmem>>, vector<1x32x1xf32>
      %27 = vector.shape_cast %26 : vector<1x32x1xf32> to vector<32x1xf32>
      %28 = vector.shape_cast %16 : vector<32x1xf32> to vector<1x32x1xf32>
      tpu.vector_store %arg7[%c0_17, %c0_18, %c0_19], %28 {strides = array<i32>} : memref<1x32x1xf32, #tpu.memory_space<vmem>>, vector<1x32x1xf32>,
    } else {
    }
    %c0_i32_12 = arith.constant 0 : i32
    %20 = arith.cmpi sgt, %arg1, %c0_i32_12 : i32
    %21 = arith.extui %20 : i1 to i32
    %c0_i32_13 = arith.constant 0 : i32
    %22 = arith.cmpi ne, %21, %c0_i32_13 : i32
    scf.if %22 {
      %c0_14 = arith.constant 0 : index
      %c0_15 = arith.constant 0 : index
      %c0_16 = arith.constant 0 : index
      %23 = vector.load %arg6[%c0_14, %c0_15, %c0_16] : memref<1x32x1xf32, #tpu.memory_space<vmem>>, vector<1x32x1xf32>
      %24 = vector.shape_cast %23 : vector<1x32x1xf32> to vector<32x1xf32>
      %25 = arith.addf %24, %13 : vector<32x1xf32>
      %c0_17 = arith.constant 0 : index
      %c0_18 = arith.constant 0 : index
      %c0_19 = arith.constant 0 : index
      %26 = vector.load %arg6[%c0_17, %c0_18, %c0_19] : memref<1x32x1xf32, #tpu.memory_space<vmem>>, vector<1x32x1xf32>
      %27 = vector.shape_cast %26 : vector<1x32x1xf32> to vector<32x1xf32>
      %28 = vector.shape_cast %25 : vector<32x1xf32> to vector<1x32x1xf32>
      tpu.vector_store %arg6[%c0_17, %c0_18, %c0_19], %28 {strides = array<i32>} : memref<1x32x1xf32, #tpu.memory_space<vmem>>, vector<1x32x1xf32>,
      %c0_20 = arith.constant 0 : index
      %c0_21 = arith.constant 0 : index
      %c0_22 = arith.constant 0 : index
      %29 = vector.load %arg7[%c0_20, %c0_21, %c0_22] : memref<1x32x1xf32, #tpu.memory_space<vmem>>, vector<1x32x1xf32>
      %30 = vector.shape_cast %29 : vector<1x32x1xf32> to vector<32x1xf32>
      %31 = arith.addf %30, %16 : vector<32x1xf32>
      %c0_23 = arith.constant 0 : index
      %c0_24 = arith.constant 0 : index
      %c0_25 = arith.constant 0 : index
      %32 = vector.load %arg7[%c0_23, %c0_24, %c0_25] : memref<1x32x1xf32, #tpu.memory_space<vmem>>, vector<1x32x1xf32>
      %33 = vector.shape_cast %32 : vector<1x32x1xf32> to vector<32x1xf32>
      %34 = vector.shape_cast %31 : vector<32x1xf32> to vector<1x32x1xf32>
      tpu.vector_store %arg7[%c0_23, %c0_24, %c0_25], %34 {strides = array<i32>} : memref<1x32x1xf32, #tpu.memory_space<vmem>>, vector<1x32x1xf32>,
    } else {
    }
    return
  }
  func.func @transform_0(%arg0: i32, %arg1: i32) -> (i32, i32, i32) {
    %c0_i32 = arith.constant 0 : i32
    %c0_i32_0 = arith.constant 0 : i32
    return %arg0, %c0_i32, %arg1 : i32, i32, i32
  }
  func.func @transform_1(%arg0: i32, %arg1: i32) -> (i32, i32) {
    %c0_i32 = arith.constant 0 : i32
    %c0_i32_0 = arith.constant 0 : i32
    %c0_i32_1 = arith.constant 0 : i32
    return %c0_i32, %c0_i32_0 : i32, i32
  }
  func.func @transform_2(%arg0: i32, %arg1: i32) -> (i32, i32) {
    %c0_i32 = arith.constant 0 : i32
    %c0_i32_0 = arith.constant 0 : i32
    %c0_i32_1 = arith.constant 0 : i32
    return %c0_i32, %c0_i32_0 : i32, i32
  }
  func.func @transform_3(%arg0: i32, %arg1: i32) -> (i32, i32, i32) {
    %c0_i32 = arith.constant 0 : i32
    %c0_i32_0 = arith.constant 0 : i32
    return %arg0, %c0_i32, %arg1 : i32, i32, i32
  }
  func.func @transform_4(%arg0: i32, %arg1: i32) -> (i32, i32, i32) {
    %c0_i32 = arith.constant 0 : i32
    %c0_i32_0 = arith.constant 0 : i32
    %c0_i32_1 = arith.constant 0 : i32
    return %arg0, %c0_i32, %c0_i32_0 : i32, i32, i32
  }
  func.func @transform_5(%arg0: i32, %arg1: i32) -> (i32, i32, i32) {
    %c0_i32 = arith.constant 0 : i32
    %c0_i32_0 = arith.constant 0 : i32
    %c0_i32_1 = arith.constant 0 : i32
    return %arg0, %c0_i32, %c0_i32_0 : i32, i32, i32
  }
}

module attributes {stable_mosaic.version = 11 : i64} {
  func.func @_stage_kernel(%arg0: i32, %arg1: i32, %arg2: memref<1x32x512xf32, #tpu.memory_space<vmem>>, %arg3: memref<1x32x1xf32, #tpu.memory_space<vmem>>, %arg4: memref<1x32x1xf32, #tpu.memory_space<vmem>>, %arg5: memref<32x32xf32, #tpu.memory_space<vmem>>, %arg6: memref<32x1xf32, #tpu.memory_space<vmem>>, %arg7: memref<1x32x512xf32, #tpu.memory_space<vmem>>, %arg8: memref<1x32x512xf32, #tpu.memory_space<vmem>>, %arg9: memref<1x32x1xf32, #tpu.memory_space<vmem>>, %arg10: memref<1x32x1xf32, #tpu.memory_space<vmem>>) attributes {dimension_semantics = [#tpu.dimension_semantics<parallel>, #tpu.dimension_semantics<arbitrary>], iteration_bounds = array<i64: 2, 2>, scalar_prefetch = 0 : i64, scratch_operands = 0 : i64, tpu.core_type = #tpu.core_type<tc>, window_params = [{transform_indices = @transform_0, window_bounds = array<i64: 1, 32, 512>}, {transform_indices = @transform_1, window_bounds = array<i64: 1, 32, 1>}, {transform_indices = @transform_2, window_bounds = array<i64: 1, 32, 1>}, {pipeline_mode = #tpu.pipeline_mode<synchronous>, transform_indices = @transform_3, window_bounds = array<i64: 32, 32>}, {pipeline_mode = #tpu.pipeline_mode<synchronous>, transform_indices = @transform_4, window_bounds = array<i64: 32, 1>}, {transform_indices = @transform_5, window_bounds = array<i64: 1, 32, 512>}, {transform_indices = @transform_6, window_bounds = array<i64: 1, 32, 512>}, {transform_indices = @transform_7, window_bounds = array<i64: 1, 32, 1>}, {transform_indices = @transform_8, window_bounds = array<i64: 1, 32, 1>}]} {
    %c0 = arith.constant 0 : index
    %c0_0 = arith.constant 0 : index
    %c0_1 = arith.constant 0 : index
    %0 = vector.load %arg2[%c0, %c0_0, %c0_1] : memref<1x32x512xf32, #tpu.memory_space<vmem>>, vector<1x32x512xf32>
    %1 = vector.shape_cast %0 : vector<1x32x512xf32> to vector<32x512xf32>
    %c0_2 = arith.constant 0 : index
    %c0_3 = arith.constant 0 : index
    %c0_4 = arith.constant 0 : index
    %2 = vector.load %arg3[%c0_2, %c0_3, %c0_4] : memref<1x32x1xf32, #tpu.memory_space<vmem>>, vector<1x32x1xf32>
    %3 = vector.shape_cast %2 : vector<1x32x1xf32> to vector<32x1xf32>
    %4 = vector.broadcast %3 : vector<32x1xf32> to vector<32x512xf32>
    %5 = arith.mulf %1, %4 : vector<32x512xf32>
    %c0_5 = arith.constant 0 : index
    %c0_6 = arith.constant 0 : index
    %c0_7 = arith.constant 0 : index
    %6 = vector.load %arg4[%c0_5, %c0_6, %c0_7] : memref<1x32x1xf32, #tpu.memory_space<vmem>>, vector<1x32x1xf32>
    %7 = vector.shape_cast %6 : vector<1x32x1xf32> to vector<32x1xf32>
    %8 = vector.broadcast %7 : vector<32x1xf32> to vector<32x512xf32>
    %9 = arith.addf %5, %8 : vector<32x512xf32>
    %cst = arith.constant 0.000000e+00 : f32
    %10 = vector.broadcast %cst : f32 to vector<32x512xf32>
    %11 = arith.maximumf %9, %10 : vector<32x512xf32>
    %c0_8 = arith.constant 0 : index
    %c0_9 = arith.constant 0 : index
    %12 = vector.load %arg5[%c0_8, %c0_9] : memref<32x32xf32, #tpu.memory_space<vmem>>, vector<32x32xf32>
    %13 = arith.truncf %12 : vector<32x32xf32> to vector<32x32xbf16>
    %14 = arith.truncf %11 : vector<32x512xf32> to vector<32x512xbf16>
    %cst_10 = arith.constant dense<0.000000e+00> : vector<32x512xf32>
    %15 = tpu.matmul %13, %14, %cst_10 {dimension_numbers = #tpu.dot_dimension_numbers<[1], [0], [0], [1], [0, 0, 1, 1], [], []>} : vector<32x32xbf16>, vector<32x512xbf16>, vector<32x512xf32> -> vector<32x512xf32>
    %c0_11 = arith.constant 0 : index
    %c0_12 = arith.constant 0 : index
    %16 = vector.load %arg6[%c0_11, %c0_12] : memref<32x1xf32, #tpu.memory_space<vmem>>, vector<32x1xf32>
    %17 = vector.broadcast %16 : vector<32x1xf32> to vector<32x512xf32>
    %18 = arith.addf %15, %17 : vector<32x512xf32>
    %c0_13 = arith.constant 0 : index
    %c0_14 = arith.constant 0 : index
    %c0_15 = arith.constant 0 : index
    %19 = vector.load %arg7[%c0_13, %c0_14, %c0_15] : memref<1x32x512xf32, #tpu.memory_space<vmem>>, vector<1x32x512xf32>
    %20 = vector.shape_cast %19 : vector<1x32x512xf32> to vector<32x512xf32>
    %21 = arith.addf %18, %20 : vector<32x512xf32>
    %c0_16 = arith.constant 0 : index
    %c0_17 = arith.constant 0 : index
    %c0_18 = arith.constant 0 : index
    %22 = vector.load %arg8[%c0_16, %c0_17, %c0_18] : memref<1x32x512xf32, #tpu.memory_space<vmem>>, vector<1x32x512xf32>
    %23 = vector.shape_cast %22 : vector<1x32x512xf32> to vector<32x512xf32>
    %24 = vector.shape_cast %21 : vector<32x512xf32> to vector<1x32x512xf32>
    tpu.vector_store %arg8[%c0_16, %c0_17, %c0_18], %24 {strides = array<i32>} : memref<1x32x512xf32, #tpu.memory_space<vmem>>, vector<1x32x512xf32>,
    %cst_19 = arith.constant dense<0.000000e+00> : vector<32xf32>
    %25 = vector.multi_reduction <add>, %21, %cst_19 [1] : vector<32x512xf32> to vector<32xf32>
    %26 = vector.shape_cast %25 : vector<32xf32> to vector<32x1xf32>
    %27 = arith.mulf %21, %21 : vector<32x512xf32>
    %cst_20 = arith.constant dense<0.000000e+00> : vector<32xf32>
    %28 = vector.multi_reduction <add>, %27, %cst_20 [1] : vector<32x512xf32> to vector<32xf32>
    %29 = vector.shape_cast %28 : vector<32xf32> to vector<32x1xf32>
    %c0_i32 = arith.constant 0 : i32
    %30 = arith.cmpi eq, %arg1, %c0_i32 : i32
    %31 = arith.extui %30 : i1 to i32
    %c0_i32_21 = arith.constant 0 : i32
    %32 = arith.cmpi ne, %31, %c0_i32_21 : i32
    scf.if %32 {
      %c0_24 = arith.constant 0 : index
      %c0_25 = arith.constant 0 : index
      %c0_26 = arith.constant 0 : index
      %36 = vector.load %arg9[%c0_24, %c0_25, %c0_26] : memref<1x32x1xf32, #tpu.memory_space<vmem>>, vector<1x32x1xf32>
      %37 = vector.shape_cast %36 : vector<1x32x1xf32> to vector<32x1xf32>
      %38 = vector.shape_cast %26 : vector<32x1xf32> to vector<1x32x1xf32>
      tpu.vector_store %arg9[%c0_24, %c0_25, %c0_26], %38 {strides = array<i32>} : memref<1x32x1xf32, #tpu.memory_space<vmem>>, vector<1x32x1xf32>,
      %c0_27 = arith.constant 0 : index
      %c0_28 = arith.constant 0 : index
      %c0_29 = arith.constant 0 : index
      %39 = vector.load %arg10[%c0_27, %c0_28, %c0_29] : memref<1x32x1xf32, #tpu.memory_space<vmem>>, vector<1x32x1xf32>
      %40 = vector.shape_cast %39 : vector<1x32x1xf32> to vector<32x1xf32>
      %41 = vector.shape_cast %29 : vector<32x1xf32> to vector<1x32x1xf32>
      tpu.vector_store %arg10[%c0_27, %c0_28, %c0_29], %41 {strides = array<i32>} : memref<1x32x1xf32, #tpu.memory_space<vmem>>, vector<1x32x1xf32>,
    } else {
    }
    %c0_i32_22 = arith.constant 0 : i32
    %33 = arith.cmpi sgt, %arg1, %c0_i32_22 : i32
    %34 = arith.extui %33 : i1 to i32
    %c0_i32_23 = arith.constant 0 : i32
    %35 = arith.cmpi ne, %34, %c0_i32_23 : i32
    scf.if %35 {
      %c0_24 = arith.constant 0 : index
      %c0_25 = arith.constant 0 : index
      %c0_26 = arith.constant 0 : index
      %36 = vector.load %arg9[%c0_24, %c0_25, %c0_26] : memref<1x32x1xf32, #tpu.memory_space<vmem>>, vector<1x32x1xf32>
      %37 = vector.shape_cast %36 : vector<1x32x1xf32> to vector<32x1xf32>
      %38 = arith.addf %37, %26 : vector<32x1xf32>
      %c0_27 = arith.constant 0 : index
      %c0_28 = arith.constant 0 : index
      %c0_29 = arith.constant 0 : index
      %39 = vector.load %arg9[%c0_27, %c0_28, %c0_29] : memref<1x32x1xf32, #tpu.memory_space<vmem>>, vector<1x32x1xf32>
      %40 = vector.shape_cast %39 : vector<1x32x1xf32> to vector<32x1xf32>
      %41 = vector.shape_cast %38 : vector<32x1xf32> to vector<1x32x1xf32>
      tpu.vector_store %arg9[%c0_27, %c0_28, %c0_29], %41 {strides = array<i32>} : memref<1x32x1xf32, #tpu.memory_space<vmem>>, vector<1x32x1xf32>,
      %c0_30 = arith.constant 0 : index
      %c0_31 = arith.constant 0 : index
      %c0_32 = arith.constant 0 : index
      %42 = vector.load %arg10[%c0_30, %c0_31, %c0_32] : memref<1x32x1xf32, #tpu.memory_space<vmem>>, vector<1x32x1xf32>
      %43 = vector.shape_cast %42 : vector<1x32x1xf32> to vector<32x1xf32>
      %44 = arith.addf %43, %29 : vector<32x1xf32>
      %c0_33 = arith.constant 0 : index
      %c0_34 = arith.constant 0 : index
      %c0_35 = arith.constant 0 : index
      %45 = vector.load %arg10[%c0_33, %c0_34, %c0_35] : memref<1x32x1xf32, #tpu.memory_space<vmem>>, vector<1x32x1xf32>
      %46 = vector.shape_cast %45 : vector<1x32x1xf32> to vector<32x1xf32>
      %47 = vector.shape_cast %44 : vector<32x1xf32> to vector<1x32x1xf32>
      tpu.vector_store %arg10[%c0_33, %c0_34, %c0_35], %47 {strides = array<i32>} : memref<1x32x1xf32, #tpu.memory_space<vmem>>, vector<1x32x1xf32>,
    } else {
    }
    return
  }
  func.func @transform_0(%arg0: i32, %arg1: i32) -> (i32, i32, i32) {
    %c0_i32 = arith.constant 0 : i32
    %c0_i32_0 = arith.constant 0 : i32
    return %arg0, %c0_i32, %arg1 : i32, i32, i32
  }
  func.func @transform_1(%arg0: i32, %arg1: i32) -> (i32, i32, i32) {
    %c0_i32 = arith.constant 0 : i32
    %c0_i32_0 = arith.constant 0 : i32
    %c0_i32_1 = arith.constant 0 : i32
    return %arg0, %c0_i32, %c0_i32_0 : i32, i32, i32
  }
  func.func @transform_2(%arg0: i32, %arg1: i32) -> (i32, i32, i32) {
    %c0_i32 = arith.constant 0 : i32
    %c0_i32_0 = arith.constant 0 : i32
    %c0_i32_1 = arith.constant 0 : i32
    return %arg0, %c0_i32, %c0_i32_0 : i32, i32, i32
  }
  func.func @transform_3(%arg0: i32, %arg1: i32) -> (i32, i32) {
    %c0_i32 = arith.constant 0 : i32
    %c0_i32_0 = arith.constant 0 : i32
    %c0_i32_1 = arith.constant 0 : i32
    return %c0_i32, %c0_i32_0 : i32, i32
  }
  func.func @transform_4(%arg0: i32, %arg1: i32) -> (i32, i32) {
    %c0_i32 = arith.constant 0 : i32
    %c0_i32_0 = arith.constant 0 : i32
    %c0_i32_1 = arith.constant 0 : i32
    return %c0_i32, %c0_i32_0 : i32, i32
  }
  func.func @transform_5(%arg0: i32, %arg1: i32) -> (i32, i32, i32) {
    %c0_i32 = arith.constant 0 : i32
    %c0_i32_0 = arith.constant 0 : i32
    return %arg0, %c0_i32, %arg1 : i32, i32, i32
  }
  func.func @transform_6(%arg0: i32, %arg1: i32) -> (i32, i32, i32) {
    %c0_i32 = arith.constant 0 : i32
    %c0_i32_0 = arith.constant 0 : i32
    return %arg0, %c0_i32, %arg1 : i32, i32, i32
  }
  func.func @transform_7(%arg0: i32, %arg1: i32) -> (i32, i32, i32) {
    %c0_i32 = arith.constant 0 : i32
    %c0_i32_0 = arith.constant 0 : i32
    %c0_i32_1 = arith.constant 0 : i32
    return %arg0, %c0_i32, %c0_i32_0 : i32, i32, i32
  }
  func.func @transform_8(%arg0: i32, %arg1: i32) -> (i32, i32, i32) {
    %c0_i32 = arith.constant 0 : i32
    %c0_i32_0 = arith.constant 0 : i32
    %c0_i32_1 = arith.constant 0 : i32
    return %arg0, %c0_i32, %c0_i32_0 : i32, i32, i32
  }
}

module attributes {stable_mosaic.version = 11 : i64} {
  func.func @_pool_kernel(%arg0: i32, %arg1: memref<1x32x1024xf32, #tpu.memory_space<vmem>>, %arg2: memref<1x32x1xf32, #tpu.memory_space<vmem>>, %arg3: memref<1x32x1xf32, #tpu.memory_space<vmem>>, %arg4: memref<8x32xf32, #tpu.memory_space<vmem>>, %arg5: memref<8x1xf32, #tpu.memory_space<vmem>>, %arg6: memref<1x32x8xf32, #tpu.memory_space<vmem>>) attributes {dimension_semantics = [#tpu.dimension_semantics<parallel>], iteration_bounds = array<i64: 2>, scalar_prefetch = 0 : i64, scratch_operands = 0 : i64, tpu.core_type = #tpu.core_type<tc>, window_params = [{transform_indices = @transform_0, window_bounds = array<i64: 1, 32, 1024>}, {transform_indices = @transform_1, window_bounds = array<i64: 1, 32, 1>}, {transform_indices = @transform_2, window_bounds = array<i64: 1, 32, 1>}, {pipeline_mode = #tpu.pipeline_mode<synchronous>, transform_indices = @transform_3, window_bounds = array<i64: 8, 32>}, {pipeline_mode = #tpu.pipeline_mode<synchronous>, transform_indices = @transform_4, window_bounds = array<i64: 8, 1>}, {transform_indices = @transform_5, window_bounds = array<i64: 1, 32, 8>}]} {
    %c0 = arith.constant 0 : index
    %c0_0 = arith.constant 0 : index
    %c0_1 = arith.constant 0 : index
    %0 = vector.load %arg1[%c0, %c0_0, %c0_1] : memref<1x32x1024xf32, #tpu.memory_space<vmem>>, vector<1x32x1024xf32>
    %1 = vector.shape_cast %0 : vector<1x32x1024xf32> to vector<32x1024xf32>
    %c0_2 = arith.constant 0 : index
    %c0_3 = arith.constant 0 : index
    %c0_4 = arith.constant 0 : index
    %2 = vector.load %arg2[%c0_2, %c0_3, %c0_4] : memref<1x32x1xf32, #tpu.memory_space<vmem>>, vector<1x32x1xf32>
    %3 = vector.shape_cast %2 : vector<1x32x1xf32> to vector<32x1xf32>
    %4 = vector.broadcast %3 : vector<32x1xf32> to vector<32x1024xf32>
    %5 = arith.mulf %1, %4 : vector<32x1024xf32>
    %c0_5 = arith.constant 0 : index
    %c0_6 = arith.constant 0 : index
    %c0_7 = arith.constant 0 : index
    %6 = vector.load %arg3[%c0_5, %c0_6, %c0_7] : memref<1x32x1xf32, #tpu.memory_space<vmem>>, vector<1x32x1xf32>
    %7 = vector.shape_cast %6 : vector<1x32x1xf32> to vector<32x1xf32>
    %8 = vector.broadcast %7 : vector<32x1xf32> to vector<32x1024xf32>
    %9 = arith.addf %5, %8 : vector<32x1024xf32>
    %cst = arith.constant 0.000000e+00 : f32
    %10 = vector.broadcast %cst : f32 to vector<32x1024xf32>
    %11 = arith.maximumf %9, %10 : vector<32x1024xf32>
    %c0_8 = arith.constant 0 : index
    %c0_9 = arith.constant 0 : index
    %12 = vector.load %arg4[%c0_8, %c0_9] : memref<8x32xf32, #tpu.memory_space<vmem>>, vector<8x32xf32>
    %13 = arith.truncf %12 : vector<8x32xf32> to vector<8x32xbf16>
    %14 = arith.truncf %11 : vector<32x1024xf32> to vector<32x1024xbf16>
    %cst_10 = arith.constant dense<0.000000e+00> : vector<8x1024xf32>
    %15 = tpu.matmul %13, %14, %cst_10 {dimension_numbers = #tpu.dot_dimension_numbers<[1], [0], [0], [1], [0, 0, 1, 1], [], []>} : vector<8x32xbf16>, vector<32x1024xbf16>, vector<8x1024xf32> -> vector<8x1024xf32>
    %c0_11 = arith.constant 0 : index
    %c0_12 = arith.constant 0 : index
    %16 = vector.load %arg5[%c0_11, %c0_12] : memref<8x1xf32, #tpu.memory_space<vmem>>, vector<8x1xf32>
    %17 = vector.broadcast %16 : vector<8x1xf32> to vector<8x1024xf32>
    %18 = arith.addf %15, %17 : vector<8x1024xf32>
    %cst_13 = arith.constant dense<0xFF800000> : vector<8xf32>
    %19 = vector.multi_reduction <maximumf>, %18, %cst_13 [1] : vector<8x1024xf32> to vector<8xf32>
    %20 = vector.shape_cast %19 : vector<8xf32> to vector<8x1xf32>
    %21 = vector.broadcast %20 : vector<8x1xf32> to vector<8x1024xf32>
    %22 = arith.subf %18, %21 : vector<8x1024xf32>
    %23 = math.exp %22 : vector<8x1024xf32>
    %cst_14 = arith.constant dense<0.000000e+00> : vector<8xf32>
    %24 = vector.multi_reduction <add>, %23, %cst_14 [1] : vector<8x1024xf32> to vector<8xf32>
    %25 = vector.shape_cast %24 : vector<8xf32> to vector<8x1xf32>
    %26 = vector.broadcast %25 : vector<8x1xf32> to vector<8x1024xf32>
    %27 = arith.divf %23, %26 : vector<8x1024xf32>
    %28 = arith.truncf %1 : vector<32x1024xf32> to vector<32x1024xbf16>
    %29 = arith.truncf %27 : vector<8x1024xf32> to vector<8x1024xbf16>
    %cst_15 = arith.constant dense<0.000000e+00> : vector<32x8xf32>
    %30 = tpu.matmul %28, %29, %cst_15 {dimension_numbers = #tpu.dot_dimension_numbers<[1], [1], [0], [0], [0, 0, 1, 0], [], []>} : vector<32x1024xbf16>, vector<8x1024xbf16>, vector<32x8xf32> -> vector<32x8xf32>
    %c0_16 = arith.constant 0 : index
    %c0_17 = arith.constant 0 : index
    %c0_18 = arith.constant 0 : index
    %31 = vector.load %arg6[%c0_16, %c0_17, %c0_18] : memref<1x32x8xf32, #tpu.memory_space<vmem>>, vector<1x32x8xf32>
    %32 = vector.shape_cast %31 : vector<1x32x8xf32> to vector<32x8xf32>
    %33 = vector.shape_cast %30 : vector<32x8xf32> to vector<1x32x8xf32>
    tpu.vector_store %arg6[%c0_16, %c0_17, %c0_18], %33 {strides = array<i32>} : memref<1x32x8xf32, #tpu.memory_space<vmem>>, vector<1x32x8xf32>,
    return
  }
  func.func @transform_0(%arg0: i32) -> (i32, i32, i32) {
    %c0_i32 = arith.constant 0 : i32
    %c0_i32_0 = arith.constant 0 : i32
    %c0_i32_1 = arith.constant 0 : i32
    return %arg0, %c0_i32, %c0_i32_0 : i32, i32, i32
  }
  func.func @transform_1(%arg0: i32) -> (i32, i32, i32) {
    %c0_i32 = arith.constant 0 : i32
    %c0_i32_0 = arith.constant 0 : i32
    %c0_i32_1 = arith.constant 0 : i32
    return %arg0, %c0_i32, %c0_i32_0 : i32, i32, i32
  }
  func.func @transform_2(%arg0: i32) -> (i32, i32, i32) {
    %c0_i32 = arith.constant 0 : i32
    %c0_i32_0 = arith.constant 0 : i32
    %c0_i32_1 = arith.constant 0 : i32
    return %arg0, %c0_i32, %c0_i32_0 : i32, i32, i32
  }
  func.func @transform_3(%arg0: i32) -> (i32, i32) {
    %c0_i32 = arith.constant 0 : i32
    %c0_i32_0 = arith.constant 0 : i32
    %c0_i32_1 = arith.constant 0 : i32
    return %c0_i32, %c0_i32_0 : i32, i32
  }
  func.func @transform_4(%arg0: i32) -> (i32, i32) {
    %c0_i32 = arith.constant 0 : i32
    %c0_i32_0 = arith.constant 0 : i32
    %c0_i32_1 = arith.constant 0 : i32
    return %c0_i32, %c0_i32_0 : i32, i32
  }
  func.func @transform_5(%arg0: i32) -> (i32, i32, i32) {
    %c0_i32 = arith.constant 0 : i32
    %c0_i32_0 = arith.constant 0 : i32
    %c0_i32_1 = arith.constant 0 : i32
    return %arg0, %c0_i32, %c0_i32_0 : i32, i32, i32
  }
}

module attributes {stable_mosaic.version = 11 : i64} {
  func.func @_stage_kernel(%arg0: i32, %arg1: i32, %arg2: memref<1x32x512xf32, #tpu.memory_space<vmem>>, %arg3: memref<1x32x1xf32, #tpu.memory_space<vmem>>, %arg4: memref<1x32x1xf32, #tpu.memory_space<vmem>>, %arg5: memref<32x32xf32, #tpu.memory_space<vmem>>, %arg6: memref<32x1xf32, #tpu.memory_space<vmem>>, %arg7: memref<1x32x512xf32, #tpu.memory_space<vmem>>, %arg8: memref<1x32x1xf32, #tpu.memory_space<vmem>>, %arg9: memref<1x32x1xf32, #tpu.memory_space<vmem>>) attributes {dimension_semantics = [#tpu.dimension_semantics<parallel>, #tpu.dimension_semantics<arbitrary>], iteration_bounds = array<i64: 2, 2>, scalar_prefetch = 0 : i64, scratch_operands = 0 : i64, tpu.core_type = #tpu.core_type<tc>, window_params = [{transform_indices = @transform_0, window_bounds = array<i64: 1, 32, 512>}, {transform_indices = @transform_1, window_bounds = array<i64: 1, 32, 1>}, {transform_indices = @transform_2, window_bounds = array<i64: 1, 32, 1>}, {pipeline_mode = #tpu.pipeline_mode<synchronous>, transform_indices = @transform_3, window_bounds = array<i64: 32, 32>}, {pipeline_mode = #tpu.pipeline_mode<synchronous>, transform_indices = @transform_4, window_bounds = array<i64: 32, 1>}, {transform_indices = @transform_5, window_bounds = array<i64: 1, 32, 512>}, {transform_indices = @transform_6, window_bounds = array<i64: 1, 32, 1>}, {transform_indices = @transform_7, window_bounds = array<i64: 1, 32, 1>}]} {
    %c0 = arith.constant 0 : index
    %c0_0 = arith.constant 0 : index
    %c0_1 = arith.constant 0 : index
    %0 = vector.load %arg2[%c0, %c0_0, %c0_1] : memref<1x32x512xf32, #tpu.memory_space<vmem>>, vector<1x32x512xf32>
    %1 = vector.shape_cast %0 : vector<1x32x512xf32> to vector<32x512xf32>
    %c0_2 = arith.constant 0 : index
    %c0_3 = arith.constant 0 : index
    %c0_4 = arith.constant 0 : index
    %2 = vector.load %arg3[%c0_2, %c0_3, %c0_4] : memref<1x32x1xf32, #tpu.memory_space<vmem>>, vector<1x32x1xf32>
    %3 = vector.shape_cast %2 : vector<1x32x1xf32> to vector<32x1xf32>
    %4 = vector.broadcast %3 : vector<32x1xf32> to vector<32x512xf32>
    %5 = arith.mulf %1, %4 : vector<32x512xf32>
    %c0_5 = arith.constant 0 : index
    %c0_6 = arith.constant 0 : index
    %c0_7 = arith.constant 0 : index
    %6 = vector.load %arg4[%c0_5, %c0_6, %c0_7] : memref<1x32x1xf32, #tpu.memory_space<vmem>>, vector<1x32x1xf32>
    %7 = vector.shape_cast %6 : vector<1x32x1xf32> to vector<32x1xf32>
    %8 = vector.broadcast %7 : vector<32x1xf32> to vector<32x512xf32>
    %9 = arith.addf %5, %8 : vector<32x512xf32>
    %cst = arith.constant 0.000000e+00 : f32
    %10 = vector.broadcast %cst : f32 to vector<32x512xf32>
    %11 = arith.maximumf %9, %10 : vector<32x512xf32>
    %c0_8 = arith.constant 0 : index
    %c0_9 = arith.constant 0 : index
    %12 = vector.load %arg5[%c0_8, %c0_9] : memref<32x32xf32, #tpu.memory_space<vmem>>, vector<32x32xf32>
    %13 = arith.truncf %12 : vector<32x32xf32> to vector<32x32xbf16>
    %14 = arith.truncf %11 : vector<32x512xf32> to vector<32x512xbf16>
    %cst_10 = arith.constant dense<0.000000e+00> : vector<32x512xf32>
    %15 = tpu.matmul %13, %14, %cst_10 {dimension_numbers = #tpu.dot_dimension_numbers<[1], [0], [0], [1], [0, 0, 1, 1], [], []>} : vector<32x32xbf16>, vector<32x512xbf16>, vector<32x512xf32> -> vector<32x512xf32>
    %c0_11 = arith.constant 0 : index
    %c0_12 = arith.constant 0 : index
    %16 = vector.load %arg6[%c0_11, %c0_12] : memref<32x1xf32, #tpu.memory_space<vmem>>, vector<32x1xf32>
    %17 = vector.broadcast %16 : vector<32x1xf32> to vector<32x512xf32>
    %18 = arith.addf %15, %17 : vector<32x512xf32>
    %c0_13 = arith.constant 0 : index
    %c0_14 = arith.constant 0 : index
    %c0_15 = arith.constant 0 : index
    %19 = vector.load %arg7[%c0_13, %c0_14, %c0_15] : memref<1x32x512xf32, #tpu.memory_space<vmem>>, vector<1x32x512xf32>
    %20 = vector.shape_cast %19 : vector<1x32x512xf32> to vector<32x512xf32>
    %21 = vector.shape_cast %18 : vector<32x512xf32> to vector<1x32x512xf32>
    tpu.vector_store %arg7[%c0_13, %c0_14, %c0_15], %21 {strides = array<i32>} : memref<1x32x512xf32, #tpu.memory_space<vmem>>, vector<1x32x512xf32>,
    %cst_16 = arith.constant dense<0.000000e+00> : vector<32xf32>
    %22 = vector.multi_reduction <add>, %18, %cst_16 [1] : vector<32x512xf32> to vector<32xf32>
    %23 = vector.shape_cast %22 : vector<32xf32> to vector<32x1xf32>
    %24 = arith.mulf %18, %18 : vector<32x512xf32>
    %cst_17 = arith.constant dense<0.000000e+00> : vector<32xf32>
    %25 = vector.multi_reduction <add>, %24, %cst_17 [1] : vector<32x512xf32> to vector<32xf32>
    %26 = vector.shape_cast %25 : vector<32xf32> to vector<32x1xf32>
    %c0_i32 = arith.constant 0 : i32
    %27 = arith.cmpi eq, %arg1, %c0_i32 : i32
    %28 = arith.extui %27 : i1 to i32
    %c0_i32_18 = arith.constant 0 : i32
    %29 = arith.cmpi ne, %28, %c0_i32_18 : i32
    scf.if %29 {
      %c0_21 = arith.constant 0 : index
      %c0_22 = arith.constant 0 : index
      %c0_23 = arith.constant 0 : index
      %33 = vector.load %arg8[%c0_21, %c0_22, %c0_23] : memref<1x32x1xf32, #tpu.memory_space<vmem>>, vector<1x32x1xf32>
      %34 = vector.shape_cast %33 : vector<1x32x1xf32> to vector<32x1xf32>
      %35 = vector.shape_cast %23 : vector<32x1xf32> to vector<1x32x1xf32>
      tpu.vector_store %arg8[%c0_21, %c0_22, %c0_23], %35 {strides = array<i32>} : memref<1x32x1xf32, #tpu.memory_space<vmem>>, vector<1x32x1xf32>,
      %c0_24 = arith.constant 0 : index
      %c0_25 = arith.constant 0 : index
      %c0_26 = arith.constant 0 : index
      %36 = vector.load %arg9[%c0_24, %c0_25, %c0_26] : memref<1x32x1xf32, #tpu.memory_space<vmem>>, vector<1x32x1xf32>
      %37 = vector.shape_cast %36 : vector<1x32x1xf32> to vector<32x1xf32>
      %38 = vector.shape_cast %26 : vector<32x1xf32> to vector<1x32x1xf32>
      tpu.vector_store %arg9[%c0_24, %c0_25, %c0_26], %38 {strides = array<i32>} : memref<1x32x1xf32, #tpu.memory_space<vmem>>, vector<1x32x1xf32>,
    } else {
    }
    %c0_i32_19 = arith.constant 0 : i32
    %30 = arith.cmpi sgt, %arg1, %c0_i32_19 : i32
    %31 = arith.extui %30 : i1 to i32
    %c0_i32_20 = arith.constant 0 : i32
    %32 = arith.cmpi ne, %31, %c0_i32_20 : i32
    scf.if %32 {
      %c0_21 = arith.constant 0 : index
      %c0_22 = arith.constant 0 : index
      %c0_23 = arith.constant 0 : index
      %33 = vector.load %arg8[%c0_21, %c0_22, %c0_23] : memref<1x32x1xf32, #tpu.memory_space<vmem>>, vector<1x32x1xf32>
      %34 = vector.shape_cast %33 : vector<1x32x1xf32> to vector<32x1xf32>
      %35 = arith.addf %34, %23 : vector<32x1xf32>
      %c0_24 = arith.constant 0 : index
      %c0_25 = arith.constant 0 : index
      %c0_26 = arith.constant 0 : index
      %36 = vector.load %arg8[%c0_24, %c0_25, %c0_26] : memref<1x32x1xf32, #tpu.memory_space<vmem>>, vector<1x32x1xf32>
      %37 = vector.shape_cast %36 : vector<1x32x1xf32> to vector<32x1xf32>
      %38 = vector.shape_cast %35 : vector<32x1xf32> to vector<1x32x1xf32>
      tpu.vector_store %arg8[%c0_24, %c0_25, %c0_26], %38 {strides = array<i32>} : memref<1x32x1xf32, #tpu.memory_space<vmem>>, vector<1x32x1xf32>,
      %c0_27 = arith.constant 0 : index
      %c0_28 = arith.constant 0 : index
      %c0_29 = arith.constant 0 : index
      %39 = vector.load %arg9[%c0_27, %c0_28, %c0_29] : memref<1x32x1xf32, #tpu.memory_space<vmem>>, vector<1x32x1xf32>
      %40 = vector.shape_cast %39 : vector<1x32x1xf32> to vector<32x1xf32>
      %41 = arith.addf %40, %26 : vector<32x1xf32>
      %c0_30 = arith.constant 0 : index
      %c0_31 = arith.constant 0 : index
      %c0_32 = arith.constant 0 : index
      %42 = vector.load %arg9[%c0_30, %c0_31, %c0_32] : memref<1x32x1xf32, #tpu.memory_space<vmem>>, vector<1x32x1xf32>
      %43 = vector.shape_cast %42 : vector<1x32x1xf32> to vector<32x1xf32>
      %44 = vector.shape_cast %41 : vector<32x1xf32> to vector<1x32x1xf32>
      tpu.vector_store %arg9[%c0_30, %c0_31, %c0_32], %44 {strides = array<i32>} : memref<1x32x1xf32, #tpu.memory_space<vmem>>, vector<1x32x1xf32>,
    } else {
    }
    return
  }
  func.func @transform_0(%arg0: i32, %arg1: i32) -> (i32, i32, i32) {
    %c0_i32 = arith.constant 0 : i32
    %c0_i32_0 = arith.constant 0 : i32
    return %arg0, %c0_i32, %arg1 : i32, i32, i32
  }
  func.func @transform_1(%arg0: i32, %arg1: i32) -> (i32, i32, i32) {
    %c0_i32 = arith.constant 0 : i32
    %c0_i32_0 = arith.constant 0 : i32
    %c0_i32_1 = arith.constant 0 : i32
    return %arg0, %c0_i32, %c0_i32_0 : i32, i32, i32
  }
  func.func @transform_2(%arg0: i32, %arg1: i32) -> (i32, i32, i32) {
    %c0_i32 = arith.constant 0 : i32
    %c0_i32_0 = arith.constant 0 : i32
    %c0_i32_1 = arith.constant 0 : i32
    return %arg0, %c0_i32, %c0_i32_0 : i32, i32, i32
  }
  func.func @transform_3(%arg0: i32, %arg1: i32) -> (i32, i32) {
    %c0_i32 = arith.constant 0 : i32
    %c0_i32_0 = arith.constant 0 : i32
    %c0_i32_1 = arith.constant 0 : i32
    return %c0_i32, %c0_i32_0 : i32, i32
  }
  func.func @transform_4(%arg0: i32, %arg1: i32) -> (i32, i32) {
    %c0_i32 = arith.constant 0 : i32
    %c0_i32_0 = arith.constant 0 : i32
    %c0_i32_1 = arith.constant 0 : i32
    return %c0_i32, %c0_i32_0 : i32, i32
  }
  func.func @transform_5(%arg0: i32, %arg1: i32) -> (i32, i32, i32) {
    %c0_i32 = arith.constant 0 : i32
    %c0_i32_0 = arith.constant 0 : i32
    return %arg0, %c0_i32, %arg1 : i32, i32, i32
  }
  func.func @transform_6(%arg0: i32, %arg1: i32) -> (i32, i32, i32) {
    %c0_i32 = arith.constant 0 : i32
    %c0_i32_0 = arith.constant 0 : i32
    %c0_i32_1 = arith.constant 0 : i32
    return %arg0, %c0_i32, %c0_i32_0 : i32, i32, i32
  }
  func.func @transform_7(%arg0: i32, %arg1: i32) -> (i32, i32, i32) {
    %c0_i32 = arith.constant 0 : i32
    %c0_i32_0 = arith.constant 0 : i32
    %c0_i32_1 = arith.constant 0 : i32
    return %arg0, %c0_i32, %c0_i32_0 : i32, i32, i32
  }
}

module attributes {stable_mosaic.version = 11 : i64} {
  func.func @_unpool_kernel(%arg0: i32, %arg1: i32, %arg2: memref<1x32x512xf32, #tpu.memory_space<vmem>>, %arg3: memref<1x32x1xf32, #tpu.memory_space<vmem>>, %arg4: memref<1x32x1xf32, #tpu.memory_space<vmem>>, %arg5: memref<8x32xf32, #tpu.memory_space<vmem>>, %arg6: memref<8x1xf32, #tpu.memory_space<vmem>>, %arg7: memref<1x32x8xf32, #tpu.memory_space<vmem>>, %arg8: memref<1x32x512xf32, #tpu.memory_space<vmem>>, %arg9: memref<1x32x1xf32, #tpu.memory_space<vmem>>, %arg10: memref<1x32x1xf32, #tpu.memory_space<vmem>>) attributes {dimension_semantics = [#tpu.dimension_semantics<parallel>, #tpu.dimension_semantics<arbitrary>], iteration_bounds = array<i64: 2, 2>, scalar_prefetch = 0 : i64, scratch_operands = 0 : i64, tpu.core_type = #tpu.core_type<tc>, window_params = [{transform_indices = @transform_0, window_bounds = array<i64: 1, 32, 512>}, {transform_indices = @transform_1, window_bounds = array<i64: 1, 32, 1>}, {transform_indices = @transform_2, window_bounds = array<i64: 1, 32, 1>}, {pipeline_mode = #tpu.pipeline_mode<synchronous>, transform_indices = @transform_3, window_bounds = array<i64: 8, 32>}, {pipeline_mode = #tpu.pipeline_mode<synchronous>, transform_indices = @transform_4, window_bounds = array<i64: 8, 1>}, {transform_indices = @transform_5, window_bounds = array<i64: 1, 32, 8>}, {transform_indices = @transform_6, window_bounds = array<i64: 1, 32, 512>}, {transform_indices = @transform_7, window_bounds = array<i64: 1, 32, 1>}, {transform_indices = @transform_8, window_bounds = array<i64: 1, 32, 1>}]} {
    %c0 = arith.constant 0 : index
    %c0_0 = arith.constant 0 : index
    %c0_1 = arith.constant 0 : index
    %0 = vector.load %arg2[%c0, %c0_0, %c0_1] : memref<1x32x512xf32, #tpu.memory_space<vmem>>, vector<1x32x512xf32>
    %1 = vector.shape_cast %0 : vector<1x32x512xf32> to vector<32x512xf32>
    %c0_2 = arith.constant 0 : index
    %c0_3 = arith.constant 0 : index
    %c0_4 = arith.constant 0 : index
    %2 = vector.load %arg3[%c0_2, %c0_3, %c0_4] : memref<1x32x1xf32, #tpu.memory_space<vmem>>, vector<1x32x1xf32>
    %3 = vector.shape_cast %2 : vector<1x32x1xf32> to vector<32x1xf32>
    %4 = vector.broadcast %3 : vector<32x1xf32> to vector<32x512xf32>
    %5 = arith.mulf %1, %4 : vector<32x512xf32>
    %c0_5 = arith.constant 0 : index
    %c0_6 = arith.constant 0 : index
    %c0_7 = arith.constant 0 : index
    %6 = vector.load %arg4[%c0_5, %c0_6, %c0_7] : memref<1x32x1xf32, #tpu.memory_space<vmem>>, vector<1x32x1xf32>
    %7 = vector.shape_cast %6 : vector<1x32x1xf32> to vector<32x1xf32>
    %8 = vector.broadcast %7 : vector<32x1xf32> to vector<32x512xf32>
    %9 = arith.addf %5, %8 : vector<32x512xf32>
    %cst = arith.constant 0.000000e+00 : f32
    %10 = vector.broadcast %cst : f32 to vector<32x512xf32>
    %11 = arith.maximumf %9, %10 : vector<32x512xf32>
    %c0_8 = arith.constant 0 : index
    %c0_9 = arith.constant 0 : index
    %12 = vector.load %arg5[%c0_8, %c0_9] : memref<8x32xf32, #tpu.memory_space<vmem>>, vector<8x32xf32>
    %13 = arith.truncf %12 : vector<8x32xf32> to vector<8x32xbf16>
    %14 = arith.truncf %11 : vector<32x512xf32> to vector<32x512xbf16>
    %cst_10 = arith.constant dense<0.000000e+00> : vector<8x512xf32>
    %15 = tpu.matmul %13, %14, %cst_10 {dimension_numbers = #tpu.dot_dimension_numbers<[1], [0], [0], [1], [0, 0, 1, 1], [], []>} : vector<8x32xbf16>, vector<32x512xbf16>, vector<8x512xf32> -> vector<8x512xf32>
    %c0_11 = arith.constant 0 : index
    %c0_12 = arith.constant 0 : index
    %16 = vector.load %arg6[%c0_11, %c0_12] : memref<8x1xf32, #tpu.memory_space<vmem>>, vector<8x1xf32>
    %17 = vector.broadcast %16 : vector<8x1xf32> to vector<8x512xf32>
    %18 = arith.addf %15, %17 : vector<8x512xf32>
    %cst_13 = arith.constant dense<0xFF800000> : vector<512xf32>
    %19 = vector.multi_reduction <maximumf>, %18, %cst_13 [0] : vector<8x512xf32> to vector<512xf32>
    %20 = vector.shape_cast %19 : vector<512xf32> to vector<1x512xf32>
    %21 = vector.broadcast %20 : vector<1x512xf32> to vector<8x512xf32>
    %22 = arith.subf %18, %21 : vector<8x512xf32>
    %23 = math.exp %22 : vector<8x512xf32>
    %cst_14 = arith.constant dense<0.000000e+00> : vector<512xf32>
    %24 = vector.multi_reduction <add>, %23, %cst_14 [0] : vector<8x512xf32> to vector<512xf32>
    %25 = vector.shape_cast %24 : vector<512xf32> to vector<1x512xf32>
    %26 = vector.broadcast %25 : vector<1x512xf32> to vector<8x512xf32>
    %27 = arith.divf %23, %26 : vector<8x512xf32>
    %c0_15 = arith.constant 0 : index
    %c0_16 = arith.constant 0 : index
    %c0_17 = arith.constant 0 : index
    %28 = vector.load %arg7[%c0_15, %c0_16, %c0_17] : memref<1x32x8xf32, #tpu.memory_space<vmem>>, vector<1x32x8xf32>
    %29 = vector.shape_cast %28 : vector<1x32x8xf32> to vector<32x8xf32>
    %30 = arith.truncf %29 : vector<32x8xf32> to vector<32x8xbf16>
    %31 = arith.truncf %27 : vector<8x512xf32> to vector<8x512xbf16>
    %cst_18 = arith.constant dense<0.000000e+00> : vector<32x512xf32>
    %32 = tpu.matmul %30, %31, %cst_18 {dimension_numbers = #tpu.dot_dimension_numbers<[1], [0], [0], [1], [0, 0, 1, 1], [], []>} : vector<32x8xbf16>, vector<8x512xbf16>, vector<32x512xf32> -> vector<32x512xf32>
    %c0_19 = arith.constant 0 : index
    %c0_20 = arith.constant 0 : index
    %c0_21 = arith.constant 0 : index
    %33 = vector.load %arg8[%c0_19, %c0_20, %c0_21] : memref<1x32x512xf32, #tpu.memory_space<vmem>>, vector<1x32x512xf32>
    %34 = vector.shape_cast %33 : vector<1x32x512xf32> to vector<32x512xf32>
    %35 = vector.shape_cast %32 : vector<32x512xf32> to vector<1x32x512xf32>
    tpu.vector_store %arg8[%c0_19, %c0_20, %c0_21], %35 {strides = array<i32>} : memref<1x32x512xf32, #tpu.memory_space<vmem>>, vector<1x32x512xf32>,
    %cst_22 = arith.constant dense<0.000000e+00> : vector<32xf32>
    %36 = vector.multi_reduction <add>, %32, %cst_22 [1] : vector<32x512xf32> to vector<32xf32>
    %37 = vector.shape_cast %36 : vector<32xf32> to vector<32x1xf32>
    %38 = arith.mulf %32, %32 : vector<32x512xf32>
    %cst_23 = arith.constant dense<0.000000e+00> : vector<32xf32>
    %39 = vector.multi_reduction <add>, %38, %cst_23 [1] : vector<32x512xf32> to vector<32xf32>
    %40 = vector.shape_cast %39 : vector<32xf32> to vector<32x1xf32>
    %c0_i32 = arith.constant 0 : i32
    %41 = arith.cmpi eq, %arg1, %c0_i32 : i32
    %42 = arith.extui %41 : i1 to i32
    %c0_i32_24 = arith.constant 0 : i32
    %43 = arith.cmpi ne, %42, %c0_i32_24 : i32
    scf.if %43 {
      %c0_27 = arith.constant 0 : index
      %c0_28 = arith.constant 0 : index
      %c0_29 = arith.constant 0 : index
      %47 = vector.load %arg9[%c0_27, %c0_28, %c0_29] : memref<1x32x1xf32, #tpu.memory_space<vmem>>, vector<1x32x1xf32>
      %48 = vector.shape_cast %47 : vector<1x32x1xf32> to vector<32x1xf32>
      %49 = vector.shape_cast %37 : vector<32x1xf32> to vector<1x32x1xf32>
      tpu.vector_store %arg9[%c0_27, %c0_28, %c0_29], %49 {strides = array<i32>} : memref<1x32x1xf32, #tpu.memory_space<vmem>>, vector<1x32x1xf32>,
      %c0_30 = arith.constant 0 : index
      %c0_31 = arith.constant 0 : index
      %c0_32 = arith.constant 0 : index
      %50 = vector.load %arg10[%c0_30, %c0_31, %c0_32] : memref<1x32x1xf32, #tpu.memory_space<vmem>>, vector<1x32x1xf32>
      %51 = vector.shape_cast %50 : vector<1x32x1xf32> to vector<32x1xf32>
      %52 = vector.shape_cast %40 : vector<32x1xf32> to vector<1x32x1xf32>
      tpu.vector_store %arg10[%c0_30, %c0_31, %c0_32], %52 {strides = array<i32>} : memref<1x32x1xf32, #tpu.memory_space<vmem>>, vector<1x32x1xf32>,
    } else {
    }
    %c0_i32_25 = arith.constant 0 : i32
    %44 = arith.cmpi sgt, %arg1, %c0_i32_25 : i32
    %45 = arith.extui %44 : i1 to i32
    %c0_i32_26 = arith.constant 0 : i32
    %46 = arith.cmpi ne, %45, %c0_i32_26 : i32
    scf.if %46 {
      %c0_27 = arith.constant 0 : index
      %c0_28 = arith.constant 0 : index
      %c0_29 = arith.constant 0 : index
      %47 = vector.load %arg9[%c0_27, %c0_28, %c0_29] : memref<1x32x1xf32, #tpu.memory_space<vmem>>, vector<1x32x1xf32>
      %48 = vector.shape_cast %47 : vector<1x32x1xf32> to vector<32x1xf32>
      %49 = arith.addf %48, %37 : vector<32x1xf32>
      %c0_30 = arith.constant 0 : index
      %c0_31 = arith.constant 0 : index
      %c0_32 = arith.constant 0 : index
      %50 = vector.load %arg9[%c0_30, %c0_31, %c0_32] : memref<1x32x1xf32, #tpu.memory_space<vmem>>, vector<1x32x1xf32>
      %51 = vector.shape_cast %50 : vector<1x32x1xf32> to vector<32x1xf32>
      %52 = vector.shape_cast %49 : vector<32x1xf32> to vector<1x32x1xf32>
      tpu.vector_store %arg9[%c0_30, %c0_31, %c0_32], %52 {strides = array<i32>} : memref<1x32x1xf32, #tpu.memory_space<vmem>>, vector<1x32x1xf32>,
      %c0_33 = arith.constant 0 : index
      %c0_34 = arith.constant 0 : index
      %c0_35 = arith.constant 0 : index
      %53 = vector.load %arg10[%c0_33, %c0_34, %c0_35] : memref<1x32x1xf32, #tpu.memory_space<vmem>>, vector<1x32x1xf32>
      %54 = vector.shape_cast %53 : vector<1x32x1xf32> to vector<32x1xf32>
      %55 = arith.addf %54, %40 : vector<32x1xf32>
      %c0_36 = arith.constant 0 : index
      %c0_37 = arith.constant 0 : index
      %c0_38 = arith.constant 0 : index
      %56 = vector.load %arg10[%c0_36, %c0_37, %c0_38] : memref<1x32x1xf32, #tpu.memory_space<vmem>>, vector<1x32x1xf32>
      %57 = vector.shape_cast %56 : vector<1x32x1xf32> to vector<32x1xf32>
      %58 = vector.shape_cast %55 : vector<32x1xf32> to vector<1x32x1xf32>
      tpu.vector_store %arg10[%c0_36, %c0_37, %c0_38], %58 {strides = array<i32>} : memref<1x32x1xf32, #tpu.memory_space<vmem>>, vector<1x32x1xf32>,
    } else {
    }
    return
  }
  func.func @transform_0(%arg0: i32, %arg1: i32) -> (i32, i32, i32) {
    %c0_i32 = arith.constant 0 : i32
    %c0_i32_0 = arith.constant 0 : i32
    return %arg0, %c0_i32, %arg1 : i32, i32, i32
  }
  func.func @transform_1(%arg0: i32, %arg1: i32) -> (i32, i32, i32) {
    %c0_i32 = arith.constant 0 : i32
    %c0_i32_0 = arith.constant 0 : i32
    %c0_i32_1 = arith.constant 0 : i32
    return %arg0, %c0_i32, %c0_i32_0 : i32, i32, i32
  }
  func.func @transform_2(%arg0: i32, %arg1: i32) -> (i32, i32, i32) {
    %c0_i32 = arith.constant 0 : i32
    %c0_i32_0 = arith.constant 0 : i32
    %c0_i32_1 = arith.constant 0 : i32
    return %arg0, %c0_i32, %c0_i32_0 : i32, i32, i32
  }
  func.func @transform_3(%arg0: i32, %arg1: i32) -> (i32, i32) {
    %c0_i32 = arith.constant 0 : i32
    %c0_i32_0 = arith.constant 0 : i32
    %c0_i32_1 = arith.constant 0 : i32
    return %c0_i32, %c0_i32_0 : i32, i32
  }
  func.func @transform_4(%arg0: i32, %arg1: i32) -> (i32, i32) {
    %c0_i32 = arith.constant 0 : i32
    %c0_i32_0 = arith.constant 0 : i32
    %c0_i32_1 = arith.constant 0 : i32
    return %c0_i32, %c0_i32_0 : i32, i32
  }
  func.func @transform_5(%arg0: i32, %arg1: i32) -> (i32, i32, i32) {
    %c0_i32 = arith.constant 0 : i32
    %c0_i32_0 = arith.constant 0 : i32
    %c0_i32_1 = arith.constant 0 : i32
    return %arg0, %c0_i32, %c0_i32_0 : i32, i32, i32
  }
  func.func @transform_6(%arg0: i32, %arg1: i32) -> (i32, i32, i32) {
    %c0_i32 = arith.constant 0 : i32
    %c0_i32_0 = arith.constant 0 : i32
    return %arg0, %c0_i32, %arg1 : i32, i32, i32
  }
  func.func @transform_7(%arg0: i32, %arg1: i32) -> (i32, i32, i32) {
    %c0_i32 = arith.constant 0 : i32
    %c0_i32_0 = arith.constant 0 : i32
    %c0_i32_1 = arith.constant 0 : i32
    return %arg0, %c0_i32, %c0_i32_0 : i32, i32, i32
  }
  func.func @transform_8(%arg0: i32, %arg1: i32) -> (i32, i32, i32) {
    %c0_i32 = arith.constant 0 : i32
    %c0_i32_0 = arith.constant 0 : i32
    %c0_i32_1 = arith.constant 0 : i32
    return %arg0, %c0_i32, %c0_i32_0 : i32, i32, i32
  }
}

module attributes {stable_mosaic.version = 11 : i64} {
  func.func @_oafilter_kernel(%arg0: i32, %arg1: memref<2x32x8xf32, #tpu.memory_space<vmem>>, %arg2: memref<1x32x1xf32, #tpu.memory_space<vmem>>, %arg3: memref<1x32x1xf32, #tpu.memory_space<vmem>>, %arg4: memref<32x32xf32, #tpu.memory_space<vmem>>, %arg5: memref<32x1xf32, #tpu.memory_space<vmem>>, %arg6: memref<1x1x8xf32, #tpu.memory_space<vmem>>, %arg7: memref<1x1x8xf32, #tpu.memory_space<vmem>>, %arg8: memref<8x8xf32, #tpu.memory_space<vmem>>, %arg9: memref<1x8xf32, #tpu.memory_space<vmem>>, %arg10: memref<1x32x1xf32, #tpu.memory_space<vmem>>, %arg11: memref<1x32x1xf32, #tpu.memory_space<vmem>>, %arg12: memref<32x32xf32, #tpu.memory_space<vmem>>, %arg13: memref<32x1xf32, #tpu.memory_space<vmem>>, %arg14: memref<2x32x8xf32, #tpu.memory_space<vmem>>, %arg15: memref<2x32x8xf32, #tpu.memory_space<vmem>>) attributes {dimension_semantics = [#tpu.dimension_semantics<arbitrary>], iteration_bounds = array<i64: 1>, scalar_prefetch = 0 : i64, scratch_operands = 1 : i64, tpu.core_type = #tpu.core_type<tc>, window_params = [{pipeline_mode = #tpu.pipeline_mode<synchronous>, transform_indices = @transform_0, window_bounds = array<i64: 2, 32, 8>}, {pipeline_mode = #tpu.pipeline_mode<synchronous>, transform_indices = @transform_1, window_bounds = array<i64: 1, 32, 1>}, {pipeline_mode = #tpu.pipeline_mode<synchronous>, transform_indices = @transform_2, window_bounds = array<i64: 1, 32, 1>}, {pipeline_mode = #tpu.pipeline_mode<synchronous>, transform_indices = @transform_3, window_bounds = array<i64: 32, 32>}, {pipeline_mode = #tpu.pipeline_mode<synchronous>, transform_indices = @transform_4, window_bounds = array<i64: 32, 1>}, {pipeline_mode = #tpu.pipeline_mode<synchronous>, transform_indices = @transform_5, window_bounds = array<i64: 1, 1, 8>}, {pipeline_mode = #tpu.pipeline_mode<synchronous>, transform_indices = @transform_6, window_bounds = array<i64: 1, 1, 8>}, {pipeline_mode = #tpu.pipeline_mode<synchronous>, transform_indices = @transform_7, window_bounds = array<i64: 8, 8>}, {pipeline_mode = #tpu.pipeline_mode<synchronous>, transform_indices = @transform_8, window_bounds = array<i64: 1, 8>}, {pipeline_mode = #tpu.pipeline_mode<synchronous>, transform_indices = @transform_9, window_bounds = array<i64: 1, 32, 1>}, {pipeline_mode = #tpu.pipeline_mode<synchronous>, transform_indices = @transform_10, window_bounds = array<i64: 1, 32, 1>}, {pipeline_mode = #tpu.pipeline_mode<synchronous>, transform_indices = @transform_11, window_bounds = array<i64: 32, 32>}, {pipeline_mode = #tpu.pipeline_mode<synchronous>, transform_indices = @transform_12, window_bounds = array<i64: 32, 1>}, {pipeline_mode = #tpu.pipeline_mode<synchronous>, transform_indices = @transform_13, window_bounds = array<i64: 2, 32, 8>}]} {
    %c0 = arith.constant 0 : index
    %c0_0 = arith.constant 0 : index
    %c0_1 = arith.constant 0 : index
    %0 = vector.load %arg1[%c0, %c0_0, %c0_1] : memref<2x32x8xf32, #tpu.memory_space<vmem>>, vector<2x32x8xf32>
    %cst = arith.constant dense<0.000000e+00> : vector<2x32xf32>
    %1 = vector.multi_reduction <add>, %0, %cst [2] : vector<2x32x8xf32> to vector<2x32xf32>
    %2 = vector.shape_cast %1 : vector<2x32xf32> to vector<2x32x1xf32>
    %cst_2 = arith.constant 8.000000e+00 : f32
    %3 = vector.broadcast %cst_2 : f32 to vector<2x32x1xf32>
    %4 = arith.divf %2, %3 : vector<2x32x1xf32>
    %5 = arith.mulf %0, %0 : vector<2x32x8xf32>
    %cst_3 = arith.constant dense<0.000000e+00> : vector<2x32xf32>
    %6 = vector.multi_reduction <add>, %5, %cst_3 [2] : vector<2x32x8xf32> to vector<2x32xf32>
    %7 = vector.shape_cast %6 : vector<2x32xf32> to vector<2x32x1xf32>
    %cst_4 = arith.constant 8.000000e+00 : f32
    %8 = vector.broadcast %cst_4 : f32 to vector<2x32x1xf32>
    %9 = arith.divf %7, %8 : vector<2x32x1xf32>
    %10 = arith.mulf %4, %4 : vector<2x32x1xf32>
    %11 = arith.subf %9, %10 : vector<2x32x1xf32>
    %cst_5 = arith.constant 0.000000e+00 : f32
    %12 = vector.broadcast %cst_5 : f32 to vector<2x32x1xf32>
    %13 = arith.maximumf %11, %12 : vector<2x32x1xf32>
    %14 = vector.broadcast %4 : vector<2x32x1xf32> to vector<2x32x8xf32>
    %15 = arith.subf %0, %14 : vector<2x32x8xf32>
    %cst_6 = arith.constant 1.000000e-03 : f32
    %16 = vector.broadcast %cst_6 : f32 to vector<2x32x1xf32>
    %17 = arith.addf %13, %16 : vector<2x32x1xf32>
    %18 = math.rsqrt %17 : vector<2x32x1xf32>
    %19 = vector.broadcast %18 : vector<2x32x1xf32> to vector<2x32x8xf32>
    %20 = arith.mulf %15, %19 : vector<2x32x8xf32>
    %cst_7 = arith.constant dense<0.000000e+00> : vector<2x32xf32>
    %21 = vector.multi_reduction <add>, %20, %cst_7 [2] : vector<2x32x8xf32> to vector<2x32xf32>
    %22 = vector.shape_cast %21 : vector<2x32xf32> to vector<2x32x1xf32>
    %cst_8 = arith.constant 8.000000e+00 : f32
    %23 = vector.broadcast %cst_8 : f32 to vector<2x32x1xf32>
    %24 = arith.divf %22, %23 : vector<2x32x1xf32>
    %cst_9 = arith.constant dense<0.000000e+00> : vector<32x1xf32>
    %25 = vector.multi_reduction <add>, %24, %cst_9 [0] : vector<2x32x1xf32> to vector<32x1xf32>
    %26 = vector.shape_cast %25 : vector<32x1xf32> to vector<1x32x1xf32>
    %cst_10 = arith.constant 2.000000e+00 : f32
    %27 = vector.broadcast %cst_10 : f32 to vector<1x32x1xf32>
    %28 = arith.divf %26, %27 : vector<1x32x1xf32>
    %29 = arith.mulf %20, %20 : vector<2x32x8xf32>
    %cst_11 = arith.constant dense<0.000000e+00> : vector<2x32xf32>
    %30 = vector.multi_reduction <add>, %29, %cst_11 [2] : vector<2x32x8xf32> to vector<2x32xf32>
    %31 = vector.shape_cast %30 : vector<2x32xf32> to vector<2x32x1xf32>
    %cst_12 = arith.constant 8.000000e+00 : f32
    %32 = vector.broadcast %cst_12 : f32 to vector<2x32x1xf32>
    %33 = arith.divf %31, %32 : vector<2x32x1xf32>
    %cst_13 = arith.constant dense<0.000000e+00> : vector<32x1xf32>
    %34 = vector.multi_reduction <add>, %33, %cst_13 [0] : vector<2x32x1xf32> to vector<32x1xf32>
    %35 = vector.shape_cast %34 : vector<32x1xf32> to vector<1x32x1xf32>
    %cst_14 = arith.constant 2.000000e+00 : f32
    %36 = vector.broadcast %cst_14 : f32 to vector<1x32x1xf32>
    %37 = arith.divf %35, %36 : vector<1x32x1xf32>
    %38 = arith.mulf %28, %28 : vector<1x32x1xf32>
    %39 = arith.subf %37, %38 : vector<1x32x1xf32>
    %cst_15 = arith.constant 0.000000e+00 : f32
    %40 = vector.broadcast %cst_15 : f32 to vector<1x32x1xf32>
    %41 = arith.maximumf %39, %40 : vector<1x32x1xf32>
    %42 = vector.broadcast %28 : vector<1x32x1xf32> to vector<2x32x8xf32>
    %43 = arith.subf %20, %42 : vector<2x32x8xf32>
    %cst_16 = arith.constant 9.99999974E-6 : f32
    %44 = vector.broadcast %cst_16 : f32 to vector<1x32x1xf32>
    %45 = arith.addf %41, %44 : vector<1x32x1xf32>
    %46 = math.rsqrt %45 : vector<1x32x1xf32>
    %47 = vector.broadcast %46 : vector<1x32x1xf32> to vector<2x32x8xf32>
    %48 = arith.mulf %43, %47 : vector<2x32x8xf32>
    %c0_17 = arith.constant 0 : index
    %c0_18 = arith.constant 0 : index
    %c0_19 = arith.constant 0 : index
    %49 = vector.load %arg2[%c0_17, %c0_18, %c0_19] : memref<1x32x1xf32, #tpu.memory_space<vmem>>, vector<1x32x1xf32>
    %50 = vector.broadcast %49 : vector<1x32x1xf32> to vector<2x32x8xf32>
    %51 = arith.mulf %48, %50 : vector<2x32x8xf32>
    %c0_20 = arith.constant 0 : index
    %c0_21 = arith.constant 0 : index
    %c0_22 = arith.constant 0 : index
    %52 = vector.load %arg3[%c0_20, %c0_21, %c0_22] : memref<1x32x1xf32, #tpu.memory_space<vmem>>, vector<1x32x1xf32>
    %53 = vector.broadcast %52 : vector<1x32x1xf32> to vector<2x32x8xf32>
    %54 = arith.addf %51, %53 : vector<2x32x8xf32>
    %cst_23 = arith.constant 0.000000e+00 : f32
    %55 = vector.broadcast %cst_23 : f32 to vector<2x32x8xf32>
    %56 = arith.maximumf %54, %55 : vector<2x32x8xf32>
    %c0_24 = arith.constant 0 : index
    %c0_25 = arith.constant 0 : index
    %57 = vector.load %arg4[%c0_24, %c0_25] : memref<32x32xf32, #tpu.memory_space<vmem>>, vector<32x32xf32>
    %58 = arith.truncf %57 : vector<32x32xf32> to vector<32x32xbf16>
    %59 = vector.extract_strided_slice %56 {offsets = [0, 0, 0], sizes = [1, 32, 8], strides = [1, 1, 1]} : vector<2x32x8xf32> to vector<1x32x8xf32>
    %60 = vector.shape_cast %59 : vector<1x32x8xf32> to vector<32x8xf32>
    %61 = arith.truncf %60 : vector<32x8xf32> to vector<32x8xbf16>
    %cst_26 = arith.constant dense<0.000000e+00> : vector<32x8xf32>
    %62 = tpu.matmul %58, %61, %cst_26 {dimension_numbers = #tpu.dot_dimension_numbers<[1], [0], [0], [1], [0, 0, 1, 1], [], []>} : vector<32x32xbf16>, vector<32x8xbf16>, vector<32x8xf32> -> vector<32x8xf32>
    %c0_27 = arith.constant 0 : index
    %c0_28 = arith.constant 0 : index
    %63 = vector.load %arg5[%c0_27, %c0_28] : memref<32x1xf32, #tpu.memory_space<vmem>>, vector<32x1xf32>
    %64 = vector.broadcast %63 : vector<32x1xf32> to vector<32x8xf32>
    %65 = arith.addf %62, %64 : vector<32x8xf32>
    %c0_29 = arith.constant 0 : index
    %c0_30 = arith.constant 0 : index
    %c0_31 = arith.constant 0 : index
    %66 = vector.load %arg15[%c0_29, %c0_30, %c0_31] : memref<2x32x8xf32, #tpu.memory_space<vmem>>, vector<1x32x8xf32>
    %67 = vector.shape_cast %66 : vector<1x32x8xf32> to vector<32x8xf32>
    %68 = vector.shape_cast %65 : vector<32x8xf32> to vector<1x32x8xf32>
    tpu.vector_store %arg15[%c0_29, %c0_30, %c0_31], %68 {strides = array<i32>} : memref<2x32x8xf32, #tpu.memory_space<vmem>>, vector<1x32x8xf32>,
    %69 = vector.extract_strided_slice %56 {offsets = [1, 0, 0], sizes = [1, 32, 8], strides = [1, 1, 1]} : vector<2x32x8xf32> to vector<1x32x8xf32>
    %70 = vector.shape_cast %69 : vector<1x32x8xf32> to vector<32x8xf32>
    %71 = arith.truncf %70 : vector<32x8xf32> to vector<32x8xbf16>
    %cst_32 = arith.constant dense<0.000000e+00> : vector<32x8xf32>
    %72 = tpu.matmul %58, %71, %cst_32 {dimension_numbers = #tpu.dot_dimension_numbers<[1], [0], [0], [1], [0, 0, 1, 1], [], []>} : vector<32x32xbf16>, vector<32x8xbf16>, vector<32x8xf32> -> vector<32x8xf32>
    %c0_33 = arith.constant 0 : index
    %c0_34 = arith.constant 0 : index
    %73 = vector.load %arg5[%c0_33, %c0_34] : memref<32x1xf32, #tpu.memory_space<vmem>>, vector<32x1xf32>
    %74 = vector.broadcast %73 : vector<32x1xf32> to vector<32x8xf32>
    %75 = arith.addf %72, %74 : vector<32x8xf32>
    %c1 = arith.constant 1 : index
    %c0_35 = arith.constant 0 : index
    %c0_36 = arith.constant 0 : index
    %76 = vector.load %arg15[%c1, %c0_35, %c0_36] : memref<2x32x8xf32, #tpu.memory_space<vmem>>, vector<1x32x8xf32>
    %77 = vector.shape_cast %76 : vector<1x32x8xf32> to vector<32x8xf32>
    %78 = vector.shape_cast %75 : vector<32x8xf32> to vector<1x32x8xf32>
    tpu.vector_store %arg15[%c1, %c0_35, %c0_36], %78 {strides = array<i32>} : memref<2x32x8xf32, #tpu.memory_space<vmem>>, vector<1x32x8xf32>,
    %c0_37 = arith.constant 0 : index
    %c0_38 = arith.constant 0 : index
    %c0_39 = arith.constant 0 : index
    %79 = vector.load %arg15[%c0_37, %c0_38, %c0_39] : memref<2x32x8xf32, #tpu.memory_space<vmem>>, vector<2x32x8xf32>
    %cst_40 = arith.constant dense<0.000000e+00> : vector<2x8xf32>
    %80 = vector.multi_reduction <add>, %79, %cst_40 [1] : vector<2x32x8xf32> to vector<2x8xf32>
    %81 = vector.shape_cast %80 : vector<2x8xf32> to vector<2x1x8xf32>
    %cst_41 = arith.constant 3.200000e+01 : f32
    %82 = vector.broadcast %cst_41 : f32 to vector<2x1x8xf32>
    %83 = arith.divf %81, %82 : vector<2x1x8xf32>
    %cst_42 = arith.constant dense<0.000000e+00> : vector<1x8xf32>
    %84 = vector.multi_reduction <add>, %83, %cst_42 [0] : vector<2x1x8xf32> to vector<1x8xf32>
    %85 = vector.shape_cast %84 : vector<1x8xf32> to vector<1x1x8xf32>
    %cst_43 = arith.constant 2.000000e+00 : f32
    %86 = vector.broadcast %cst_43 : f32 to vector<1x1x8xf32>
    %87 = arith.divf %85, %86 : vector<1x1x8xf32>
    %88 = arith.mulf %79, %79 : vector<2x32x8xf32>
    %cst_44 = arith.constant dense<0.000000e+00> : vector<2x8xf32>
    %89 = vector.multi_reduction <add>, %88, %cst_44 [1] : vector<2x32x8xf32> to vector<2x8xf32>
    %90 = vector.shape_cast %89 : vector<2x8xf32> to vector<2x1x8xf32>
    %cst_45 = arith.constant 3.200000e+01 : f32
    %91 = vector.broadcast %cst_45 : f32 to vector<2x1x8xf32>
    %92 = arith.divf %90, %91 : vector<2x1x8xf32>
    %cst_46 = arith.constant dense<0.000000e+00> : vector<1x8xf32>
    %93 = vector.multi_reduction <add>, %92, %cst_46 [0] : vector<2x1x8xf32> to vector<1x8xf32>
    %94 = vector.shape_cast %93 : vector<1x8xf32> to vector<1x1x8xf32>
    %cst_47 = arith.constant 2.000000e+00 : f32
    %95 = vector.broadcast %cst_47 : f32 to vector<1x1x8xf32>
    %96 = arith.divf %94, %95 : vector<1x1x8xf32>
    %97 = arith.mulf %87, %87 : vector<1x1x8xf32>
    %98 = arith.subf %96, %97 : vector<1x1x8xf32>
    %cst_48 = arith.constant 0.000000e+00 : f32
    %99 = vector.broadcast %cst_48 : f32 to vector<1x1x8xf32>
    %100 = arith.maximumf %98, %99 : vector<1x1x8xf32>
    %101 = vector.broadcast %87 : vector<1x1x8xf32> to vector<2x32x8xf32>
    %102 = arith.subf %79, %101 : vector<2x32x8xf32>
    %cst_49 = arith.constant 9.99999974E-6 : f32
    %103 = vector.broadcast %cst_49 : f32 to vector<1x1x8xf32>
    %104 = arith.addf %100, %103 : vector<1x1x8xf32>
    %105 = math.rsqrt %104 : vector<1x1x8xf32>
    %106 = vector.broadcast %105 : vector<1x1x8xf32> to vector<2x32x8xf32>
    %107 = arith.mulf %102, %106 : vector<2x32x8xf32>
    %c0_50 = arith.constant 0 : index
    %c0_51 = arith.constant 0 : index
    %c0_52 = arith.constant 0 : index
    %108 = vector.load %arg6[%c0_50, %c0_51, %c0_52] : memref<1x1x8xf32, #tpu.memory_space<vmem>>, vector<1x1x8xf32>
    %109 = vector.broadcast %108 : vector<1x1x8xf32> to vector<2x32x8xf32>
    %110 = arith.mulf %107, %109 : vector<2x32x8xf32>
    %c0_53 = arith.constant 0 : index
    %c0_54 = arith.constant 0 : index
    %c0_55 = arith.constant 0 : index
    %111 = vector.load %arg7[%c0_53, %c0_54, %c0_55] : memref<1x1x8xf32, #tpu.memory_space<vmem>>, vector<1x1x8xf32>
    %112 = vector.broadcast %111 : vector<1x1x8xf32> to vector<2x32x8xf32>
    %113 = arith.addf %110, %112 : vector<2x32x8xf32>
    %cst_56 = arith.constant 0.000000e+00 : f32
    %114 = vector.broadcast %cst_56 : f32 to vector<2x32x8xf32>
    %115 = arith.maximumf %113, %114 : vector<2x32x8xf32>
    %c0_57 = arith.constant 0 : index
    %c0_58 = arith.constant 0 : index
    %116 = vector.load %arg8[%c0_57, %c0_58] : memref<8x8xf32, #tpu.memory_space<vmem>>, vector<8x8xf32>
    %117 = arith.truncf %116 : vector<8x8xf32> to vector<8x8xbf16>
    %118 = vector.extract_strided_slice %115 {offsets = [0, 0, 0], sizes = [1, 32, 8], strides = [1, 1, 1]} : vector<2x32x8xf32> to vector<1x32x8xf32>
    %119 = vector.shape_cast %118 : vector<1x32x8xf32> to vector<32x8xf32>
    %120 = arith.truncf %119 : vector<32x8xf32> to vector<32x8xbf16>
    %cst_59 = arith.constant dense<0.000000e+00> : vector<32x8xf32>
    %121 = tpu.matmul %120, %117, %cst_59 {dimension_numbers = #tpu.dot_dimension_numbers<[1], [1], [0], [0], [0, 0, 1, 0], [], []>} : vector<32x8xbf16>, vector<8x8xbf16>, vector<32x8xf32> -> vector<32x8xf32>
    %122 = vector.extract_strided_slice %79 {offsets = [0, 0, 0], sizes = [1, 32, 8], strides = [1, 1, 1]} : vector<2x32x8xf32> to vector<1x32x8xf32>
    %123 = vector.shape_cast %122 : vector<1x32x8xf32> to vector<32x8xf32>
    %124 = arith.addf %123, %121 : vector<32x8xf32>
    %c0_60 = arith.constant 0 : index
    %c0_61 = arith.constant 0 : index
    %125 = vector.load %arg9[%c0_60, %c0_61] : memref<1x8xf32, #tpu.memory_space<vmem>>, vector<1x8xf32>
    %126 = vector.broadcast %125 : vector<1x8xf32> to vector<32x8xf32>
    %127 = arith.addf %124, %126 : vector<32x8xf32>
    %c0_62 = arith.constant 0 : index
    %c0_63 = arith.constant 0 : index
    %c0_64 = arith.constant 0 : index
    %128 = vector.load %arg15[%c0_62, %c0_63, %c0_64] : memref<2x32x8xf32, #tpu.memory_space<vmem>>, vector<1x32x8xf32>
    %129 = vector.shape_cast %128 : vector<1x32x8xf32> to vector<32x8xf32>
    %130 = vector.shape_cast %127 : vector<32x8xf32> to vector<1x32x8xf32>
    tpu.vector_store %arg15[%c0_62, %c0_63, %c0_64], %130 {strides = array<i32>} : memref<2x32x8xf32, #tpu.memory_space<vmem>>, vector<1x32x8xf32>,
    %131 = vector.extract_strided_slice %115 {offsets = [1, 0, 0], sizes = [1, 32, 8], strides = [1, 1, 1]} : vector<2x32x8xf32> to vector<1x32x8xf32>
    %132 = vector.shape_cast %131 : vector<1x32x8xf32> to vector<32x8xf32>
    %133 = arith.truncf %132 : vector<32x8xf32> to vector<32x8xbf16>
    %cst_65 = arith.constant dense<0.000000e+00> : vector<32x8xf32>
    %134 = tpu.matmul %133, %117, %cst_65 {dimension_numbers = #tpu.dot_dimension_numbers<[1], [1], [0], [0], [0, 0, 1, 0], [], []>} : vector<32x8xbf16>, vector<8x8xbf16>, vector<32x8xf32> -> vector<32x8xf32>
    %135 = vector.extract_strided_slice %79 {offsets = [1, 0, 0], sizes = [1, 32, 8], strides = [1, 1, 1]} : vector<2x32x8xf32> to vector<1x32x8xf32>
    %136 = vector.shape_cast %135 : vector<1x32x8xf32> to vector<32x8xf32>
    %137 = arith.addf %136, %134 : vector<32x8xf32>
    %c0_66 = arith.constant 0 : index
    %c0_67 = arith.constant 0 : index
    %138 = vector.load %arg9[%c0_66, %c0_67] : memref<1x8xf32, #tpu.memory_space<vmem>>, vector<1x8xf32>
    %139 = vector.broadcast %138 : vector<1x8xf32> to vector<32x8xf32>
    %140 = arith.addf %137, %139 : vector<32x8xf32>
    %c1_68 = arith.constant 1 : index
    %c0_69 = arith.constant 0 : index
    %c0_70 = arith.constant 0 : index
    %141 = vector.load %arg15[%c1_68, %c0_69, %c0_70] : memref<2x32x8xf32, #tpu.memory_space<vmem>>, vector<1x32x8xf32>
    %142 = vector.shape_cast %141 : vector<1x32x8xf32> to vector<32x8xf32>
    %143 = vector.shape_cast %140 : vector<32x8xf32> to vector<1x32x8xf32>
    tpu.vector_store %arg15[%c1_68, %c0_69, %c0_70], %143 {strides = array<i32>} : memref<2x32x8xf32, #tpu.memory_space<vmem>>, vector<1x32x8xf32>,
    %c0_71 = arith.constant 0 : index
    %c0_72 = arith.constant 0 : index
    %c0_73 = arith.constant 0 : index
    %144 = vector.load %arg15[%c0_71, %c0_72, %c0_73] : memref<2x32x8xf32, #tpu.memory_space<vmem>>, vector<2x32x8xf32>
    %cst_74 = arith.constant dense<0.000000e+00> : vector<2x32xf32>
    %145 = vector.multi_reduction <add>, %144, %cst_74 [2] : vector<2x32x8xf32> to vector<2x32xf32>
    %146 = vector.shape_cast %145 : vector<2x32xf32> to vector<2x32x1xf32>
    %cst_75 = arith.constant 8.000000e+00 : f32
    %147 = vector.broadcast %cst_75 : f32 to vector<2x32x1xf32>
    %148 = arith.divf %146, %147 : vector<2x32x1xf32>
    %149 = arith.mulf %144, %144 : vector<2x32x8xf32>
    %cst_76 = arith.constant dense<0.000000e+00> : vector<2x32xf32>
    %150 = vector.multi_reduction <add>, %149, %cst_76 [2] : vector<2x32x8xf32> to vector<2x32xf32>
    %151 = vector.shape_cast %150 : vector<2x32xf32> to vector<2x32x1xf32>
    %cst_77 = arith.constant 8.000000e+00 : f32
    %152 = vector.broadcast %cst_77 : f32 to vector<2x32x1xf32>
    %153 = arith.divf %151, %152 : vector<2x32x1xf32>
    %154 = arith.mulf %148, %148 : vector<2x32x1xf32>
    %155 = arith.subf %153, %154 : vector<2x32x1xf32>
    %cst_78 = arith.constant 0.000000e+00 : f32
    %156 = vector.broadcast %cst_78 : f32 to vector<2x32x1xf32>
    %157 = arith.maximumf %155, %156 : vector<2x32x1xf32>
    %158 = vector.broadcast %148 : vector<2x32x1xf32> to vector<2x32x8xf32>
    %159 = arith.subf %144, %158 : vector<2x32x8xf32>
    %cst_79 = arith.constant 1.000000e-03 : f32
    %160 = vector.broadcast %cst_79 : f32 to vector<2x32x1xf32>
    %161 = arith.addf %157, %160 : vector<2x32x1xf32>
    %162 = math.rsqrt %161 : vector<2x32x1xf32>
    %163 = vector.broadcast %162 : vector<2x32x1xf32> to vector<2x32x8xf32>
    %164 = arith.mulf %159, %163 : vector<2x32x8xf32>
    %cst_80 = arith.constant dense<0.000000e+00> : vector<2x32xf32>
    %165 = vector.multi_reduction <add>, %164, %cst_80 [2] : vector<2x32x8xf32> to vector<2x32xf32>
    %166 = vector.shape_cast %165 : vector<2x32xf32> to vector<2x32x1xf32>
    %cst_81 = arith.constant 8.000000e+00 : f32
    %167 = vector.broadcast %cst_81 : f32 to vector<2x32x1xf32>
    %168 = arith.divf %166, %167 : vector<2x32x1xf32>
    %cst_82 = arith.constant dense<0.000000e+00> : vector<32x1xf32>
    %169 = vector.multi_reduction <add>, %168, %cst_82 [0] : vector<2x32x1xf32> to vector<32x1xf32>
    %170 = vector.shape_cast %169 : vector<32x1xf32> to vector<1x32x1xf32>
    %cst_83 = arith.constant 2.000000e+00 : f32
    %171 = vector.broadcast %cst_83 : f32 to vector<1x32x1xf32>
    %172 = arith.divf %170, %171 : vector<1x32x1xf32>
    %173 = arith.mulf %164, %164 : vector<2x32x8xf32>
    %cst_84 = arith.constant dense<0.000000e+00> : vector<2x32xf32>
    %174 = vector.multi_reduction <add>, %173, %cst_84 [2] : vector<2x32x8xf32> to vector<2x32xf32>
    %175 = vector.shape_cast %174 : vector<2x32xf32> to vector<2x32x1xf32>
    %cst_85 = arith.constant 8.000000e+00 : f32
    %176 = vector.broadcast %cst_85 : f32 to vector<2x32x1xf32>
    %177 = arith.divf %175, %176 : vector<2x32x1xf32>
    %cst_86 = arith.constant dense<0.000000e+00> : vector<32x1xf32>
    %178 = vector.multi_reduction <add>, %177, %cst_86 [0] : vector<2x32x1xf32> to vector<32x1xf32>
    %179 = vector.shape_cast %178 : vector<32x1xf32> to vector<1x32x1xf32>
    %cst_87 = arith.constant 2.000000e+00 : f32
    %180 = vector.broadcast %cst_87 : f32 to vector<1x32x1xf32>
    %181 = arith.divf %179, %180 : vector<1x32x1xf32>
    %182 = arith.mulf %172, %172 : vector<1x32x1xf32>
    %183 = arith.subf %181, %182 : vector<1x32x1xf32>
    %cst_88 = arith.constant 0.000000e+00 : f32
    %184 = vector.broadcast %cst_88 : f32 to vector<1x32x1xf32>
    %185 = arith.maximumf %183, %184 : vector<1x32x1xf32>
    %186 = vector.broadcast %172 : vector<1x32x1xf32> to vector<2x32x8xf32>
    %187 = arith.subf %164, %186 : vector<2x32x8xf32>
    %cst_89 = arith.constant 9.99999974E-6 : f32
    %188 = vector.broadcast %cst_89 : f32 to vector<1x32x1xf32>
    %189 = arith.addf %185, %188 : vector<1x32x1xf32>
    %190 = math.rsqrt %189 : vector<1x32x1xf32>
    %191 = vector.broadcast %190 : vector<1x32x1xf32> to vector<2x32x8xf32>
    %192 = arith.mulf %187, %191 : vector<2x32x8xf32>
    %c0_90 = arith.constant 0 : index
    %c0_91 = arith.constant 0 : index
    %c0_92 = arith.constant 0 : index
    %193 = vector.load %arg10[%c0_90, %c0_91, %c0_92] : memref<1x32x1xf32, #tpu.memory_space<vmem>>, vector<1x32x1xf32>
    %194 = vector.broadcast %193 : vector<1x32x1xf32> to vector<2x32x8xf32>
    %195 = arith.mulf %192, %194 : vector<2x32x8xf32>
    %c0_93 = arith.constant 0 : index
    %c0_94 = arith.constant 0 : index
    %c0_95 = arith.constant 0 : index
    %196 = vector.load %arg11[%c0_93, %c0_94, %c0_95] : memref<1x32x1xf32, #tpu.memory_space<vmem>>, vector<1x32x1xf32>
    %197 = vector.broadcast %196 : vector<1x32x1xf32> to vector<2x32x8xf32>
    %198 = arith.addf %195, %197 : vector<2x32x8xf32>
    %cst_96 = arith.constant 0.000000e+00 : f32
    %199 = vector.broadcast %cst_96 : f32 to vector<2x32x8xf32>
    %200 = arith.maximumf %198, %199 : vector<2x32x8xf32>
    %c0_97 = arith.constant 0 : index
    %c0_98 = arith.constant 0 : index
    %201 = vector.load %arg12[%c0_97, %c0_98] : memref<32x32xf32, #tpu.memory_space<vmem>>, vector<32x32xf32>
    %202 = arith.truncf %201 : vector<32x32xf32> to vector<32x32xbf16>
    %203 = vector.extract_strided_slice %200 {offsets = [0, 0, 0], sizes = [1, 32, 8], strides = [1, 1, 1]} : vector<2x32x8xf32> to vector<1x32x8xf32>
    %204 = vector.shape_cast %203 : vector<1x32x8xf32> to vector<32x8xf32>
    %205 = arith.truncf %204 : vector<32x8xf32> to vector<32x8xbf16>
    %cst_99 = arith.constant dense<0.000000e+00> : vector<32x8xf32>
    %206 = tpu.matmul %202, %205, %cst_99 {dimension_numbers = #tpu.dot_dimension_numbers<[1], [0], [0], [1], [0, 0, 1, 1], [], []>} : vector<32x32xbf16>, vector<32x8xbf16>, vector<32x8xf32> -> vector<32x8xf32>
    %c0_100 = arith.constant 0 : index
    %c0_101 = arith.constant 0 : index
    %207 = vector.load %arg13[%c0_100, %c0_101] : memref<32x1xf32, #tpu.memory_space<vmem>>, vector<32x1xf32>
    %208 = vector.broadcast %207 : vector<32x1xf32> to vector<32x8xf32>
    %209 = arith.addf %206, %208 : vector<32x8xf32>
    %210 = vector.extract_strided_slice %0 {offsets = [0, 0, 0], sizes = [1, 32, 8], strides = [1, 1, 1]} : vector<2x32x8xf32> to vector<1x32x8xf32>
    %211 = vector.shape_cast %210 : vector<1x32x8xf32> to vector<32x8xf32>
    %212 = arith.addf %209, %211 : vector<32x8xf32>
    %c0_102 = arith.constant 0 : index
    %c0_103 = arith.constant 0 : index
    %c0_104 = arith.constant 0 : index
    %213 = vector.load %arg14[%c0_102, %c0_103, %c0_104] : memref<2x32x8xf32, #tpu.memory_space<vmem>>, vector<1x32x8xf32>
    %214 = vector.shape_cast %213 : vector<1x32x8xf32> to vector<32x8xf32>
    %215 = vector.shape_cast %212 : vector<32x8xf32> to vector<1x32x8xf32>
    tpu.vector_store %arg14[%c0_102, %c0_103, %c0_104], %215 {strides = array<i32>} : memref<2x32x8xf32, #tpu.memory_space<vmem>>, vector<1x32x8xf32>,
    %216 = vector.extract_strided_slice %200 {offsets = [1, 0, 0], sizes = [1, 32, 8], strides = [1, 1, 1]} : vector<2x32x8xf32> to vector<1x32x8xf32>
    %217 = vector.shape_cast %216 : vector<1x32x8xf32> to vector<32x8xf32>
    %218 = arith.truncf %217 : vector<32x8xf32> to vector<32x8xbf16>
    %cst_105 = arith.constant dense<0.000000e+00> : vector<32x8xf32>
    %219 = tpu.matmul %202, %218, %cst_105 {dimension_numbers = #tpu.dot_dimension_numbers<[1], [0], [0], [1], [0, 0, 1, 1], [], []>} : vector<32x32xbf16>, vector<32x8xbf16>, vector<32x8xf32> -> vector<32x8xf32>
    %c0_106 = arith.constant 0 : index
    %c0_107 = arith.constant 0 : index
    %220 = vector.load %arg13[%c0_106, %c0_107] : memref<32x1xf32, #tpu.memory_space<vmem>>, vector<32x1xf32>
    %221 = vector.broadcast %220 : vector<32x1xf32> to vector<32x8xf32>
    %222 = arith.addf %219, %221 : vector<32x8xf32>
    %223 = vector.extract_strided_slice %0 {offsets = [1, 0, 0], sizes = [1, 32, 8], strides = [1, 1, 1]} : vector<2x32x8xf32> to vector<1x32x8xf32>
    %224 = vector.shape_cast %223 : vector<1x32x8xf32> to vector<32x8xf32>
    %225 = arith.addf %222, %224 : vector<32x8xf32>
    %c1_108 = arith.constant 1 : index
    %c0_109 = arith.constant 0 : index
    %c0_110 = arith.constant 0 : index
    %226 = vector.load %arg14[%c1_108, %c0_109, %c0_110] : memref<2x32x8xf32, #tpu.memory_space<vmem>>, vector<1x32x8xf32>
    %227 = vector.shape_cast %226 : vector<1x32x8xf32> to vector<32x8xf32>
    %228 = vector.shape_cast %225 : vector<32x8xf32> to vector<1x32x8xf32>
    tpu.vector_store %arg14[%c1_108, %c0_109, %c0_110], %228 {strides = array<i32>} : memref<2x32x8xf32, #tpu.memory_space<vmem>>, vector<1x32x8xf32>,
    return
  }
  func.func @transform_0(%arg0: i32) -> (i32, i32, i32) {
    %c0_i32 = arith.constant 0 : i32
    %c0_i32_0 = arith.constant 0 : i32
    %c0_i32_1 = arith.constant 0 : i32
    %c0_i32_2 = arith.constant 0 : i32
    return %c0_i32, %c0_i32_0, %c0_i32_1 : i32, i32, i32
  }
  func.func @transform_1(%arg0: i32) -> (i32, i32, i32) {
    %c0_i32 = arith.constant 0 : i32
    %c0_i32_0 = arith.constant 0 : i32
    %c0_i32_1 = arith.constant 0 : i32
    %c0_i32_2 = arith.constant 0 : i32
    return %c0_i32, %c0_i32_0, %c0_i32_1 : i32, i32, i32
  }
  func.func @transform_2(%arg0: i32) -> (i32, i32, i32) {
    %c0_i32 = arith.constant 0 : i32
    %c0_i32_0 = arith.constant 0 : i32
    %c0_i32_1 = arith.constant 0 : i32
    %c0_i32_2 = arith.constant 0 : i32
    return %c0_i32, %c0_i32_0, %c0_i32_1 : i32, i32, i32
  }
  func.func @transform_3(%arg0: i32) -> (i32, i32) {
    %c0_i32 = arith.constant 0 : i32
    %c0_i32_0 = arith.constant 0 : i32
    %c0_i32_1 = arith.constant 0 : i32
    return %c0_i32, %c0_i32_0 : i32, i32
  }
  func.func @transform_4(%arg0: i32) -> (i32, i32) {
    %c0_i32 = arith.constant 0 : i32
    %c0_i32_0 = arith.constant 0 : i32
    %c0_i32_1 = arith.constant 0 : i32
    return %c0_i32, %c0_i32_0 : i32, i32
  }
  func.func @transform_5(%arg0: i32) -> (i32, i32, i32) {
    %c0_i32 = arith.constant 0 : i32
    %c0_i32_0 = arith.constant 0 : i32
    %c0_i32_1 = arith.constant 0 : i32
    %c0_i32_2 = arith.constant 0 : i32
    return %c0_i32, %c0_i32_0, %c0_i32_1 : i32, i32, i32
  }
  func.func @transform_6(%arg0: i32) -> (i32, i32, i32) {
    %c0_i32 = arith.constant 0 : i32
    %c0_i32_0 = arith.constant 0 : i32
    %c0_i32_1 = arith.constant 0 : i32
    %c0_i32_2 = arith.constant 0 : i32
    return %c0_i32, %c0_i32_0, %c0_i32_1 : i32, i32, i32
  }
  func.func @transform_7(%arg0: i32) -> (i32, i32) {
    %c0_i32 = arith.constant 0 : i32
    %c0_i32_0 = arith.constant 0 : i32
    %c0_i32_1 = arith.constant 0 : i32
    return %c0_i32, %c0_i32_0 : i32, i32
  }
  func.func @transform_8(%arg0: i32) -> (i32, i32) {
    %c0_i32 = arith.constant 0 : i32
    %c0_i32_0 = arith.constant 0 : i32
    %c0_i32_1 = arith.constant 0 : i32
    return %c0_i32, %c0_i32_0 : i32, i32
  }
  func.func @transform_9(%arg0: i32) -> (i32, i32, i32) {
    %c0_i32 = arith.constant 0 : i32
    %c0_i32_0 = arith.constant 0 : i32
    %c0_i32_1 = arith.constant 0 : i32
    %c0_i32_2 = arith.constant 0 : i32
    return %c0_i32, %c0_i32_0, %c0_i32_1 : i32, i32, i32
  }
  func.func @transform_10(%arg0: i32) -> (i32, i32, i32) {
    %c0_i32 = arith.constant 0 : i32
    %c0_i32_0 = arith.constant 0 : i32
    %c0_i32_1 = arith.constant 0 : i32
    %c0_i32_2 = arith.constant 0 : i32
    return %c0_i32, %c0_i32_0, %c0_i32_1 : i32, i32, i32
  }
  func.func @transform_11(%arg0: i32) -> (i32, i32) {
    %c0_i32 = arith.constant 0 : i32
    %c0_i32_0 = arith.constant 0 : i32
    %c0_i32_1 = arith.constant 0 : i32
    return %c0_i32, %c0_i32_0 : i32, i32
  }
  func.func @transform_12(%arg0: i32) -> (i32, i32) {
    %c0_i32 = arith.constant 0 : i32
    %c0_i32_0 = arith.constant 0 : i32
    %c0_i32_1 = arith.constant 0 : i32
    return %c0_i32, %c0_i32_0 : i32, i32
  }
  func.func @transform_13(%arg0: i32) -> (i32, i32, i32) {
    %c0_i32 = arith.constant 0 : i32
    %c0_i32_0 = arith.constant 0 : i32
    %c0_i32_1 = arith.constant 0 : i32
    %c0_i32_2 = arith.constant 0 : i32
    return %c0_i32, %c0_i32_0, %c0_i32_1 : i32, i32, i32
  }
}

module attributes {stable_mosaic.version = 11 : i64} {
  func.func @_stage_kernel(%arg0: i32, %arg1: i32, %arg2: memref<1x64x512xf32, #tpu.memory_space<vmem>>, %arg3: memref<1x64x1xf32, #tpu.memory_space<vmem>>, %arg4: memref<1x64x1xf32, #tpu.memory_space<vmem>>, %arg5: memref<32x64xf32, #tpu.memory_space<vmem>>, %arg6: memref<32x1xf32, #tpu.memory_space<vmem>>, %arg7: memref<1x32x512xf32, #tpu.memory_space<vmem>>, %arg8: memref<1x32x1xf32, #tpu.memory_space<vmem>>, %arg9: memref<1x32x1xf32, #tpu.memory_space<vmem>>) attributes {dimension_semantics = [#tpu.dimension_semantics<parallel>, #tpu.dimension_semantics<arbitrary>], iteration_bounds = array<i64: 2, 2>, scalar_prefetch = 0 : i64, scratch_operands = 0 : i64, tpu.core_type = #tpu.core_type<tc>, window_params = [{transform_indices = @transform_0, window_bounds = array<i64: 1, 64, 512>}, {transform_indices = @transform_1, window_bounds = array<i64: 1, 64, 1>}, {transform_indices = @transform_2, window_bounds = array<i64: 1, 64, 1>}, {pipeline_mode = #tpu.pipeline_mode<synchronous>, transform_indices = @transform_3, window_bounds = array<i64: 32, 64>}, {pipeline_mode = #tpu.pipeline_mode<synchronous>, transform_indices = @transform_4, window_bounds = array<i64: 32, 1>}, {transform_indices = @transform_5, window_bounds = array<i64: 1, 32, 512>}, {transform_indices = @transform_6, window_bounds = array<i64: 1, 32, 1>}, {transform_indices = @transform_7, window_bounds = array<i64: 1, 32, 1>}]} {
    %c0 = arith.constant 0 : index
    %c0_0 = arith.constant 0 : index
    %c0_1 = arith.constant 0 : index
    %0 = vector.load %arg2[%c0, %c0_0, %c0_1] : memref<1x64x512xf32, #tpu.memory_space<vmem>>, vector<1x64x512xf32>
    %1 = vector.shape_cast %0 : vector<1x64x512xf32> to vector<64x512xf32>
    %c0_2 = arith.constant 0 : index
    %c0_3 = arith.constant 0 : index
    %c0_4 = arith.constant 0 : index
    %2 = vector.load %arg3[%c0_2, %c0_3, %c0_4] : memref<1x64x1xf32, #tpu.memory_space<vmem>>, vector<1x64x1xf32>
    %3 = vector.shape_cast %2 : vector<1x64x1xf32> to vector<64x1xf32>
    %4 = vector.broadcast %3 : vector<64x1xf32> to vector<64x512xf32>
    %5 = arith.mulf %1, %4 : vector<64x512xf32>
    %c0_5 = arith.constant 0 : index
    %c0_6 = arith.constant 0 : index
    %c0_7 = arith.constant 0 : index
    %6 = vector.load %arg4[%c0_5, %c0_6, %c0_7] : memref<1x64x1xf32, #tpu.memory_space<vmem>>, vector<1x64x1xf32>
    %7 = vector.shape_cast %6 : vector<1x64x1xf32> to vector<64x1xf32>
    %8 = vector.broadcast %7 : vector<64x1xf32> to vector<64x512xf32>
    %9 = arith.addf %5, %8 : vector<64x512xf32>
    %cst = arith.constant 0.000000e+00 : f32
    %10 = vector.broadcast %cst : f32 to vector<64x512xf32>
    %11 = arith.maximumf %9, %10 : vector<64x512xf32>
    %c0_8 = arith.constant 0 : index
    %c0_9 = arith.constant 0 : index
    %12 = vector.load %arg5[%c0_8, %c0_9] : memref<32x64xf32, #tpu.memory_space<vmem>>, vector<32x64xf32>
    %13 = arith.truncf %12 : vector<32x64xf32> to vector<32x64xbf16>
    %14 = arith.truncf %11 : vector<64x512xf32> to vector<64x512xbf16>
    %cst_10 = arith.constant dense<0.000000e+00> : vector<32x512xf32>
    %15 = tpu.matmul %13, %14, %cst_10 {dimension_numbers = #tpu.dot_dimension_numbers<[1], [0], [0], [1], [0, 0, 1, 1], [], []>} : vector<32x64xbf16>, vector<64x512xbf16>, vector<32x512xf32> -> vector<32x512xf32>
    %c0_11 = arith.constant 0 : index
    %c0_12 = arith.constant 0 : index
    %16 = vector.load %arg6[%c0_11, %c0_12] : memref<32x1xf32, #tpu.memory_space<vmem>>, vector<32x1xf32>
    %17 = vector.broadcast %16 : vector<32x1xf32> to vector<32x512xf32>
    %18 = arith.addf %15, %17 : vector<32x512xf32>
    %c0_13 = arith.constant 0 : index
    %c0_14 = arith.constant 0 : index
    %c0_15 = arith.constant 0 : index
    %19 = vector.load %arg7[%c0_13, %c0_14, %c0_15] : memref<1x32x512xf32, #tpu.memory_space<vmem>>, vector<1x32x512xf32>
    %20 = vector.shape_cast %19 : vector<1x32x512xf32> to vector<32x512xf32>
    %21 = vector.shape_cast %18 : vector<32x512xf32> to vector<1x32x512xf32>
    tpu.vector_store %arg7[%c0_13, %c0_14, %c0_15], %21 {strides = array<i32>} : memref<1x32x512xf32, #tpu.memory_space<vmem>>, vector<1x32x512xf32>,
    %cst_16 = arith.constant dense<0.000000e+00> : vector<32xf32>
    %22 = vector.multi_reduction <add>, %18, %cst_16 [1] : vector<32x512xf32> to vector<32xf32>
    %23 = vector.shape_cast %22 : vector<32xf32> to vector<32x1xf32>
    %24 = arith.mulf %18, %18 : vector<32x512xf32>
    %cst_17 = arith.constant dense<0.000000e+00> : vector<32xf32>
    %25 = vector.multi_reduction <add>, %24, %cst_17 [1] : vector<32x512xf32> to vector<32xf32>
    %26 = vector.shape_cast %25 : vector<32xf32> to vector<32x1xf32>
    %c0_i32 = arith.constant 0 : i32
    %27 = arith.cmpi eq, %arg1, %c0_i32 : i32
    %28 = arith.extui %27 : i1 to i32
    %c0_i32_18 = arith.constant 0 : i32
    %29 = arith.cmpi ne, %28, %c0_i32_18 : i32
    scf.if %29 {
      %c0_21 = arith.constant 0 : index
      %c0_22 = arith.constant 0 : index
      %c0_23 = arith.constant 0 : index
      %33 = vector.load %arg8[%c0_21, %c0_22, %c0_23] : memref<1x32x1xf32, #tpu.memory_space<vmem>>, vector<1x32x1xf32>
      %34 = vector.shape_cast %33 : vector<1x32x1xf32> to vector<32x1xf32>
      %35 = vector.shape_cast %23 : vector<32x1xf32> to vector<1x32x1xf32>
      tpu.vector_store %arg8[%c0_21, %c0_22, %c0_23], %35 {strides = array<i32>} : memref<1x32x1xf32, #tpu.memory_space<vmem>>, vector<1x32x1xf32>,
      %c0_24 = arith.constant 0 : index
      %c0_25 = arith.constant 0 : index
      %c0_26 = arith.constant 0 : index
      %36 = vector.load %arg9[%c0_24, %c0_25, %c0_26] : memref<1x32x1xf32, #tpu.memory_space<vmem>>, vector<1x32x1xf32>
      %37 = vector.shape_cast %36 : vector<1x32x1xf32> to vector<32x1xf32>
      %38 = vector.shape_cast %26 : vector<32x1xf32> to vector<1x32x1xf32>
      tpu.vector_store %arg9[%c0_24, %c0_25, %c0_26], %38 {strides = array<i32>} : memref<1x32x1xf32, #tpu.memory_space<vmem>>, vector<1x32x1xf32>,
    } else {
    }
    %c0_i32_19 = arith.constant 0 : i32
    %30 = arith.cmpi sgt, %arg1, %c0_i32_19 : i32
    %31 = arith.extui %30 : i1 to i32
    %c0_i32_20 = arith.constant 0 : i32
    %32 = arith.cmpi ne, %31, %c0_i32_20 : i32
    scf.if %32 {
      %c0_21 = arith.constant 0 : index
      %c0_22 = arith.constant 0 : index
      %c0_23 = arith.constant 0 : index
      %33 = vector.load %arg8[%c0_21, %c0_22, %c0_23] : memref<1x32x1xf32, #tpu.memory_space<vmem>>, vector<1x32x1xf32>
      %34 = vector.shape_cast %33 : vector<1x32x1xf32> to vector<32x1xf32>
      %35 = arith.addf %34, %23 : vector<32x1xf32>
      %c0_24 = arith.constant 0 : index
      %c0_25 = arith.constant 0 : index
      %c0_26 = arith.constant 0 : index
      %36 = vector.load %arg8[%c0_24, %c0_25, %c0_26] : memref<1x32x1xf32, #tpu.memory_space<vmem>>, vector<1x32x1xf32>
      %37 = vector.shape_cast %36 : vector<1x32x1xf32> to vector<32x1xf32>
      %38 = vector.shape_cast %35 : vector<32x1xf32> to vector<1x32x1xf32>
      tpu.vector_store %arg8[%c0_24, %c0_25, %c0_26], %38 {strides = array<i32>} : memref<1x32x1xf32, #tpu.memory_space<vmem>>, vector<1x32x1xf32>,
      %c0_27 = arith.constant 0 : index
      %c0_28 = arith.constant 0 : index
      %c0_29 = arith.constant 0 : index
      %39 = vector.load %arg9[%c0_27, %c0_28, %c0_29] : memref<1x32x1xf32, #tpu.memory_space<vmem>>, vector<1x32x1xf32>
      %40 = vector.shape_cast %39 : vector<1x32x1xf32> to vector<32x1xf32>
      %41 = arith.addf %40, %26 : vector<32x1xf32>
      %c0_30 = arith.constant 0 : index
      %c0_31 = arith.constant 0 : index
      %c0_32 = arith.constant 0 : index
      %42 = vector.load %arg9[%c0_30, %c0_31, %c0_32] : memref<1x32x1xf32, #tpu.memory_space<vmem>>, vector<1x32x1xf32>
      %43 = vector.shape_cast %42 : vector<1x32x1xf32> to vector<32x1xf32>
      %44 = vector.shape_cast %41 : vector<32x1xf32> to vector<1x32x1xf32>
      tpu.vector_store %arg9[%c0_30, %c0_31, %c0_32], %44 {strides = array<i32>} : memref<1x32x1xf32, #tpu.memory_space<vmem>>, vector<1x32x1xf32>,
    } else {
    }
    return
  }
  func.func @transform_0(%arg0: i32, %arg1: i32) -> (i32, i32, i32) {
    %c0_i32 = arith.constant 0 : i32
    %c0_i32_0 = arith.constant 0 : i32
    return %arg0, %c0_i32, %arg1 : i32, i32, i32
  }
  func.func @transform_1(%arg0: i32, %arg1: i32) -> (i32, i32, i32) {
    %c0_i32 = arith.constant 0 : i32
    %c0_i32_0 = arith.constant 0 : i32
    %c0_i32_1 = arith.constant 0 : i32
    return %arg0, %c0_i32, %c0_i32_0 : i32, i32, i32
  }
  func.func @transform_2(%arg0: i32, %arg1: i32) -> (i32, i32, i32) {
    %c0_i32 = arith.constant 0 : i32
    %c0_i32_0 = arith.constant 0 : i32
    %c0_i32_1 = arith.constant 0 : i32
    return %arg0, %c0_i32, %c0_i32_0 : i32, i32, i32
  }
  func.func @transform_3(%arg0: i32, %arg1: i32) -> (i32, i32) {
    %c0_i32 = arith.constant 0 : i32
    %c0_i32_0 = arith.constant 0 : i32
    %c0_i32_1 = arith.constant 0 : i32
    return %c0_i32, %c0_i32_0 : i32, i32
  }
  func.func @transform_4(%arg0: i32, %arg1: i32) -> (i32, i32) {
    %c0_i32 = arith.constant 0 : i32
    %c0_i32_0 = arith.constant 0 : i32
    %c0_i32_1 = arith.constant 0 : i32
    return %c0_i32, %c0_i32_0 : i32, i32
  }
  func.func @transform_5(%arg0: i32, %arg1: i32) -> (i32, i32, i32) {
    %c0_i32 = arith.constant 0 : i32
    %c0_i32_0 = arith.constant 0 : i32
    return %arg0, %c0_i32, %arg1 : i32, i32, i32
  }
  func.func @transform_6(%arg0: i32, %arg1: i32) -> (i32, i32, i32) {
    %c0_i32 = arith.constant 0 : i32
    %c0_i32_0 = arith.constant 0 : i32
    %c0_i32_1 = arith.constant 0 : i32
    return %arg0, %c0_i32, %c0_i32_0 : i32, i32, i32
  }
  func.func @transform_7(%arg0: i32, %arg1: i32) -> (i32, i32, i32) {
    %c0_i32 = arith.constant 0 : i32
    %c0_i32_0 = arith.constant 0 : i32
    %c0_i32_1 = arith.constant 0 : i32
    return %arg0, %c0_i32, %c0_i32_0 : i32, i32, i32
  }
}

module attributes {stable_mosaic.version = 11 : i64} {
  func.func @_stage_kernel(%arg0: i32, %arg1: i32, %arg2: memref<1x32x512xf32, #tpu.memory_space<vmem>>, %arg3: memref<1x32x1xf32, #tpu.memory_space<vmem>>, %arg4: memref<1x32x1xf32, #tpu.memory_space<vmem>>, %arg5: memref<32x32xf32, #tpu.memory_space<vmem>>, %arg6: memref<32x1xf32, #tpu.memory_space<vmem>>, %arg7: memref<1x64x512xf32, #tpu.memory_space<vmem>>, %arg8: memref<32x64xf32, #tpu.memory_space<vmem>>, %arg9: memref<32x1xf32, #tpu.memory_space<vmem>>, %arg10: memref<1x32x512xf32, #tpu.memory_space<vmem>>, %arg11: memref<1x32x1xf32, #tpu.memory_space<vmem>>, %arg12: memref<1x32x1xf32, #tpu.memory_space<vmem>>) attributes {dimension_semantics = [#tpu.dimension_semantics<parallel>, #tpu.dimension_semantics<arbitrary>], iteration_bounds = array<i64: 2, 2>, scalar_prefetch = 0 : i64, scratch_operands = 0 : i64, tpu.core_type = #tpu.core_type<tc>, window_params = [{transform_indices = @transform_0, window_bounds = array<i64: 1, 32, 512>}, {transform_indices = @transform_1, window_bounds = array<i64: 1, 32, 1>}, {transform_indices = @transform_2, window_bounds = array<i64: 1, 32, 1>}, {pipeline_mode = #tpu.pipeline_mode<synchronous>, transform_indices = @transform_3, window_bounds = array<i64: 32, 32>}, {pipeline_mode = #tpu.pipeline_mode<synchronous>, transform_indices = @transform_4, window_bounds = array<i64: 32, 1>}, {transform_indices = @transform_5, window_bounds = array<i64: 1, 64, 512>}, {pipeline_mode = #tpu.pipeline_mode<synchronous>, transform_indices = @transform_6, window_bounds = array<i64: 32, 64>}, {pipeline_mode = #tpu.pipeline_mode<synchronous>, transform_indices = @transform_7, window_bounds = array<i64: 32, 1>}, {transform_indices = @transform_8, window_bounds = array<i64: 1, 32, 512>}, {transform_indices = @transform_9, window_bounds = array<i64: 1, 32, 1>}, {transform_indices = @transform_10, window_bounds = array<i64: 1, 32, 1>}]} {
    %c0 = arith.constant 0 : index
    %c0_0 = arith.constant 0 : index
    %c0_1 = arith.constant 0 : index
    %0 = vector.load %arg2[%c0, %c0_0, %c0_1] : memref<1x32x512xf32, #tpu.memory_space<vmem>>, vector<1x32x512xf32>
    %1 = vector.shape_cast %0 : vector<1x32x512xf32> to vector<32x512xf32>
    %c0_2 = arith.constant 0 : index
    %c0_3 = arith.constant 0 : index
    %c0_4 = arith.constant 0 : index
    %2 = vector.load %arg3[%c0_2, %c0_3, %c0_4] : memref<1x32x1xf32, #tpu.memory_space<vmem>>, vector<1x32x1xf32>
    %3 = vector.shape_cast %2 : vector<1x32x1xf32> to vector<32x1xf32>
    %4 = vector.broadcast %3 : vector<32x1xf32> to vector<32x512xf32>
    %5 = arith.mulf %1, %4 : vector<32x512xf32>
    %c0_5 = arith.constant 0 : index
    %c0_6 = arith.constant 0 : index
    %c0_7 = arith.constant 0 : index
    %6 = vector.load %arg4[%c0_5, %c0_6, %c0_7] : memref<1x32x1xf32, #tpu.memory_space<vmem>>, vector<1x32x1xf32>
    %7 = vector.shape_cast %6 : vector<1x32x1xf32> to vector<32x1xf32>
    %8 = vector.broadcast %7 : vector<32x1xf32> to vector<32x512xf32>
    %9 = arith.addf %5, %8 : vector<32x512xf32>
    %cst = arith.constant 0.000000e+00 : f32
    %10 = vector.broadcast %cst : f32 to vector<32x512xf32>
    %11 = arith.maximumf %9, %10 : vector<32x512xf32>
    %c0_8 = arith.constant 0 : index
    %c0_9 = arith.constant 0 : index
    %12 = vector.load %arg5[%c0_8, %c0_9] : memref<32x32xf32, #tpu.memory_space<vmem>>, vector<32x32xf32>
    %13 = arith.truncf %12 : vector<32x32xf32> to vector<32x32xbf16>
    %14 = arith.truncf %11 : vector<32x512xf32> to vector<32x512xbf16>
    %cst_10 = arith.constant dense<0.000000e+00> : vector<32x512xf32>
    %15 = tpu.matmul %13, %14, %cst_10 {dimension_numbers = #tpu.dot_dimension_numbers<[1], [0], [0], [1], [0, 0, 1, 1], [], []>} : vector<32x32xbf16>, vector<32x512xbf16>, vector<32x512xf32> -> vector<32x512xf32>
    %c0_11 = arith.constant 0 : index
    %c0_12 = arith.constant 0 : index
    %16 = vector.load %arg6[%c0_11, %c0_12] : memref<32x1xf32, #tpu.memory_space<vmem>>, vector<32x1xf32>
    %17 = vector.broadcast %16 : vector<32x1xf32> to vector<32x512xf32>
    %18 = arith.addf %15, %17 : vector<32x512xf32>
    %c0_13 = arith.constant 0 : index
    %c0_14 = arith.constant 0 : index
    %19 = vector.load %arg8[%c0_13, %c0_14] : memref<32x64xf32, #tpu.memory_space<vmem>>, vector<32x64xf32>
    %20 = arith.truncf %19 : vector<32x64xf32> to vector<32x64xbf16>
    %c0_15 = arith.constant 0 : index
    %c0_16 = arith.constant 0 : index
    %c0_17 = arith.constant 0 : index
    %21 = vector.load %arg7[%c0_15, %c0_16, %c0_17] : memref<1x64x512xf32, #tpu.memory_space<vmem>>, vector<1x64x512xf32>
    %22 = vector.shape_cast %21 : vector<1x64x512xf32> to vector<64x512xf32>
    %23 = arith.truncf %22 : vector<64x512xf32> to vector<64x512xbf16>
    %cst_18 = arith.constant dense<0.000000e+00> : vector<32x512xf32>
    %24 = tpu.matmul %20, %23, %cst_18 {dimension_numbers = #tpu.dot_dimension_numbers<[1], [0], [0], [1], [0, 0, 1, 1], [], []>} : vector<32x64xbf16>, vector<64x512xbf16>, vector<32x512xf32> -> vector<32x512xf32>
    %25 = arith.addf %18, %24 : vector<32x512xf32>
    %c0_19 = arith.constant 0 : index
    %c0_20 = arith.constant 0 : index
    %26 = vector.load %arg9[%c0_19, %c0_20] : memref<32x1xf32, #tpu.memory_space<vmem>>, vector<32x1xf32>
    %27 = vector.broadcast %26 : vector<32x1xf32> to vector<32x512xf32>
    %28 = arith.addf %25, %27 : vector<32x512xf32>
    %c0_21 = arith.constant 0 : index
    %c0_22 = arith.constant 0 : index
    %c0_23 = arith.constant 0 : index
    %29 = vector.load %arg10[%c0_21, %c0_22, %c0_23] : memref<1x32x512xf32, #tpu.memory_space<vmem>>, vector<1x32x512xf32>
    %30 = vector.shape_cast %29 : vector<1x32x512xf32> to vector<32x512xf32>
    %31 = vector.shape_cast %28 : vector<32x512xf32> to vector<1x32x512xf32>
    tpu.vector_store %arg10[%c0_21, %c0_22, %c0_23], %31 {strides = array<i32>} : memref<1x32x512xf32, #tpu.memory_space<vmem>>, vector<1x32x512xf32>,
    %cst_24 = arith.constant dense<0.000000e+00> : vector<32xf32>
    %32 = vector.multi_reduction <add>, %28, %cst_24 [1] : vector<32x512xf32> to vector<32xf32>
    %33 = vector.shape_cast %32 : vector<32xf32> to vector<32x1xf32>
    %34 = arith.mulf %28, %28 : vector<32x512xf32>
    %cst_25 = arith.constant dense<0.000000e+00> : vector<32xf32>
    %35 = vector.multi_reduction <add>, %34, %cst_25 [1] : vector<32x512xf32> to vector<32xf32>
    %36 = vector.shape_cast %35 : vector<32xf32> to vector<32x1xf32>
    %c0_i32 = arith.constant 0 : i32
    %37 = arith.cmpi eq, %arg1, %c0_i32 : i32
    %38 = arith.extui %37 : i1 to i32
    %c0_i32_26 = arith.constant 0 : i32
    %39 = arith.cmpi ne, %38, %c0_i32_26 : i32
    scf.if %39 {
      %c0_29 = arith.constant 0 : index
      %c0_30 = arith.constant 0 : index
      %c0_31 = arith.constant 0 : index
      %43 = vector.load %arg11[%c0_29, %c0_30, %c0_31] : memref<1x32x1xf32, #tpu.memory_space<vmem>>, vector<1x32x1xf32>
      %44 = vector.shape_cast %43 : vector<1x32x1xf32> to vector<32x1xf32>
      %45 = vector.shape_cast %33 : vector<32x1xf32> to vector<1x32x1xf32>
      tpu.vector_store %arg11[%c0_29, %c0_30, %c0_31], %45 {strides = array<i32>} : memref<1x32x1xf32, #tpu.memory_space<vmem>>, vector<1x32x1xf32>,
      %c0_32 = arith.constant 0 : index
      %c0_33 = arith.constant 0 : index
      %c0_34 = arith.constant 0 : index
      %46 = vector.load %arg12[%c0_32, %c0_33, %c0_34] : memref<1x32x1xf32, #tpu.memory_space<vmem>>, vector<1x32x1xf32>
      %47 = vector.shape_cast %46 : vector<1x32x1xf32> to vector<32x1xf32>
      %48 = vector.shape_cast %36 : vector<32x1xf32> to vector<1x32x1xf32>
      tpu.vector_store %arg12[%c0_32, %c0_33, %c0_34], %48 {strides = array<i32>} : memref<1x32x1xf32, #tpu.memory_space<vmem>>, vector<1x32x1xf32>,
    } else {
    }
    %c0_i32_27 = arith.constant 0 : i32
    %40 = arith.cmpi sgt, %arg1, %c0_i32_27 : i32
    %41 = arith.extui %40 : i1 to i32
    %c0_i32_28 = arith.constant 0 : i32
    %42 = arith.cmpi ne, %41, %c0_i32_28 : i32
    scf.if %42 {
      %c0_29 = arith.constant 0 : index
      %c0_30 = arith.constant 0 : index
      %c0_31 = arith.constant 0 : index
      %43 = vector.load %arg11[%c0_29, %c0_30, %c0_31] : memref<1x32x1xf32, #tpu.memory_space<vmem>>, vector<1x32x1xf32>
      %44 = vector.shape_cast %43 : vector<1x32x1xf32> to vector<32x1xf32>
      %45 = arith.addf %44, %33 : vector<32x1xf32>
      %c0_32 = arith.constant 0 : index
      %c0_33 = arith.constant 0 : index
      %c0_34 = arith.constant 0 : index
      %46 = vector.load %arg11[%c0_32, %c0_33, %c0_34] : memref<1x32x1xf32, #tpu.memory_space<vmem>>, vector<1x32x1xf32>
      %47 = vector.shape_cast %46 : vector<1x32x1xf32> to vector<32x1xf32>
      %48 = vector.shape_cast %45 : vector<32x1xf32> to vector<1x32x1xf32>
      tpu.vector_store %arg11[%c0_32, %c0_33, %c0_34], %48 {strides = array<i32>} : memref<1x32x1xf32, #tpu.memory_space<vmem>>, vector<1x32x1xf32>,
      %c0_35 = arith.constant 0 : index
      %c0_36 = arith.constant 0 : index
      %c0_37 = arith.constant 0 : index
      %49 = vector.load %arg12[%c0_35, %c0_36, %c0_37] : memref<1x32x1xf32, #tpu.memory_space<vmem>>, vector<1x32x1xf32>
      %50 = vector.shape_cast %49 : vector<1x32x1xf32> to vector<32x1xf32>
      %51 = arith.addf %50, %36 : vector<32x1xf32>
      %c0_38 = arith.constant 0 : index
      %c0_39 = arith.constant 0 : index
      %c0_40 = arith.constant 0 : index
      %52 = vector.load %arg12[%c0_38, %c0_39, %c0_40] : memref<1x32x1xf32, #tpu.memory_space<vmem>>, vector<1x32x1xf32>
      %53 = vector.shape_cast %52 : vector<1x32x1xf32> to vector<32x1xf32>
      %54 = vector.shape_cast %51 : vector<32x1xf32> to vector<1x32x1xf32>
      tpu.vector_store %arg12[%c0_38, %c0_39, %c0_40], %54 {strides = array<i32>} : memref<1x32x1xf32, #tpu.memory_space<vmem>>, vector<1x32x1xf32>,
    } else {
    }
    return
  }
  func.func @transform_0(%arg0: i32, %arg1: i32) -> (i32, i32, i32) {
    %c0_i32 = arith.constant 0 : i32
    %c0_i32_0 = arith.constant 0 : i32
    return %arg0, %c0_i32, %arg1 : i32, i32, i32
  }
  func.func @transform_1(%arg0: i32, %arg1: i32) -> (i32, i32, i32) {
    %c0_i32 = arith.constant 0 : i32
    %c0_i32_0 = arith.constant 0 : i32
    %c0_i32_1 = arith.constant 0 : i32
    return %arg0, %c0_i32, %c0_i32_0 : i32, i32, i32
  }
  func.func @transform_2(%arg0: i32, %arg1: i32) -> (i32, i32, i32) {
    %c0_i32 = arith.constant 0 : i32
    %c0_i32_0 = arith.constant 0 : i32
    %c0_i32_1 = arith.constant 0 : i32
    return %arg0, %c0_i32, %c0_i32_0 : i32, i32, i32
  }
  func.func @transform_3(%arg0: i32, %arg1: i32) -> (i32, i32) {
    %c0_i32 = arith.constant 0 : i32
    %c0_i32_0 = arith.constant 0 : i32
    %c0_i32_1 = arith.constant 0 : i32
    return %c0_i32, %c0_i32_0 : i32, i32
  }
  func.func @transform_4(%arg0: i32, %arg1: i32) -> (i32, i32) {
    %c0_i32 = arith.constant 0 : i32
    %c0_i32_0 = arith.constant 0 : i32
    %c0_i32_1 = arith.constant 0 : i32
    return %c0_i32, %c0_i32_0 : i32, i32
  }
  func.func @transform_5(%arg0: i32, %arg1: i32) -> (i32, i32, i32) {
    %c0_i32 = arith.constant 0 : i32
    %c0_i32_0 = arith.constant 0 : i32
    return %arg0, %c0_i32, %arg1 : i32, i32, i32
  }
  func.func @transform_6(%arg0: i32, %arg1: i32) -> (i32, i32) {
    %c0_i32 = arith.constant 0 : i32
    %c0_i32_0 = arith.constant 0 : i32
    %c0_i32_1 = arith.constant 0 : i32
    return %c0_i32, %c0_i32_0 : i32, i32
  }
  func.func @transform_7(%arg0: i32, %arg1: i32) -> (i32, i32) {
    %c0_i32 = arith.constant 0 : i32
    %c0_i32_0 = arith.constant 0 : i32
    %c0_i32_1 = arith.constant 0 : i32
    return %c0_i32, %c0_i32_0 : i32, i32
  }
  func.func @transform_8(%arg0: i32, %arg1: i32) -> (i32, i32, i32) {
    %c0_i32 = arith.constant 0 : i32
    %c0_i32_0 = arith.constant 0 : i32
    return %arg0, %c0_i32, %arg1 : i32, i32, i32
  }
  func.func @transform_9(%arg0: i32, %arg1: i32) -> (i32, i32, i32) {
    %c0_i32 = arith.constant 0 : i32
    %c0_i32_0 = arith.constant 0 : i32
    %c0_i32_1 = arith.constant 0 : i32
    return %arg0, %c0_i32, %c0_i32_0 : i32, i32, i32
  }
  func.func @transform_10(%arg0: i32, %arg1: i32) -> (i32, i32, i32) {
    %c0_i32 = arith.constant 0 : i32
    %c0_i32_0 = arith.constant 0 : i32
    %c0_i32_1 = arith.constant 0 : i32
    return %arg0, %c0_i32, %c0_i32_0 : i32, i32, i32
  }
}

module attributes {stable_mosaic.version = 11 : i64} {
  func.func @_stage_kernel(%arg0: i32, %arg1: i32, %arg2: memref<1x32x512xf32, #tpu.memory_space<vmem>>, %arg3: memref<1x32xf32, #tpu.memory_space<vmem>>, %arg4: memref<1x1xf32, #tpu.memory_space<vmem>>, %arg5: memref<1x1x512xf32, #tpu.memory_space<vmem>>, %arg6: memref<1x1x1xf32, #tpu.memory_space<vmem>>, %arg7: memref<1x1x1xf32, #tpu.memory_space<vmem>>) attributes {dimension_semantics = [#tpu.dimension_semantics<parallel>, #tpu.dimension_semantics<arbitrary>], iteration_bounds = array<i64: 2, 2>, scalar_prefetch = 0 : i64, scratch_operands = 0 : i64, tpu.core_type = #tpu.core_type<tc>, window_params = [{transform_indices = @transform_0, window_bounds = array<i64: 1, 32, 512>}, {pipeline_mode = #tpu.pipeline_mode<synchronous>, transform_indices = @transform_1, window_bounds = array<i64: 1, 32>}, {pipeline_mode = #tpu.pipeline_mode<synchronous>, transform_indices = @transform_2, window_bounds = array<i64: 1, 1>}, {transform_indices = @transform_3, window_bounds = array<i64: 1, 1, 512>}, {transform_indices = @transform_4, window_bounds = array<i64: 1, 1, 1>}, {transform_indices = @transform_5, window_bounds = array<i64: 1, 1, 1>}]} {
    %c0 = arith.constant 0 : index
    %c0_0 = arith.constant 0 : index
    %c0_1 = arith.constant 0 : index
    %0 = vector.load %arg2[%c0, %c0_0, %c0_1] : memref<1x32x512xf32, #tpu.memory_space<vmem>>, vector<1x32x512xf32>
    %1 = vector.shape_cast %0 : vector<1x32x512xf32> to vector<32x512xf32>
    %c0_2 = arith.constant 0 : index
    %c0_3 = arith.constant 0 : index
    %2 = vector.load %arg3[%c0_2, %c0_3] : memref<1x32xf32, #tpu.memory_space<vmem>>, vector<1x32xf32>
    %3 = arith.truncf %2 : vector<1x32xf32> to vector<1x32xbf16>
    %4 = arith.truncf %1 : vector<32x512xf32> to vector<32x512xbf16>
    %cst = arith.constant dense<0.000000e+00> : vector<1x512xf32>
    %5 = tpu.matmul %3, %4, %cst {dimension_numbers = #tpu.dot_dimension_numbers<[1], [0], [0], [1], [0, 0, 1, 1], [], []>} : vector<1x32xbf16>, vector<32x512xbf16>, vector<1x512xf32> -> vector<1x512xf32>
    %c0_4 = arith.constant 0 : index
    %c0_5 = arith.constant 0 : index
    %6 = vector.load %arg4[%c0_4, %c0_5] : memref<1x1xf32, #tpu.memory_space<vmem>>, vector<1x1xf32>
    %7 = vector.broadcast %6 : vector<1x1xf32> to vector<1x512xf32>
    %8 = arith.addf %5, %7 : vector<1x512xf32>
    %c0_6 = arith.constant 0 : index
    %c0_7 = arith.constant 0 : index
    %c0_8 = arith.constant 0 : index
    %9 = vector.load %arg5[%c0_6, %c0_7, %c0_8] : memref<1x1x512xf32, #tpu.memory_space<vmem>>, vector<1x1x512xf32>
    %10 = vector.shape_cast %9 : vector<1x1x512xf32> to vector<1x512xf32>
    %11 = vector.shape_cast %8 : vector<1x512xf32> to vector<1x1x512xf32>
    tpu.vector_store %arg5[%c0_6, %c0_7, %c0_8], %11 {strides = array<i32>} : memref<1x1x512xf32, #tpu.memory_space<vmem>>, vector<1x1x512xf32>,
    %cst_9 = arith.constant dense<0.000000e+00> : vector<1xf32>
    %12 = vector.multi_reduction <add>, %8, %cst_9 [1] : vector<1x512xf32> to vector<1xf32>
    %13 = vector.shape_cast %12 : vector<1xf32> to vector<1x1xf32>
    %14 = arith.mulf %8, %8 : vector<1x512xf32>
    %cst_10 = arith.constant dense<0.000000e+00> : vector<1xf32>
    %15 = vector.multi_reduction <add>, %14, %cst_10 [1] : vector<1x512xf32> to vector<1xf32>
    %16 = vector.shape_cast %15 : vector<1xf32> to vector<1x1xf32>
    %c0_i32 = arith.constant 0 : i32
    %17 = arith.cmpi eq, %arg1, %c0_i32 : i32
    %18 = arith.extui %17 : i1 to i32
    %c0_i32_11 = arith.constant 0 : i32
    %19 = arith.cmpi ne, %18, %c0_i32_11 : i32
    scf.if %19 {
      %c0_14 = arith.constant 0 : index
      %c0_15 = arith.constant 0 : index
      %c0_16 = arith.constant 0 : index
      %23 = vector.load %arg6[%c0_14, %c0_15, %c0_16] : memref<1x1x1xf32, #tpu.memory_space<vmem>>, vector<1x1x1xf32>
      %24 = vector.shape_cast %23 : vector<1x1x1xf32> to vector<1x1xf32>
      %25 = vector.shape_cast %13 : vector<1x1xf32> to vector<1x1x1xf32>
      tpu.vector_store %arg6[%c0_14, %c0_15, %c0_16], %25 {strides = array<i32>} : memref<1x1x1xf32, #tpu.memory_space<vmem>>, vector<1x1x1xf32>,
      %c0_17 = arith.constant 0 : index
      %c0_18 = arith.constant 0 : index
      %c0_19 = arith.constant 0 : index
      %26 = vector.load %arg7[%c0_17, %c0_18, %c0_19] : memref<1x1x1xf32, #tpu.memory_space<vmem>>, vector<1x1x1xf32>
      %27 = vector.shape_cast %26 : vector<1x1x1xf32> to vector<1x1xf32>
      %28 = vector.shape_cast %16 : vector<1x1xf32> to vector<1x1x1xf32>
      tpu.vector_store %arg7[%c0_17, %c0_18, %c0_19], %28 {strides = array<i32>} : memref<1x1x1xf32, #tpu.memory_space<vmem>>, vector<1x1x1xf32>,
    } else {
    }
    %c0_i32_12 = arith.constant 0 : i32
    %20 = arith.cmpi sgt, %arg1, %c0_i32_12 : i32
    %21 = arith.extui %20 : i1 to i32
    %c0_i32_13 = arith.constant 0 : i32
    %22 = arith.cmpi ne, %21, %c0_i32_13 : i32
    scf.if %22 {
      %c0_14 = arith.constant 0 : index
      %c0_15 = arith.constant 0 : index
      %c0_16 = arith.constant 0 : index
      %23 = vector.load %arg6[%c0_14, %c0_15, %c0_16] : memref<1x1x1xf32, #tpu.memory_space<vmem>>, vector<1x1x1xf32>
      %24 = vector.shape_cast %23 : vector<1x1x1xf32> to vector<1x1xf32>
      %25 = arith.addf %24, %13 : vector<1x1xf32>
      %c0_17 = arith.constant 0 : index
      %c0_18 = arith.constant 0 : index
      %c0_19 = arith.constant 0 : index
      %26 = vector.load %arg6[%c0_17, %c0_18, %c0_19] : memref<1x1x1xf32, #tpu.memory_space<vmem>>, vector<1x1x1xf32>
      %27 = vector.shape_cast %26 : vector<1x1x1xf32> to vector<1x1xf32>
      %28 = vector.shape_cast %25 : vector<1x1xf32> to vector<1x1x1xf32>
      tpu.vector_store %arg6[%c0_17, %c0_18, %c0_19], %28 {strides = array<i32>} : memref<1x1x1xf32, #tpu.memory_space<vmem>>, vector<1x1x1xf32>,
      %c0_20 = arith.constant 0 : index
      %c0_21 = arith.constant 0 : index
      %c0_22 = arith.constant 0 : index
      %29 = vector.load %arg7[%c0_20, %c0_21, %c0_22] : memref<1x1x1xf32, #tpu.memory_space<vmem>>, vector<1x1x1xf32>
      %30 = vector.shape_cast %29 : vector<1x1x1xf32> to vector<1x1xf32>
      %31 = arith.addf %30, %16 : vector<1x1xf32>
      %c0_23 = arith.constant 0 : index
      %c0_24 = arith.constant 0 : index
      %c0_25 = arith.constant 0 : index
      %32 = vector.load %arg7[%c0_23, %c0_24, %c0_25] : memref<1x1x1xf32, #tpu.memory_space<vmem>>, vector<1x1x1xf32>
      %33 = vector.shape_cast %32 : vector<1x1x1xf32> to vector<1x1xf32>
      %34 = vector.shape_cast %31 : vector<1x1xf32> to vector<1x1x1xf32>
      tpu.vector_store %arg7[%c0_23, %c0_24, %c0_25], %34 {strides = array<i32>} : memref<1x1x1xf32, #tpu.memory_space<vmem>>, vector<1x1x1xf32>,
    } else {
    }
    return
  }
  func.func @transform_0(%arg0: i32, %arg1: i32) -> (i32, i32, i32) {
    %c0_i32 = arith.constant 0 : i32
    %c0_i32_0 = arith.constant 0 : i32
    return %arg0, %c0_i32, %arg1 : i32, i32, i32
  }
  func.func @transform_1(%arg0: i32, %arg1: i32) -> (i32, i32) {
    %c0_i32 = arith.constant 0 : i32
    %c0_i32_0 = arith.constant 0 : i32
    %c0_i32_1 = arith.constant 0 : i32
    return %c0_i32, %c0_i32_0 : i32, i32
  }
  func.func @transform_2(%arg0: i32, %arg1: i32) -> (i32, i32) {
    %c0_i32 = arith.constant 0 : i32
    %c0_i32_0 = arith.constant 0 : i32
    %c0_i32_1 = arith.constant 0 : i32
    return %c0_i32, %c0_i32_0 : i32, i32
  }
  func.func @transform_3(%arg0: i32, %arg1: i32) -> (i32, i32, i32) {
    %c0_i32 = arith.constant 0 : i32
    %c0_i32_0 = arith.constant 0 : i32
    return %arg0, %c0_i32, %arg1 : i32, i32, i32
  }
  func.func @transform_4(%arg0: i32, %arg1: i32) -> (i32, i32, i32) {
    %c0_i32 = arith.constant 0 : i32
    %c0_i32_0 = arith.constant 0 : i32
    %c0_i32_1 = arith.constant 0 : i32
    return %arg0, %c0_i32, %c0_i32_0 : i32, i32, i32
  }
  func.func @transform_5(%arg0: i32, %arg1: i32) -> (i32, i32, i32) {
    %c0_i32 = arith.constant 0 : i32
    %c0_i32_0 = arith.constant 0 : i32
    %c0_i32_1 = arith.constant 0 : i32
    return %arg0, %c0_i32, %c0_i32_0 : i32, i32, i32
  }
}

module attributes {stable_mosaic.version = 11 : i64} {
  func.func @_stage_kernel(%arg0: i32, %arg1: i32, %arg2: memref<1x32x512xf32, #tpu.memory_space<vmem>>, %arg3: memref<1x32x1xf32, #tpu.memory_space<vmem>>, %arg4: memref<1x32x1xf32, #tpu.memory_space<vmem>>, %arg5: memref<32x32xf32, #tpu.memory_space<vmem>>, %arg6: memref<32x1xf32, #tpu.memory_space<vmem>>, %arg7: memref<1x32x512xf32, #tpu.memory_space<vmem>>, %arg8: memref<1x32x512xf32, #tpu.memory_space<vmem>>, %arg9: memref<1x32x1xf32, #tpu.memory_space<vmem>>, %arg10: memref<1x32x1xf32, #tpu.memory_space<vmem>>) attributes {dimension_semantics = [#tpu.dimension_semantics<parallel>, #tpu.dimension_semantics<arbitrary>], iteration_bounds = array<i64: 2, 2>, scalar_prefetch = 0 : i64, scratch_operands = 0 : i64, tpu.core_type = #tpu.core_type<tc>, window_params = [{transform_indices = @transform_0, window_bounds = array<i64: 1, 32, 512>}, {transform_indices = @transform_1, window_bounds = array<i64: 1, 32, 1>}, {transform_indices = @transform_2, window_bounds = array<i64: 1, 32, 1>}, {pipeline_mode = #tpu.pipeline_mode<synchronous>, transform_indices = @transform_3, window_bounds = array<i64: 32, 32>}, {pipeline_mode = #tpu.pipeline_mode<synchronous>, transform_indices = @transform_4, window_bounds = array<i64: 32, 1>}, {transform_indices = @transform_5, window_bounds = array<i64: 1, 32, 512>}, {transform_indices = @transform_6, window_bounds = array<i64: 1, 32, 512>}, {transform_indices = @transform_7, window_bounds = array<i64: 1, 32, 1>}, {transform_indices = @transform_8, window_bounds = array<i64: 1, 32, 1>}]} {
    %c0 = arith.constant 0 : index
    %c0_0 = arith.constant 0 : index
    %c0_1 = arith.constant 0 : index
    %0 = vector.load %arg2[%c0, %c0_0, %c0_1] : memref<1x32x512xf32, #tpu.memory_space<vmem>>, vector<1x32x512xf32>
    %1 = vector.shape_cast %0 : vector<1x32x512xf32> to vector<32x512xf32>
    %c0_2 = arith.constant 0 : index
    %c0_3 = arith.constant 0 : index
    %c0_4 = arith.constant 0 : index
    %2 = vector.load %arg3[%c0_2, %c0_3, %c0_4] : memref<1x32x1xf32, #tpu.memory_space<vmem>>, vector<1x32x1xf32>
    %3 = vector.shape_cast %2 : vector<1x32x1xf32> to vector<32x1xf32>
    %4 = vector.broadcast %3 : vector<32x1xf32> to vector<32x512xf32>
    %5 = arith.mulf %1, %4 : vector<32x512xf32>
    %c0_5 = arith.constant 0 : index
    %c0_6 = arith.constant 0 : index
    %c0_7 = arith.constant 0 : index
    %6 = vector.load %arg4[%c0_5, %c0_6, %c0_7] : memref<1x32x1xf32, #tpu.memory_space<vmem>>, vector<1x32x1xf32>
    %7 = vector.shape_cast %6 : vector<1x32x1xf32> to vector<32x1xf32>
    %8 = vector.broadcast %7 : vector<32x1xf32> to vector<32x512xf32>
    %9 = arith.addf %5, %8 : vector<32x512xf32>
    %cst = arith.constant 0.000000e+00 : f32
    %10 = vector.broadcast %cst : f32 to vector<32x512xf32>
    %11 = arith.maximumf %9, %10 : vector<32x512xf32>
    %c0_8 = arith.constant 0 : index
    %c0_9 = arith.constant 0 : index
    %12 = vector.load %arg5[%c0_8, %c0_9] : memref<32x32xf32, #tpu.memory_space<vmem>>, vector<32x32xf32>
    %13 = arith.truncf %12 : vector<32x32xf32> to vector<32x32xbf16>
    %14 = arith.truncf %11 : vector<32x512xf32> to vector<32x512xbf16>
    %cst_10 = arith.constant dense<0.000000e+00> : vector<32x512xf32>
    %15 = tpu.matmul %13, %14, %cst_10 {dimension_numbers = #tpu.dot_dimension_numbers<[1], [0], [0], [1], [0, 0, 1, 1], [], []>} : vector<32x32xbf16>, vector<32x512xbf16>, vector<32x512xf32> -> vector<32x512xf32>
    %c0_11 = arith.constant 0 : index
    %c0_12 = arith.constant 0 : index
    %16 = vector.load %arg6[%c0_11, %c0_12] : memref<32x1xf32, #tpu.memory_space<vmem>>, vector<32x1xf32>
    %17 = vector.broadcast %16 : vector<32x1xf32> to vector<32x512xf32>
    %18 = arith.addf %15, %17 : vector<32x512xf32>
    %c0_13 = arith.constant 0 : index
    %c0_14 = arith.constant 0 : index
    %c0_15 = arith.constant 0 : index
    %19 = vector.load %arg7[%c0_13, %c0_14, %c0_15] : memref<1x32x512xf32, #tpu.memory_space<vmem>>, vector<1x32x512xf32>
    %20 = vector.shape_cast %19 : vector<1x32x512xf32> to vector<32x512xf32>
    %21 = arith.addf %18, %20 : vector<32x512xf32>
    %c0_16 = arith.constant 0 : index
    %c0_17 = arith.constant 0 : index
    %c0_18 = arith.constant 0 : index
    %22 = vector.load %arg8[%c0_16, %c0_17, %c0_18] : memref<1x32x512xf32, #tpu.memory_space<vmem>>, vector<1x32x512xf32>
    %23 = vector.shape_cast %22 : vector<1x32x512xf32> to vector<32x512xf32>
    %24 = vector.shape_cast %21 : vector<32x512xf32> to vector<1x32x512xf32>
    tpu.vector_store %arg8[%c0_16, %c0_17, %c0_18], %24 {strides = array<i32>} : memref<1x32x512xf32, #tpu.memory_space<vmem>>, vector<1x32x512xf32>,
    %cst_19 = arith.constant dense<0.000000e+00> : vector<32xf32>
    %25 = vector.multi_reduction <add>, %21, %cst_19 [1] : vector<32x512xf32> to vector<32xf32>
    %26 = vector.shape_cast %25 : vector<32xf32> to vector<32x1xf32>
    %27 = arith.mulf %21, %21 : vector<32x512xf32>
    %cst_20 = arith.constant dense<0.000000e+00> : vector<32xf32>
    %28 = vector.multi_reduction <add>, %27, %cst_20 [1] : vector<32x512xf32> to vector<32xf32>
    %29 = vector.shape_cast %28 : vector<32xf32> to vector<32x1xf32>
    %c0_i32 = arith.constant 0 : i32
    %30 = arith.cmpi eq, %arg1, %c0_i32 : i32
    %31 = arith.extui %30 : i1 to i32
    %c0_i32_21 = arith.constant 0 : i32
    %32 = arith.cmpi ne, %31, %c0_i32_21 : i32
    scf.if %32 {
      %c0_24 = arith.constant 0 : index
      %c0_25 = arith.constant 0 : index
      %c0_26 = arith.constant 0 : index
      %36 = vector.load %arg9[%c0_24, %c0_25, %c0_26] : memref<1x32x1xf32, #tpu.memory_space<vmem>>, vector<1x32x1xf32>
      %37 = vector.shape_cast %36 : vector<1x32x1xf32> to vector<32x1xf32>
      %38 = vector.shape_cast %26 : vector<32x1xf32> to vector<1x32x1xf32>
      tpu.vector_store %arg9[%c0_24, %c0_25, %c0_26], %38 {strides = array<i32>} : memref<1x32x1xf32, #tpu.memory_space<vmem>>, vector<1x32x1xf32>,
      %c0_27 = arith.constant 0 : index
      %c0_28 = arith.constant 0 : index
      %c0_29 = arith.constant 0 : index
      %39 = vector.load %arg10[%c0_27, %c0_28, %c0_29] : memref<1x32x1xf32, #tpu.memory_space<vmem>>, vector<1x32x1xf32>
      %40 = vector.shape_cast %39 : vector<1x32x1xf32> to vector<32x1xf32>
      %41 = vector.shape_cast %29 : vector<32x1xf32> to vector<1x32x1xf32>
      tpu.vector_store %arg10[%c0_27, %c0_28, %c0_29], %41 {strides = array<i32>} : memref<1x32x1xf32, #tpu.memory_space<vmem>>, vector<1x32x1xf32>,
    } else {
    }
    %c0_i32_22 = arith.constant 0 : i32
    %33 = arith.cmpi sgt, %arg1, %c0_i32_22 : i32
    %34 = arith.extui %33 : i1 to i32
    %c0_i32_23 = arith.constant 0 : i32
    %35 = arith.cmpi ne, %34, %c0_i32_23 : i32
    scf.if %35 {
      %c0_24 = arith.constant 0 : index
      %c0_25 = arith.constant 0 : index
      %c0_26 = arith.constant 0 : index
      %36 = vector.load %arg9[%c0_24, %c0_25, %c0_26] : memref<1x32x1xf32, #tpu.memory_space<vmem>>, vector<1x32x1xf32>
      %37 = vector.shape_cast %36 : vector<1x32x1xf32> to vector<32x1xf32>
      %38 = arith.addf %37, %26 : vector<32x1xf32>
      %c0_27 = arith.constant 0 : index
      %c0_28 = arith.constant 0 : index
      %c0_29 = arith.constant 0 : index
      %39 = vector.load %arg9[%c0_27, %c0_28, %c0_29] : memref<1x32x1xf32, #tpu.memory_space<vmem>>, vector<1x32x1xf32>
      %40 = vector.shape_cast %39 : vector<1x32x1xf32> to vector<32x1xf32>
      %41 = vector.shape_cast %38 : vector<32x1xf32> to vector<1x32x1xf32>
      tpu.vector_store %arg9[%c0_27, %c0_28, %c0_29], %41 {strides = array<i32>} : memref<1x32x1xf32, #tpu.memory_space<vmem>>, vector<1x32x1xf32>,
      %c0_30 = arith.constant 0 : index
      %c0_31 = arith.constant 0 : index
      %c0_32 = arith.constant 0 : index
      %42 = vector.load %arg10[%c0_30, %c0_31, %c0_32] : memref<1x32x1xf32, #tpu.memory_space<vmem>>, vector<1x32x1xf32>
      %43 = vector.shape_cast %42 : vector<1x32x1xf32> to vector<32x1xf32>
      %44 = arith.addf %43, %29 : vector<32x1xf32>
      %c0_33 = arith.constant 0 : index
      %c0_34 = arith.constant 0 : index
      %c0_35 = arith.constant 0 : index
      %45 = vector.load %arg10[%c0_33, %c0_34, %c0_35] : memref<1x32x1xf32, #tpu.memory_space<vmem>>, vector<1x32x1xf32>
      %46 = vector.shape_cast %45 : vector<1x32x1xf32> to vector<32x1xf32>
      %47 = vector.shape_cast %44 : vector<32x1xf32> to vector<1x32x1xf32>
      tpu.vector_store %arg10[%c0_33, %c0_34, %c0_35], %47 {strides = array<i32>} : memref<1x32x1xf32, #tpu.memory_space<vmem>>, vector<1x32x1xf32>,
    } else {
    }
    return
  }
  func.func @transform_0(%arg0: i32, %arg1: i32) -> (i32, i32, i32) {
    %c0_i32 = arith.constant 0 : i32
    %c0_i32_0 = arith.constant 0 : i32
    return %arg0, %c0_i32, %arg1 : i32, i32, i32
  }
  func.func @transform_1(%arg0: i32, %arg1: i32) -> (i32, i32, i32) {
    %c0_i32 = arith.constant 0 : i32
    %c0_i32_0 = arith.constant 0 : i32
    %c0_i32_1 = arith.constant 0 : i32
    return %arg0, %c0_i32, %c0_i32_0 : i32, i32, i32
  }
  func.func @transform_2(%arg0: i32, %arg1: i32) -> (i32, i32, i32) {
    %c0_i32 = arith.constant 0 : i32
    %c0_i32_0 = arith.constant 0 : i32
    %c0_i32_1 = arith.constant 0 : i32
    return %arg0, %c0_i32, %c0_i32_0 : i32, i32, i32
  }
  func.func @transform_3(%arg0: i32, %arg1: i32) -> (i32, i32) {
    %c0_i32 = arith.constant 0 : i32
    %c0_i32_0 = arith.constant 0 : i32
    %c0_i32_1 = arith.constant 0 : i32
    return %c0_i32, %c0_i32_0 : i32, i32
  }
  func.func @transform_4(%arg0: i32, %arg1: i32) -> (i32, i32) {
    %c0_i32 = arith.constant 0 : i32
    %c0_i32_0 = arith.constant 0 : i32
    %c0_i32_1 = arith.constant 0 : i32
    return %c0_i32, %c0_i32_0 : i32, i32
  }
  func.func @transform_5(%arg0: i32, %arg1: i32) -> (i32, i32, i32) {
    %c0_i32 = arith.constant 0 : i32
    %c0_i32_0 = arith.constant 0 : i32
    return %arg0, %c0_i32, %arg1 : i32, i32, i32
  }
  func.func @transform_6(%arg0: i32, %arg1: i32) -> (i32, i32, i32) {
    %c0_i32 = arith.constant 0 : i32
    %c0_i32_0 = arith.constant 0 : i32
    return %arg0, %c0_i32, %arg1 : i32, i32, i32
  }
  func.func @transform_7(%arg0: i32, %arg1: i32) -> (i32, i32, i32) {
    %c0_i32 = arith.constant 0 : i32
    %c0_i32_0 = arith.constant 0 : i32
    %c0_i32_1 = arith.constant 0 : i32
    return %arg0, %c0_i32, %c0_i32_0 : i32, i32, i32
  }
  func.func @transform_8(%arg0: i32, %arg1: i32) -> (i32, i32, i32) {
    %c0_i32 = arith.constant 0 : i32
    %c0_i32_0 = arith.constant 0 : i32
    %c0_i32_1 = arith.constant 0 : i32
    return %arg0, %c0_i32, %c0_i32_0 : i32, i32, i32
  }
}

</mosaic_0001>

<bundles_post_ra>
// kernel: oanblock_forward.14
= control target key start
LH: loop header
LB: loop body
LE: loop exit
PB: predicated region body
PF: predicated region fallthrough
CT: control target
= control target key end

     0   :  { %s931_s18 = smov 0   ;;  %s933_s19 = smov 0   ;;  %s1131_s0 = inlined_call_operand.vmem [shape: f32[2,4,1024], index: 0, kind: input, shape index: {}]   ;;  %s1132_s1 = inlined_call_operand.vmem [shape: f32[32,4], index: 1, kind: input, shape index: {}]   ;;  %s1133_s2 = inlined_call_operand.vmem [shape: f32[32,1], index: 2, kind: input, shape index: {}]   ;;  %s1134_s3 = inlined_call_operand.vmem [shape: f32[2,32,1024], index: 3, kind: output, shape index: {0}]   ;;  %s1135_s4 = inlined_call_operand.vmem [shape: f32[2,32,1], index: 4, kind: output, shape index: {1}]   ;;  %s1136_s5 = inlined_call_operand.vmem [shape: f32[2,32,1], index: 5, kind: output, shape index: {2}]  }
   0x1   :  { %s935_s20 = smov 0   ;;  %s937_s21 = smov 0  }
   0x2   :  { %s939_s22 = smov 0   ;;  %s941_s23 = smov 0  }
   0x3   :  { %s943_s24 = smov 0  }
   0x4 LB: > { %1141 = sst [smem:[#allocation3_spill]] %s890_s22  ;;  %s25_s25 = sadd.s32 1, %s890_s22  ;;  %s898_s24 = sphi %s943_s24, %s16_s24   ;;  %s894_s23 = sphi %s941_s23, %s1149_s23   ;;  %s890_s22 = sphi %s939_s22, %s1148_s22   ;;  %s886_s21 = sphi %s937_s21, %s1147_s21   ;;  %s882_s20 = sphi %s935_s20, %s1146_s20   ;;  %s878_s19 = sphi %s933_s19, %s1151_s19   ;;  %s874_s18 = sphi %s931_s18, %s1150_s18  }
   0x5   : > { %1142 = sst [smem:[#allocation4_spill]] %s894_s23  ;;  %p26_p0 = scmp.ge.s32.totalorder %s25_s25, 2 }
   0x6   : > { %s28_s26 = sadd.s32 1, %s894_s23  ;;  %s754_s27 = sadd.s32 4294967295, %s898_s24  }
   0x7   : > { %p117_p1 = scmp.ne.s32.totalorder %s878_s19, %s874_s18  ;;  %s1153_s25 = smov (%p26_p0, %s25_s25), 0 }
   0x8   : > { %1143 = sst [smem:[#allocation5_spill]] %s1153_s25  ;;  %s1155_s26 = smov (!%p26_p0, %s28_s26), %s894_s23 }
   0x9   : > { %s103_s28 = ssub.s32 %s890_s22, %s1153_s25  ;;  %p118_p2 = scmp.eq.s32.totalorder %s754_s27, 3 }
   0xa   : > { %p30_p3 = scmp.ge.s32.totalorder %s1155_s26, 2  ;;  %p758_p4 = scmp.ge.s32.totalorder %s898_s24, 1 }
   0xb   : > { %p977_p5 = por %p118_p2, %p117_p1  ;;  %p213_p6 = scmp.lt.s32.totalorder %s898_s24, 5 }
   0xc   : > { %s1157_s26 = smov (%p30_p3, %s1155_s26), 0  ;;  %s107_s7 = sadd.s32 1, %s878_s19 }
   0xd   : > { %1145 = sst [smem:[#allocation6_spill]] %s1157_s26  ;;  %p214_p7 = pnand %p758_p4, %p213_p6 }
   0xe   : > { %s102_s30 = ssub.s32 %s894_s23, %s1157_s26  ;;  %s991_s9 = sshll.u32 (!%p214_p7), %s882_s20, 2  ;;  %v900_v0 = vmov (!%p214_p7), 0   ;;  %v294_v1 = vld [vmem:[%s1133_s2] sm:$0xff] (!%p214_p7)  ;;  %v296_v2 = vld [vmem:[%s1133_s2 + $0x10] sm:$0xff] (!%p214_p7)  ;;  %v295_v3 = vld [vmem:[%s1133_s2 + $0x8] sm:$0xff] (!%p214_p7)  ;;  %vm325_vm0 = vcmask (!%p214_p7), 1041408  }
   0xf   : > { %s104_s6 = sor.u32 %s103_s28, %s102_s30  ;;  %217 = sbr.rel (%p214_p7) target bundleno = 440 (0x1b8), region = 32  ;;  %370 = vmatprep.mubr.bf16.mxu0 (!%p214_p7), %v900_v0  ;;  %423 = vmatprep.mubr.bf16.mxu1 (!%p214_p7), %v900_v0  ;;  %v297_v4 = vld [vmem:[%s1133_s2 + $0x18] sm:$0xff] (!%p214_p7)  ;;  %v278_v11 = vld [vmem:[%s1132_s1] sm:$0xff] (!%p214_p7)  ;;  %v279_v12 = vld [vmem:[%s1132_s1 + $0x8] sm:$0xff] (!%p214_p7)  ;;  %vm318_vm1 = vcmask (!%p214_p7), 31744  }
  0x10   : > { %p105_p8 = scmp.eq.s32.totalorder %s104_s6, 0  ;;  %p255_p9 = scmp.lt.s32.totalorder (!%p214_p7), %s886_s21, 1  ;;  %840 = vset.pattern.permute.xlu0 (!%p214_p7), %v900_v0  ;;  %841 = vset.pattern.permute.xlu1 (!%p214_p7), %v900_v0  ;;  %v282_v17 = vpack.c.bf16 (!%p214_p7), %v279_v12, %v278_v11  ;;  %v280_v18 = vld [vmem:[%s1132_s1 + $0x10] sm:$0xff] (!%p214_p7)  ;;  %v281_v19 = vld [vmem:[%s1132_s1 + $0x18] sm:$0xff] (!%p214_p7) }
  0x11   : > { %p257_p10 = scmp.lt.s32.totalorder (!%p214_p7), %s991_s9, 7  ;;  %300 = vperm.xlu0 (!%p214_p7), %840, %v294_v1   ;;  %310 = vperm.xlu1 (!%p214_p7), %841, %v296_v2   ;;  %v283_v20 = vpack.c.bf16 (!%p214_p7), %v281_v19, %v280_v18  ;;  %p773_p11 = scmp.ne.s32.totalorder (!%p214_p7), %s882_s20, 0 }
  0x12   : > { %s988_s8 = scalar_select %p105_p8, %s878_s19, %s107_s7  }
  0x15   : > { %305 = vperm.xlu0 (!%p214_p7), %840, %v295_v3   ;;  %315 = vperm.xlu1 (!%p214_p7), %841, %v297_v4  }
  0x16   : > { %s256_s12 = scalar_select %p255_p9, %s886_s21, 1 }
  0x17   : > { %s258_s15 = scalar_select %p257_p10, %s991_s9, 7 }
  0x18   : > { %s761_s16 = sshll.u32 %s256_s12, 3  ;;  %s781_s17 = sshll.u32 %s256_s12, 5  ;;  %vm520_vm2 = vcmask (!%p773_p11), 7168  }
  0x19   : > { %s260_s7 = sadd.s32 %s761_s16, %s258_s15  ;;  %s1012_s26 = scalar_lea.vmem %s1135_s4, %s781_s17 }
  0x1a   : > { %s762_s13 = sshll.u32 %s260_s7, 2  ;;  %s1017_s23 = scalar_lea.vmem %s1136_s5, %s781_s17 }
  0x1b   : > { %s262_s27 = scalar_lea.vmem %s1131_s0, %s762_s13  ;;  %s237_s7 = sand.u32 1, %s874_s18  }
  0x1c   : > { %v276_v5 = vld [vmem:[%s262_s27] sm:$0xff]  ;;  %v277_v6 = vld [vmem:[%s262_s27 + $0x8] sm:$0xff]  ;;  %s759_s10 = sshll.u32 %s237_s7, 7 }
  0x1d   : > { %v286_v7 = vcombine.high %v276_v5, %v276_v5  ;;  %v287_v8 = vcombine.high %v277_v6, %v277_v6  ;;  %v290_v9 = vpack.c.bf16 %v276_v5, %v276_v5  ;;  %v292_v10 = vpack.c.bf16 %v277_v6, %v277_v6  ;;  %s1035_s11 = scalar_lea.vmem [#allocation2], %s759_s10 }
  0x1f   : > { %v291_v13 = vpack.c.bf16 %v286_v7, %v286_v7  ;;  %v293_v14 = vpack.c.bf16 %v287_v8, %v287_v8  ;;  %v327_v15 = vsel %vm325_vm0, %v290_v9, 0  ;;  %v333_v16 = vsel %vm325_vm0, %v292_v10, 0 }
  0x21   : > { %767 = vmatprep.subr.msk.bf16.mxu0 %vm325_vm0, %v291_v13  ;;  %770 = vmatprep.subr.msk.bf16.mxu1 %vm325_vm0, %v293_v14 }
  0x22   : > { %339 = vmatpush1.bf16.msra.mxu0 %v327_v15  ;;  %392 = vmatpush1.bf16.msra.mxu1 %v333_v16 }
  0x25   : > { %768 = vmatmul.mubr.msk.bf16.vlgmr.msra.gmra.mrb[0].mxu0 %vm318_vm1, %v282_v17  ;;  %771 = vmatmul.mubr.msk.bf16.vlgmr.msra.gmra.mrb[0].mxu1 %vm318_vm1, %v282_v17 }
  0x26   : > { %380 = vmatprep.mubr.bf16.mxu0 %v900_v0  ;;  %433 = vmatprep.mubr.bf16.mxu1 %v900_v0 }
  0x2d   : > { %769 = vmatmul.mubr.msk.bf16.gmra.mrb[4].mxu0 %vm318_vm1, %v283_v20  ;;  %772 = vmatmul.mubr.msk.bf16.gmra.mrb[4].mxu1 %vm318_vm1, %v283_v20 }
  0x90   : > { %v301_v21 = vpop.permute.xlu0 %300  ;;  %v311_v23 = vpop.permute.xlu1 %310 }
  0x94   : > { %v306_v22 = vpop.permute.xlu0 %305  ;;  %v316_v48 = vpop.permute.xlu1 %315 }
  0xf8   : > { %v372_v24 = vpop.f32.mrb[0].mxu0  ;;  %v425_v25 = vpop.f32.mrb[0].mxu1 }
  0xf9   : > { %v373_v26 = vadd.f32 %v372_v24, %v301_v21  ;;  %v426_v27 = vadd.f32 %v425_v25, %v301_v21  ;;  %v374_v28 = vpop.f32.mrb[1].mxu0  ;;  %v427_v29 = vpop.f32.mrb[1].mxu1 }
  0xfa   : > { %v375_v30 = vadd.f32 %v374_v28, %v301_v21  ;;  %v428_v31 = vadd.f32 %v427_v29, %v301_v21  ;;  %v376_v32 = vpop.f32.mrb[2].mxu0  ;;  %v429_v33 = vpop.f32.mrb[2].mxu1 }
  0xfb   : > { %444 = vst [vmem:[%s1035_s11] sm:$0xff] %v373_v26  ;;  %v480_v34 = vmul.f32 %v373_v26, %v373_v26  ;;  %446 = vst [vmem:[%s1035_s11 + $0x10] sm:$0xff] %v426_v27  ;;  %v377_v35 = vadd.f32 %v376_v32, %v306_v22  ;;  %v430_v36 = vadd.f32 %v429_v33, %v306_v22  ;;  %v378_v37 = vpop.f32.mrb[3].mxu0  ;;  %v431_v38 = vpop.f32.mrb[3].mxu1 }
  0xfc   : > { %445 = vst [vmem:[%s1035_s11 + $0x8] sm:$0xff] %v375_v30  ;;  %v460_v39 = vadd.f32 %v375_v30, %v373_v26  ;;  %v481_v40 = vmul.f32 %v375_v30, %v375_v30  ;;  %447 = vst [vmem:[%s1035_s11 + $0x18] sm:$0xff] %v428_v31  ;;  %v379_v41 = vadd.f32 %v378_v37, %v306_v22 }
  0xfd   : > { %v432_v42 = vadd.f32 %v431_v38, %v306_v22  ;;  %448 = vst [vmem:[%s1035_s11 + $0x20] sm:$0xff] %v377_v35  ;;  %v484_v43 = vmul.f32 %v377_v35, %v377_v35  ;;  %450 = vst [vmem:[%s1035_s11 + $0x30] sm:$0xff] %v430_v36  ;;  %v482_v47 = vmul.f32 %v426_v27, %v426_v27 }
  0xfe   : > { %449 = vst [vmem:[%s1035_s11 + $0x28] sm:$0xff] %v379_v41  ;;  %v465_v44 = vadd.f32 %v379_v41, %v377_v35  ;;  %v485_v45 = vmul.f32 %v379_v41, %v379_v41  ;;  %v461_v46 = vadd.f32 %v460_v39, %v426_v27  ;;  %v496_v49 = vadd.f32 %v481_v40, %v480_v34 }
  0xff   : > { %451 = vst [vmem:[%s1035_s11 + $0x38] sm:$0xff] %v432_v42  ;;  %v486_v50 = vmul.f32 %v430_v36, %v430_v36  ;;  %v483_v60 = vmul.f32 %v428_v31, %v428_v31  ;;  %v487_v9 = vmul.f32 %v432_v42, %v432_v42 }
 0x100   : > { %v382_v51 = vpop.f32.mrb[4].mxu0  ;;  %v435_v52 = vpop.f32.mrb[4].mxu1  ;;  %v462_v53 = vadd.f32 %v461_v46, %v428_v31  ;;  %v466_v54 = vadd.f32 %v465_v44, %v430_v36  ;;  %v501_v55 = vadd.f32 %v485_v45, %v484_v43  ;;  %v497_v61 = vadd.f32 %v496_v49, %v482_v47 }
 0x101   : > { %v383_v56 = vadd.f32 %v382_v51, %v311_v23  ;;  %v436_v57 = vadd.f32 %v435_v52, %v311_v23  ;;  %v384_v58 = vpop.f32.mrb[5].mxu0  ;;  %v437_v59 = vpop.f32.mrb[5].mxu1 }
 0x102   : > { %v385_v62 = vadd.f32 %v384_v58, %v311_v23  ;;  %v438_v63 = vadd.f32 %v437_v59, %v311_v23  ;;  %v386_v0 = vpop.f32.mrb[6].mxu0  ;;  %v439_v1 = vpop.f32.mrb[6].mxu1  ;;  %463 = vadd.xlane.f32.xlu0 %v462_v53  ;;  %v467_v2 = vadd.f32 %v466_v54, %v432_v42  ;;  %v502_v3 = vadd.f32 %v501_v55, %v486_v50 }
 0x103   : > { %452 = vst [vmem:[%s1035_s11 + $0x40] sm:$0xff] %v383_v56  ;;  %v488_v4 = vmul.f32 %v383_v56, %v383_v56  ;;  %454 = vst [vmem:[%s1035_s11 + $0x50] sm:$0xff] %v436_v57  ;;  %v387_v5 = vadd.f32 %v386_v0, %v316_v48  ;;  %v440_v6 = vadd.f32 %v439_v1, %v316_v48  ;;  %v388_v7 = vpop.f32.mrb[7].mxu0  ;;  %v441_v8 = vpop.f32.mrb[7].mxu1 }
 0x104   : > { %453 = vst [vmem:[%s1035_s11 + $0x48] sm:$0xff] %v385_v62  ;;  %v470_v10 = vadd.f32 %v385_v62, %v383_v56  ;;  %v489_v11 = vmul.f32 %v385_v62, %v385_v62  ;;  %455 = vst [vmem:[%s1035_s11 + $0x58] sm:$0xff] %v438_v63  ;;  %v389_v12 = vadd.f32 %v388_v7, %v316_v48  ;;  %468 = vadd.xlane.f32.xlu1 %v467_v2 }
 0x105   : > { %v442_v13 = vadd.f32 %v441_v8, %v316_v48  ;;  %456 = vst [vmem:[%s1035_s11 + $0x60] sm:$0xff] %v387_v5  ;;  %v492_v14 = vmul.f32 %v387_v5, %v387_v5  ;;  %458 = vst [vmem:[%s1035_s11 + $0x70] sm:$0xff] %v440_v6  ;;  %v503_v15 = vadd.f32 %v502_v3, %v487_v9 }
 0x106   : > { %v498_v16 = vadd.f32 %v497_v61, %v483_v60  ;;  %457 = vst [vmem:[%s1035_s11 + $0x68] sm:$0xff] %v389_v12  ;;  %v475_v17 = vadd.f32 %v389_v12, %v387_v5  ;;  %v493_v18 = vmul.f32 %v389_v12, %v389_v12  ;;  %v471_v19 = vadd.f32 %v470_v10, %v436_v57 }
 0x107   : > { %459 = vst [vmem:[%s1035_s11 + $0x78] sm:$0xff] %v442_v13  ;;  %v490_v20 = vmul.f32 %v436_v57, %v436_v57  ;;  %504 = vadd.xlane.f32.xlu0 %v503_v15  ;;  %v506_v21 = vadd.f32 %v489_v11, %v488_v4  ;;  %v494_v22 = vmul.f32 %v440_v6, %v440_v6 }
 0x108   : > { %499 = vadd.xlane.f32.xlu1 %v498_v16  ;;  %v472_v23 = vadd.f32 %v471_v19, %v438_v63  ;;  %v476_v24 = vadd.f32 %v475_v17, %v440_v6  ;;  %v511_v25 = vadd.f32 %v493_v18, %v492_v14  ;;  %v491_v26 = vmul.f32 %v438_v63, %v438_v63 }
 0x109   : > { %v507_v27 = vadd.f32 %v506_v21, %v490_v20  ;;  %v495_v29 = vmul.f32 %v442_v13, %v442_v13 }
 0x10a   : > { %v477_v28 = vadd.f32 %v476_v24, %v442_v13  ;;  %v512_v30 = vadd.f32 %v511_v25, %v494_v22 }
 0x10b   : > { %473 = vadd.xlane.f32.xlu0 %v472_v23  ;;  %v508_v31 = vadd.f32 %v507_v27, %v491_v26 }
 0x10c   : > { %v513_v32 = vadd.f32 %v512_v30, %v495_v29 }
 0x10d   : > { %509 = vadd.xlane.f32.xlu1 %v508_v31 }
 0x10f   : > { %478 = vadd.xlane.f32.xlu0 %v477_v28 }
 0x113   : > { %514 = vadd.xlane.f32.xlu0 %v513_v32 }
 0x18f   : > { %v464_v33 = vpop.xlane.xlu0 %463 }
 0x190   : > { %521 = vst.msk [vmem:[%s1012_s26] sm:$0xff] (!%p773_p11), %vm520_vm2, %v464_v33 }
 0x191   : > { %v469_v34 = vpop.xlane.xlu1 %468 }
 0x192   : > { %522 = vst.msk [vmem:[%s1012_s26 + $0x8] sm:$0xff] (!%p773_p11), %vm520_vm2, %v469_v34 }
 0x194   : > { %v505_v35 = vpop.xlane.xlu0 %504 }
 0x195   : > { %v500_v36 = vpop.xlane.xlu1 %499  ;;  %526 = vst.msk [vmem:[%s1017_s23 + $0x8] sm:$0xff] (!%p773_p11), %vm520_vm2, %v505_v35 }
 0x196   : > { %525 = vst.msk [vmem:[%s1017_s23] sm:$0xff] (!%p773_p11), %vm520_vm2, %v500_v36 }
 0x198   : > { %v474_v37 = vpop.xlane.xlu0 %473 }
 0x199   : > { %523 = vst.msk [vmem:[%s1012_s26 + $0x10] sm:$0xff] (!%p773_p11), %vm520_vm2, %v474_v37 }
 0x19a   : > { %v510_v38 = vpop.xlane.xlu1 %509  ;;  %519 = sbr.rel (%p773_p11) target bundleno = 418 (0x1a2), region = 36 }
 0x19b   : > { %527 = vst.msk [vmem:[%s1017_s23 + $0x10] sm:$0xff] (!%p773_p11), %vm520_vm2, %v510_v38 }
 0x19c   : > { %v479_v39 = vpop.xlane.xlu0 %478 }
 0x19d   : > { %524 = vst.msk [vmem:[%s1012_s26 + $0x18] sm:$0xff] (!%p773_p11), %vm520_vm2, %v479_v39 }
 0x1a0   : > { %v515_v40 = vpop.xlane.xlu0 %514 }
 0x1a1   : > { %528 = vst.msk [vmem:[%s1017_s23 + $0x18] sm:$0xff] %vm520_vm2, %v515_v40 }
 0x1a2 PF: > { %p774_p12 = scmp.le.s32.totalorder %s882_s20, 0 }
 0x1a3   : > { %v533_v41 = vld [vmem:[%s1012_s26] sm:$0xff] (!%p774_p12)  ;;  %vm541_vm3 = vcmask (!%p774_p12), 7168   ;;  %v534_v42 = vld [vmem:[%s1012_s26 + $0x8] sm:$0xff] (!%p774_p12)  ;;  %v535_v43 = vld [vmem:[%s1012_s26 + $0x10] sm:$0xff] (!%p774_p12) }
 0x1a4   : > { %532 = sbr.rel (%p774_p12) target bundleno = 428 (0x1ac), region = 40  ;;  %v537_v44 = vadd.f32 (!%p774_p12), %v533_v41, %v464_v33  ;;  %v538_v45 = vadd.f32 (!%p774_p12), %v534_v42, %v469_v34  ;;  %v539_v46 = vadd.f32 (!%p774_p12), %v535_v43, %v474_v37  ;;  %v546_v48 = vld [vmem:[%s1017_s23] sm:$0xff] (!%p774_p12)  ;;  %v547_v49 = vld [vmem:[%s1017_s23 + $0x8] sm:$0xff] (!%p774_p12)  ;;  %v548_v53 = vld [vmem:[%s1017_s23 + $0x10] sm:$0xff] (!%p774_p12) }
 0x1a5   : > { %v536_v47 = vld [vmem:[%s1012_s26 + $0x18] sm:$0xff] (!%p774_p12)  ;;  %v550_v51 = vadd.f32 (!%p774_p12), %v546_v48, %v500_v36  ;;  %v551_v52 = vadd.f32 (!%p774_p12), %v547_v49, %v505_v35  ;;  %v552_v55 = vadd.f32 (!%p774_p12), %v548_v53, %v510_v38 }
 0x1a6   : > { %v540_v50 = vadd.f32 (!%p774_p12), %v536_v47, %v479_v39  ;;  %542 = vst.msk [vmem:[%s1012_s26] sm:$0xff] (!%p774_p12), %vm541_vm3, %v537_v44  ;;  %543 = vst.msk [vmem:[%s1012_s26 + $0x8] sm:$0xff] (!%p774_p12), %vm541_vm3, %v538_v45 }
 0x1a7   : > { %544 = vst.msk [vmem:[%s1012_s26 + $0x10] sm:$0xff] (!%p774_p12), %vm541_vm3, %v539_v46  ;;  %554 = vst.msk [vmem:[%s1017_s23] sm:$0xff] (!%p774_p12), %vm541_vm3, %v550_v51 }
 0x1a8   : > { %v549_v54 = vld [vmem:[%s1017_s23 + $0x18] sm:$0xff] (!%p774_p12)  ;;  %545 = vst.msk [vmem:[%s1012_s26 + $0x18] sm:$0xff] (!%p774_p12), %vm541_vm3, %v540_v50  ;;  %555 = vst.msk [vmem:[%s1017_s23 + $0x8] sm:$0xff] (!%p774_p12), %vm541_vm3, %v551_v52 }
 0x1a9   : > { %v553_v56 = vadd.f32 (!%p774_p12), %v549_v54, %v515_v40  ;;  %556 = vst.msk [vmem:[%s1017_s23 + $0x10] sm:$0xff] (!%p774_p12), %vm541_vm3, %v552_v55 }
 0x1ab   : > { %557 = vst.msk [vmem:[%s1017_s23 + $0x18] sm:$0xff] %vm541_vm3, %v553_v56 }
 0x1ac PF: > { %574 = sbr.rel (!%p977_p5) target bundleno = 440 (0x1b8), region = 44  ;;  %s777_s18 = sshll.u32 (%p977_p5), %s886_s21, 5  ;;  %v592_v57 = vld [vmem:[%s1035_s11] sm:$0xff] (%p977_p5)  ;;  %v594_v58 = vld [vmem:[%s1035_s11 + $0x8] sm:$0xff] (%p977_p5)  ;;  %v596_v59 = vld [vmem:[%s1035_s11 + $0x10] sm:$0xff] (%p977_p5) }
 0x1ad   : > { %s577_s20 = sadd.s32 (%p977_p5), %s777_s18, %s991_s9  ;;  %v598_v60 = vld [vmem:[%s1035_s11 + $0x18] sm:$0xff] (%p977_p5)  ;;  %v600_v61 = vld [vmem:[%s1035_s11 + $0x20] sm:$0xff] (%p977_p5)  ;;  %v602_v62 = vld [vmem:[%s1035_s11 + $0x28] sm:$0xff] (%p977_p5) }
 0x1ae   : > { %s778_s23 = sshll.u32 (%p977_p5), %s577_s20, 3  ;;  %v604_v63 = vld [vmem:[%s1035_s11 + $0x30] sm:$0xff] (%p977_p5)  ;;  %v606_v0 = vld [vmem:[%s1035_s11 + $0x38] sm:$0xff] (%p977_p5)  ;;  %v608_v1 = vld [vmem:[%s1035_s11 + $0x40] sm:$0xff] (%p977_p5) }
 0x1af   : > { %s579_s13 = scalar_lea.vmem (%p977_p5), %s1134_s3, %s778_s23  ;;  %v610_v2 = vld [vmem:[%s1035_s11 + $0x48] sm:$0xff] (%p977_p5)  ;;  %v612_v3 = vld [vmem:[%s1035_s11 + $0x50] sm:$0xff] (%p977_p5)  ;;  %v614_v4 = vld [vmem:[%s1035_s11 + $0x58] sm:$0xff] (%p977_p5) }
 0x1b0   : > { %593 = vst [vmem:[%s579_s13] sm:$0xff] (%p977_p5), %v592_v57  ;;  %595 = vst [vmem:[%s579_s13 + $0x8] sm:$0xff] (%p977_p5), %v594_v58  ;;  %v616_v5 = vld [vmem:[%s1035_s11 + $0x60] sm:$0xff] (%p977_p5)  ;;  %v618_v6 = vld [vmem:[%s1035_s11 + $0x68] sm:$0xff] (%p977_p5) }
 0x1b1   : > { %597 = vst [vmem:[%s579_s13 + $0x10] sm:$0xff] (%p977_p5), %v596_v59  ;;  %599 = vst [vmem:[%s579_s13 + $0x18] sm:$0xff] (%p977_p5), %v598_v60  ;;  %v620_v7 = vld [vmem:[%s1035_s11 + $0x70] sm:$0xff] (%p977_p5)  ;;  %v622_v8 = vld [vmem:[%s1035_s11 + $0x78] sm:$0xff] (%p977_p5) }
 0x1b2   : > { %601 = vst [vmem:[%s579_s13 + $0x40] sm:$0xff] (%p977_p5), %v600_v61  ;;  %603 = vst [vmem:[%s579_s13 + $0x48] sm:$0xff] (%p977_p5), %v602_v62 }
 0x1b3   : > { %605 = vst [vmem:[%s579_s13 + $0x50] sm:$0xff] %v604_v63  ;;  %607 = vst [vmem:[%s579_s13 + $0x58] sm:$0xff] %v606_v0 }
 0x1b4   : > { %609 = vst [vmem:[%s579_s13 + $0x80] sm:$0xff] %v608_v1  ;;  %611 = vst [vmem:[%s579_s13 + $0x88] sm:$0xff] %v610_v2 }
 0x1b5   : > { %613 = vst [vmem:[%s579_s13 + $0x90] sm:$0xff] %v612_v3  ;;  %615 = vst [vmem:[%s579_s13 + $0x98] sm:$0xff] %v614_v4 }
 0x1b6   : > { %617 = vst [vmem:[%s579_s13 + $0xc0] sm:$0xff] %v616_v5  ;;  %619 = vst [vmem:[%s579_s13 + $0xc8] sm:$0xff] %v618_v6 }
 0x1b7   : > { %621 = vst [vmem:[%s579_s13 + $0xd0] sm:$0xff] %v620_v7  ;;  %623 = vst [vmem:[%s579_s13 + $0xd8] sm:$0xff] %v622_v8 }
 0x1b8 PF: > { %s16_s24 = sadd.s32 1, %s898_s24   ;;  %s1146_s20 = sld [smem:[#allocation3_spill]] }
 0x1b9   : > { %p13_p13 = scmp.ge.s32.totalorder %s16_s24, 6   ;;  %s1147_s21 = sld [smem:[#allocation4_spill]] }
 0x1ba   : > { %s1148_s22 = sld [smem:[#allocation5_spill]]  ;;  %s1149_s23 = sld [smem:[#allocation6_spill]] }
 0x1bb   : > { %s1150_s18 = smov %s878_s19  ;;  %s1151_s19 = smov %s988_s8 }
 0x1bc   :  { %15 = sbr.rel (!%p13_p13) target bundleno = 4 (0x4), region = 117 }

// kernel: oanblock_forward.16
= control target key start
LH: loop header
LB: loop body
LE: loop exit
PB: predicated region body
PF: predicated region fallthrough
CT: control target
= control target key end

     0   :  { %s1668_s0 = inlined_call_operand.vmem [shape: f32[2,32,1024], index: 0, kind: input, shape index: {}]   ;;  %s1669_s1 = inlined_call_operand.vmem [shape: f32[2,32,1], index: 1, kind: input, shape index: {}]   ;;  %s1670_s2 = inlined_call_operand.vmem [shape: f32[2,32,1], index: 2, kind: input, shape index: {}]   ;;  %s1671_s3 = inlined_call_operand.vmem [shape: f32[32,32], index: 3, kind: input, shape index: {}]   ;;  %s1672_s4 = inlined_call_operand.vmem [shape: f32[32,1], index: 4, kind: input, shape index: {}]   ;;  %s1673_s5 = inlined_call_operand.vmem [shape: f32[2,32,1024], index: 5, kind: input, shape index: {}]   ;;  %s1674_s6 = inlined_call_operand.vmem [shape: f32[2,32,1024], index: 6, kind: output, shape index: {0}]   ;;  %s1675_s7 = inlined_call_operand.vmem [shape: f32[2,32,1], index: 7, kind: output, shape index: {1}]   ;;  %s1676_s8 = inlined_call_operand.vmem [shape: f32[2,32,1], index: 8, kind: output, shape index: {2}]  }
   0x1   :  { %1678 = sst [smem:[#allocation6_spill]] %s1668_s0 }
   0x2   :  { %1679 = sst [smem:[#allocation7_spill]] %s1673_s5 }
   0x3   :  { %s1365_s27 = smov 0   ;;  %s1367_s28 = smov 0  }
   0x4   :  { %s1369_s29 = smov 0   ;;  %s1371_s30 = smov 0  }
   0x5   :  { %s1373_s9 = smov 0   ;;  %s1375_s10 = smov 0  }
   0x6   :  { %s1377_s11 = smov 0  }
   0x7 LB: > { %s28_s12 = sadd.s32 1, %s1309_s9  ;;  %s31_s13 = sadd.s32 1, %s1313_s10  ;;  %s1317_s11 = sphi %s1377_s11, %s19_s11   ;;  %s1313_s10 = sphi %s1375_s10, %s1691_s10   ;;  %s1309_s9 = sphi %s1373_s9, %s1690_s9   ;;  %s1305_s30 = sphi %s1371_s30, %s1689_s30   ;;  %s1301_s29 = sphi %s1369_s29, %s1688_s29   ;;  %s1297_s28 = sphi %s1367_s28, %s1687_s28   ;;  %s1293_s27 = sphi %s1365_s27, %s1686_s27  }
   0x8   : > { %p29_p0 = scmp.ge.s32.totalorder %s28_s12, 2  ;;  %s1164_s14 = sadd.s32 4294967295, %s1317_s11  }
   0x9   : > { %p47_p1 = scmp.ne.s32.totalorder %s1297_s28, %s1293_s27  ;;  %p48_p2 = scmp.eq.s32.totalorder %s1317_s11, 0 }
   0xa   : > { %s1693_s12 = smov (%p29_p0, %s28_s12), 0  ;;  %s1695_s13 = smov (!%p29_p0, %s31_s13), %s1313_s10 }
   0xb   : > { %p33_p3 = scmp.ge.s32.totalorder %s1695_s13, 2  ;;  %p201_p4 = scmp.eq.s32.totalorder %s1164_s14, 3 }
   0xc   : > { %s36_s15 = ssub.s32 %s1309_s9, %s1693_s12  ;;  %p1411_p5 = por %p48_p2, %p47_p1 }
   0xd   : > { %s1697_s13 = smov (%p33_p3, %s1695_s13), 0  ;;  %p1417_p6 = por %p201_p4, %p47_p1 }
   0xe   : > { %1681 = sst [smem:[#allocation5_spill]] %s1697_s13  ;;  %s35_s18 = ssub.s32 %s1313_s10, %s1697_s13 }
   0xf   : > { %s37_s19 = sor.u32 %s36_s15, %s35_s18  ;;  %s40_s20 = sadd.s32 1, %s1297_s28 }
  0x10   : > { %p38_p7 = scmp.eq.s32.totalorder %s37_s19, 0  ;;  %p1167_p8 = scmp.ge.s32.totalorder %s1317_s11, 4 }
  0x12   : > { %s1425_s21 = scalar_select %p38_p7, %s1297_s28, %s40_s20  }
  0x13   : > { %281 = sbr.rel (%p1167_p8) target bundleno = 62 (0x3e), region = 24 }
  0x1a   : > { %284 = sbr.rel (!%p1411_p5) target bundleno = 44 (0x2c), region = 28  ;;  %s286_s22 = sand.u32 (%p1411_p5), 1, %s1297_s28  }
  0x1b   : > { %s1169_s23 = sshll.u32 (%p1411_p5), %s1309_s9, 2  ;;  %s1168_s24 = sshll.u32 (%p1411_p5), %s286_s22, 7 }
  0x1c   : > { %s1170_s25 = sshll.u32 (%p1411_p5), %s1313_s10, 5  ;;  %s1683_s0 = sld [smem:[#allocation6_spill]] (%p1411_p5) }
  0x1d   : > { %s291_s26 = sadd.s32 (%p1411_p5), %s1170_s25, %s1169_s23  ;;  %s288_s20 = scalar_lea.vmem (%p1411_p5), [#allocation2], %s1168_s24 }
  0x1e   : > { %s1171_s14 = sshll.u32 (%p1411_p5), %s291_s26, 3 }
  0x22   : > { %s1436_s19 = scalar_lea.vmem %s1683_s0, %s1171_s14 }
  0x23   : > { %v306_v0 = vld [vmem:[%s1436_s19] sm:$0xff]  ;;  %v308_v1 = vld [vmem:[%s1436_s19 + $0x8] sm:$0xff]  ;;  %v310_v2 = vld [vmem:[%s1436_s19 + $0x10] sm:$0xff] }
  0x24   : > { %307 = vst [vmem:[%s288_s20] sm:$0xff] %v306_v0  ;;  %309 = vst [vmem:[%s288_s20 + $0x8] sm:$0xff] %v308_v1  ;;  %v312_v3 = vld [vmem:[%s1436_s19 + $0x18] sm:$0xff]  ;;  %v314_v4 = vld [vmem:[%s1436_s19 + $0x40] sm:$0xff] }
  0x25   : > { %311 = vst [vmem:[%s288_s20 + $0x10] sm:$0xff] %v310_v2  ;;  %v316_v5 = vld [vmem:[%s1436_s19 + $0x48] sm:$0xff]  ;;  %313 = vst [vmem:[%s288_s20 + $0x18] sm:$0xff] %v312_v3  ;;  %v318_v6 = vld [vmem:[%s1436_s19 + $0x50] sm:$0xff] }
  0x26   : > { %315 = vst [vmem:[%s288_s20 + $0x20] sm:$0xff] %v314_v4  ;;  %317 = vst [vmem:[%s288_s20 + $0x28] sm:$0xff] %v316_v5  ;;  %v320_v7 = vld [vmem:[%s1436_s19 + $0x58] sm:$0xff]  ;;  %v322_v8 = vld [vmem:[%s1436_s19 + $0x80] sm:$0xff] }
  0x27   : > { %319 = vst [vmem:[%s288_s20 + $0x30] sm:$0xff] %v318_v6  ;;  %321 = vst [vmem:[%s288_s20 + $0x38] sm:$0xff] %v320_v7  ;;  %v324_v9 = vld [vmem:[%s1436_s19 + $0x88] sm:$0xff]  ;;  %v326_v10 = vld [vmem:[%s1436_s19 + $0x90] sm:$0xff] }
  0x28   : > { %323 = vst [vmem:[%s288_s20 + $0x40] sm:$0xff] %v322_v8  ;;  %v328_v11 = vld [vmem:[%s1436_s19 + $0x98] sm:$0xff]  ;;  %325 = vst [vmem:[%s288_s20 + $0x48] sm:$0xff] %v324_v9  ;;  %v330_v12 = vld [vmem:[%s1436_s19 + $0xc0] sm:$0xff] }
  0x29   : > { %327 = vst [vmem:[%s288_s20 + $0x50] sm:$0xff] %v326_v10  ;;  %329 = vst [vmem:[%s288_s20 + $0x58] sm:$0xff] %v328_v11  ;;  %v332_v13 = vld [vmem:[%s1436_s19 + $0xc8] sm:$0xff]  ;;  %v334_v14 = vld [vmem:[%s1436_s19 + $0xd0] sm:$0xff] }
  0x2a   : > { %331 = vst [vmem:[%s288_s20 + $0x60] sm:$0xff] %v330_v12  ;;  %333 = vst [vmem:[%s288_s20 + $0x68] sm:$0xff] %v332_v13  ;;  %v336_v15 = vld [vmem:[%s1436_s19 + $0xd8] sm:$0xff] }
  0x2b   : > { %335 = vst [vmem:[%s288_s20 + $0x70] sm:$0xff] %v334_v14  ;;  %337 = vst [vmem:[%s288_s20 + $0x78] sm:$0xff] %v336_v15 }
  0x2c PF: > { %359 = sbr.rel (!%p1411_p5) target bundleno = 62 (0x3e), region = 59  ;;  %s361_s22 = sand.u32 (%p1411_p5), 1, %s1297_s28  }
  0x2d   : > { %s1173_s23 = sshll.u32 (%p1411_p5), %s1309_s9, 2  ;;  %s1172_s24 = sshll.u32 (%p1411_p5), %s361_s22, 7 }
  0x2e   : > { %s1174_s25 = sshll.u32 (%p1411_p5), %s1313_s10, 5  ;;  %s1684_s5 = sld [smem:[#allocation7_spill]] (%p1411_p5) }
  0x2f   : > { %s366_s26 = sadd.s32 (%p1411_p5), %s1174_s25, %s1173_s23  ;;  %s363_s16 = scalar_lea.vmem (%p1411_p5), [#allocation3], %s1172_s24 }
  0x30   : > { %s1175_s14 = sshll.u32 (%p1411_p5), %s366_s26, 3 }
  0x34   : > { %s1462_s0 = scalar_lea.vmem %s1684_s5, %s1175_s14 }
  0x35   : > { %v381_v16 = vld [vmem:[%s1462_s0] sm:$0xff]  ;;  %v383_v17 = vld [vmem:[%s1462_s0 + $0x8] sm:$0xff]  ;;  %v385_v18 = vld [vmem:[%s1462_s0 + $0x10] sm:$0xff] }
  0x36   : > { %382 = vst [vmem:[%s363_s16] sm:$0xff] %v381_v16  ;;  %384 = vst [vmem:[%s363_s16 + $0x8] sm:$0xff] %v383_v17  ;;  %v387_v19 = vld [vmem:[%s1462_s0 + $0x18] sm:$0xff]  ;;  %v389_v20 = vld [vmem:[%s1462_s0 + $0x40] sm:$0xff] }
  0x37   : > { %386 = vst [vmem:[%s363_s16 + $0x10] sm:$0xff] %v385_v18  ;;  %v391_v21 = vld [vmem:[%s1462_s0 + $0x48] sm:$0xff]  ;;  %388 = vst [vmem:[%s363_s16 + $0x18] sm:$0xff] %v387_v19  ;;  %v393_v22 = vld [vmem:[%s1462_s0 + $0x50] sm:$0xff] }
  0x38   : > { %390 = vst [vmem:[%s363_s16 + $0x20] sm:$0xff] %v389_v20  ;;  %392 = vst [vmem:[%s363_s16 + $0x28] sm:$0xff] %v391_v21  ;;  %v395_v23 = vld [vmem:[%s1462_s0 + $0x58] sm:$0xff]  ;;  %v397_v24 = vld [vmem:[%s1462_s0 + $0x80] sm:$0xff] }
  0x39   : > { %394 = vst [vmem:[%s363_s16 + $0x30] sm:$0xff] %v393_v22  ;;  %396 = vst [vmem:[%s363_s16 + $0x38] sm:$0xff] %v395_v23  ;;  %v399_v25 = vld [vmem:[%s1462_s0 + $0x88] sm:$0xff]  ;;  %v401_v26 = vld [vmem:[%s1462_s0 + $0x90] sm:$0xff] }
  0x3a   : > { %398 = vst [vmem:[%s363_s16 + $0x40] sm:$0xff] %v397_v24  ;;  %v403_v27 = vld [vmem:[%s1462_s0 + $0x98] sm:$0xff]  ;;  %400 = vst [vmem:[%s363_s16 + $0x48] sm:$0xff] %v399_v25  ;;  %v405_v28 = vld [vmem:[%s1462_s0 + $0xc0] sm:$0xff] }
  0x3b   : > { %402 = vst [vmem:[%s363_s16 + $0x50] sm:$0xff] %v401_v26  ;;  %404 = vst [vmem:[%s363_s16 + $0x58] sm:$0xff] %v403_v27  ;;  %v407_v29 = vld [vmem:[%s1462_s0 + $0xc8] sm:$0xff]  ;;  %v409_v30 = vld [vmem:[%s1462_s0 + $0xd0] sm:$0xff] }
  0x3c   : > { %406 = vst [vmem:[%s363_s16 + $0x60] sm:$0xff] %v405_v28  ;;  %408 = vst [vmem:[%s363_s16 + $0x68] sm:$0xff] %v407_v29  ;;  %v411_v31 = vld [vmem:[%s1462_s0 + $0xd8] sm:$0xff] }
  0x3d   : > { %410 = vst [vmem:[%s363_s16 + $0x70] sm:$0xff] %v409_v30  ;;  %412 = vst [vmem:[%s363_s16 + $0x78] sm:$0xff] %v411_v31 }
  0x3e PF: > { %p1176_p9 = scmp.ge.s32.totalorder %s1317_s11, 1  ;;  %p417_p10 = scmp.lt.s32.totalorder %s1317_s11, 5 }
  0x40   : > { %p418_p11 = pnand %p1176_p9, %p417_p10 }
  0x41   : > { %p488_p12 = scmp.lt.s32.totalorder (!%p418_p11), %s1305_s30, 1  ;;  %v1319_v32 = vmov (!%p418_p11), 0   ;;  %v638_v41 = vld [vmem:[%s1672_s4 + $0x8] sm:$0xff] (!%p418_p11)  ;;  %v637_v42 = vld [vmem:[%s1672_s4] sm:$0xff] (!%p418_p11)  ;;  %v640_v43 = vld [vmem:[%s1672_s4 + $0x18] sm:$0xff] (!%p418_p11)  ;;  %vm661_vm0 = vcmask (!%p418_p11), 261120  }
  0x42   : > { %421 = sbr.rel (%p418_p11) target bundleno = 638 (0x27e), region = 82  ;;  %1262 = vset.pattern.permute.xlu1 (!%p418_p11), %v1319_v32  ;;  %1261 = vset.pattern.permute.xlu0 (!%p418_p11), %v1319_v32  ;;  %v639_v44 = vld [vmem:[%s1672_s4 + $0x10] sm:$0xff] (!%p418_p11)  ;;  %p1192_p13 = scmp.ne.s32.totalorder (!%p418_p11), %s1301_s29, 0 }
  0x43   : > { %700 = vmatprep.mubr.bf16.mxu0 (!%p418_p11), %v1319_v32  ;;  %753 = vmatprep.mubr.bf16.mxu1 (!%p418_p11), %v1319_v32 }
  0x49   : > { %s489_s19 = scalar_select %p488_p12, %s1305_s30, 1 }
  0x4a   : > { %vm882_vm1 = vcmask (!%p1192_p13), 7168  }
  0x4b   : > { %s1200_s0 = sshll.u32 %s489_s19, 5 }
  0x4c   : > { %s497_s23 = scalar_lea.vmem %s1670_s2, %s1200_s0  ;;  %s1494_s26 = scalar_lea.vmem %s1675_s7, %s1200_s0 }
  0x4d   : > { %s1499_s18 = scalar_lea.vmem %s1676_s8, %s1200_s0  ;;  %v567_v33 = vld [vmem:[%s497_s23] sm:$0xff]  ;;  %s492_s13 = scalar_lea.vmem %s1669_s1, %s1200_s0  ;;  %v568_v35 = vld [vmem:[%s497_s23 + $0x8] sm:$0xff]  ;;  %v570_v39 = vld [vmem:[%s497_s23 + $0x18] sm:$0xff] }
  0x4e   : > { %573 = vperm.xlu1 %1262, %v567_v33   ;;  %v527_v34 = vld [vmem:[%s492_s13] sm:$0xff]  ;;  %v528_v36 = vld [vmem:[%s492_s13 + $0x8] sm:$0xff]  ;;  %v530_v37 = vld [vmem:[%s492_s13 + $0x18] sm:$0xff] }
  0x4f   : > { %533 = vperm.xlu0 %1261, %v527_v34   ;;  %v529_v38 = vld [vmem:[%s492_s13 + $0x10] sm:$0xff] }
  0x50   : > { %v569_v40 = vld [vmem:[%s497_s23 + $0x10] sm:$0xff]  ;;  %s424_s23 = sand.u32 1, %s1293_s27  }
  0x51   : > { %s1517_s14 = sshll.u32 %s424_s23, 7 }
  0x52   : > { %578 = vperm.xlu1 %1262, %v568_v35   ;;  %s1520_s15 = scalar_lea.vmem [#allocation2], %s1517_s14  ;;  %s1553_s13 = scalar_lea.vmem [#allocation3], %s1517_s14 }
  0x53   : > { %538 = vperm.xlu0 %1261, %v528_v36   ;;  %v511_v45 = vld [vmem:[%s1520_s15] sm:$0xff]  ;;  %v513_v46 = vld [vmem:[%s1520_s15 + $0x10] sm:$0xff]  ;;  %v512_v47 = vld [vmem:[%s1520_s15 + $0x8] sm:$0xff]  ;;  %s1563_s25 = scalar_lea.vmem [#allocation4], %s1517_s14 }
  0x54   : > { %v514_v48 = vld [vmem:[%s1520_s15 + $0x18] sm:$0xff]  ;;  %v515_v55 = vld [vmem:[%s1520_s15 + $0x20] sm:$0xff]  ;;  %v517_v56 = vld [vmem:[%s1520_s15 + $0x30] sm:$0xff] }
  0x55   : > { %v516_v57 = vld [vmem:[%s1520_s15 + $0x28] sm:$0xff]  ;;  %v518_v59 = vld [vmem:[%s1520_s15 + $0x38] sm:$0xff]  ;;  %v523_v3 = vld [vmem:[%s1520_s15 + $0x60] sm:$0xff] }
  0x56   : > { %548 = vperm.xlu1 %1262, %v530_v37   ;;  %v524_v5 = vld [vmem:[%s1520_s15 + $0x68] sm:$0xff]  ;;  %v525_v6 = vld [vmem:[%s1520_s15 + $0x70] sm:$0xff]  ;;  %v526_v7 = vld [vmem:[%s1520_s15 + $0x78] sm:$0xff] }
  0x57   : > { %543 = vperm.xlu0 %1261, %v529_v38   ;;  %v519_v10 = vld [vmem:[%s1520_s15 + $0x40] sm:$0xff]  ;;  %v520_v11 = vld [vmem:[%s1520_s15 + $0x48] sm:$0xff]  ;;  %v521_v16 = vld [vmem:[%s1520_s15 + $0x50] sm:$0xff] }
  0x58   : > { %v522_v17 = vld [vmem:[%s1520_s15 + $0x58] sm:$0xff] }
  0x5a   : > { %588 = vperm.xlu1 %1262, %v570_v39  }
  0x5b   : > { %583 = vperm.xlu0 %1261, %v569_v40  }
  0x5e   : > { %648 = vperm.xlu1 %1262, %v638_v41  }
  0x5f   : > { %643 = vperm.xlu0 %1261, %v637_v42  }
  0x62   : > { %658 = vperm.xlu1 %1262, %v640_v43  }
  0x63   : > { %653 = vperm.xlu0 %1261, %v639_v44  }
  0xcd   : > { %v574_v49 = vpop.permute.xlu1 %573 }
  0xce   : > { %v534_v50 = vpop.permute.xlu0 %533 }
  0xcf   : > { %v551_v51 = vmul.f32 %v534_v50, %v511_v45  ;;  %v553_v52 = vmul.f32 %v534_v50, %v513_v46  ;;  %v552_v53 = vmul.f32 %v534_v50, %v512_v47  ;;  %v554_v54 = vmul.f32 %v534_v50, %v514_v48 }
  0xd1   : > { %v579_v58 = vpop.permute.xlu1 %578  ;;  %v592_v61 = vadd.f32 %v574_v49, %v552_v53  ;;  %v594_v62 = vadd.f32 %v574_v49, %v554_v54  ;;  %v591_v63 = vadd.f32 %v574_v49, %v551_v51  ;;  %v593_v0 = vadd.f32 %v574_v49, %v553_v52 }
  0xd2   : > { %v539_v60 = vpop.permute.xlu0 %538 }
  0xd3   : > { %v555_v1 = vmul.f32 %v539_v60, %v515_v55  ;;  %v557_v2 = vmul.f32 %v539_v60, %v517_v56  ;;  %v556_v4 = vmul.f32 %v539_v60, %v516_v57  ;;  %v558_v8 = vmul.f32 %v539_v60, %v518_v59  ;;  %v623_v60 = vld [vmem:[%s1671_s3] sm:$0xff] }
  0xd4   : > { %v608_v18 = vmax.f32 %v592_v61, 0.0  ;;  %v610_v19 = vmax.f32 %v594_v62, 0.0  ;;  %v607_v20 = vmax.f32 %v591_v63, 0.0  ;;  %v609_v21 = vmax.f32 %v593_v0, 0.0  ;;  %v624_v61 = vld [vmem:[%s1671_s3 + $0x8] sm:$0xff] }
  0xd5   : > { %v549_v9 = vpop.permute.xlu1 %548  ;;  %v596_v12 = vadd.f32 %v579_v58, %v556_v4  ;;  %v595_v13 = vadd.f32 %v579_v58, %v555_v1  ;;  %v597_v14 = vadd.f32 %v579_v58, %v557_v2  ;;  %v598_v27 = vadd.f32 %v579_v58, %v558_v8  ;;  %v625_v1 = vld [vmem:[%s1671_s3 + $0x10] sm:$0xff]  ;;  %v626_v2 = vld [vmem:[%s1671_s3 + $0x18] sm:$0xff] }
  0xd6   : > { %v544_v15 = vpop.permute.xlu0 %543  ;;  %v563_v22 = vmul.f32 %v549_v9, %v523_v3  ;;  %v564_v23 = vmul.f32 %v549_v9, %v524_v5  ;;  %v565_v24 = vmul.f32 %v549_v9, %v525_v6  ;;  %v566_v25 = vmul.f32 %v549_v9, %v526_v7  ;;  %v774_v6 = vld [vmem:[%s1553_s13] sm:$0xff] }
  0xd7   : > { %v612_v26 = vmax.f32 %v596_v12, 0.0  ;;  %v611_v28 = vmax.f32 %v595_v13, 0.0  ;;  %v613_v29 = vmax.f32 %v597_v14, 0.0  ;;  %v559_v30 = vmul.f32 %v544_v15, %v519_v10  ;;  %v775_v10 = vld [vmem:[%s1553_s13 + $0x8] sm:$0xff]  ;;  %v778_v14 = vld [vmem:[%s1553_s13 + $0x20] sm:$0xff] }
  0xd8   : > { %v560_v31 = vmul.f32 %v544_v15, %v520_v11  ;;  %v561_v33 = vmul.f32 %v544_v15, %v521_v16  ;;  %v562_v34 = vmul.f32 %v544_v15, %v522_v17  ;;  %v614_v46 = vmax.f32 %v598_v27, 0.0  ;;  %v776_v11 = vld [vmem:[%s1553_s13 + $0x10] sm:$0xff] }
  0xd9   : > { %v589_v35 = vpop.permute.xlu1 %588  ;;  %v630_v45 = vpack.c.bf16 %v612_v26, %v608_v18  ;;  %v629_v47 = vpack.c.bf16 %v611_v28, %v607_v20  ;;  %v631_v48 = vpack.c.bf16 %v613_v29, %v609_v21  ;;  %v627_v0 = vpack.c.bf16 %v624_v61, %v623_v60  ;;  %v777_v18 = vld [vmem:[%s1553_s13 + $0x18] sm:$0xff]  ;;  %v779_v21 = vld [vmem:[%s1553_s13 + $0x28] sm:$0xff]  ;;  %v786_v60 = vld [vmem:[%s1553_s13 + $0x60] sm:$0xff] }
  0xda   : > { %v603_v36 = vadd.f32 %v589_v35, %v563_v22  ;;  %v604_v37 = vadd.f32 %v589_v35, %v564_v23  ;;  %v605_v38 = vadd.f32 %v589_v35, %v565_v24  ;;  %v606_v39 = vadd.f32 %v589_v35, %v566_v25  ;;  %v584_v40 = vpop.permute.xlu0 %583  ;;  %v780_v25 = vld [vmem:[%s1553_s13 + $0x30] sm:$0xff] }
  0xdb   : > { %v599_v41 = vadd.f32 %v584_v40, %v559_v30  ;;  %v600_v42 = vadd.f32 %v584_v40, %v560_v31  ;;  %v601_v43 = vadd.f32 %v584_v40, %v561_v33  ;;  %v602_v44 = vadd.f32 %v584_v40, %v562_v34  ;;  %668 = vmatprep.subr.bf16.mxu0 %v630_v45  ;;  %v781_v33 = vld [vmem:[%s1553_s13 + $0x38] sm:$0xff] }
  0xdc   : > { %v620_v50 = vmax.f32 %v604_v37, 0.0  ;;  %v622_v52 = vmax.f32 %v606_v39, 0.0  ;;  %v632_v53 = vpack.c.bf16 %v614_v46, %v610_v19  ;;  %v619_v55 = vmax.f32 %v603_v36, 0.0  ;;  %669 = vmatpush1.bf16.msra.mxu0 %v629_v47  ;;  %v782_v46 = vld [vmem:[%s1553_s13 + $0x40] sm:$0xff] }
  0xdd   : > { %v616_v49 = vmax.f32 %v600_v42, 0.0  ;;  %v618_v51 = vmax.f32 %v602_v44, 0.0  ;;  %v615_v54 = vmax.f32 %v599_v41, 0.0  ;;  %v617_v56 = vmax.f32 %v601_v43, 0.0  ;;  %v649_v7 = vpop.permute.xlu1 %648 }
  0xde   : > { %v621_v59 = vmax.f32 %v605_v38, 0.0  ;;  %721 = vmatprep.subr.bf16.mxu1 %v632_v53  ;;  %v628_v3 = vpack.c.bf16 %v626_v2, %v625_v1  ;;  %v644_v4 = vpop.permute.xlu0 %643 }
  0xdf   : > { %v634_v57 = vpack.c.bf16 %v620_v50, %v616_v49  ;;  %v636_v58 = vpack.c.bf16 %v622_v52, %v618_v51  ;;  %v633_v62 = vpack.c.bf16 %v619_v55, %v615_v54  ;;  %722 = vmatpush1.bf16.msra.mxu1 %v631_v48  ;;  %v783_v52 = vld [vmem:[%s1553_s13 + $0x48] sm:$0xff] }
  0xe0   : > { %v635_v63 = vpack.c.bf16 %v621_v59, %v617_v56 }
  0xe1   : > { %670 = vmatprep.subr.bf16.mxu0 %v634_v57  ;;  %723 = vmatprep.subr.bf16.mxu1 %v636_v58  ;;  %v659_v49 = vpop.permute.xlu1 %658  ;;  %v784_v57 = vld [vmem:[%s1553_s13 + $0x50] sm:$0xff] }
  0xe2   : > { %671 = vmatpush1.bf16.msra.mxu0 %v633_v62  ;;  %v654_v42 = vpop.permute.xlu0 %653 }
  0xe3   : > { %724 = vmatpush1.bf16.msra.mxu1 %v635_v63 }
  0xe5   : > { %1188 = vmatmul.mubr.msk.bf16.vlgmr.msra.gmra.mrb[0].mxu0 %vm661_vm0, %v627_v0 }
  0xe6   : > { %710 = vmatprep.mubr.bf16.mxu0 %v1319_v32  ;;  %1190 = vmatmul.mubr.msk.bf16.vlgmr.msra.gmra.mrb[0].mxu1 %vm661_vm0, %v627_v0 }
  0xe7   : > { %763 = vmatprep.mubr.bf16.mxu1 %v1319_v32 }
  0xed   : > { %1189 = vmatmul.mubr.msk.bf16.gmra.mrb[4].mxu0 %vm661_vm0, %v628_v3 }
  0xee   : > { %1191 = vmatmul.mubr.msk.bf16.gmra.mrb[4].mxu1 %vm661_vm0, %v628_v3  ;;  %v785_v3 = vld [vmem:[%s1553_s13 + $0x58] sm:$0xff] }
 0x1b8   : > { %v702_v5 = vpop.f32.mrb[0].mxu0 }
 0x1b9   : > { %v703_v8 = vadd.f32 %v702_v5, %v644_v4  ;;  %v704_v9 = vpop.f32.mrb[1].mxu0  ;;  %v755_v32 = vpop.f32.mrb[0].mxu1 }
 0x1ba   : > { %v705_v12 = vadd.f32 %v704_v9, %v644_v4  ;;  %v706_v13 = vpop.f32.mrb[2].mxu0  ;;  %v756_v16 = vadd.f32 %v755_v32, %v644_v4  ;;  %v757_v17 = vpop.f32.mrb[1].mxu1  ;;  %v788_v32 = vld [vmem:[%s1553_s13 + $0x70] sm:$0xff] }
 0x1bb   : > { %v790_v15 = vadd.f32 %v774_v6, %v703_v8  ;;  %v707_v19 = vadd.f32 %v706_v13, %v649_v7  ;;  %v708_v20 = vpop.f32.mrb[3].mxu0  ;;  %v758_v23 = vadd.f32 %v757_v17, %v644_v4  ;;  %v759_v24 = vpop.f32.mrb[2].mxu1  ;;  %v787_v6 = vld [vmem:[%s1553_s13 + $0x68] sm:$0xff] }
 0x1bc   : > { %v791_v22 = vadd.f32 %v775_v10, %v705_v12  ;;  %v709_v26 = vadd.f32 %v708_v20, %v649_v7  ;;  %v792_v28 = vadd.f32 %v776_v11, %v756_v16  ;;  %v760_v30 = vadd.f32 %v759_v24, %v649_v7  ;;  %v761_v31 = vpop.f32.mrb[3].mxu1 }
 0x1bd   : > { %806 = vst [vmem:[%s1563_s25] sm:$0xff] %v790_v15  ;;  %v842_v27 = vmul.f32 %v790_v15, %v790_v15  ;;  %v794_v29 = vadd.f32 %v778_v14, %v707_v19  ;;  %v793_v35 = vadd.f32 %v777_v18, %v758_v23  ;;  %v762_v37 = vadd.f32 %v761_v31, %v649_v7  ;;  %v789_v18 = vld [vmem:[%s1553_s13 + $0x78] sm:$0xff] }
 0x1be   : > { %807 = vst [vmem:[%s1563_s25 + $0x8] sm:$0xff] %v791_v22  ;;  %v843_v34 = vmul.f32 %v791_v22, %v791_v22  ;;  %v795_v36 = vadd.f32 %v779_v21, %v709_v26  ;;  %808 = vst [vmem:[%s1563_s25 + $0x10] sm:$0xff] %v792_v28  ;;  %v796_v39 = vadd.f32 %v780_v25, %v760_v30 }
 0x1bf   : > { %810 = vst [vmem:[%s1563_s25 + $0x20] sm:$0xff] %v794_v29  ;;  %v846_v38 = vmul.f32 %v794_v29, %v794_v29  ;;  %v822_v40 = vadd.f32 %v791_v22, %v790_v15  ;;  %v844_v41 = vmul.f32 %v792_v28, %v792_v28  ;;  %809 = vst [vmem:[%s1563_s25 + $0x18] sm:$0xff] %v793_v35 }
 0x1c0   : > { %811 = vst [vmem:[%s1563_s25 + $0x28] sm:$0xff] %v795_v36  ;;  %v847_v43 = vmul.f32 %v795_v36, %v795_v36  ;;  %v797_v44 = vadd.f32 %v781_v33, %v762_v37  ;;  %v712_v45 = vpop.f32.mrb[4].mxu0  ;;  %v827_v47 = vadd.f32 %v795_v36, %v794_v29  ;;  %v845_v48 = vmul.f32 %v793_v35, %v793_v35 }
 0x1c1   : > { %812 = vst [vmem:[%s1563_s25 + $0x30] sm:$0xff] %v796_v39  ;;  %v713_v50 = vadd.f32 %v712_v45, %v654_v42  ;;  %v714_v51 = vpop.f32.mrb[5].mxu0  ;;  %v823_v53 = vadd.f32 %v822_v40, %v792_v28  ;;  %v848_v54 = vmul.f32 %v796_v39, %v796_v39  ;;  %v858_v55 = vadd.f32 %v843_v34, %v842_v27  ;;  %v765_v56 = vpop.f32.mrb[4].mxu1 }
 0x1c2   : > { %813 = vst [vmem:[%s1563_s25 + $0x38] sm:$0xff] %v797_v44  ;;  %v715_v58 = vadd.f32 %v714_v51, %v654_v42  ;;  %v716_v59 = vpop.f32.mrb[6].mxu0  ;;  %v828_v61 = vadd.f32 %v827_v47, %v796_v39  ;;  %v849_v62 = vmul.f32 %v797_v44, %v797_v44  ;;  %v863_v63 = vadd.f32 %v847_v43, %v846_v38  ;;  %v767_v2 = vpop.f32.mrb[5].mxu1 }
 0x1c3   : > { %v798_v0 = vadd.f32 %v782_v46, %v713_v50  ;;  %v766_v1 = vadd.f32 %v765_v56, %v654_v42  ;;  %v717_v4 = vadd.f32 %v716_v59, %v659_v49  ;;  %v718_v5 = vpop.f32.mrb[7].mxu0  ;;  %v824_v7 = vadd.f32 %v823_v53, %v793_v35  ;;  %v769_v10 = vpop.f32.mrb[6].mxu1 }
 0x1c4   : > { %v799_v8 = vadd.f32 %v783_v52, %v715_v58  ;;  %v768_v9 = vadd.f32 %v767_v2, %v654_v42  ;;  %v719_v11 = vadd.f32 %v718_v5, %v659_v49  ;;  %v829_v12 = vadd.f32 %v828_v61, %v797_v44  ;;  %v771_v17 = vpop.f32.mrb[7].mxu1 }
 0x1c5   : > { %814 = vst [vmem:[%s1563_s25 + $0x40] sm:$0xff] %v798_v0  ;;  %v850_v13 = vmul.f32 %v798_v0, %v798_v0  ;;  %v800_v14 = vadd.f32 %v784_v57, %v766_v1  ;;  %v802_v15 = vadd.f32 %v786_v60, %v717_v4  ;;  %v770_v16 = vadd.f32 %v769_v10, %v659_v49 }
 0x1c6   : > { %825 = vadd.xlane.f32.xlu0 %v824_v7  ;;  %815 = vst [vmem:[%s1563_s25 + $0x48] sm:$0xff] %v799_v8  ;;  %v851_v19 = vmul.f32 %v799_v8, %v799_v8  ;;  %v801_v20 = vadd.f32 %v785_v3, %v768_v9  ;;  %v803_v21 = vadd.f32 %v787_v6, %v719_v11 }
 0x1c7   : > { %v772_v22 = vadd.f32 %v771_v17, %v659_v49  ;;  %830 = vadd.xlane.f32.xlu1 %v829_v12  ;;  %816 = vst [vmem:[%s1563_s25 + $0x50] sm:$0xff] %v800_v14  ;;  %818 = vst [vmem:[%s1563_s25 + $0x60] sm:$0xff] %v802_v15  ;;  %v854_v23 = vmul.f32 %v802_v15, %v802_v15  ;;  %v804_v24 = vadd.f32 %v788_v32, %v770_v16 }
 0x1c8   : > { %v864_v25 = vadd.f32 %v863_v63, %v848_v54  ;;  %v859_v26 = vadd.f32 %v858_v55, %v844_v41  ;;  %817 = vst [vmem:[%s1563_s25 + $0x58] sm:$0xff] %v801_v20  ;;  %819 = vst [vmem:[%s1563_s25 + $0x68] sm:$0xff] %v803_v21  ;;  %v855_v27 = vmul.f32 %v803_v21, %v803_v21 }
 0x1c9   : > { %v805_v28 = vadd.f32 %v789_v18, %v772_v22  ;;  %v832_v29 = vadd.f32 %v799_v8, %v798_v0  ;;  %820 = vst [vmem:[%s1563_s25 + $0x70] sm:$0xff] %v804_v24  ;;  %v852_v33 = vmul.f32 %v800_v14, %v800_v14  ;;  %v868_v34 = vadd.f32 %v851_v19, %v850_v13 }
 0x1ca   : > { %v865_v30 = vadd.f32 %v864_v25, %v849_v62  ;;  %v860_v31 = vadd.f32 %v859_v26, %v845_v48  ;;  %v853_v36 = vmul.f32 %v801_v20, %v801_v20  ;;  %v837_v37 = vadd.f32 %v803_v21, %v802_v15 }
 0x1cb   : > { %821 = vst [vmem:[%s1563_s25 + $0x78] sm:$0xff] %v805_v28  ;;  %v833_v35 = vadd.f32 %v832_v29, %v800_v14  ;;  %v869_v38 = vadd.f32 %v868_v34, %v852_v33  ;;  %v856_v39 = vmul.f32 %v804_v24, %v804_v24  ;;  %v873_v40 = vadd.f32 %v855_v27, %v854_v23 }
 0x1cc   : > { %866 = vadd.xlane.f32.xlu0 %v865_v30  ;;  %861 = vadd.xlane.f32.xlu1 %v860_v31  ;;  %v838_v42 = vadd.f32 %v837_v37, %v804_v24  ;;  %v857_v44 = vmul.f32 %v805_v28, %v805_v28 }
 0x1cd   : > { %v834_v41 = vadd.f32 %v833_v35, %v801_v20  ;;  %v870_v43 = vadd.f32 %v869_v38, %v853_v36  ;;  %v874_v45 = vadd.f32 %v873_v40, %v856_v39 }
 0x1ce   : > { %v839_v46 = vadd.f32 %v838_v42, %v805_v28 }
 0x1cf   : > { %v875_v47 = vadd.f32 %v874_v45, %v857_v44 }
 0x1d0   : > { %835 = vadd.xlane.f32.xlu0 %v834_v41  ;;  %871 = vadd.xlane.f32.xlu1 %v870_v43 }
 0x1d4   : > { %840 = vadd.xlane.f32.xlu0 %v839_v46 }
 0x1d8   : > { %876 = vadd.xlane.f32.xlu0 %v875_v47 }
 0x253   : > { %v826_v48 = vpop.xlane.xlu0 %825 }
 0x254   : > { %v831_v49 = vpop.xlane.xlu1 %830  ;;  %883 = vst.msk [vmem:[%s1494_s26] sm:$0xff] (!%p1192_p13), %vm882_vm1, %v826_v48 }
 0x255   : > { %884 = vst.msk [vmem:[%s1494_s26 + $0x8] sm:$0xff] (!%p1192_p13), %vm882_vm1, %v831_v49 }
 0x259   : > { %v867_v50 = vpop.xlane.xlu0 %866  ;;  %v862_v51 = vpop.xlane.xlu1 %861 }
 0x25a   : > { %887 = vst.msk [vmem:[%s1499_s18] sm:$0xff] (!%p1192_p13), %vm882_vm1, %v862_v51  ;;  %888 = vst.msk [vmem:[%s1499_s18 + $0x8] sm:$0xff] (!%p1192_p13), %vm882_vm1, %v867_v50 }
 0x25d   : > { %v836_v52 = vpop.xlane.xlu0 %835  ;;  %v872_v53 = vpop.xlane.xlu1 %871 }
 0x25e   : > { %885 = vst.msk [vmem:[%s1494_s26 + $0x10] sm:$0xff] (!%p1192_p13), %vm882_vm1, %v836_v52  ;;  %889 = vst.msk [vmem:[%s1499_s18 + $0x10] sm:$0xff] (!%p1192_p13), %vm882_vm1, %v872_v53 }
 0x25f   : > { %881 = sbr.rel (%p1192_p13) target bundleno = 615 (0x267), region = 94 }
 0x261   : > { %v841_v54 = vpop.xlane.xlu0 %840 }
 0x262   : > { %886 = vst.msk [vmem:[%s1494_s26 + $0x18] sm:$0xff] (!%p1192_p13), %vm882_vm1, %v841_v54 }
 0x265   : > { %v877_v55 = vpop.xlane.xlu0 %876 }
 0x266   : > { %890 = vst.msk [vmem:[%s1499_s18 + $0x18] sm:$0xff] %vm882_vm1, %v877_v55 }
 0x267 PF: > { %p1193_p0 = scmp.le.s32.totalorder %s1301_s29, 0 }
 0x268   : > { %v895_v56 = vld [vmem:[%s1494_s26] sm:$0xff] (!%p1193_p0)  ;;  %vm903_vm2 = vcmask (!%p1193_p0), 7168   ;;  %v896_v57 = vld [vmem:[%s1494_s26 + $0x8] sm:$0xff] (!%p1193_p0)  ;;  %v897_v58 = vld [vmem:[%s1494_s26 + $0x10] sm:$0xff] (!%p1193_p0) }
 0x269   : > { %894 = sbr.rel (%p1193_p0) target bundleno = 625 (0x271), region = 98  ;;  %v899_v59 = vadd.f32 (!%p1193_p0), %v895_v56, %v826_v48  ;;  %v900_v60 = vadd.f32 (!%p1193_p0), %v896_v57, %v831_v49  ;;  %v901_v61 = vadd.f32 (!%p1193_p0), %v897_v58, %v836_v52  ;;  %v908_v63 = vld [vmem:[%s1499_s18] sm:$0xff] (!%p1193_p0)  ;;  %v909_v0 = vld [vmem:[%s1499_s18 + $0x8] sm:$0xff] (!%p1193_p0)  ;;  %v910_v4 = vld [vmem:[%s1499_s18 + $0x10] sm:$0xff] (!%p1193_p0) }
 0x26a   : > { %v898_v62 = vld [vmem:[%s1494_s26 + $0x18] sm:$0xff] (!%p1193_p0)  ;;  %v912_v2 = vadd.f32 (!%p1193_p0), %v908_v63, %v862_v51  ;;  %v913_v3 = vadd.f32 (!%p1193_p0), %v909_v0, %v867_v50  ;;  %v914_v6 = vadd.f32 (!%p1193_p0), %v910_v4, %v872_v53 }
 0x26b   : > { %v902_v1 = vadd.f32 (!%p1193_p0), %v898_v62, %v841_v54  ;;  %904 = vst.msk [vmem:[%s1494_s26] sm:$0xff] (!%p1193_p0), %vm903_vm2, %v899_v59  ;;  %905 = vst.msk [vmem:[%s1494_s26 + $0x8] sm:$0xff] (!%p1193_p0), %vm903_vm2, %v900_v60 }
 0x26c   : > { %906 = vst.msk [vmem:[%s1494_s26 + $0x10] sm:$0xff] (!%p1193_p0), %vm903_vm2, %v901_v61  ;;  %916 = vst.msk [vmem:[%s1499_s18] sm:$0xff] (!%p1193_p0), %vm903_vm2, %v912_v2 }
 0x26d   : > { %v911_v5 = vld [vmem:[%s1499_s18 + $0x18] sm:$0xff] (!%p1193_p0)  ;;  %907 = vst.msk [vmem:[%s1494_s26 + $0x18] sm:$0xff] (!%p1193_p0), %vm903_vm2, %v902_v1  ;;  %917 = vst.msk [vmem:[%s1499_s18 + $0x8] sm:$0xff] (!%p1193_p0), %vm903_vm2, %v913_v3 }
 0x26e   : > { %v915_v7 = vadd.f32 (!%p1193_p0), %v911_v5, %v877_v55  ;;  %918 = vst.msk [vmem:[%s1499_s18 + $0x10] sm:$0xff] (!%p1193_p0), %vm903_vm2, %v914_v6 }
 0x270   : > { %919 = vst.msk [vmem:[%s1499_s18 + $0x18] sm:$0xff] %vm903_vm2, %v915_v7 }
 0x271 PF: > { %936 = sbr.rel (!%p1417_p6) target bundleno = 638 (0x27e), region = 102  ;;  %s1195_s26 = sshll.u32 (%p1417_p6), %s1301_s29, 2  ;;  %v954_v8 = vld [vmem:[%s1563_s25] sm:$0xff] (%p1417_p6)  ;;  %v956_v9 = vld [vmem:[%s1563_s25 + $0x8] sm:$0xff] (%p1417_p6)  ;;  %v958_v10 = vld [vmem:[%s1563_s25 + $0x10] sm:$0xff] (%p1417_p6) }
 0x272   : > { %s1196_s18 = sshll.u32 (%p1417_p6), %s1305_s30, 5  ;;  %v960_v32 = vld [vmem:[%s1563_s25 + $0x18] sm:$0xff] (%p1417_p6)  ;;  %v962_v11 = vld [vmem:[%s1563_s25 + $0x20] sm:$0xff] (%p1417_p6)  ;;  %v964_v12 = vld [vmem:[%s1563_s25 + $0x28] sm:$0xff] (%p1417_p6) }
 0x273   : > { %s939_s17 = sadd.s32 (%p1417_p6), %s1196_s18, %s1195_s26  ;;  %v966_v13 = vld [vmem:[%s1563_s25 + $0x30] sm:$0xff] (%p1417_p6)  ;;  %v968_v14 = vld [vmem:[%s1563_s25 + $0x38] sm:$0xff] (%p1417_p6)  ;;  %v970_v15 = vld [vmem:[%s1563_s25 + $0x40] sm:$0xff] (%p1417_p6) }
 0x274   : > { %s1197_s23 = sshll.u32 (%p1417_p6), %s939_s17, 3  ;;  %v972_v16 = vld [vmem:[%s1563_s25 + $0x48] sm:$0xff] (%p1417_p6)  ;;  %v974_v17 = vld [vmem:[%s1563_s25 + $0x50] sm:$0xff] (%p1417_p6)  ;;  %v976_v18 = vld [vmem:[%s1563_s25 + $0x58] sm:$0xff] (%p1417_p6) }
 0x275   : > { %s941_s27 = scalar_lea.vmem (%p1417_p6), %s1674_s6, %s1197_s23  ;;  %v978_v19 = vld [vmem:[%s1563_s25 + $0x60] sm:$0xff] (%p1417_p6)  ;;  %v980_v20 = vld [vmem:[%s1563_s25 + $0x68] sm:$0xff] (%p1417_p6)  ;;  %v982_v21 = vld [vmem:[%s1563_s25 + $0x70] sm:$0xff] (%p1417_p6) }
 0x276   : > { %955 = vst [vmem:[%s941_s27] sm:$0xff] (%p1417_p6), %v954_v8  ;;  %957 = vst [vmem:[%s941_s27 + $0x8] sm:$0xff] (%p1417_p6), %v956_v9  ;;  %v984_v22 = vld [vmem:[%s1563_s25 + $0x78] sm:$0xff] (%p1417_p6) }
 0x277   : > { %959 = vst [vmem:[%s941_s27 + $0x10] sm:$0xff] (%p1417_p6), %v958_v10  ;;  %961 = vst [vmem:[%s941_s27 + $0x18] sm:$0xff] (%p1417_p6), %v960_v32 }
 0x278   : > { %963 = vst [vmem:[%s941_s27 + $0x40] sm:$0xff] %v962_v11  ;;  %965 = vst [vmem:[%s941_s27 + $0x48] sm:$0xff] %v964_v12 }
 0x279   : > { %967 = vst [vmem:[%s941_s27 + $0x50] sm:$0xff] %v966_v13  ;;  %969 = vst [vmem:[%s941_s27 + $0x58] sm:$0xff] %v968_v14 }
 0x27a   : > { %971 = vst [vmem:[%s941_s27 + $0x80] sm:$0xff] %v970_v15  ;;  %973 = vst [vmem:[%s941_s27 + $0x88] sm:$0xff] %v972_v16 }
 0x27b   : > { %975 = vst [vmem:[%s941_s27 + $0x90] sm:$0xff] %v974_v17  ;;  %977 = vst [vmem:[%s941_s27 + $0x98] sm:$0xff] %v976_v18 }
 0x27c   : > { %979 = vst [vmem:[%s941_s27 + $0xc0] sm:$0xff] %v978_v19  ;;  %981 = vst [vmem:[%s941_s27 + $0xc8] sm:$0xff] %v980_v20 }
 0x27d   : > { %983 = vst [vmem:[%s941_s27 + $0xd0] sm:$0xff] %v982_v21  ;;  %985 = vst [vmem:[%s941_s27 + $0xd8] sm:$0xff] %v984_v22 }
 0x27e PF: > { %s19_s11 = sadd.s32 1, %s1317_s11   ;;  %s1685_s16 = sld [smem:[#allocation5_spill]] }
 0x27f   : > { %p16_p1 = scmp.ge.s32.totalorder %s19_s11, 6   ;;  %s1686_s27 = smov %s1297_s28 }
 0x280   : > { %s1687_s28 = smov %s1425_s21  ;;  %s1688_s29 = smov %s1309_s9 }
 0x281   : > { %s1689_s30 = smov %s1313_s10  ;;  %s1690_s9 = smov %s1693_s12 }
 0x282   :  { %18 = sbr.rel (!%p16_p1) target bundleno = 7 (0x7), region = 194 }
 0x284   : > { %s1691_s10 = smov %s1685_s16 }

// kernel: oanblock_forward.19
= control target key start
LH: loop header
LB: loop body
LE: loop exit
PB: predicated region body
PF: predicated region fallthrough
CT: control target
= control target key end

     0   :  { %s1100_s18 = smov 0   ;;  %s1390_s0 = inlined_call_operand.vmem [shape: f32[2,32,1024], index: 0, kind: input, shape index: {}]   ;;  %s1391_s1 = inlined_call_operand.vmem [shape: f32[2,32,1], index: 1, kind: input, shape index: {}]   ;;  %s1392_s2 = inlined_call_operand.vmem [shape: f32[2,32,1], index: 2, kind: input, shape index: {}]   ;;  %s1393_s3 = inlined_call_operand.vmem [shape: f32[8,32], index: 3, kind: input, shape index: {}]   ;;  %s1394_s4 = inlined_call_operand.vmem [shape: f32[8,1], index: 4, kind: input, shape index: {}]   ;;  %s1395_s5 = inlined_call_operand.vmem [shape: f32[2,32,8], index: 5, kind: output, shape index: {}]  }
   0x1 LB: > { %s989_s19 = sadd.s32 4294967295, %s1067_s18   ;;  %p993_p0 = scmp.ge.s32.totalorder %s1067_s18, 1  ;;  %s1067_s18 = sphi %s1100_s18, %s15_s18  }
   0x2   : > { %p207_p1 = scmp.lt.s32.totalorder %s1067_s18, 3 }
   0x4   : > { %p208_p2 = pnand %p993_p0, %p207_p1 }
   0x5   : > { %p245_p3 = scmp.lt.s32.totalorder (!%p208_p2), %s989_s19, 1  ;;  %v1069_v0 = vmov (!%p208_p2), 0   ;;  %v460_v9 = vld [vmem:[%s1394_s4] sm:$0xff] (!%p208_p2)  ;;  %vm466_vm0 = vcmask (!%p208_p2), 261120   ;;  %vm905_vm1 = vcmask (!%p208_p2), 64512  }
   0x6   : > { %211 = sbr.rel (%p208_p2) target bundleno = 981 (0x3d5), region = 40  ;;  %1042 = vset.pattern.permute.xlu1 (!%p208_p2), %v1069_v0  ;;  %1041 = vset.pattern.permute.xlu0 (!%p208_p2), %v1069_v0  ;;  %v442_v12 = vld [vmem:[%s1393_s3] sm:$0xff] (!%p208_p2) }
   0x7   : > { %502 = vmatprep.mubr.bf16.mxu0 (!%p208_p2), %v1069_v0  ;;  %543 = vmatprep.mubr.bf16.mxu1 (!%p208_p2), %v1069_v0  ;;  %v1157_v21 = vpack.c.bf16 (!%p208_p2), %v442_v12, %v442_v12 }
   0xd   : > { %s1397_s19 = smov (!%p245_p3, %s989_s19), 1 }
   0xe   : > { %s1112_s20 = sshll.u32 %s1397_s19, 5  ;;  %s1008_s29 = sshll.u32 %s1397_s19, 8 }
   0xf   : > { %s259_s23 = scalar_lea.vmem %s1392_s2, %s1112_s20  ;;  %s254_s26 = scalar_lea.vmem %s1391_s1, %s1112_s20 }
  0x10   : > { %v354_v1 = vld [vmem:[%s259_s23] sm:$0xff]  ;;  %v355_v3 = vld [vmem:[%s259_s23 + $0x8] sm:$0xff]  ;;  %v301_v5 = vld [vmem:[%s254_s26 + $0x18] sm:$0xff]  ;;  %s1128_s7 = scalar_lea.vmem %s1390_s0, %s1008_s29  ;;  %s264_s12 = scalar_lea.vmem %s1395_s5, %s1112_s20 }
  0x11   : > { %360 = vperm.xlu1 %1042, %v354_v1   ;;  %v298_v2 = vld [vmem:[%s254_s26] sm:$0xff]  ;;  %v299_v4 = vld [vmem:[%s254_s26 + $0x8] sm:$0xff]  ;;  %v300_v6 = vld [vmem:[%s254_s26 + $0x10] sm:$0xff] }
  0x12   : > { %304 = vperm.xlu0 %1041, %v298_v2   ;;  %v357_v7 = vld [vmem:[%s259_s23 + $0x18] sm:$0xff]  ;;  %v356_v8 = vld [vmem:[%s259_s23 + $0x10] sm:$0xff]  ;;  %v1131_v10 = vld [vmem:[%s1128_s7 + $0x8] sm:$0xff] }
  0x13   : > { %v1134_v11 = vld [vmem:[%s1128_s7 + $0x18] sm:$0xff]  ;;  %v1140_v13 = vld [vmem:[%s1128_s7] sm:$0xff]  ;;  %v1143_v14 = vld [vmem:[%s1128_s7 + $0x10] sm:$0xff] }
  0x14   : > { %v1146_v15 = vld [vmem:[%s1128_s7 + $0x28] sm:$0xff]  ;;  %v1149_v17 = vld [vmem:[%s1128_s7 + $0x38] sm:$0xff]  ;;  %v1152_v18 = vld [vmem:[%s1128_s7 + $0x20] sm:$0xff] }
  0x15   : > { %365 = vperm.xlu1 %1042, %v355_v3   ;;  %v1155_v19 = vld [vmem:[%s1128_s7 + $0x30] sm:$0xff]  ;;  %v1164_v26 = vld [vmem:[%s1128_s7 + $0x48] sm:$0xff]  ;;  %v1167_v27 = vld [vmem:[%s1128_s7 + $0x58] sm:$0xff] }
  0x16   : > { %309 = vperm.xlu0 %1041, %v299_v4   ;;  %v1176_v35 = vld [vmem:[%s1128_s7 + $0x40] sm:$0xff]  ;;  %v1179_v37 = vld [vmem:[%s1128_s7 + $0x50] sm:$0xff]  ;;  %v1184_v40 = vld [vmem:[%s1128_s7 + $0x68] sm:$0xff] }
  0x17   : > { %v1199_v49 = vld [vmem:[%s1128_s7 + $0xc8] sm:$0xff]  ;;  %v1202_v50 = vld [vmem:[%s1128_s7 + $0xd8] sm:$0xff]  ;;  %v1219_v60 = vld [vmem:[%s1128_s7 + $0x80] sm:$0xff] }
  0x18   : > { %v1209_v55 = vld [vmem:[%s1128_s7 + $0x88] sm:$0xff]  ;;  %v1212_v56 = vld [vmem:[%s1128_s7 + $0x98] sm:$0xff]  ;;  %v1222_v61 = vld [vmem:[%s1128_s7 + $0xc0] sm:$0xff] }
  0x19   : > { %319 = vperm.xlu1 %1042, %v301_v5  }
  0x1a   : > { %314 = vperm.xlu0 %1041, %v300_v6   ;;  %v1236_v6 = vld [vmem:[%s1128_s7 + $0x90] sm:$0xff] }
  0x1d   : > { %375 = vperm.xlu1 %1042, %v357_v7   ;;  %v1239_v7 = vld [vmem:[%s1128_s7 + $0xd0] sm:$0xff] }
  0x1e   : > { %370 = vperm.xlu0 %1041, %v356_v8  }
  0x22   : > { %463 = vperm.xlu0 %1041, %v460_v9  }
  0x90   : > { %v361_v16 = vpop.permute.xlu1 %360 }
  0x91   : > { %v305_v20 = vpop.permute.xlu0 %304 }
  0x92   : > { %v323_v22 = vmul.f32 %v305_v20, %v1131_v10  ;;  %v325_v23 = vmul.f32 %v305_v20, %v1134_v11  ;;  %v322_v24 = vmul.f32 %v305_v20, %v1140_v13  ;;  %v324_v25 = vmul.f32 %v305_v20, %v1143_v14 }
  0x93   : > { %v327_v28 = vmul.f32 %v305_v20, %v1146_v15  ;;  %v329_v29 = vmul.f32 %v305_v20, %v1149_v17  ;;  %v326_v30 = vmul.f32 %v305_v20, %v1152_v18  ;;  %v328_v31 = vmul.f32 %v305_v20, %v1155_v19 }
  0x94   : > { %v1173_v32 = vpop.permute.xlu1 %365  ;;  %v379_v33 = vadd.f32 %v361_v16, %v323_v22  ;;  %v381_v34 = vadd.f32 %v361_v16, %v325_v23  ;;  %v378_v36 = vadd.f32 %v361_v16, %v322_v24  ;;  %v380_v38 = vadd.f32 %v361_v16, %v324_v25 }
  0x95   : > { %v1181_v39 = vpop.permute.xlu0 %309  ;;  %v1186_v41 = vadd.f32 %v361_v16, %v327_v28  ;;  %v1188_v42 = vadd.f32 %v361_v16, %v329_v29  ;;  %v1190_v43 = vadd.f32 %v361_v16, %v326_v30  ;;  %v1192_v44 = vadd.f32 %v361_v16, %v328_v31 }
  0x96   : > { %v331_v45 = vmul.f32 %v1181_v39, %v1164_v26  ;;  %v411_v46 = vmax.f32 %v379_v33, 0.0  ;;  %v333_v47 = vmul.f32 %v1181_v39, %v1167_v27  ;;  %v413_v48 = vmax.f32 %v381_v34, 0.0 }
  0x97   : > { %v330_v51 = vmul.f32 %v1181_v39, %v1176_v35  ;;  %v410_v52 = vmax.f32 %v378_v36, 0.0  ;;  %v332_v53 = vmul.f32 %v1181_v39, %v1179_v37  ;;  %v412_v54 = vmax.f32 %v380_v38, 0.0 }
  0x98   : > { %v1214_v57 = vpop.permute.xlu1 %319  ;;  %v387_v58 = vadd.f32 %v1173_v32, %v331_v45  ;;  %v389_v59 = vadd.f32 %v1173_v32, %v333_v47  ;;  %v335_v62 = vmul.f32 %v1181_v39, %v1184_v40  ;;  %v415_v63 = vmax.f32 %v1186_v41, 0.0 }
  0x99   : > { %v1227_v1 = vpop.permute.xlu0 %314  ;;  %v386_v2 = vadd.f32 %v1173_v32, %v330_v51  ;;  %v388_v3 = vadd.f32 %v1173_v32, %v332_v53  ;;  %v347_v4 = vmul.f32 %v1214_v57, %v1199_v49  ;;  %v349_v5 = vmul.f32 %v1214_v57, %v1202_v50  ;;  %v1263_v51 = vld [vmem:[%s1128_s7 + $0x78] sm:$0xff] }
  0x9a   : > { %v419_v8 = vmax.f32 %v387_v58, 0.0  ;;  %v421_v9 = vmax.f32 %v389_v59, 0.0  ;;  %v339_v12 = vmul.f32 %v1227_v1, %v1209_v55  ;;  %v341_v16 = vmul.f32 %v1227_v1, %v1212_v56 }
  0x9b   : > { %v418_v20 = vmax.f32 %v386_v2, 0.0  ;;  %v420_v22 = vmax.f32 %v388_v3, 0.0  ;;  %v338_v23 = vmul.f32 %v1227_v1, %v1219_v60  ;;  %v346_v24 = vmul.f32 %v1214_v57, %v1222_v61  ;;  %v1269_v2 = vld [vmem:[%s1128_s7 + $0x60] sm:$0xff] }
  0x9c   : > { %v1249_v25 = vpop.permute.xlu1 %375  ;;  %v445_v28 = vpack.c.bf16 %v419_v8, %v411_v46  ;;  %v447_v29 = vpack.c.bf16 %v421_v9, %v413_v48  ;;  %v340_v30 = vmul.f32 %v1227_v1, %v1236_v6  ;;  %v348_v31 = vmul.f32 %v1214_v57, %v1239_v7 }
  0x9d   : > { %v1255_v33 = vpop.permute.xlu0 %370  ;;  %v444_v34 = vpack.c.bf16 %v418_v20, %v410_v52  ;;  %v446_v36 = vpack.c.bf16 %v420_v22, %v412_v54  ;;  %v403_v38 = vadd.f32 %v1249_v25, %v347_v4  ;;  %v405_v45 = vadd.f32 %v1249_v25, %v349_v5  ;;  %v1276_v20 = vld [vmem:[%s1128_s7 + $0x70] sm:$0xff] }
  0x9e   : > { %470 = vmatprep.subr.bf16.mxu0 %v445_v28  ;;  %511 = vmatprep.subr.bf16.mxu1 %v447_v29  ;;  %v395_v46 = vadd.f32 %v1255_v33, %v339_v12  ;;  %v397_v47 = vadd.f32 %v1255_v33, %v341_v16  ;;  %v394_v48 = vadd.f32 %v1255_v33, %v338_v23  ;;  %v417_v53 = vmax.f32 %v1188_v42, 0.0  ;;  %v1281_v29 = vld [vmem:[%s1128_s7 + $0xa8] sm:$0xff] }
  0x9f   : > { %471 = vmatpush1.bf16.msra.mxu0 %v444_v34  ;;  %512 = vmatpush1.bf16.msra.mxu1 %v446_v36  ;;  %v435_v52 = vmax.f32 %v403_v38, 0.0  ;;  %v437_v54 = vmax.f32 %v405_v45, 0.0  ;;  %v402_v58 = vadd.f32 %v1249_v25, %v346_v24  ;;  %v396_v59 = vadd.f32 %v1255_v33, %v340_v30  ;;  %v1284_v30 = vld [vmem:[%s1128_s7 + $0xe8] sm:$0xff]  ;;  %v1289_v38 = vld [vmem:[%s1128_s7 + $0xb8] sm:$0xff] }
  0xa0   : > { %v427_v3 = vmax.f32 %v395_v46, 0.0  ;;  %v429_v4 = vmax.f32 %v397_v47, 0.0  ;;  %v426_v5 = vmax.f32 %v394_v48, 0.0  ;;  %v404_v8 = vadd.f32 %v1249_v25, %v348_v31  ;;  %v1292_v45 = vld [vmem:[%s1128_s7 + $0xf8] sm:$0xff] }
  0xa1   : > { %v434_v42 = vmax.f32 %v402_v58, 0.0  ;;  %v428_v9 = vmax.f32 %v396_v59, 0.0  ;;  %v391_v12 = vadd.f32 %v1173_v32, %v335_v62  ;;  %v337_v16 = vmul.f32 %v1181_v39, %v1263_v51 }
  0xa2   : > { %v453_v22 = vpack.c.bf16 %v435_v52, %v427_v3  ;;  %v455_v23 = vpack.c.bf16 %v437_v54, %v429_v4  ;;  %v436_v24 = vmax.f32 %v404_v8, 0.0  ;;  %v334_v28 = vmul.f32 %v1181_v39, %v1269_v2  ;;  %v1299_v54 = vld [vmem:[%s1128_s7 + $0xa0] sm:$0xff] }
  0xa3   : > { %v452_v31 = vpack.c.bf16 %v434_v42, %v426_v5  ;;  %v423_v34 = vmax.f32 %v391_v12, 0.0  ;;  %v393_v62 = vadd.f32 %v1173_v32, %v337_v16  ;;  %v414_v36 = vmax.f32 %v1190_v43, 0.0  ;;  %v1313_v5 = vld [vmem:[%s1128_s7 + $0xe0] sm:$0xff]  ;;  %v1320_v12 = vld [vmem:[%s1128_s7 + $0xb0] sm:$0xff] }
  0xa4   : > { %472 = vmatprep.subr.bf16.mxu0 %v453_v22  ;;  %513 = vmatprep.subr.bf16.mxu1 %v455_v23  ;;  %v454_v46 = vpack.c.bf16 %v436_v24, %v428_v9  ;;  %v390_v47 = vadd.f32 %v1173_v32, %v334_v28  ;;  %v336_v48 = vmul.f32 %v1181_v39, %v1276_v20  ;;  %v416_v52 = vmax.f32 %v1192_v44, 0.0  ;;  %v1327_v24 = vld [vmem:[%s1128_s7 + $0xf0] sm:$0xff] }
  0xa5   : > { %473 = vmatpush1.bf16.msra.mxu0 %v452_v31  ;;  %v449_v43 = vpack.c.bf16 %v423_v34, %v415_v63  ;;  %v425_v58 = vmax.f32 %v393_v62, 0.0  ;;  %v343_v59 = vmul.f32 %v1227_v1, %v1281_v29  ;;  %v351_v3 = vmul.f32 %v1214_v57, %v1284_v30 }
  0xa6   : > { %514 = vmatpush1.bf16.msra.mxu1 %v454_v46  ;;  %v422_v4 = vmax.f32 %v390_v47, 0.0  ;;  %v392_v39 = vadd.f32 %v1173_v32, %v336_v48  ;;  %v345_v44 = vmul.f32 %v1227_v1, %v1289_v38  ;;  %v353_v41 = vmul.f32 %v1214_v57, %v1292_v45 }
  0xa7   : > { %552 = vmatprep.subr.bf16.mxu0 %v449_v43  ;;  %v451_v63 = vpack.c.bf16 %v425_v58, %v417_v53  ;;  %v399_v8 = vadd.f32 %v1255_v33, %v343_v59  ;;  %v407_v42 = vadd.f32 %v1249_v25, %v351_v3  ;;  %v342_v9 = vmul.f32 %v1227_v1, %v1299_v54 }
  0xa8   : > { %1002 = vmatmul.mubr.msk.bf16.vlgmr.msra.gmra.mrb[0].mxu0 %vm466_vm0, %v1157_v21  ;;  %v448_v32 = vpack.c.bf16 %v422_v4, %v414_v36  ;;  %v424_v16 = vmax.f32 %v392_v39, 0.0  ;;  %v401_v22 = vadd.f32 %v1255_v33, %v345_v44  ;;  %v409_v23 = vadd.f32 %v1249_v25, %v353_v41 }
  0xa9   : > { %593 = vmatprep.subr.bf16.mxu1 %v451_v63  ;;  %1003 = vmatmul.mubr.msk.bf16.vlgmr.msra.gmra.mrb[0].mxu1 %vm466_vm0, %v1157_v21  ;;  %v431_v53 = vmax.f32 %v399_v8, 0.0  ;;  %v439_v28 = vmax.f32 %v407_v42, 0.0  ;;  %v350_v31 = vmul.f32 %v1214_v57, %v1313_v5  ;;  %v398_v34 = vadd.f32 %v1255_v33, %v342_v9 }
  0xaa   : > { %553 = vmatpush1.bf16.msra.mxu0 %v448_v32  ;;  %v450_v62 = vpack.c.bf16 %v424_v16, %v416_v52  ;;  %v433_v36 = vmax.f32 %v401_v22, 0.0  ;;  %v441_v46 = vmax.f32 %v409_v23, 0.0  ;;  %v344_v47 = vmul.f32 %v1227_v1, %v1320_v12  ;;  %584 = vmatprep.mubr.bf16.mxu0 %v1069_v0  ;;  %v464_v16 = vpop.permute.xlu0 %463 }
  0xab   : > { %v457_v48 = vpack.c.bf16 %v439_v28, %v431_v53  ;;  %v406_v43 = vadd.f32 %v1249_v25, %v350_v31  ;;  %v430_v58 = vmax.f32 %v398_v34, 0.0  ;;  %v352_v59 = vmul.f32 %v1214_v57, %v1327_v24  ;;  %625 = vmatprep.mubr.bf16.mxu1 %v1069_v0 }
  0xac   : > { %594 = vmatpush1.bf16.msra.mxu1 %v450_v62  ;;  %v459_v3 = vpack.c.bf16 %v441_v46, %v433_v36  ;;  %v400_v52 = vadd.f32 %v1255_v33, %v344_v47 }
  0xad   : > { %554 = vmatprep.subr.bf16.mxu0 %v457_v48  ;;  %v438_v4 = vmax.f32 %v406_v43, 0.0  ;;  %v408_v39 = vadd.f32 %v1249_v25, %v352_v59 }
  0xae   : > { %595 = vmatprep.subr.bf16.mxu1 %v459_v3  ;;  %v432_v1 = vmax.f32 %v400_v52, 0.0 }
  0xaf   : > { %v456_v44 = vpack.c.bf16 %v438_v4, %v430_v58  ;;  %v440_v41 = vmax.f32 %v408_v39, 0.0 }
  0xb1   : > { %555 = vmatpush1.bf16.msra.mxu0 %v456_v44  ;;  %v458_v63 = vpack.c.bf16 %v440_v41, %v432_v1 }
  0xb3   : > { %596 = vmatpush1.bf16.msra.mxu1 %v458_v63 }
  0xb4   : > { %1004 = vmatmul.mubr.msk.bf16.vlgmr.msra.gmra.mrb[4].mxu0 %vm466_vm0, %v1157_v21 }
  0xb6   : > { %1005 = vmatmul.mubr.msk.bf16.vlgmr.msra.gmra.mrb[4].mxu1 %vm466_vm0, %v1157_v21 }
 0x17b   : > { %v504_v0 = vpop.f32.mrb[0].mxu0 }
 0x17c   : > { %v545_v57 = vpop.f32.mrb[0].mxu1  ;;  %v506_v33 = vpop.f32.mrb[1].mxu0  ;;  %v505_v23 = vadd.f32 %v504_v0, %v464_v16 }
 0x17d   : > { %v547_v8 = vpop.f32.mrb[1].mxu1  ;;  %v508_v42 = vpop.f32.mrb[2].mxu0  ;;  %v507_v31 = vadd.f32 %v506_v33, %v464_v16  ;;  %v546_v46 = vadd.f32 %v545_v57, %v464_v16 }
 0x17e   : > { %v549_v9 = vpop.f32.mrb[2].mxu1  ;;  %v509_v25 = vpop.f32.mrb[3].mxu0  ;;  %v548_v58 = vadd.f32 %v547_v8, %v464_v16 }
 0x17f   : > { %v550_v32 = vpop.f32.mrb[3].mxu1 }
 0x187   : > { %v586_v22 = vpop.f32.mrb[4].mxu0 }
 0x188   : > { %v587_v53 = vadd.f32 %v586_v22, %v464_v16  ;;  %v588_v28 = vpop.f32.mrb[5].mxu0 }
 0x189   : > { %v627_v34 = vpop.f32.mrb[4].mxu1  ;;  %v589_v62 = vadd.f32 %v588_v28, %v464_v16  ;;  %v590_v36 = vpop.f32.mrb[6].mxu0 }
 0x18a   : > { %v634_v47 = vmax.f32 %v505_v23, %v587_v53  ;;  %v628_v21 = vadd.f32 %v627_v34, %v464_v16  ;;  %v629_v48 = vpop.f32.mrb[5].mxu1  ;;  %v591_v43 = vpop.f32.mrb[7].mxu0 }
 0x18b   : > { %v635_v59 = vmax.f32 %v507_v31, %v589_v62  ;;  %v630_v3 = vadd.f32 %v629_v48, %v464_v16  ;;  %v631_v52 = vpop.f32.mrb[6].mxu1 }
 0x18c   : > { %v636_v4 = vmax.f32 %v546_v46, %v628_v21  ;;  %v632_v39 = vpop.f32.mrb[7].mxu1 }
 0x18d   : > { %v637_v1 = vmax.f32 %v548_v58, %v630_v3  ;;  %v638_v44 = vmax.f32 %v634_v47, %v635_v59 }
 0x18f   : > { %v639_v41 = vmax.f32 %v636_v4, %v637_v1 }
 0x191   : > { %v640_v63 = vmax.f32 %v638_v44, %v639_v41 }
 0x193   : > { %641 = vmax.xlane.f32.xlu1 %v640_v63 }
 0x220   : > { %v642_v0 = vpop.xlane.xlu1 %641 }
 0x221   : > { %v643_v33 = vsub.f32 %v505_v23, %v642_v0  ;;  %v644_v42 = vsub.f32 %v507_v31, %v642_v0  ;;  %v645_v9 = vsub.f32 %v546_v46, %v642_v0  ;;  %v646_v57 = vsub.f32 %v548_v58, %v642_v0 }
 0x222   : > { %v647_v22 = vsub.f32 %v587_v53, %v642_v0  ;;  %v648_v8 = vsub.f32 %v589_v62, %v642_v0  ;;  %v649_v36 = vsub.f32 %v628_v21, %v642_v0  ;;  %v650_v48 = vsub.f32 %v630_v3, %v642_v0 }
 0x223   : > { %v651_v25 = vmul.f32 1.442695, %v643_v33  ;;  %v653_v32 = vmul.f32 1.442695, %v644_v42  ;;  %v655_v28 = vmul.f32 1.442695, %v645_v9  ;;  %v686_v0 = vpack.c.bf16 %v1164_v26, %v1131_v10 }
 0x224   : > { %v657_v16 = vmul.f32 1.442695, %v646_v57  ;;  %v659_v34 = vmul.f32 1.442695, %v647_v22  ;;  %v661_v47 = vmul.f32 1.442695, %v648_v8  ;;  %v690_v33 = vpack.c.bf16 %v1184_v40, %v1146_v15 }
 0x225   : > { %1043 = vpow2.f32 %v651_v25  ;;  %v663_v43 = vmul.f32 1.442695, %v649_v36  ;;  %v665_v23 = vmul.f32 1.442695, %v650_v48  ;;  %741 = vmatprep.mubr.bf16.mxu1 %v686_v0  ;;  %v685_v48 = vpack.c.bf16 %v1176_v35, %v1140_v13 }
 0x226   : > { %1045 = vpow2.f32 %v653_v32  ;;  %839 = vmatprep.mubr.bf16.mxu0 %v690_v33  ;;  %v693_v13 = vpack.c.bf16 %v1222_v61, %v1219_v60  ;;  %v688_v35 = vpack.c.bf16 %v1167_v27, %v1134_v11  ;;  %v691_v60 = vpack.c.bf16 %v1276_v20, %v1155_v19 }
 0x227   : > { %1047 = vpow2.f32 %v655_v28  ;;  %v696_v61 = vpack.c.bf16 %v1202_v50, %v1212_v56  ;;  %v700_v11 = vpack.c.bf16 %v1292_v45, %v1289_v38  ;;  %v699_v27 = vpack.c.bf16 %v1327_v24, %v1320_v12 }
 0x228   : > { %1049 = vpow2.f32 %v657_v16 }
 0x229   : > { %1051 = vpow2.f32 %v659_v34 }
 0x22a   : > { %1053 = vpow2.f32 %v661_v47 }
 0x22b   : > { %1055 = vpow2.f32 %v663_v43  ;;  %v689_v43 = vpack.c.bf16 %v1269_v2, %v1152_v18  ;;  %v697_v18 = vpack.c.bf16 %v1313_v5, %v1299_v54 }
 0x22c   : > { %1057 = vpow2.f32 %v665_v23  ;;  %v694_v23 = vpack.c.bf16 %v1199_v49, %v1209_v55  ;;  %v692_v49 = vpack.c.bf16 %v1263_v51, %v1149_v17  ;;  %v687_v55 = vpack.c.bf16 %v1179_v37, %v1143_v14 }
 0x22d   : > { %v695_v17 = vpack.c.bf16 %v1239_v7, %v1236_v6 }
 0x22f   : > { %v1044_v31 = vpop.eup %1043 }
 0x230   : > { %v1046_v46 = vpop.eup %1045 }
 0x231   : > { %v667_v58 = vadd.f32 %v1046_v46, %v1044_v31  ;;  %v1048_v53 = vpop.eup %1047 }
 0x232   : > { %v1050_v62 = vpop.eup %1049 }
 0x233   : > { %v668_v59 = vadd.f32 %v1048_v53, %v667_v58  ;;  %v1052_v4 = vpop.eup %1051 }
 0x234   : > { %v1054_v1 = vpop.eup %1053 }
 0x235   : > { %v669_v52 = vadd.f32 %v1050_v62, %v668_v59  ;;  %v1056_v44 = vpop.eup %1055 }
 0x236   : > { %v1058_v3 = vpop.eup %1057 }
 0x237   : > { %v670_v39 = vadd.f32 %v1052_v4, %v669_v52 }
 0x239   : > { %v671_v21 = vadd.f32 %v1054_v1, %v670_v39 }
 0x23b   : > { %v672_v41 = vadd.f32 %v1056_v44, %v671_v21 }
 0x23d   : > { %v673_v63 = vadd.f32 %v1058_v3, %v672_v41 }
 0x23f   : > { %674 = vadd.xlane.f32.xlu0 %v673_v63 }
 0x2cc   : > { %v675_v42 = vpop.xlane.xlu0 %674 }
 0x2cd   : > { %1059 = vrcp.f32 %v675_v42 }
 0x2d7   : > { %v1060_v9 = vpop.eup %1059 }
 0x2d8   : > { %v678_v57 = vmul.f32 %v1060_v9, %v1046_v46  ;;  %v682_v25 = vmul.f32 %v1060_v9, %v1054_v1  ;;  %v677_v32 = vmul.f32 %v1060_v9, %v1044_v31  ;;  %v681_v22 = vmul.f32 %v1060_v9, %v1052_v4 }
 0x2d9   : > { %v680_v28 = vmul.f32 %v1060_v9, %v1050_v62  ;;  %v684_v8 = vmul.f32 %v1060_v9, %v1058_v3  ;;  %v679_v15 = vmul.f32 %v1060_v9, %v1048_v53  ;;  %v683_v40 = vmul.f32 %v1060_v9, %v1056_v44 }
 0x2da   : > { %v702_v16 = vpack.c.bf16 %v678_v57, %v678_v57  ;;  %v706_v34 = vpack.c.bf16 %v682_v25, %v682_v25  ;;  %v701_v36 = vpack.c.bf16 %v677_v32, %v677_v32  ;;  %v705_v47 = vpack.c.bf16 %v681_v22, %v681_v22 }
 0x2db   : > { %v704_v10 = vpack.c.bf16 %v680_v28, %v680_v28  ;;  %v708_v26 = vpack.c.bf16 %v684_v8, %v684_v8  ;;  %v698_v31 = vpack.c.bf16 %v1284_v30, %v1281_v29  ;;  %v703_v46 = vpack.c.bf16 %v679_v15, %v679_v15 }
 0x2dc   : > { %709 = vmatprep.subr.bf16.mxu1 %v702_v16  ;;  %807 = vmatprep.subr.bf16.mxu0 %v706_v34  ;;  %v707_v58 = vpack.c.bf16 %v683_v40, %v683_v40 }
 0x2dd   : > { %710 = vmatpush1.bf16.xpose.msra.mxu1 %v701_v36  ;;  %808 = vmatpush1.bf16.xpose.msra.mxu0 %v705_v47 }
 0x2de   : > { %758 = vmatprep.subr.bf16.mxu1 %v704_v10  ;;  %856 = vmatprep.subr.bf16.mxu0 %v708_v26 }
 0x2e4   : > { %742 = vmatmul.mubr.bf16.vlgmr.msra.gmra.mrb[8].mxu1 %v685_v48  ;;  %840 = vmatmul.mubr.bf16.vlgmr.msra.gmra.mrb[8].mxu0 %v689_v43 }
 0x2e5   : > { %759 = vmatpush1.bf16.xpose.msra.mxu1 %v703_v46  ;;  %857 = vmatpush1.bf16.xpose.msra.mxu0 %v707_v58 }
 0x2e6   : > { %749 = vmatprep.mubr.bf16.mxu1 %v694_v23  ;;  %847 = vmatprep.mubr.bf16.mxu0 %v698_v31 }
 0x2ec   : > { %750 = vmatmul.mubr.bf16.gmra.mrb[12].mxu1 %v693_v13  ;;  %848 = vmatmul.mubr.bf16.gmra.mrb[12].mxu0 %v697_v18 }
 0x2ed   : > { %790 = vmatprep.mubr.bf16.mxu1 %v688_v35  ;;  %888 = vmatprep.mubr.bf16.mxu0 %v692_v49 }
 0x2f4   : > { %791 = vmatmul.mubr.bf16.vlgmr.msra.gmra.mrb[8].mxu1 %v687_v55  ;;  %889 = vmatmul.mubr.bf16.vlgmr.msra.gmra.mrb[8].mxu0 %v691_v60 }
 0x2f5   : > { %798 = vmatprep.mubr.bf16.mxu1 %v696_v61  ;;  %896 = vmatprep.mubr.bf16.mxu0 %v700_v11 }
 0x2fc   : > { %799 = vmatmul.mubr.bf16.gmra.mrb[12].mxu1 %v695_v17  ;;  %897 = vmatmul.mubr.bf16.gmra.mrb[12].mxu0 %v699_v27 }
 0x3c7   : > { %v792_v14 = vpop.f32.mrb[8].mxu1  ;;  %v890_v19 = vpop.f32.mrb[8].mxu0 }
 0x3c8   : > { %v1012_v37 = vadd.f32 %v890_v19, %v792_v14  ;;  %v794_v50 = vpop.f32.mrb[9].mxu1  ;;  %v892_v56 = vpop.f32.mrb[9].mxu0 }
 0x3c9   : > { %v795_v51 = vpop.f32.mrb[10].mxu1  ;;  %v893_v2 = vpop.f32.mrb[10].mxu0 }
 0x3ca   : > { %906 = vst.msk [vmem:[%s264_s12] sm:$0xff] %vm905_vm1, %v1012_v37  ;;  %v1013_v6 = vadd.f32 %v893_v2, %v795_v51  ;;  %v797_v7 = vpop.f32.mrb[11].mxu1  ;;  %v895_v20 = vpop.f32.mrb[11].mxu0 }
 0x3cc   : > { %907 = vst.msk [vmem:[%s264_s12 + $0x8] sm:$0xff] %vm905_vm1, %v1013_v6 }
 0x3cf   : > { %v800_v29 = vpop.f32.mrb[12].mxu1  ;;  %v898_v30 = vpop.f32.mrb[12].mxu0 }
 0x3d0   : > { %v1014_v38 = vadd.f32 %v898_v30, %v800_v29  ;;  %v802_v45 = vpop.f32.mrb[13].mxu1  ;;  %v900_v54 = vpop.f32.mrb[13].mxu0 }
 0x3d1   : > { %v803_v5 = vpop.f32.mrb[14].mxu1  ;;  %v901_v12 = vpop.f32.mrb[14].mxu0 }
 0x3d2   : > { %908 = vst.msk [vmem:[%s264_s12 + $0x10] sm:$0xff] %vm905_vm1, %v1014_v38  ;;  %v1015_v24 = vadd.f32 %v901_v12, %v803_v5  ;;  %v805_v53 = vpop.f32.mrb[15].mxu1  ;;  %v903_v59 = vpop.f32.mrb[15].mxu0 }
 0x3d4   : > { %909 = vst.msk [vmem:[%s264_s12 + $0x18] sm:$0xff] %vm905_vm1, %v1015_v24 }
 0x3d5 PF: > { %s15_s18 = sadd.s32 1, %s1067_s18  }
 0x3d6   : > { %p12_p4 = scmp.ge.s32.totalorder %s15_s18, 4  }
 0x3d8   :  { %14 = sbr.rel (!%p12_p4) target bundleno = 1 (0x1), region = 76 }

// kernel: oanblock_forward.15
= control target key start
LH: loop header
LB: loop body
LE: loop exit
PB: predicated region body
PF: predicated region fallthrough
CT: control target
= control target key end

     0   :  { %s1452_s0 = inlined_call_operand.vmem [shape: f32[2,32,1024], index: 0, kind: input, shape index: {}]   ;;  %s1453_s1 = inlined_call_operand.vmem [shape: f32[2,32,1], index: 1, kind: input, shape index: {}]   ;;  %s1454_s2 = inlined_call_operand.vmem [shape: f32[2,32,1], index: 2, kind: input, shape index: {}]   ;;  %s1455_s3 = inlined_call_operand.vmem [shape: f32[32,32], index: 3, kind: input, shape index: {}]   ;;  %s1456_s4 = inlined_call_operand.vmem [shape: f32[32,1], index: 4, kind: input, shape index: {}]   ;;  %s1457_s5 = inlined_call_operand.vmem [shape: f32[2,32,1024], index: 5, kind: output, shape index: {0}]   ;;  %s1458_s6 = inlined_call_operand.vmem [shape: f32[2,32,1], index: 6, kind: output, shape index: {1}]   ;;  %s1459_s7 = inlined_call_operand.vmem [shape: f32[2,32,1], index: 7, kind: output, shape index: {2}]  }
   0x1   :  { %1461 = sst [smem:[#allocation5_spill]] %s1452_s0 }
   0x2   :  { %s1200_s24 = smov 0   ;;  %s1202_s25 = smov 0  }
   0x3   :  { %s1204_s26 = smov 0   ;;  %s1206_s27 = smov 0  }
   0x4   :  { %s1208_s28 = smov 0   ;;  %s1210_s29 = smov 0  }
   0x5   :  { %s1212_s30 = smov 0  }
   0x6 LB: > { %s27_s8 = sadd.s32 1, %s1149_s28  ;;  %s30_s9 = sadd.s32 1, %s1153_s29  ;;  %s1157_s30 = sphi %s1212_s30, %s18_s30   ;;  %s1153_s29 = sphi %s1210_s29, %s1471_s29   ;;  %s1149_s28 = sphi %s1208_s28, %s1470_s28   ;;  %s1145_s27 = sphi %s1206_s27, %s1469_s27   ;;  %s1141_s26 = sphi %s1204_s26, %s1468_s26   ;;  %s1137_s25 = sphi %s1202_s25, %s1467_s25   ;;  %s1133_s24 = sphi %s1200_s24, %s1466_s24  }
   0x7   : > { %p28_p0 = scmp.ge.s32.totalorder %s27_s8, 2  ;;  %s1009_s10 = sadd.s32 4294967295, %s1157_s30  }
   0x8   : > { %p46_p1 = scmp.ne.s32.totalorder %s1137_s25, %s1133_s24  ;;  %p47_p2 = scmp.eq.s32.totalorder %s1157_s30, 0 }
   0x9   : > { %s1473_s8 = smov (%p28_p0, %s27_s8), 0  ;;  %s1475_s9 = smov (!%p28_p0, %s30_s9), %s1153_s29 }
   0xa   : > { %p32_p3 = scmp.ge.s32.totalorder %s1475_s9, 2  ;;  %p172_p4 = scmp.eq.s32.totalorder %s1009_s10, 3 }
   0xb   : > { %s35_s11 = ssub.s32 %s1149_s28, %s1473_s8  ;;  %p48_p5 = por %p47_p2, %p46_p1 }
   0xc   : > { %s1477_s9 = smov (%p32_p3, %s1475_s9), 0  ;;  %p1248_p6 = por %p172_p4, %p46_p1 }
   0xd   : > { %1462 = sst [smem:[#allocation4_spill]] %s1477_s9  ;;  %s34_s13 = ssub.s32 %s1153_s29, %s1477_s9 }
   0xe   : > { %s36_s14 = sor.u32 %s35_s11, %s34_s13  ;;  %s39_s15 = sadd.s32 1, %s1137_s25 }
   0xf   : > { %p37_p7 = scmp.eq.s32.totalorder %s36_s14, 0  ;;  %p1012_p8 = scmp.ge.s32.totalorder %s1157_s30, 4 }
  0x11   : > { %s1256_s16 = scalar_select %p37_p7, %s1137_s25, %s39_s15  }
  0x12   : > { %252 = sbr.rel (%p1012_p8) target bundleno = 43 (0x2b), region = 24 }
  0x19   : > { %255 = sbr.rel (!%p48_p5) target bundleno = 43 (0x2b), region = 28  ;;  %s257_s17 = sand.u32 (%p48_p5), 1, %s1137_s25  }
  0x1a   : > { %s1014_s18 = sshll.u32 (%p48_p5), %s1149_s28, 2  ;;  %s1013_s19 = sshll.u32 (%p48_p5), %s257_s17, 7 }
  0x1b   : > { %s1015_s20 = sshll.u32 (%p48_p5), %s1153_s29, 5  ;;  %s1464_s0 = sld [smem:[#allocation5_spill]] (%p48_p5) }
  0x1c   : > { %s262_s21 = sadd.s32 (%p48_p5), %s1015_s20, %s1014_s18  ;;  %s259_s13 = scalar_lea.vmem (%p48_p5), [#allocation2], %s1013_s19 }
  0x1d   : > { %s1016_s22 = sshll.u32 (%p48_p5), %s262_s21, 3 }
  0x21   : > { %s1265_s11 = scalar_lea.vmem %s1464_s0, %s1016_s22 }
  0x22   : > { %v277_v0 = vld [vmem:[%s1265_s11] sm:$0xff]  ;;  %v279_v1 = vld [vmem:[%s1265_s11 + $0x8] sm:$0xff]  ;;  %v281_v2 = vld [vmem:[%s1265_s11 + $0x10] sm:$0xff] }
  0x23   : > { %278 = vst [vmem:[%s259_s13] sm:$0xff] %v277_v0  ;;  %280 = vst [vmem:[%s259_s13 + $0x8] sm:$0xff] %v279_v1  ;;  %v283_v3 = vld [vmem:[%s1265_s11 + $0x18] sm:$0xff]  ;;  %v285_v4 = vld [vmem:[%s1265_s11 + $0x40] sm:$0xff] }
  0x24   : > { %282 = vst [vmem:[%s259_s13 + $0x10] sm:$0xff] %v281_v2  ;;  %v287_v5 = vld [vmem:[%s1265_s11 + $0x48] sm:$0xff]  ;;  %284 = vst [vmem:[%s259_s13 + $0x18] sm:$0xff] %v283_v3  ;;  %v289_v6 = vld [vmem:[%s1265_s11 + $0x50] sm:$0xff] }
  0x25   : > { %286 = vst [vmem:[%s259_s13 + $0x20] sm:$0xff] %v285_v4  ;;  %288 = vst [vmem:[%s259_s13 + $0x28] sm:$0xff] %v287_v5  ;;  %v291_v7 = vld [vmem:[%s1265_s11 + $0x58] sm:$0xff]  ;;  %v293_v8 = vld [vmem:[%s1265_s11 + $0x80] sm:$0xff] }
  0x26   : > { %290 = vst [vmem:[%s259_s13 + $0x30] sm:$0xff] %v289_v6  ;;  %292 = vst [vmem:[%s259_s13 + $0x38] sm:$0xff] %v291_v7  ;;  %v295_v9 = vld [vmem:[%s1265_s11 + $0x88] sm:$0xff]  ;;  %v297_v10 = vld [vmem:[%s1265_s11 + $0x90] sm:$0xff] }
  0x27   : > { %294 = vst [vmem:[%s259_s13 + $0x40] sm:$0xff] %v293_v8  ;;  %v299_v11 = vld [vmem:[%s1265_s11 + $0x98] sm:$0xff]  ;;  %296 = vst [vmem:[%s259_s13 + $0x48] sm:$0xff] %v295_v9  ;;  %v301_v12 = vld [vmem:[%s1265_s11 + $0xc0] sm:$0xff] }
  0x28   : > { %298 = vst [vmem:[%s259_s13 + $0x50] sm:$0xff] %v297_v10  ;;  %300 = vst [vmem:[%s259_s13 + $0x58] sm:$0xff] %v299_v11  ;;  %v303_v13 = vld [vmem:[%s1265_s11 + $0xc8] sm:$0xff]  ;;  %v305_v14 = vld [vmem:[%s1265_s11 + $0xd0] sm:$0xff] }
  0x29   : > { %302 = vst [vmem:[%s259_s13 + $0x60] sm:$0xff] %v301_v12  ;;  %304 = vst [vmem:[%s259_s13 + $0x68] sm:$0xff] %v303_v13  ;;  %v307_v15 = vld [vmem:[%s1265_s11 + $0xd8] sm:$0xff] }
  0x2a   : > { %306 = vst [vmem:[%s259_s13 + $0x70] sm:$0xff] %v305_v14  ;;  %308 = vst [vmem:[%s259_s13 + $0x78] sm:$0xff] %v307_v15 }
  0x2b PF: > { %p1017_p9 = scmp.ge.s32.totalorder %s1157_s30, 1  ;;  %p329_p10 = scmp.lt.s32.totalorder %s1157_s30, 5 }
  0x2d   : > { %p330_p11 = pnand %p1017_p9, %p329_p10 }
  0x2e   : > { %p387_p12 = scmp.lt.s32.totalorder (!%p330_p11), %s1145_s27, 1  ;;  %v1159_v16 = vmov (!%p330_p11), 0   ;;  %v536_v25 = vld [vmem:[%s1456_s4 + $0x8] sm:$0xff] (!%p330_p11)  ;;  %v535_v26 = vld [vmem:[%s1456_s4] sm:$0xff] (!%p330_p11)  ;;  %v538_v27 = vld [vmem:[%s1456_s4 + $0x18] sm:$0xff] (!%p330_p11)  ;;  %vm559_vm0 = vcmask (!%p330_p11), 261120  }
  0x2f   : > { %333 = sbr.rel (%p330_p11) target bundleno = 614 (0x266), region = 59  ;;  %1102 = vset.pattern.permute.xlu1 (!%p330_p11), %v1159_v16  ;;  %1101 = vset.pattern.permute.xlu0 (!%p330_p11), %v1159_v16  ;;  %v537_v28 = vld [vmem:[%s1456_s4 + $0x10] sm:$0xff] (!%p330_p11)  ;;  %p1032_p13 = scmp.ne.s32.totalorder (!%p330_p11), %s1141_s26, 0 }
  0x30   : > { %598 = vmatprep.mubr.bf16.mxu0 (!%p330_p11), %v1159_v16  ;;  %651 = vmatprep.mubr.bf16.mxu1 (!%p330_p11), %v1159_v16 }
  0x36   : > { %s388_s14 = scalar_select %p387_p12, %s1145_s27, 1 }
  0x37   : > { %vm748_vm1 = vcmask (!%p1032_p13), 7168  }
  0x38   : > { %s1040_s15 = sshll.u32 %s388_s14, 5 }
  0x39   : > { %s396_s19 = scalar_lea.vmem %s1454_s2, %s1040_s15  ;;  %s1297_s22 = scalar_lea.vmem %s1458_s6, %s1040_s15 }
  0x3a   : > { %s1302_s11 = scalar_lea.vmem %s1459_s7, %s1040_s15  ;;  %v465_v17 = vld [vmem:[%s396_s19] sm:$0xff]  ;;  %s391_s9 = scalar_lea.vmem %s1453_s1, %s1040_s15  ;;  %v466_v19 = vld [vmem:[%s396_s19 + $0x8] sm:$0xff]  ;;  %v468_v23 = vld [vmem:[%s396_s19 + $0x18] sm:$0xff] }
  0x3b   : > { %471 = vperm.xlu1 %1102, %v465_v17   ;;  %v425_v18 = vld [vmem:[%s391_s9] sm:$0xff]  ;;  %v426_v20 = vld [vmem:[%s391_s9 + $0x8] sm:$0xff]  ;;  %v428_v21 = vld [vmem:[%s391_s9 + $0x18] sm:$0xff] }
  0x3c   : > { %431 = vperm.xlu0 %1101, %v425_v18   ;;  %v427_v22 = vld [vmem:[%s391_s9 + $0x10] sm:$0xff] }
  0x3d   : > { %v467_v24 = vld [vmem:[%s396_s19 + $0x10] sm:$0xff]  ;;  %s336_s19 = sand.u32 1, %s1133_s24  }
  0x3e   : > { %s1320_s23 = sshll.u32 %s336_s19, 7 }
  0x3f   : > { %476 = vperm.xlu1 %1102, %v466_v19   ;;  %s1323_s10 = scalar_lea.vmem [#allocation2], %s1320_s23  ;;  %s1356_s9 = scalar_lea.vmem [#allocation3], %s1320_s23 }
  0x40   : > { %436 = vperm.xlu0 %1101, %v426_v20   ;;  %v409_v29 = vld [vmem:[%s1323_s10] sm:$0xff]  ;;  %v411_v30 = vld [vmem:[%s1323_s10 + $0x10] sm:$0xff]  ;;  %v410_v31 = vld [vmem:[%s1323_s10 + $0x8] sm:$0xff] }
  0x41   : > { %v412_v32 = vld [vmem:[%s1323_s10 + $0x18] sm:$0xff]  ;;  %v413_v39 = vld [vmem:[%s1323_s10 + $0x20] sm:$0xff]  ;;  %v415_v40 = vld [vmem:[%s1323_s10 + $0x30] sm:$0xff] }
  0x42   : > { %v414_v41 = vld [vmem:[%s1323_s10 + $0x28] sm:$0xff]  ;;  %v416_v43 = vld [vmem:[%s1323_s10 + $0x38] sm:$0xff]  ;;  %v421_v51 = vld [vmem:[%s1323_s10 + $0x60] sm:$0xff] }
  0x43   : > { %446 = vperm.xlu1 %1102, %v428_v21   ;;  %v422_v53 = vld [vmem:[%s1323_s10 + $0x68] sm:$0xff]  ;;  %v423_v54 = vld [vmem:[%s1323_s10 + $0x70] sm:$0xff]  ;;  %v424_v55 = vld [vmem:[%s1323_s10 + $0x78] sm:$0xff] }
  0x44   : > { %441 = vperm.xlu0 %1101, %v427_v22   ;;  %v417_v58 = vld [vmem:[%s1323_s10 + $0x40] sm:$0xff]  ;;  %v418_v59 = vld [vmem:[%s1323_s10 + $0x48] sm:$0xff]  ;;  %v419_v0 = vld [vmem:[%s1323_s10 + $0x50] sm:$0xff] }
  0x45   : > { %v420_v1 = vld [vmem:[%s1323_s10 + $0x58] sm:$0xff] }
  0x47   : > { %486 = vperm.xlu1 %1102, %v468_v23  }
  0x48   : > { %481 = vperm.xlu0 %1101, %v467_v24  }
  0x4b   : > { %546 = vperm.xlu1 %1102, %v536_v25  }
  0x4c   : > { %541 = vperm.xlu0 %1101, %v535_v26  }
  0x4f   : > { %556 = vperm.xlu1 %1102, %v538_v27  }
  0x50   : > { %551 = vperm.xlu0 %1101, %v537_v28  }
  0xba   : > { %v472_v33 = vpop.permute.xlu1 %471 }
  0xbb   : > { %v432_v34 = vpop.permute.xlu0 %431 }
  0xbc   : > { %v449_v35 = vmul.f32 %v432_v34, %v409_v29  ;;  %v451_v36 = vmul.f32 %v432_v34, %v411_v30  ;;  %v450_v37 = vmul.f32 %v432_v34, %v410_v31  ;;  %v452_v38 = vmul.f32 %v432_v34, %v412_v32 }
  0xbe   : > { %v477_v42 = vpop.permute.xlu1 %476  ;;  %v490_v45 = vadd.f32 %v472_v33, %v450_v37  ;;  %v492_v46 = vadd.f32 %v472_v33, %v452_v38  ;;  %v489_v47 = vadd.f32 %v472_v33, %v449_v35  ;;  %v491_v48 = vadd.f32 %v472_v33, %v451_v36 }
  0xbf   : > { %v437_v44 = vpop.permute.xlu0 %436 }
  0xc0   : > { %v453_v49 = vmul.f32 %v437_v44, %v413_v39  ;;  %v455_v50 = vmul.f32 %v437_v44, %v415_v40  ;;  %v454_v52 = vmul.f32 %v437_v44, %v414_v41  ;;  %v456_v56 = vmul.f32 %v437_v44, %v416_v43  ;;  %v521_v44 = vld [vmem:[%s1455_s3] sm:$0xff] }
  0xc1   : > { %v506_v2 = vmax.f32 %v490_v45, 0.0  ;;  %v508_v3 = vmax.f32 %v492_v46, 0.0  ;;  %v505_v4 = vmax.f32 %v489_v47, 0.0  ;;  %v507_v5 = vmax.f32 %v491_v48, 0.0  ;;  %v522_v45 = vld [vmem:[%s1455_s3 + $0x8] sm:$0xff] }
  0xc2   : > { %v447_v57 = vpop.permute.xlu1 %446  ;;  %v494_v60 = vadd.f32 %v477_v42, %v454_v52  ;;  %v493_v61 = vadd.f32 %v477_v42, %v453_v49  ;;  %v495_v62 = vadd.f32 %v477_v42, %v455_v50  ;;  %v496_v11 = vadd.f32 %v477_v42, %v456_v56  ;;  %v523_v49 = vld [vmem:[%s1455_s3 + $0x10] sm:$0xff]  ;;  %v524_v50 = vld [vmem:[%s1455_s3 + $0x18] sm:$0xff] }
  0xc3   : > { %v442_v63 = vpop.permute.xlu0 %441  ;;  %v461_v6 = vmul.f32 %v447_v57, %v421_v51  ;;  %v462_v7 = vmul.f32 %v447_v57, %v422_v53  ;;  %v463_v8 = vmul.f32 %v447_v57, %v423_v54  ;;  %v464_v9 = vmul.f32 %v447_v57, %v424_v55 }
  0xc4   : > { %v510_v10 = vmax.f32 %v494_v60, 0.0  ;;  %v509_v12 = vmax.f32 %v493_v61, 0.0  ;;  %v511_v13 = vmax.f32 %v495_v62, 0.0  ;;  %v457_v14 = vmul.f32 %v442_v63, %v417_v58 }
  0xc5   : > { %v458_v15 = vmul.f32 %v442_v63, %v418_v59  ;;  %v459_v17 = vmul.f32 %v442_v63, %v419_v0  ;;  %v460_v18 = vmul.f32 %v442_v63, %v420_v1  ;;  %v512_v30 = vmax.f32 %v496_v11, 0.0 }
  0xc6   : > { %v487_v19 = vpop.permute.xlu1 %486  ;;  %v528_v29 = vpack.c.bf16 %v510_v10, %v506_v2  ;;  %v527_v31 = vpack.c.bf16 %v509_v12, %v505_v4  ;;  %v529_v32 = vpack.c.bf16 %v511_v13, %v507_v5  ;;  %v525_v48 = vpack.c.bf16 %v522_v45, %v521_v44 }
  0xc7   : > { %v501_v20 = vadd.f32 %v487_v19, %v461_v6  ;;  %v502_v21 = vadd.f32 %v487_v19, %v462_v7  ;;  %v503_v22 = vadd.f32 %v487_v19, %v463_v8  ;;  %v504_v23 = vadd.f32 %v487_v19, %v464_v9  ;;  %v482_v24 = vpop.permute.xlu0 %481 }
  0xc8   : > { %v497_v25 = vadd.f32 %v482_v24, %v457_v14  ;;  %v498_v26 = vadd.f32 %v482_v24, %v458_v15  ;;  %v499_v27 = vadd.f32 %v482_v24, %v459_v17  ;;  %v500_v28 = vadd.f32 %v482_v24, %v460_v18  ;;  %566 = vmatprep.subr.bf16.mxu0 %v528_v29 }
  0xc9   : > { %v518_v34 = vmax.f32 %v502_v21, 0.0  ;;  %v520_v36 = vmax.f32 %v504_v23, 0.0  ;;  %v530_v37 = vpack.c.bf16 %v512_v30, %v508_v3  ;;  %v517_v39 = vmax.f32 %v501_v20, 0.0  ;;  %567 = vmatpush1.bf16.msra.mxu0 %v527_v31 }
  0xca   : > { %v514_v33 = vmax.f32 %v498_v26, 0.0  ;;  %v516_v35 = vmax.f32 %v500_v28, 0.0  ;;  %v513_v38 = vmax.f32 %v497_v25, 0.0  ;;  %v515_v40 = vmax.f32 %v499_v27, 0.0  ;;  %v547_v54 = vpop.permute.xlu1 %546 }
  0xcb   : > { %v519_v43 = vmax.f32 %v503_v22, 0.0  ;;  %619 = vmatprep.subr.bf16.mxu1 %v530_v37  ;;  %v526_v51 = vpack.c.bf16 %v524_v50, %v523_v49  ;;  %v542_v52 = vpop.permute.xlu0 %541 }
  0xcc   : > { %v532_v41 = vpack.c.bf16 %v518_v34, %v514_v33  ;;  %v534_v42 = vpack.c.bf16 %v520_v36, %v516_v35  ;;  %v531_v46 = vpack.c.bf16 %v517_v39, %v513_v38  ;;  %620 = vmatpush1.bf16.msra.mxu1 %v529_v32 }
  0xcd   : > { %v533_v47 = vpack.c.bf16 %v519_v43, %v515_v40 }
  0xce   : > { %568 = vmatprep.subr.bf16.mxu0 %v532_v41  ;;  %621 = vmatprep.subr.bf16.mxu1 %v534_v42  ;;  %v557_v21 = vpop.permute.xlu1 %556 }
  0xcf   : > { %569 = vmatpush1.bf16.msra.mxu0 %v531_v46  ;;  %v552_v14 = vpop.permute.xlu0 %551 }
  0xd0   : > { %622 = vmatpush1.bf16.msra.mxu1 %v533_v47 }
  0xd2   : > { %1028 = vmatmul.mubr.msk.bf16.vlgmr.msra.gmra.mrb[0].mxu0 %vm559_vm0, %v525_v48 }
  0xd3   : > { %608 = vmatprep.mubr.bf16.mxu0 %v1159_v16  ;;  %1030 = vmatmul.mubr.msk.bf16.vlgmr.msra.gmra.mrb[0].mxu1 %vm559_vm0, %v525_v48 }
  0xd4   : > { %661 = vmatprep.mubr.bf16.mxu1 %v1159_v16 }
  0xda   : > { %1029 = vmatmul.mubr.msk.bf16.gmra.mrb[4].mxu0 %vm559_vm0, %v526_v51 }
  0xdb   : > { %1031 = vmatmul.mubr.msk.bf16.gmra.mrb[4].mxu1 %vm559_vm0, %v526_v51 }
 0x1a5   : > { %v600_v53 = vpop.f32.mrb[0].mxu0 }
 0x1a6   : > { %v601_v55 = vadd.f32 %v600_v53, %v542_v52  ;;  %v602_v56 = vpop.f32.mrb[1].mxu0  ;;  %v653_v57 = vpop.f32.mrb[0].mxu1 }
 0x1a7   : > { %v603_v58 = vadd.f32 %v602_v56, %v542_v52  ;;  %v604_v59 = vpop.f32.mrb[2].mxu0  ;;  %v654_v16 = vadd.f32 %v653_v57, %v542_v52  ;;  %v655_v61 = vpop.f32.mrb[1].mxu1 }
 0x1a8   : > { %672 = vst [vmem:[%s1356_s9] sm:$0xff] %v601_v55  ;;  %v708_v60 = vmul.f32 %v601_v55, %v601_v55  ;;  %v605_v62 = vadd.f32 %v604_v59, %v547_v54  ;;  %v606_v63 = vpop.f32.mrb[3].mxu0  ;;  %v656_v2 = vadd.f32 %v655_v61, %v542_v52  ;;  %v657_v3 = vpop.f32.mrb[2].mxu1 }
 0x1a9   : > { %673 = vst [vmem:[%s1356_s9 + $0x8] sm:$0xff] %v603_v58  ;;  %v688_v0 = vadd.f32 %v603_v58, %v601_v55  ;;  %v709_v1 = vmul.f32 %v603_v58, %v603_v58  ;;  %v607_v4 = vadd.f32 %v606_v63, %v547_v54  ;;  %674 = vst [vmem:[%s1356_s9 + $0x10] sm:$0xff] %v654_v16  ;;  %v659_v7 = vpop.f32.mrb[3].mxu1 }
 0x1aa   : > { %676 = vst [vmem:[%s1356_s9 + $0x20] sm:$0xff] %v605_v62  ;;  %v712_v5 = vmul.f32 %v605_v62, %v605_v62  ;;  %v658_v6 = vadd.f32 %v657_v3, %v547_v54  ;;  %675 = vst [vmem:[%s1356_s9 + $0x18] sm:$0xff] %v656_v2  ;;  %v660_v10 = vadd.f32 %v659_v7, %v547_v54 }
 0x1ab   : > { %677 = vst [vmem:[%s1356_s9 + $0x28] sm:$0xff] %v607_v4  ;;  %v693_v8 = vadd.f32 %v607_v4, %v605_v62  ;;  %v713_v9 = vmul.f32 %v607_v4, %v607_v4  ;;  %v689_v11 = vadd.f32 %v688_v0, %v654_v16  ;;  %v710_v12 = vmul.f32 %v654_v16, %v654_v16 }
 0x1ac   : > { %678 = vst [vmem:[%s1356_s9 + $0x30] sm:$0xff] %v658_v6  ;;  %v724_v13 = vadd.f32 %v709_v1, %v708_v60  ;;  %v714_v15 = vmul.f32 %v658_v6, %v658_v6  ;;  %679 = vst [vmem:[%s1356_s9 + $0x38] sm:$0xff] %v660_v10  ;;  %v711_v24 = vmul.f32 %v656_v2, %v656_v2 }
 0x1ad   : > { %v610_v17 = vpop.f32.mrb[4].mxu0  ;;  %v690_v18 = vadd.f32 %v689_v11, %v656_v2  ;;  %v694_v19 = vadd.f32 %v693_v8, %v658_v6  ;;  %v729_v20 = vadd.f32 %v713_v9, %v712_v5  ;;  %v715_v30 = vmul.f32 %v660_v10, %v660_v10 }
 0x1ae   : > { %v611_v22 = vadd.f32 %v610_v17, %v552_v14  ;;  %v612_v23 = vpop.f32.mrb[5].mxu0  ;;  %v725_v25 = vadd.f32 %v724_v13, %v710_v12  ;;  %v663_v26 = vpop.f32.mrb[4].mxu1 }
 0x1af   : > { %v613_v27 = vadd.f32 %v612_v23, %v552_v14  ;;  %v614_v28 = vpop.f32.mrb[6].mxu0  ;;  %691 = vadd.xlane.f32.xlu0 %v690_v18  ;;  %v695_v29 = vadd.f32 %v694_v19, %v660_v10  ;;  %v730_v31 = vadd.f32 %v729_v20, %v714_v15  ;;  %v664_v33 = vadd.f32 %v663_v26, %v552_v14  ;;  %v665_v34 = vpop.f32.mrb[5].mxu1 }
 0x1b0   : > { %680 = vst [vmem:[%s1356_s9 + $0x40] sm:$0xff] %v611_v22  ;;  %v716_v32 = vmul.f32 %v611_v22, %v611_v22  ;;  %v615_v35 = vadd.f32 %v614_v28, %v557_v21  ;;  %v616_v36 = vpop.f32.mrb[7].mxu0  ;;  %v726_v37 = vadd.f32 %v725_v25, %v711_v24  ;;  %v666_v40 = vadd.f32 %v665_v34, %v552_v14  ;;  %v667_v41 = vpop.f32.mrb[6].mxu1 }
 0x1b1   : > { %681 = vst [vmem:[%s1356_s9 + $0x48] sm:$0xff] %v613_v27  ;;  %v698_v38 = vadd.f32 %v613_v27, %v611_v22  ;;  %v717_v39 = vmul.f32 %v613_v27, %v613_v27  ;;  %v617_v42 = vadd.f32 %v616_v36, %v557_v21  ;;  %696 = vadd.xlane.f32.xlu1 %v695_v29  ;;  %682 = vst [vmem:[%s1356_s9 + $0x50] sm:$0xff] %v664_v33  ;;  %v669_v45 = vpop.f32.mrb[7].mxu1 }
 0x1b2   : > { %684 = vst [vmem:[%s1356_s9 + $0x60] sm:$0xff] %v615_v35  ;;  %v720_v43 = vmul.f32 %v615_v35, %v615_v35  ;;  %v668_v44 = vadd.f32 %v667_v41, %v557_v21  ;;  %v731_v46 = vadd.f32 %v730_v31, %v715_v30  ;;  %683 = vst [vmem:[%s1356_s9 + $0x58] sm:$0xff] %v666_v40 }
 0x1b3   : > { %685 = vst [vmem:[%s1356_s9 + $0x68] sm:$0xff] %v617_v42  ;;  %v703_v47 = vadd.f32 %v617_v42, %v615_v35  ;;  %v721_v48 = vmul.f32 %v617_v42, %v617_v42  ;;  %v670_v49 = vadd.f32 %v669_v45, %v557_v21  ;;  %v699_v50 = vadd.f32 %v698_v38, %v664_v33 }
 0x1b4   : > { %v718_v51 = vmul.f32 %v664_v33, %v664_v33  ;;  %686 = vst [vmem:[%s1356_s9 + $0x70] sm:$0xff] %v668_v44  ;;  %732 = vadd.xlane.f32.xlu0 %v731_v46  ;;  %v734_v52 = vadd.f32 %v717_v39, %v716_v32  ;;  %v722_v53 = vmul.f32 %v668_v44, %v668_v44 }
 0x1b5   : > { %687 = vst [vmem:[%s1356_s9 + $0x78] sm:$0xff] %v670_v49  ;;  %727 = vadd.xlane.f32.xlu1 %v726_v37  ;;  %v700_v54 = vadd.f32 %v699_v50, %v666_v40  ;;  %v704_v55 = vadd.f32 %v703_v47, %v668_v44  ;;  %v739_v56 = vadd.f32 %v721_v48, %v720_v43 }
 0x1b6   : > { %v719_v57 = vmul.f32 %v666_v40, %v666_v40  ;;  %v735_v58 = vadd.f32 %v734_v52, %v718_v51  ;;  %v723_v60 = vmul.f32 %v670_v49, %v670_v49 }
 0x1b7   : > { %v705_v59 = vadd.f32 %v704_v55, %v670_v49  ;;  %v740_v16 = vadd.f32 %v739_v56, %v722_v53 }
 0x1b8   : > { %701 = vadd.xlane.f32.xlu0 %v700_v54  ;;  %v736_v61 = vadd.f32 %v735_v58, %v719_v57 }
 0x1b9   : > { %v741_v62 = vadd.f32 %v740_v16, %v723_v60 }
 0x1ba   : > { %737 = vadd.xlane.f32.xlu1 %v736_v61 }
 0x1bc   : > { %706 = vadd.xlane.f32.xlu0 %v705_v59 }
 0x1c0   : > { %742 = vadd.xlane.f32.xlu0 %v741_v62 }
 0x23c   : > { %v692_v63 = vpop.xlane.xlu0 %691 }
 0x23d   : > { %749 = vst.msk [vmem:[%s1297_s22] sm:$0xff] (!%p1032_p13), %vm748_vm1, %v692_v63 }
 0x23e   : > { %v697_v0 = vpop.xlane.xlu1 %696 }
 0x23f   : > { %750 = vst.msk [vmem:[%s1297_s22 + $0x8] sm:$0xff] (!%p1032_p13), %vm748_vm1, %v697_v0 }
 0x241   : > { %v733_v1 = vpop.xlane.xlu0 %732 }
 0x242   : > { %v728_v2 = vpop.xlane.xlu1 %727  ;;  %754 = vst.msk [vmem:[%s1302_s11 + $0x8] sm:$0xff] (!%p1032_p13), %vm748_vm1, %v733_v1 }
 0x243   : > { %753 = vst.msk [vmem:[%s1302_s11] sm:$0xff] (!%p1032_p13), %vm748_vm1, %v728_v2 }
 0x245   : > { %v702_v3 = vpop.xlane.xlu0 %701 }
 0x246   : > { %751 = vst.msk [vmem:[%s1297_s22 + $0x10] sm:$0xff] (!%p1032_p13), %vm748_vm1, %v702_v3 }
 0x247   : > { %v738_v4 = vpop.xlane.xlu1 %737  ;;  %747 = sbr.rel (%p1032_p13) target bundleno = 591 (0x24f), region = 67 }
 0x248   : > { %755 = vst.msk [vmem:[%s1302_s11 + $0x10] sm:$0xff] (!%p1032_p13), %vm748_vm1, %v738_v4 }
 0x249   : > { %v707_v5 = vpop.xlane.xlu0 %706 }
 0x24a   : > { %752 = vst.msk [vmem:[%s1297_s22 + $0x18] sm:$0xff] (!%p1032_p13), %vm748_vm1, %v707_v5 }
 0x24d   : > { %v743_v6 = vpop.xlane.xlu0 %742 }
 0x24e   : > { %756 = vst.msk [vmem:[%s1302_s11 + $0x18] sm:$0xff] %vm748_vm1, %v743_v6 }
 0x24f PF: > { %p1033_p0 = scmp.le.s32.totalorder %s1141_s26, 0 }
 0x250   : > { %v761_v7 = vld [vmem:[%s1297_s22] sm:$0xff] (!%p1033_p0)  ;;  %vm769_vm2 = vcmask (!%p1033_p0), 7168   ;;  %v762_v8 = vld [vmem:[%s1297_s22 + $0x8] sm:$0xff] (!%p1033_p0)  ;;  %v763_v9 = vld [vmem:[%s1297_s22 + $0x10] sm:$0xff] (!%p1033_p0) }
 0x251   : > { %760 = sbr.rel (%p1033_p0) target bundleno = 601 (0x259), region = 71  ;;  %v765_v10 = vadd.f32 (!%p1033_p0), %v761_v7, %v692_v63  ;;  %v766_v11 = vadd.f32 (!%p1033_p0), %v762_v8, %v697_v0  ;;  %v767_v12 = vadd.f32 (!%p1033_p0), %v763_v9, %v702_v3  ;;  %v774_v14 = vld [vmem:[%s1302_s11] sm:$0xff] (!%p1033_p0)  ;;  %v775_v15 = vld [vmem:[%s1302_s11 + $0x8] sm:$0xff] (!%p1033_p0)  ;;  %v776_v20 = vld [vmem:[%s1302_s11 + $0x10] sm:$0xff] (!%p1033_p0) }
 0x252   : > { %v764_v13 = vld [vmem:[%s1297_s22 + $0x18] sm:$0xff] (!%p1033_p0)  ;;  %v778_v18 = vadd.f32 (!%p1033_p0), %v774_v14, %v728_v2  ;;  %v779_v19 = vadd.f32 (!%p1033_p0), %v775_v15, %v733_v1  ;;  %v780_v22 = vadd.f32 (!%p1033_p0), %v776_v20, %v738_v4 }
 0x253   : > { %v768_v17 = vadd.f32 (!%p1033_p0), %v764_v13, %v707_v5  ;;  %770 = vst.msk [vmem:[%s1297_s22] sm:$0xff] (!%p1033_p0), %vm769_vm2, %v765_v10  ;;  %771 = vst.msk [vmem:[%s1297_s22 + $0x8] sm:$0xff] (!%p1033_p0), %vm769_vm2, %v766_v11 }
 0x254   : > { %772 = vst.msk [vmem:[%s1297_s22 + $0x10] sm:$0xff] (!%p1033_p0), %vm769_vm2, %v767_v12  ;;  %782 = vst.msk [vmem:[%s1302_s11] sm:$0xff] (!%p1033_p0), %vm769_vm2, %v778_v18 }
 0x255   : > { %v777_v21 = vld [vmem:[%s1302_s11 + $0x18] sm:$0xff] (!%p1033_p0)  ;;  %773 = vst.msk [vmem:[%s1297_s22 + $0x18] sm:$0xff] (!%p1033_p0), %vm769_vm2, %v768_v17  ;;  %783 = vst.msk [vmem:[%s1302_s11 + $0x8] sm:$0xff] (!%p1033_p0), %vm769_vm2, %v779_v19 }
 0x256   : > { %v781_v23 = vadd.f32 (!%p1033_p0), %v777_v21, %v743_v6  ;;  %784 = vst.msk [vmem:[%s1302_s11 + $0x10] sm:$0xff] (!%p1033_p0), %vm769_vm2, %v780_v22 }
 0x258   : > { %785 = vst.msk [vmem:[%s1302_s11 + $0x18] sm:$0xff] %vm769_vm2, %v781_v23 }
 0x259 PF: > { %802 = sbr.rel (!%p1248_p6) target bundleno = 614 (0x266), region = 75  ;;  %s1035_s22 = sshll.u32 (%p1248_p6), %s1141_s26, 2  ;;  %v820_v24 = vld [vmem:[%s1356_s9] sm:$0xff] (%p1248_p6)  ;;  %v822_v25 = vld [vmem:[%s1356_s9 + $0x8] sm:$0xff] (%p1248_p6)  ;;  %v824_v26 = vld [vmem:[%s1356_s9 + $0x10] sm:$0xff] (%p1248_p6) }
 0x25a   : > { %s1036_s11 = sshll.u32 (%p1248_p6), %s1145_s27, 5  ;;  %v826_v27 = vld [vmem:[%s1356_s9 + $0x18] sm:$0xff] (%p1248_p6)  ;;  %v828_v28 = vld [vmem:[%s1356_s9 + $0x20] sm:$0xff] (%p1248_p6)  ;;  %v830_v29 = vld [vmem:[%s1356_s9 + $0x28] sm:$0xff] (%p1248_p6) }
 0x25b   : > { %s805_s12 = sadd.s32 (%p1248_p6), %s1036_s11, %s1035_s22  ;;  %v832_v30 = vld [vmem:[%s1356_s9 + $0x30] sm:$0xff] (%p1248_p6)  ;;  %v834_v31 = vld [vmem:[%s1356_s9 + $0x38] sm:$0xff] (%p1248_p6)  ;;  %v836_v32 = vld [vmem:[%s1356_s9 + $0x40] sm:$0xff] (%p1248_p6) }
 0x25c   : > { %s1037_s21 = sshll.u32 (%p1248_p6), %s805_s12, 3  ;;  %v838_v33 = vld [vmem:[%s1356_s9 + $0x48] sm:$0xff] (%p1248_p6)  ;;  %v840_v34 = vld [vmem:[%s1356_s9 + $0x50] sm:$0xff] (%p1248_p6)  ;;  %v842_v35 = vld [vmem:[%s1356_s9 + $0x58] sm:$0xff] (%p1248_p6) }
 0x25d   : > { %s807_s10 = scalar_lea.vmem (%p1248_p6), %s1457_s5, %s1037_s21  ;;  %v844_v36 = vld [vmem:[%s1356_s9 + $0x60] sm:$0xff] (%p1248_p6)  ;;  %v846_v37 = vld [vmem:[%s1356_s9 + $0x68] sm:$0xff] (%p1248_p6)  ;;  %v848_v38 = vld [vmem:[%s1356_s9 + $0x70] sm:$0xff] (%p1248_p6) }
 0x25e   : > { %821 = vst [vmem:[%s807_s10] sm:$0xff] (%p1248_p6), %v820_v24  ;;  %823 = vst [vmem:[%s807_s10 + $0x8] sm:$0xff] (%p1248_p6), %v822_v25  ;;  %v850_v39 = vld [vmem:[%s1356_s9 + $0x78] sm:$0xff] (%p1248_p6) }
 0x25f   : > { %825 = vst [vmem:[%s807_s10 + $0x10] sm:$0xff] (%p1248_p6), %v824_v26  ;;  %827 = vst [vmem:[%s807_s10 + $0x18] sm:$0xff] (%p1248_p6), %v826_v27 }
 0x260   : > { %829 = vst [vmem:[%s807_s10 + $0x40] sm:$0xff] %v828_v28  ;;  %831 = vst [vmem:[%s807_s10 + $0x48] sm:$0xff] %v830_v29 }
 0x261   : > { %833 = vst [vmem:[%s807_s10 + $0x50] sm:$0xff] %v832_v30  ;;  %835 = vst [vmem:[%s807_s10 + $0x58] sm:$0xff] %v834_v31 }
 0x262   : > { %837 = vst [vmem:[%s807_s10 + $0x80] sm:$0xff] %v836_v32  ;;  %839 = vst [vmem:[%s807_s10 + $0x88] sm:$0xff] %v838_v33 }
 0x263   : > { %841 = vst [vmem:[%s807_s10 + $0x90] sm:$0xff] %v840_v34  ;;  %843 = vst [vmem:[%s807_s10 + $0x98] sm:$0xff] %v842_v35 }
 0x264   : > { %845 = vst [vmem:[%s807_s10 + $0xc0] sm:$0xff] %v844_v36  ;;  %847 = vst [vmem:[%s807_s10 + $0xc8] sm:$0xff] %v846_v37 }
 0x265   : > { %849 = vst [vmem:[%s807_s10 + $0xd0] sm:$0xff] %v848_v38  ;;  %851 = vst [vmem:[%s807_s10 + $0xd8] sm:$0xff] %v850_v39 }
 0x266 PF: > { %s18_s30 = sadd.s32 1, %s1157_s30   ;;  %s1465_s13 = sld [smem:[#allocation4_spill]] }
 0x267   : > { %p15_p1 = scmp.ge.s32.totalorder %s18_s30, 6   ;;  %s1466_s24 = smov %s1137_s25 }
 0x268   : > { %s1467_s25 = smov %s1256_s16  ;;  %s1468_s26 = smov %s1149_s28 }
 0x269   : > { %s1469_s27 = smov %s1153_s29  ;;  %s1470_s28 = smov %s1473_s8 }
 0x26a   :  { %17 = sbr.rel (!%p15_p1) target bundleno = 6 (0x6), region = 159 }
 0x26c   : > { %s1471_s29 = smov %s1465_s13 }

// kernel: oanblock_forward.22
= control target key start
LH: loop header
LB: loop body
LE: loop exit
PB: predicated region body
PF: predicated region fallthrough
CT: control target
= control target key end

     0   :  { %s1692_s0 = inlined_call_operand.vmem [shape: f32[2,32,1024], index: 0, kind: input, shape index: {}]   ;;  %s1693_s1 = inlined_call_operand.vmem [shape: f32[2,32,1], index: 1, kind: input, shape index: {}]   ;;  %s1694_s2 = inlined_call_operand.vmem [shape: f32[2,32,1], index: 2, kind: input, shape index: {}]   ;;  %s1695_s3 = inlined_call_operand.vmem [shape: f32[8,32], index: 3, kind: input, shape index: {}]   ;;  %s1696_s4 = inlined_call_operand.vmem [shape: f32[8,1], index: 4, kind: input, shape index: {}]   ;;  %s1697_s5 = inlined_call_operand.vmem [shape: f32[2,32,8], index: 5, kind: input, shape index: {}]   ;;  %s1698_s6 = inlined_call_operand.vmem [shape: f32[2,32,1024], index: 6, kind: output, shape index: {0}]   ;;  %s1699_s7 = inlined_call_operand.vmem [shape: f32[2,32,1], index: 7, kind: output, shape index: {1}]   ;;  %s1700_s8 = inlined_call_operand.vmem [shape: f32[2,32,1], index: 8, kind: output, shape index: {2}]  }
   0x1   :  { %1702 = sst [smem:[#allocation5_spill]] %s1692_s0 }
   0x2   :  { %s1442_s27 = smov 0   ;;  %s1444_s28 = smov 0  }
   0x3   :  { %s1446_s29 = smov 0   ;;  %s1448_s30 = smov 0  }
   0x4   :  { %s1450_s9 = smov 0   ;;  %s1452_s10 = smov 0  }
   0x5   :  { %s1454_s11 = smov 0  }
   0x6 LB: > { %s28_s12 = sadd.s32 1, %s1386_s9  ;;  %s31_s13 = sadd.s32 1, %s1390_s10  ;;  %s1394_s11 = sphi %s1454_s11, %s19_s11   ;;  %s1390_s10 = sphi %s1452_s10, %s1712_s10   ;;  %s1386_s9 = sphi %s1450_s9, %s1711_s9   ;;  %s1382_s30 = sphi %s1448_s30, %s1710_s30   ;;  %s1378_s29 = sphi %s1446_s29, %s1709_s29   ;;  %s1374_s28 = sphi %s1444_s28, %s1708_s28   ;;  %s1370_s27 = sphi %s1442_s27, %s1707_s27  }
   0x7   : > { %p29_p0 = scmp.ge.s32.totalorder %s28_s12, 2  ;;  %s1223_s14 = sadd.s32 4294967295, %s1394_s11  }
   0x8   : > { %p47_p1 = scmp.ne.s32.totalorder %s1374_s28, %s1370_s27  ;;  %p48_p2 = scmp.eq.s32.totalorder %s1394_s11, 0 }
   0x9   : > { %s1714_s12 = smov (%p29_p0, %s28_s12), 0  ;;  %s1716_s13 = smov (!%p29_p0, %s31_s13), %s1390_s10 }
   0xa   : > { %p33_p3 = scmp.ge.s32.totalorder %s1716_s13, 2  ;;  %p199_p4 = scmp.eq.s32.totalorder %s1223_s14, 3 }
   0xb   : > { %s36_s15 = ssub.s32 %s1386_s9, %s1714_s12  ;;  %p49_p5 = por %p48_p2, %p47_p1 }
   0xc   : > { %s1718_s13 = smov (%p33_p3, %s1716_s13), 0  ;;  %p1490_p6 = por %p199_p4, %p47_p1 }
   0xd   : > { %1703 = sst [smem:[#allocation4_spill]] %s1718_s13  ;;  %s35_s17 = ssub.s32 %s1390_s10, %s1718_s13 }
   0xe   : > { %s37_s18 = sor.u32 %s36_s15, %s35_s17  ;;  %s40_s19 = sadd.s32 1, %s1374_s28 }
   0xf   : > { %p38_p7 = scmp.eq.s32.totalorder %s37_s18, 0  ;;  %p1226_p8 = scmp.ge.s32.totalorder %s1394_s11, 4 }
  0x11   : > { %s1498_s20 = scalar_select %p38_p7, %s1374_s28, %s40_s19  }
  0x12   : > { %279 = sbr.rel (%p1226_p8) target bundleno = 43 (0x2b), region = 24 }
  0x19   : > { %282 = sbr.rel (!%p49_p5) target bundleno = 43 (0x2b), region = 28  ;;  %s284_s21 = sand.u32 (%p49_p5), 1, %s1374_s28  }
  0x1a   : > { %s1228_s22 = sshll.u32 (%p49_p5), %s1386_s9, 2  ;;  %s1227_s23 = sshll.u32 (%p49_p5), %s284_s21, 7 }
  0x1b   : > { %s1229_s24 = sshll.u32 (%p49_p5), %s1390_s10, 5  ;;  %s1705_s0 = sld [smem:[#allocation5_spill]] (%p49_p5) }
  0x1c   : > { %s289_s25 = sadd.s32 (%p49_p5), %s1229_s24, %s1228_s22  ;;  %s286_s17 = scalar_lea.vmem (%p49_p5), [#allocation2], %s1227_s23 }
  0x1d   : > { %s1230_s26 = sshll.u32 (%p49_p5), %s289_s25, 3 }
  0x21   : > { %s1507_s15 = scalar_lea.vmem %s1705_s0, %s1230_s26 }
  0x22   : > { %v304_v0 = vld [vmem:[%s1507_s15] sm:$0xff]  ;;  %v306_v1 = vld [vmem:[%s1507_s15 + $0x8] sm:$0xff]  ;;  %v308_v2 = vld [vmem:[%s1507_s15 + $0x10] sm:$0xff] }
  0x23   : > { %305 = vst [vmem:[%s286_s17] sm:$0xff] %v304_v0  ;;  %307 = vst [vmem:[%s286_s17 + $0x8] sm:$0xff] %v306_v1  ;;  %v310_v3 = vld [vmem:[%s1507_s15 + $0x18] sm:$0xff]  ;;  %v312_v4 = vld [vmem:[%s1507_s15 + $0x40] sm:$0xff] }
  0x24   : > { %309 = vst [vmem:[%s286_s17 + $0x10] sm:$0xff] %v308_v2  ;;  %v314_v5 = vld [vmem:[%s1507_s15 + $0x48] sm:$0xff]  ;;  %311 = vst [vmem:[%s286_s17 + $0x18] sm:$0xff] %v310_v3  ;;  %v316_v6 = vld [vmem:[%s1507_s15 + $0x50] sm:$0xff] }
  0x25   : > { %313 = vst [vmem:[%s286_s17 + $0x20] sm:$0xff] %v312_v4  ;;  %315 = vst [vmem:[%s286_s17 + $0x28] sm:$0xff] %v314_v5  ;;  %v318_v7 = vld [vmem:[%s1507_s15 + $0x58] sm:$0xff]  ;;  %v320_v8 = vld [vmem:[%s1507_s15 + $0x80] sm:$0xff] }
  0x26   : > { %317 = vst [vmem:[%s286_s17 + $0x30] sm:$0xff] %v316_v6  ;;  %319 = vst [vmem:[%s286_s17 + $0x38] sm:$0xff] %v318_v7  ;;  %v322_v9 = vld [vmem:[%s1507_s15 + $0x88] sm:$0xff]  ;;  %v324_v10 = vld [vmem:[%s1507_s15 + $0x90] sm:$0xff] }
  0x27   : > { %321 = vst [vmem:[%s286_s17 + $0x40] sm:$0xff] %v320_v8  ;;  %v326_v11 = vld [vmem:[%s1507_s15 + $0x98] sm:$0xff]  ;;  %323 = vst [vmem:[%s286_s17 + $0x48] sm:$0xff] %v322_v9  ;;  %v328_v12 = vld [vmem:[%s1507_s15 + $0xc0] sm:$0xff] }
  0x28   : > { %325 = vst [vmem:[%s286_s17 + $0x50] sm:$0xff] %v324_v10  ;;  %327 = vst [vmem:[%s286_s17 + $0x58] sm:$0xff] %v326_v11  ;;  %v330_v13 = vld [vmem:[%s1507_s15 + $0xc8] sm:$0xff]  ;;  %v332_v14 = vld [vmem:[%s1507_s15 + $0xd0] sm:$0xff] }
  0x29   : > { %329 = vst [vmem:[%s286_s17 + $0x60] sm:$0xff] %v328_v12  ;;  %331 = vst [vmem:[%s286_s17 + $0x68] sm:$0xff] %v330_v13  ;;  %v334_v15 = vld [vmem:[%s1507_s15 + $0xd8] sm:$0xff] }
  0x2a   : > { %333 = vst [vmem:[%s286_s17 + $0x70] sm:$0xff] %v332_v14  ;;  %335 = vst [vmem:[%s286_s17 + $0x78] sm:$0xff] %v334_v15 }
  0x2b PF: > { %p1231_p9 = scmp.ge.s32.totalorder %s1394_s11, 1  ;;  %p364_p10 = scmp.lt.s32.totalorder %s1394_s11, 5 }
  0x2d   : > { %p365_p11 = pnand %p1231_p9, %p364_p10 }
  0x2e   : > { %p429_p12 = scmp.lt.s32.totalorder (!%p365_p11), %s1382_s30, 1  ;;  %v1396_v16 = vmov (!%p365_p11), 0   ;;  %v578_v25 = vld [vmem:[%s1696_s4] sm:$0xff] (!%p365_p11)  ;;  %s371_s23 = sand.u32 (!%p365_p11), 1, %s1370_s27   ;;  %vm584_vm0 = vcmask (!%p365_p11), 261120   ;;  %vm755_vm1 = vcmask (!%p365_p11), 1043456  }
  0x2f   : > { %368 = sbr.rel (%p365_p11) target bundleno = 882 (0x372), region = 63  ;;  %1323 = vset.pattern.permute.xlu1 (!%p365_p11), %v1396_v16  ;;  %1322 = vset.pattern.permute.xlu0 (!%p365_p11), %v1396_v16  ;;  %s1559_s24 = sshll.u32 (!%p365_p11), %s371_s23, 7  ;;  %vm748_vm2 = vcmask (!%p365_p11), 64512  }
  0x30   : > { %620 = vmatprep.mubr.bf16.mxu0 (!%p365_p11), %v1396_v16  ;;  %661 = vmatprep.mubr.bf16.mxu1 (!%p365_p11), %v1396_v16  ;;  %s1562_s26 = scalar_lea.vmem (!%p365_p11), [#allocation2], %s1559_s24  ;;  %p1252_p13 = scmp.ne.s32.totalorder (!%p365_p11), %s1378_s29, 0 }
  0x31   : > { %v456_v26 = vld [vmem:[%s1562_s26] sm:$0xff] (!%p365_p11)  ;;  %v458_v27 = vld [vmem:[%s1562_s26 + $0x10] sm:$0xff] (!%p365_p11)  ;;  %v457_v28 = vld [vmem:[%s1562_s26 + $0x8] sm:$0xff] (!%p365_p11) }
  0x32   : > { %v459_v29 = vld [vmem:[%s1562_s26 + $0x18] sm:$0xff] (!%p365_p11)  ;;  %v460_v36 = vld [vmem:[%s1562_s26 + $0x20] sm:$0xff] (!%p365_p11)  ;;  %v462_v37 = vld [vmem:[%s1562_s26 + $0x30] sm:$0xff] (!%p365_p11) }
  0x33   : > { %v461_v38 = vld [vmem:[%s1562_s26 + $0x28] sm:$0xff] (!%p365_p11)  ;;  %v463_v40 = vld [vmem:[%s1562_s26 + $0x38] sm:$0xff] (!%p365_p11)  ;;  %v468_v48 = vld [vmem:[%s1562_s26 + $0x60] sm:$0xff] (!%p365_p11) }
  0x34   : > { %v469_v50 = vld [vmem:[%s1562_s26 + $0x68] sm:$0xff] (!%p365_p11)  ;;  %v470_v51 = vld [vmem:[%s1562_s26 + $0x70] sm:$0xff] (!%p365_p11)  ;;  %v471_v52 = vld [vmem:[%s1562_s26 + $0x78] sm:$0xff] (!%p365_p11) }
  0x35   : > { %v464_v55 = vld [vmem:[%s1562_s26 + $0x40] sm:$0xff] (!%p365_p11)  ;;  %v465_v56 = vld [vmem:[%s1562_s26 + $0x48] sm:$0xff] (!%p365_p11)  ;;  %v466_v61 = vld [vmem:[%s1562_s26 + $0x50] sm:$0xff] (!%p365_p11) }
  0x36   : > { %s430_s13 = scalar_select %p429_p12, %s1382_s30, 1  ;;  %v467_v62 = vld [vmem:[%s1562_s26 + $0x58] sm:$0xff] }
  0x37   : > { %vm950_vm3 = vcmask (!%p1252_p13), 7168  }
  0x38   : > { %s1533_s18 = sshll.u32 %s430_s13, 5 }
  0x39   : > { %s438_s22 = scalar_lea.vmem %s1694_s2, %s1533_s18  ;;  %s1543_s25 = scalar_lea.vmem %s1699_s7, %s1533_s18 }
  0x3a   : > { %s1549_s15 = scalar_lea.vmem %s1700_s8, %s1533_s18  ;;  %v512_v17 = vld [vmem:[%s438_s22] sm:$0xff]  ;;  %s433_s0 = scalar_lea.vmem %s1693_s1, %s1533_s18  ;;  %v513_v19 = vld [vmem:[%s438_s22 + $0x8] sm:$0xff]  ;;  %v515_v23 = vld [vmem:[%s438_s22 + $0x18] sm:$0xff] }
  0x3b   : > { %518 = vperm.xlu1 %1323, %v512_v17   ;;  %v472_v18 = vld [vmem:[%s433_s0] sm:$0xff]  ;;  %v473_v20 = vld [vmem:[%s433_s0 + $0x8] sm:$0xff]  ;;  %v475_v21 = vld [vmem:[%s433_s0 + $0x18] sm:$0xff]  ;;  %s443_s17 = scalar_lea.vmem %s1697_s5, %s1533_s18  ;;  %s1596_s18 = scalar_lea.vmem [#allocation3], %s1559_s24 }
  0x3c   : > { %478 = vperm.xlu0 %1322, %v472_v18   ;;  %v474_v22 = vld [vmem:[%s433_s0 + $0x10] sm:$0xff] }
  0x3d   : > { %v514_v24 = vld [vmem:[%s438_s22 + $0x10] sm:$0xff] }
  0x3f   : > { %523 = vperm.xlu1 %1323, %v513_v19  }
  0x40   : > { %483 = vperm.xlu0 %1322, %v473_v20  }
  0x43   : > { %493 = vperm.xlu1 %1323, %v475_v21  }
  0x44   : > { %488 = vperm.xlu0 %1322, %v474_v22  }
  0x47   : > { %533 = vperm.xlu1 %1323, %v515_v23  }
  0x48   : > { %528 = vperm.xlu0 %1322, %v514_v24  }
  0x4c   : > { %581 = vperm.xlu0 %1322, %v578_v25  }
  0xba   : > { %v519_v30 = vpop.permute.xlu1 %518 }
  0xbb   : > { %v479_v31 = vpop.permute.xlu0 %478 }
  0xbc   : > { %v496_v32 = vmul.f32 %v479_v31, %v456_v26  ;;  %v498_v33 = vmul.f32 %v479_v31, %v458_v27  ;;  %v497_v34 = vmul.f32 %v479_v31, %v457_v28  ;;  %v499_v35 = vmul.f32 %v479_v31, %v459_v29 }
  0xbe   : > { %v524_v39 = vpop.permute.xlu1 %523  ;;  %v537_v42 = vadd.f32 %v519_v30, %v497_v34  ;;  %v539_v43 = vadd.f32 %v519_v30, %v499_v35  ;;  %v536_v44 = vadd.f32 %v519_v30, %v496_v32  ;;  %v538_v45 = vadd.f32 %v519_v30, %v498_v33 }
  0xbf   : > { %v484_v41 = vpop.permute.xlu0 %483 }
  0xc0   : > { %v500_v46 = vmul.f32 %v484_v41, %v460_v36  ;;  %v502_v47 = vmul.f32 %v484_v41, %v462_v37  ;;  %v501_v49 = vmul.f32 %v484_v41, %v461_v38  ;;  %v503_v53 = vmul.f32 %v484_v41, %v463_v40  ;;  %v568_v41 = vld [vmem:[%s1695_s3] sm:$0xff] }
  0xc1   : > { %v553_v63 = vmax.f32 %v537_v42, 0.0  ;;  %v555_v0 = vmax.f32 %v539_v43, 0.0  ;;  %v552_v1 = vmax.f32 %v536_v44, 0.0  ;;  %v554_v2 = vmax.f32 %v538_v45, 0.0 }
  0xc2   : > { %v494_v54 = vpop.permute.xlu1 %493  ;;  %v541_v57 = vadd.f32 %v524_v39, %v501_v49  ;;  %v540_v58 = vadd.f32 %v524_v39, %v500_v46  ;;  %v542_v59 = vadd.f32 %v524_v39, %v502_v47  ;;  %v543_v8 = vadd.f32 %v524_v39, %v503_v53 }
  0xc3   : > { %v489_v60 = vpop.permute.xlu0 %488  ;;  %v508_v3 = vmul.f32 %v494_v54, %v468_v48  ;;  %v509_v4 = vmul.f32 %v494_v54, %v469_v50  ;;  %v510_v5 = vmul.f32 %v494_v54, %v470_v51  ;;  %v511_v6 = vmul.f32 %v494_v54, %v471_v52 }
  0xc4   : > { %v557_v7 = vmax.f32 %v541_v57, 0.0  ;;  %v556_v9 = vmax.f32 %v540_v58, 0.0  ;;  %v558_v10 = vmax.f32 %v542_v59, 0.0  ;;  %v504_v11 = vmul.f32 %v489_v60, %v464_v55 }
  0xc5   : > { %v505_v12 = vmul.f32 %v489_v60, %v465_v56  ;;  %v506_v13 = vmul.f32 %v489_v60, %v466_v61  ;;  %v507_v14 = vmul.f32 %v489_v60, %v467_v62  ;;  %v559_v27 = vmax.f32 %v543_v8, 0.0 }
  0xc6   : > { %v534_v15 = vpop.permute.xlu1 %533  ;;  %v571_v26 = vpack.c.bf16 %v557_v7, %v553_v63  ;;  %v570_v28 = vpack.c.bf16 %v556_v9, %v552_v1  ;;  %v572_v29 = vpack.c.bf16 %v558_v10, %v554_v2  ;;  %v569_v44 = vpack.c.bf16 %v568_v41, %v568_v41 }
  0xc7   : > { %v548_v17 = vadd.f32 %v534_v15, %v508_v3  ;;  %v549_v18 = vadd.f32 %v534_v15, %v509_v4  ;;  %v550_v19 = vadd.f32 %v534_v15, %v510_v5  ;;  %v551_v20 = vadd.f32 %v534_v15, %v511_v6  ;;  %v529_v21 = vpop.permute.xlu0 %528 }
  0xc8   : > { %v544_v22 = vadd.f32 %v529_v21, %v504_v11  ;;  %v545_v23 = vadd.f32 %v529_v21, %v505_v12  ;;  %v546_v24 = vadd.f32 %v529_v21, %v506_v13  ;;  %v547_v25 = vadd.f32 %v529_v21, %v507_v14  ;;  %588 = vmatprep.subr.bf16.mxu0 %v571_v26 }
  0xc9   : > { %v565_v31 = vmax.f32 %v549_v18, 0.0  ;;  %v567_v33 = vmax.f32 %v551_v20, 0.0  ;;  %v573_v34 = vpack.c.bf16 %v559_v27, %v555_v0  ;;  %v564_v36 = vmax.f32 %v548_v17, 0.0  ;;  %589 = vmatpush1.bf16.msra.mxu0 %v570_v28 }
  0xca   : > { %v561_v30 = vmax.f32 %v545_v23, 0.0  ;;  %v563_v32 = vmax.f32 %v547_v25, 0.0  ;;  %v560_v35 = vmax.f32 %v544_v22, 0.0  ;;  %v562_v37 = vmax.f32 %v546_v24, 0.0 }
  0xcb   : > { %v566_v40 = vmax.f32 %v550_v19, 0.0  ;;  %629 = vmatprep.subr.bf16.mxu1 %v573_v34  ;;  %v582_v45 = vpop.permute.xlu0 %581 }
  0xcc   : > { %v575_v38 = vpack.c.bf16 %v565_v31, %v561_v30  ;;  %v577_v39 = vpack.c.bf16 %v567_v33, %v563_v32  ;;  %v574_v42 = vpack.c.bf16 %v564_v36, %v560_v35  ;;  %630 = vmatpush1.bf16.msra.mxu1 %v572_v29 }
  0xcd   : > { %v576_v43 = vpack.c.bf16 %v566_v40, %v562_v37 }
  0xce   : > { %590 = vmatprep.subr.bf16.mxu0 %v575_v38  ;;  %631 = vmatprep.subr.bf16.mxu1 %v577_v39 }
  0xcf   : > { %591 = vmatpush1.bf16.msra.mxu0 %v574_v42 }
  0xd0   : > { %632 = vmatpush1.bf16.msra.mxu1 %v576_v43 }
  0xd2   : > { %1244 = vmatmul.mubr.msk.bf16.vlgmr.msra.gmra.mrb[0].mxu0 %vm584_vm0, %v569_v44 }
  0xd3   : > { %800 = vmatprep.mubr.bf16.mxu0 %v1396_v16  ;;  %1245 = vmatmul.mubr.msk.bf16.vlgmr.msra.gmra.mrb[0].mxu1 %vm584_vm0, %v569_v44 }
  0xd4   : > { %853 = vmatprep.mubr.bf16.mxu1 %v1396_v16 }
 0x1a5   : > { %v622_v46 = vpop.f32.mrb[0].mxu0 }
 0x1a6   : > { %v623_v47 = vadd.f32 %v622_v46, %v582_v45  ;;  %v624_v48 = vpop.f32.mrb[1].mxu0  ;;  %v663_v49 = vpop.f32.mrb[0].mxu1 }
 0x1a7   : > { %v625_v50 = vadd.f32 %v624_v48, %v582_v45  ;;  %v626_v51 = vpop.f32.mrb[2].mxu0  ;;  %v664_v53 = vadd.f32 %v663_v49, %v582_v45  ;;  %v665_v54 = vpop.f32.mrb[1].mxu1 }
 0x1a8   : > { %v670_v52 = vrot.slane %v623_v47, 4  ;;  %v627_v55 = vpop.f32.mrb[3].mxu0  ;;  %v666_v57 = vadd.f32 %v665_v54, %v582_v45  ;;  %v667_v58 = vpop.f32.mrb[2].mxu1 }
 0x1a9   : > { %v676_v56 = vrot.slane %v625_v50, 4  ;;  %v682_v60 = vrot.slane %v664_v53, 4  ;;  %v668_v61 = vpop.f32.mrb[3].mxu1 }
 0x1aa   : > { %v671_v59 = vmax.f32 %v623_v47, %v670_v52  ;;  %v688_v63 = vrot.slane %v666_v57, 4 }
 0x1ab   : > { %v677_v62 = vmax.f32 %v625_v50, %v676_v56  ;;  %v683_v1 = vmax.f32 %v664_v53, %v682_v60 }
 0x1ac   : > { %v672_v0 = vrot.slane %v671_v59, 2  ;;  %v689_v3 = vmax.f32 %v666_v57, %v688_v63  ;;  %v738_v63 = vld [vmem:[%s443_s17] sm:$0xff] }
 0x1ad   : > { %v678_v2 = vrot.slane %v677_v62, 2  ;;  %v684_v5 = vrot.slane %v683_v1, 2 }
 0x1ae   : > { %v673_v4 = vmax.f32 %v671_v59, %v672_v0  ;;  %v690_v7 = vrot.slane %v689_v3, 2  ;;  %v739_v0 = vld [vmem:[%s443_s17 + $0x8] sm:$0xff] }
 0x1af   : > { %v679_v6 = vmax.f32 %v677_v62, %v678_v2  ;;  %v685_v9 = vmax.f32 %v683_v1, %v684_v5 }
 0x1b0   : > { %v674_v8 = vrot.slane %v673_v4, 1  ;;  %v691_v11 = vmax.f32 %v689_v3, %v690_v7 }
 0x1b1   : > { %v680_v10 = vrot.slane %v679_v6, 1  ;;  %v686_v13 = vrot.slane %v685_v9, 1 }
 0x1b2   : > { %v675_v12 = vmax.f32 %v673_v4, %v674_v8  ;;  %v692_v15 = vrot.slane %v691_v11, 1  ;;  %v740_v8 = vld [vmem:[%s443_s17 + $0x10] sm:$0xff] }
 0x1b3   : > { %v681_v14 = vmax.f32 %v679_v6, %v680_v10  ;;  %v687_v18 = vmax.f32 %v685_v9, %v686_v13  ;;  %v742_v6 = vpack.c.bf16 %v739_v0, %v738_v63  ;;  %v741_v9 = vld [vmem:[%s443_s17 + $0x18] sm:$0xff] }
 0x1b4   : > { %v694_v17 = vsub.f32 %v623_v47, %v675_v12  ;;  %v693_v20 = vmax.f32 %v691_v11, %v692_v15  ;;  %v743_v10 = vpack.c.bf16 %v741_v9, %v740_v8 }
 0x1b5   : > { %v695_v19 = vsub.f32 %v625_v50, %v681_v14  ;;  %v696_v22 = vsub.f32 %v664_v53, %v687_v18 }
 0x1b6   : > { %v698_v21 = vmul.f32 1.442695, %v694_v17  ;;  %v697_v24 = vsub.f32 %v666_v57, %v693_v20 }
 0x1b7   : > { %v700_v23 = vmul.f32 1.442695, %v695_v19  ;;  %v702_v25 = vmul.f32 1.442695, %v696_v22 }
 0x1b8   : > { %1324 = vpow2.f32 %v698_v21  ;;  %v704_v26 = vmul.f32 1.442695, %v697_v24 }
 0x1b9   : > { %1326 = vpow2.f32 %v700_v23 }
 0x1ba   : > { %1328 = vpow2.f32 %v702_v25 }
 0x1bb   : > { %1330 = vpow2.f32 %v704_v26 }
 0x1c2   : > { %v1325_v27 = vpop.eup %1324 }
 0x1c3   : > { %v1327_v28 = vpop.eup %1326  ;;  %v706_v29 = vrot.slane %v1325_v27, 4 }
 0x1c4   : > { %v1329_v30 = vpop.eup %1328  ;;  %v712_v31 = vrot.slane %v1327_v28, 4 }
 0x1c5   : > { %v1331_v32 = vpop.eup %1330  ;;  %v707_v33 = vadd.f32 %v1325_v27, %v706_v29  ;;  %v718_v34 = vrot.slane %v1329_v30, 4 }
 0x1c6   : > { %v713_v35 = vadd.f32 %v1327_v28, %v712_v31  ;;  %v724_v36 = vrot.slane %v1331_v32, 4 }
 0x1c7   : > { %v708_v37 = vrot.slane %v707_v33, 2  ;;  %v719_v38 = vadd.f32 %v1329_v30, %v718_v34 }
 0x1c8   : > { %v714_v39 = vrot.slane %v713_v35, 2  ;;  %v725_v40 = vadd.f32 %v1331_v32, %v724_v36 }
 0x1c9   : > { %v709_v41 = vadd.f32 %v708_v37, %v707_v33  ;;  %v720_v42 = vrot.slane %v719_v38, 2 }
 0x1ca   : > { %v715_v43 = vadd.f32 %v714_v39, %v713_v35  ;;  %v726_v44 = vrot.slane %v725_v40, 2 }
 0x1cb   : > { %v710_v45 = vrot.slane %v709_v41, 1  ;;  %v721_v46 = vadd.f32 %v720_v42, %v719_v38 }
 0x1cc   : > { %v716_v47 = vrot.slane %v715_v43, 1  ;;  %v727_v48 = vadd.f32 %v726_v44, %v725_v40 }
 0x1cd   : > { %v711_v49 = vadd.f32 %v710_v45, %v709_v41  ;;  %v722_v50 = vrot.slane %v721_v46, 1 }
 0x1ce   : > { %v717_v51 = vadd.f32 %v716_v47, %v715_v43  ;;  %v728_v52 = vrot.slane %v727_v48, 1 }
 0x1cf   : > { %1332 = vrcp.f32 %v711_v49  ;;  %v723_v53 = vadd.f32 %v722_v50, %v721_v46 }
 0x1d0   : > { %1334 = vrcp.f32 %v717_v51  ;;  %v729_v54 = vadd.f32 %v728_v52, %v727_v48 }
 0x1d1   : > { %1336 = vrcp.f32 %v723_v53 }
 0x1d2   : > { %1338 = vrcp.f32 %v729_v54 }
 0x1d9   : > { %v1333_v55 = vpop.eup %1332 }
 0x1da   : > { %v1335_v56 = vpop.eup %1334  ;;  %v731_v57 = vmul.f32 %v1333_v55, %v1325_v27 }
 0x1db   : > { %v1337_v58 = vpop.eup %1336  ;;  %v733_v59 = vmul.f32 %v1335_v56, %v1327_v28 }
 0x1dc   : > { %v1339_v60 = vpop.eup %1338  ;;  %v744_v61 = vpack.c.bf16 %v731_v57, %v731_v57  ;;  %v735_v62 = vmul.f32 %v1337_v58, %v1329_v30 }
 0x1dd   : > { %v745_v1 = vpack.c.bf16 %v733_v59, %v733_v59  ;;  %v737_v2 = vmul.f32 %v1339_v60, %v1331_v32 }
 0x1de   : > { %v757_v3 = vsel %vm755_vm1, %v744_v61, 0  ;;  %v746_v4 = vpack.c.bf16 %v735_v62, %v735_v62 }
 0x1df   : > { %1246 = vmatprep.subr.msk.bf16.mxu0 %vm755_vm1, %v745_v1  ;;  %v747_v5 = vpack.c.bf16 %v737_v2, %v737_v2 }
 0x1e0   : > { %769 = vmatpush1.bf16.msra.mxu0 %v757_v3  ;;  %v763_v7 = vsel %vm755_vm1, %v746_v4, 0 }
 0x1e1   : > { %1249 = vmatprep.subr.msk.bf16.mxu1 %vm755_vm1, %v747_v5 }
 0x1e2   : > { %822 = vmatpush1.bf16.msra.mxu1 %v763_v7 }
 0x1e3   : > { %1247 = vmatmul.mubr.msk.bf16.vlgmr.msra.gmra.mrb[4].mxu0 %vm748_vm2, %v742_v6 }
 0x1e4   : > { %810 = vmatprep.mubr.bf16.mxu0 %v1396_v16 }
 0x1e5   : > { %1250 = vmatmul.mubr.msk.bf16.vlgmr.msra.gmra.mrb[4].mxu1 %vm748_vm2, %v742_v6 }
 0x1e6   : > { %863 = vmatprep.mubr.bf16.mxu1 %v1396_v16 }
 0x1eb   : > { %1248 = vmatmul.mubr.msk.bf16.gmra.mrb[8].mxu0 %vm748_vm2, %v743_v10 }
 0x1ed   : > { %1251 = vmatmul.mubr.msk.bf16.gmra.mrb[8].mxu1 %vm748_vm2, %v743_v10 }
 0x2b6   : > { %v802_v11 = vpop.f32.mrb[4].mxu0 }
 0x2b7   : > { %874 = vst [vmem:[%s1596_s18] sm:$0xff] %v802_v11  ;;  %v910_v12 = vmul.f32 %v802_v11, %v802_v11  ;;  %v804_v13 = vpop.f32.mrb[5].mxu0 }
 0x2b8   : > { %875 = vst [vmem:[%s1596_s18 + $0x8] sm:$0xff] %v804_v13  ;;  %v890_v14 = vadd.f32 %v804_v13, %v802_v11  ;;  %v911_v15 = vmul.f32 %v804_v13, %v804_v13  ;;  %v806_v16 = vpop.f32.mrb[6].mxu0  ;;  %v855_v17 = vpop.f32.mrb[4].mxu1 }
 0x2b9   : > { %878 = vst [vmem:[%s1596_s18 + $0x20] sm:$0xff] %v806_v16  ;;  %v914_v18 = vmul.f32 %v806_v16, %v806_v16  ;;  %v808_v19 = vpop.f32.mrb[7].mxu0  ;;  %876 = vst [vmem:[%s1596_s18 + $0x10] sm:$0xff] %v855_v17  ;;  %v912_v20 = vmul.f32 %v855_v17, %v855_v17  ;;  %v857_v21 = vpop.f32.mrb[5].mxu1 }
 0x2ba   : > { %879 = vst [vmem:[%s1596_s18 + $0x28] sm:$0xff] %v808_v19  ;;  %v895_v22 = vadd.f32 %v808_v19, %v806_v16  ;;  %v915_v23 = vmul.f32 %v808_v19, %v808_v19  ;;  %877 = vst [vmem:[%s1596_s18 + $0x18] sm:$0xff] %v857_v21  ;;  %v859_v24 = vpop.f32.mrb[6].mxu1  ;;  %v891_v25 = vadd.f32 %v890_v14, %v855_v17 }
 0x2bb   : > { %880 = vst [vmem:[%s1596_s18 + $0x30] sm:$0xff] %v859_v24  ;;  %v861_v26 = vpop.f32.mrb[7].mxu1  ;;  %v926_v27 = vadd.f32 %v911_v15, %v910_v12  ;;  %v916_v28 = vmul.f32 %v859_v24, %v859_v24  ;;  %v913_v32 = vmul.f32 %v857_v21, %v857_v21 }
 0x2bc   : > { %881 = vst [vmem:[%s1596_s18 + $0x38] sm:$0xff] %v861_v26  ;;  %v892_v29 = vadd.f32 %v891_v25, %v857_v21  ;;  %v896_v30 = vadd.f32 %v895_v22, %v859_v24  ;;  %v931_v31 = vadd.f32 %v915_v23, %v914_v18  ;;  %v917_v36 = vmul.f32 %v861_v26, %v861_v26 }
 0x2bd   : > { %v927_v33 = vadd.f32 %v926_v27, %v912_v20 }
 0x2be   : > { %v812_v34 = vpop.f32.mrb[8].mxu0  ;;  %893 = vadd.xlane.f32.xlu1 %v892_v29  ;;  %v897_v35 = vadd.f32 %v896_v30, %v861_v26  ;;  %v932_v37 = vadd.f32 %v931_v31, %v916_v28 }
 0x2bf   : > { %882 = vst [vmem:[%s1596_s18 + $0x40] sm:$0xff] %v812_v34  ;;  %v918_v38 = vmul.f32 %v812_v34, %v812_v34  ;;  %v814_v39 = vpop.f32.mrb[9].mxu0  ;;  %v928_v40 = vadd.f32 %v927_v33, %v913_v32 }
 0x2c0   : > { %883 = vst [vmem:[%s1596_s18 + $0x48] sm:$0xff] %v814_v39  ;;  %v900_v41 = vadd.f32 %v814_v39, %v812_v34  ;;  %v919_v42 = vmul.f32 %v814_v39, %v814_v39  ;;  %898 = vadd.xlane.f32.xlu0 %v897_v35  ;;  %v816_v43 = vpop.f32.mrb[10].mxu0  ;;  %v865_v44 = vpop.f32.mrb[8].mxu1  ;;  %v933_v45 = vadd.f32 %v932_v37, %v917_v36 }
 0x2c1   : > { %886 = vst [vmem:[%s1596_s18 + $0x60] sm:$0xff] %v816_v43  ;;  %v922_v46 = vmul.f32 %v816_v43, %v816_v43  ;;  %v818_v47 = vpop.f32.mrb[11].mxu0  ;;  %884 = vst [vmem:[%s1596_s18 + $0x50] sm:$0xff] %v865_v44  ;;  %v920_v48 = vmul.f32 %v865_v44, %v865_v44  ;;  %v867_v49 = vpop.f32.mrb[9].mxu1 }
 0x2c2   : > { %887 = vst [vmem:[%s1596_s18 + $0x68] sm:$0xff] %v818_v47  ;;  %v905_v50 = vadd.f32 %v818_v47, %v816_v43  ;;  %v923_v51 = vmul.f32 %v818_v47, %v818_v47  ;;  %885 = vst [vmem:[%s1596_s18 + $0x58] sm:$0xff] %v867_v49  ;;  %v869_v52 = vpop.f32.mrb[10].mxu1  ;;  %934 = vadd.xlane.f32.xlu1 %v933_v45  ;;  %v901_v53 = vadd.f32 %v900_v41, %v865_v44 }
 0x2c3   : > { %888 = vst [vmem:[%s1596_s18 + $0x70] sm:$0xff] %v869_v52  ;;  %v871_v54 = vpop.f32.mrb[11].mxu1  ;;  %v936_v55 = vadd.f32 %v919_v42, %v918_v38  ;;  %v924_v57 = vmul.f32 %v869_v52, %v869_v52  ;;  %v921_v60 = vmul.f32 %v867_v49, %v867_v49 }
 0x2c4   : > { %v941_v56 = vadd.f32 %v923_v51, %v922_v46  ;;  %929 = vadd.xlane.f32.xlu0 %v928_v40  ;;  %889 = vst [vmem:[%s1596_s18 + $0x78] sm:$0xff] %v871_v54  ;;  %v902_v58 = vadd.f32 %v901_v53, %v867_v49  ;;  %v906_v59 = vadd.f32 %v905_v50, %v869_v52 }
 0x2c5   : > { %v937_v61 = vadd.f32 %v936_v55, %v920_v48  ;;  %v925_v62 = vmul.f32 %v871_v54, %v871_v54 }
 0x2c6   : > { %v907_v63 = vadd.f32 %v906_v59, %v871_v54  ;;  %v942_v0 = vadd.f32 %v941_v56, %v924_v57 }
 0x2c7   : > { %v938_v1 = vadd.f32 %v937_v61, %v921_v60 }
 0x2c8   : > { %903 = vadd.xlane.f32.xlu0 %v902_v58  ;;  %908 = vadd.xlane.f32.xlu1 %v907_v63  ;;  %v943_v2 = vadd.f32 %v942_v0, %v925_v62 }
 0x2cc   : > { %939 = vadd.xlane.f32.xlu0 %v938_v1  ;;  %944 = vadd.xlane.f32.xlu1 %v943_v2 }
 0x34b   : > { %v894_v3 = vpop.xlane.xlu1 %893 }
 0x34c   : > { %951 = vst.msk [vmem:[%s1543_s25] sm:$0xff] (!%p1252_p13), %vm950_vm3, %v894_v3 }
 0x34d   : > { %v899_v4 = vpop.xlane.xlu0 %898 }
 0x34e   : > { %952 = vst.msk [vmem:[%s1543_s25 + $0x8] sm:$0xff] (!%p1252_p13), %vm950_vm3, %v899_v4 }
 0x34f   : > { %v935_v5 = vpop.xlane.xlu1 %934 }
 0x350   : > { %956 = vst.msk [vmem:[%s1549_s15 + $0x8] sm:$0xff] (!%p1252_p13), %vm950_vm3, %v935_v5 }
 0x351   : > { %v930_v6 = vpop.xlane.xlu0 %929 }
 0x352   : > { %955 = vst.msk [vmem:[%s1549_s15] sm:$0xff] (!%p1252_p13), %vm950_vm3, %v930_v6 }
 0x353   : > { %949 = sbr.rel (%p1252_p13) target bundleno = 859 (0x35b), region = 71 }
 0x355   : > { %v904_v7 = vpop.xlane.xlu0 %903  ;;  %v909_v8 = vpop.xlane.xlu1 %908 }
 0x356   : > { %953 = vst.msk [vmem:[%s1543_s25 + $0x10] sm:$0xff] (!%p1252_p13), %vm950_vm3, %v904_v7  ;;  %954 = vst.msk [vmem:[%s1543_s25 + $0x18] sm:$0xff] (!%p1252_p13), %vm950_vm3, %v909_v8 }
 0x359   : > { %v940_v9 = vpop.xlane.xlu0 %939  ;;  %v945_v10 = vpop.xlane.xlu1 %944 }
 0x35a   : > { %957 = vst.msk [vmem:[%s1549_s15 + $0x10] sm:$0xff] %vm950_vm3, %v940_v9  ;;  %958 = vst.msk [vmem:[%s1549_s15 + $0x18] sm:$0xff] %vm950_vm3, %v945_v10 }
 0x35b PF: > { %p1253_p0 = scmp.le.s32.totalorder %s1378_s29, 0 }
 0x35c   : > { %v963_v11 = vld [vmem:[%s1543_s25] sm:$0xff] (!%p1253_p0)  ;;  %vm971_vm4 = vcmask (!%p1253_p0), 7168   ;;  %v964_v12 = vld [vmem:[%s1543_s25 + $0x8] sm:$0xff] (!%p1253_p0) }
 0x35d   : > { %962 = sbr.rel (%p1253_p0) target bundleno = 869 (0x365), region = 75  ;;  %v967_v14 = vadd.f32 (!%p1253_p0), %v963_v11, %v894_v3  ;;  %v968_v15 = vadd.f32 (!%p1253_p0), %v964_v12, %v899_v4  ;;  %v976_v18 = vld [vmem:[%s1549_s15] sm:$0xff] (!%p1253_p0)  ;;  %v977_v19 = vld [vmem:[%s1549_s15 + $0x8] sm:$0xff] (!%p1253_p0) }
 0x35e   : > { %v965_v13 = vld [vmem:[%s1543_s25 + $0x10] sm:$0xff] (!%p1253_p0)  ;;  %v966_v17 = vld [vmem:[%s1543_s25 + $0x18] sm:$0xff] (!%p1253_p0)  ;;  %v980_v21 = vadd.f32 (!%p1253_p0), %v976_v18, %v930_v6  ;;  %v981_v22 = vadd.f32 (!%p1253_p0), %v977_v19, %v935_v5 }
 0x35f   : > { %v969_v16 = vadd.f32 (!%p1253_p0), %v965_v13, %v904_v7  ;;  %v970_v20 = vadd.f32 (!%p1253_p0), %v966_v17, %v909_v8  ;;  %972 = vst.msk [vmem:[%s1543_s25] sm:$0xff] (!%p1253_p0), %vm971_vm4, %v967_v14  ;;  %973 = vst.msk [vmem:[%s1543_s25 + $0x8] sm:$0xff] (!%p1253_p0), %vm971_vm4, %v968_v15 }
 0x360   : > { %984 = vst.msk [vmem:[%s1549_s15] sm:$0xff] (!%p1253_p0), %vm971_vm4, %v980_v21  ;;  %985 = vst.msk [vmem:[%s1549_s15 + $0x8] sm:$0xff] (!%p1253_p0), %vm971_vm4, %v981_v22 }
 0x361   : > { %v978_v23 = vld [vmem:[%s1549_s15 + $0x10] sm:$0xff] (!%p1253_p0)  ;;  %v979_v24 = vld [vmem:[%s1549_s15 + $0x18] sm:$0xff] (!%p1253_p0)  ;;  %974 = vst.msk [vmem:[%s1543_s25 + $0x10] sm:$0xff] (!%p1253_p0), %vm971_vm4, %v969_v16  ;;  %975 = vst.msk [vmem:[%s1543_s25 + $0x18] sm:$0xff] (!%p1253_p0), %vm971_vm4, %v970_v20 }
 0x362   : > { %v982_v25 = vadd.f32 (!%p1253_p0), %v978_v23, %v940_v9  ;;  %v983_v26 = vadd.f32 (!%p1253_p0), %v979_v24, %v945_v10 }
 0x364   : > { %986 = vst.msk [vmem:[%s1549_s15 + $0x10] sm:$0xff] %vm971_vm4, %v982_v25  ;;  %987 = vst.msk [vmem:[%s1549_s15 + $0x18] sm:$0xff] %vm971_vm4, %v983_v26 }
 0x365 PF: > { %1004 = sbr.rel (!%p1490_p6) target bundleno = 882 (0x372), region = 79  ;;  %s1255_s25 = sshll.u32 (%p1490_p6), %s1378_s29, 2  ;;  %v1022_v27 = vld [vmem:[%s1596_s18] sm:$0xff] (%p1490_p6)  ;;  %v1024_v28 = vld [vmem:[%s1596_s18 + $0x8] sm:$0xff] (%p1490_p6)  ;;  %v1026_v29 = vld [vmem:[%s1596_s18 + $0x10] sm:$0xff] (%p1490_p6) }
 0x366   : > { %s1256_s15 = sshll.u32 (%p1490_p6), %s1382_s30, 5  ;;  %v1028_v30 = vld [vmem:[%s1596_s18 + $0x18] sm:$0xff] (%p1490_p6)  ;;  %v1030_v31 = vld [vmem:[%s1596_s18 + $0x20] sm:$0xff] (%p1490_p6)  ;;  %v1032_v32 = vld [vmem:[%s1596_s18 + $0x28] sm:$0xff] (%p1490_p6) }
 0x367   : > { %s1007_s16 = sadd.s32 (%p1490_p6), %s1256_s15, %s1255_s25  ;;  %v1034_v33 = vld [vmem:[%s1596_s18 + $0x30] sm:$0xff] (%p1490_p6)  ;;  %v1036_v34 = vld [vmem:[%s1596_s18 + $0x38] sm:$0xff] (%p1490_p6)  ;;  %v1038_v35 = vld [vmem:[%s1596_s18 + $0x40] sm:$0xff] (%p1490_p6) }
 0x368   : > { %s1257_s13 = sshll.u32 (%p1490_p6), %s1007_s16, 3  ;;  %v1040_v36 = vld [vmem:[%s1596_s18 + $0x48] sm:$0xff] (%p1490_p6)  ;;  %v1042_v37 = vld [vmem:[%s1596_s18 + $0x50] sm:$0xff] (%p1490_p6)  ;;  %v1044_v38 = vld [vmem:[%s1596_s18 + $0x58] sm:$0xff] (%p1490_p6) }
 0x369   : > { %s1009_s23 = scalar_lea.vmem (%p1490_p6), %s1698_s6, %s1257_s13  ;;  %v1046_v39 = vld [vmem:[%s1596_s18 + $0x60] sm:$0xff] (%p1490_p6)  ;;  %v1048_v40 = vld [vmem:[%s1596_s18 + $0x68] sm:$0xff] (%p1490_p6)  ;;  %v1050_v41 = vld [vmem:[%s1596_s18 + $0x70] sm:$0xff] (%p1490_p6) }
 0x36a   : > { %1023 = vst [vmem:[%s1009_s23] sm:$0xff] (%p1490_p6), %v1022_v27  ;;  %1025 = vst [vmem:[%s1009_s23 + $0x8] sm:$0xff] (%p1490_p6), %v1024_v28  ;;  %v1052_v42 = vld [vmem:[%s1596_s18 + $0x78] sm:$0xff] (%p1490_p6) }
 0x36b   : > { %1027 = vst [vmem:[%s1009_s23 + $0x10] sm:$0xff] (%p1490_p6), %v1026_v29  ;;  %1029 = vst [vmem:[%s1009_s23 + $0x18] sm:$0xff] (%p1490_p6), %v1028_v30 }
 0x36c   : > { %1031 = vst [vmem:[%s1009_s23 + $0x40] sm:$0xff] %v1030_v31  ;;  %1033 = vst [vmem:[%s1009_s23 + $0x48] sm:$0xff] %v1032_v32 }
 0x36d   : > { %1035 = vst [vmem:[%s1009_s23 + $0x50] sm:$0xff] %v1034_v33  ;;  %1037 = vst [vmem:[%s1009_s23 + $0x58] sm:$0xff] %v1036_v34 }
 0x36e   : > { %1039 = vst [vmem:[%s1009_s23 + $0x80] sm:$0xff] %v1038_v35  ;;  %1041 = vst [vmem:[%s1009_s23 + $0x88] sm:$0xff] %v1040_v36 }
 0x36f   : > { %1043 = vst [vmem:[%s1009_s23 + $0x90] sm:$0xff] %v1042_v37  ;;  %1045 = vst [vmem:[%s1009_s23 + $0x98] sm:$0xff] %v1044_v38 }
 0x370   : > { %1047 = vst [vmem:[%s1009_s23 + $0xc0] sm:$0xff] %v1046_v39  ;;  %1049 = vst [vmem:[%s1009_s23 + $0xc8] sm:$0xff] %v1048_v40 }
 0x371   : > { %1051 = vst [vmem:[%s1009_s23 + $0xd0] sm:$0xff] %v1050_v41  ;;  %1053 = vst [vmem:[%s1009_s23 + $0xd8] sm:$0xff] %v1052_v42 }
 0x372 PF: > { %s19_s11 = sadd.s32 1, %s1394_s11   ;;  %s1706_s24 = sld [smem:[#allocation4_spill]] }
 0x373   : > { %p16_p1 = scmp.ge.s32.totalorder %s19_s11, 6   ;;  %s1707_s27 = smov %s1374_s28 }
 0x374   : > { %s1708_s28 = smov %s1498_s20  ;;  %s1709_s29 = smov %s1386_s9 }
 0x375   : > { %s1710_s30 = smov %s1390_s10  ;;  %s1711_s9 = smov %s1714_s12 }
 0x376   :  { %18 = sbr.rel (!%p16_p1) target bundleno = 6 (0x6), region = 166 }
 0x378   : > { %s1712_s10 = smov %s1706_s24 }

// kernel: oanblock_forward.20
= control target key start
LH: loop header
LB: loop body
LE: loop exit
PB: predicated region body
PF: predicated region fallthrough
CT: control target
= control target key end

     0   :  { %vm53_vm0 = vcmask 64512   ;;  %v1513_v32 = vmov 0   ;;  %vm412_vm1 = vcmask 261120   ;;  %s2208_s0 = inlined_call_operand.vmem [shape: f32[2,32,8], index: 0, kind: input, shape index: {}]   ;;  %s2209_s1 = inlined_call_operand.vmem [shape: f32[1,32,1], index: 1, kind: input, shape index: {}]   ;;  %s2210_s2 = inlined_call_operand.vmem [shape: f32[1,32,1], index: 2, kind: input, shape index: {}]   ;;  %s2211_s4 = inlined_call_operand.vmem [shape: f32[32,1], index: 4, kind: input, shape index: {}]   ;;  %s2212_s3 = inlined_call_operand.vmem [shape: f32[32,32], index: 3, kind: input, shape index: {}]   ;;  %s2213_s7 = inlined_call_operand.vmem [shape: f32[8,8], index: 7, kind: input, shape index: {}]   ;;  %s2214_s5 = inlined_call_operand.vmem [shape: f32[1,1,8], index: 5, kind: input, shape index: {}]   ;;  %s2215_s6 = inlined_call_operand.vmem [shape: f32[1,1,8], index: 6, kind: input, shape index: {}]   ;;  %s2216_s8 = inlined_call_operand.vmem [shape: f32[1,8], index: 8, kind: input, shape index: {}]   ;;  %s2217_s9 = inlined_call_operand.vmem [shape: f32[1,32,1], index: 9, kind: input, shape index: {}]   ;;  %s2218_s10 = inlined_call_operand.vmem [shape: f32[1,32,1], index: 10, kind: input, shape index: {}]   ;;  %s2219_s12 = inlined_call_operand.vmem [shape: f32[32,1], index: 12, kind: input, shape index: {}]   ;;  %s2220_s11 = inlined_call_operand.vmem [shape: f32[32,32], index: 11, kind: input, shape index: {}]   ;;  %s2221_s13 = inlined_call_operand.vmem [shape: f32[2,32,8], index: 13, kind: output, shape index: {}]  }
   0x1   :  { %v1587_v0 = vld [vmem:[%s2208_s0 + $0x20] sm:$0xff]  ;;  %v1597_v2 = vld [vmem:[%s2208_s0 + $0x28] sm:$0xff]  ;;  %v1627_v16 = vld [vmem:[%s2208_s0 + $0x18] sm:$0xff]  ;;  %1454 = vset.pattern.permute.xlu1 %v1513_v32  ;;  %1453 = vset.pattern.permute.xlu0 %v1513_v32 }
   0x2   :  { %v1592_v1 = vld [vmem:[%s2208_s0] sm:$0xff]  ;;  %v66_v3 = vsel %vm53_vm0, %v1587_v0, 0.0  ;;  %v1606_v5 = vld [vmem:[%s2208_s0 + $0x8] sm:$0xff]  ;;  %v69_v6 = vsel %vm53_vm0, %v1597_v2, 0.0  ;;  %v92_v12 = vmul.f32 %v1597_v2, %v1597_v2  ;;  %v91_v13 = vmul.f32 %v1587_v0, %v1587_v0  ;;  %v1632_v17 = vld [vmem:[%s2208_s0 + $0x10] sm:$0xff] }
   0x3   :  { %v54_v4 = vsel %vm53_vm0, %v1592_v1, 0.0  ;;  %67 = vadd.xlane.f32.xlu1 %v66_v3  ;;  %v57_v7 = vsel %vm53_vm0, %v1606_v5, 0.0  ;;  %v88_v8 = vmul.f32 %v1606_v5, %v1606_v5  ;;  %v87_v9 = vmul.f32 %v1592_v1, %v1592_v1  ;;  %v1641_v20 = vld [vmem:[%s2208_s0 + $0x38] sm:$0xff]  ;;  %v1646_v21 = vld [vmem:[%s2208_s0 + $0x30] sm:$0xff] }
   0x4   :  { %55 = vadd.xlane.f32.xlu0 %v54_v4  ;;  %v110_v14 = vsel %vm53_vm0, %v92_v12, 0.0  ;;  %v107_v15 = vsel %vm53_vm0, %v91_v13, 0.0  ;;  %v63_v18 = vsel %vm53_vm0, %v1627_v16, 0.0  ;;  %v60_v19 = vsel %vm53_vm0, %v1632_v17, 0.0 }
   0x5   :  { %v98_v10 = vsel %vm53_vm0, %v88_v8, 0.0  ;;  %v95_v11 = vsel %vm53_vm0, %v87_v9, 0.0  ;;  %v75_v22 = vsel %vm53_vm0, %v1641_v20, 0.0  ;;  %v72_v23 = vsel %vm53_vm0, %v1646_v21, 0.0 }
   0x6   :  { %v90_v24 = vmul.f32 %v1627_v16, %v1627_v16  ;;  %v89_v25 = vmul.f32 %v1632_v17, %v1632_v17  ;;  %v94_v28 = vmul.f32 %v1641_v20, %v1641_v20  ;;  %v93_v29 = vmul.f32 %v1646_v21, %v1646_v21 }
   0x7   :  { %70 = vadd.xlane.f32.xlu1 %v69_v6 }
   0x8   :  { %58 = vadd.xlane.f32.xlu0 %v57_v7  ;;  %v104_v26 = vsel %vm53_vm0, %v90_v24, 0.0  ;;  %v101_v27 = vsel %vm53_vm0, %v89_v25, 0.0  ;;  %v116_v30 = vsel %vm53_vm0, %v94_v28, 0.0  ;;  %v113_v31 = vsel %vm53_vm0, %v93_v29, 0.0 }
   0xb   :  { %99 = vadd.xlane.f32.xlu1 %v98_v10 }
   0xc   :  { %96 = vadd.xlane.f32.xlu0 %v95_v11 }
   0xf   :  { %111 = vadd.xlane.f32.xlu1 %v110_v14 }
  0x10   :  { %108 = vadd.xlane.f32.xlu0 %v107_v15 }
  0x13   :  { %64 = vadd.xlane.f32.xlu1 %v63_v18 }
  0x14   :  { %61 = vadd.xlane.f32.xlu0 %v60_v19 }
  0x17   :  { %76 = vadd.xlane.f32.xlu1 %v75_v22 }
  0x18   :  { %73 = vadd.xlane.f32.xlu0 %v72_v23 }
  0x1b   :  { %105 = vadd.xlane.f32.xlu1 %v104_v26 }
  0x1c   :  { %102 = vadd.xlane.f32.xlu0 %v101_v27 }
  0x1f   :  { %117 = vadd.xlane.f32.xlu1 %v116_v30 }
  0x20   :  { %114 = vadd.xlane.f32.xlu0 %v113_v31 }
  0x90   :  { %v68_v33 = vpop.xlane.xlu1 %67 }
  0x91   :  { %v56_v34 = vpop.xlane.xlu0 %55  ;;  %v1668_v41 = vmul.f32 0.125, %v68_v33 }
  0x92   :  { %v1664_v35 = vmul.f32 0.125, %v56_v34 }
  0x93   :  { %v131_v49 = vmul.f32 %v1668_v41, %v1668_v41 }
  0x94   :  { %v71_v36 = vpop.xlane.xlu1 %70  ;;  %v127_v39 = vmul.f32 %v1664_v35, %v1664_v35  ;;  %v151_v29 = vsub.f32 %v1592_v1, %v1664_v35 }
  0x95   :  { %v59_v37 = vpop.xlane.xlu0 %58  ;;  %v1670_v42 = vmul.f32 0.125, %v71_v36 }
  0x96   :  { %v80_v38 = vmul.f32 0.125, %v59_v37 }
  0x97   :  { %v132_v50 = vmul.f32 %v1670_v42, %v1670_v42 }
  0x98   :  { %v128_v40 = vmul.f32 %v80_v38, %v80_v38  ;;  %v100_v43 = vpop.xlane.xlu1 %99  ;;  %v152_v23 = vsub.f32 %v1606_v5, %v80_v38  ;;  %v155_v38 = vsub.f32 %v1587_v0, %v1668_v41 }
  0x99   :  { %v97_v44 = vpop.xlane.xlu0 %96  ;;  %v120_v45 = vmul.f32 0.125, %v100_v43 }
  0x9a   :  { %v119_v46 = vmul.f32 0.125, %v97_v44 }
  0x9b   :  { %v136_v47 = vsub.f32 %v120_v45, %v128_v40 }
  0x9c   :  { %v135_v48 = vsub.f32 %v119_v46, %v127_v39  ;;  %v112_v51 = vpop.xlane.xlu1 %111  ;;  %v156_v39 = vsub.f32 %v1597_v2, %v1670_v42 }
  0x9d   :  { %v109_v52 = vpop.xlane.xlu0 %108  ;;  %v144_v53 = vmax.f32 %v136_v47, 0.0  ;;  %v124_v55 = vmul.f32 0.125, %v112_v51 }
  0x9e   :  { %v143_v54 = vmax.f32 %v135_v48, 0.0  ;;  %v123_v56 = vmul.f32 0.125, %v109_v52 }
  0x9f   :  { %v160_v57 = vadd.f32 0.001, %v144_v53  ;;  %v140_v59 = vsub.f32 %v124_v55, %v132_v50 }
  0xa0   :  { %v159_v58 = vadd.f32 0.001, %v143_v54  ;;  %v139_v60 = vsub.f32 %v123_v56, %v131_v49  ;;  %v65_v61 = vpop.xlane.xlu1 %64 }
  0xa1   :  { %v62_v62 = vpop.xlane.xlu0 %61  ;;  %1455 = vrsqrt.f32 %v160_v57  ;;  %v148_v63 = vmax.f32 %v140_v59, 0.0  ;;  %v82_v10 = vmul.f32 0.125, %v65_v61 }
  0xa2   :  { %v147_v3 = vmax.f32 %v139_v60, 0.0  ;;  %1457 = vrsqrt.f32 %v159_v58  ;;  %v1676_v7 = vmul.f32 0.125, %v62_v62 }
  0xa3   :  { %v164_v4 = vadd.f32 0.001, %v148_v63  ;;  %v130_v18 = vmul.f32 %v82_v10, %v82_v10  ;;  %v154_v54 = vsub.f32 %v1627_v16, %v82_v10 }
  0xa4   :  { %v163_v6 = vadd.f32 0.001, %v147_v3  ;;  %v77_v8 = vpop.xlane.xlu1 %76  ;;  %v129_v11 = vmul.f32 %v1676_v7, %v1676_v7  ;;  %v153_v53 = vsub.f32 %v1632_v17, %v1676_v7 }
  0xa5   :  { %v74_v9 = vpop.xlane.xlu0 %73  ;;  %1459 = vrsqrt.f32 %v164_v4  ;;  %v1682_v13 = vmul.f32 0.125, %v77_v8 }
  0xa6   :  { %1461 = vrsqrt.f32 %v163_v6  ;;  %v1680_v12 = vmul.f32 0.125, %v74_v9 }
  0xa7   :  { %v134_v30 = vmul.f32 %v1682_v13, %v1682_v13  ;;  %v158_v60 = vsub.f32 %v1641_v20, %v1682_v13 }
  0xa8   :  { %v106_v14 = vpop.xlane.xlu1 %105  ;;  %v133_v25 = vmul.f32 %v1680_v12, %v1680_v12  ;;  %v157_v58 = vsub.f32 %v1646_v21, %v1680_v12 }
  0xa9   :  { %v103_v15 = vpop.xlane.xlu0 %102  ;;  %v122_v19 = vmul.f32 0.125, %v106_v14 }
  0xaa   :  { %v121_v22 = vmul.f32 0.125, %v103_v15 }
  0xab   :  { %v1456_v24 = vpop.eup %1455  ;;  %v138_v26 = vsub.f32 %v122_v19, %v130_v18 }
  0xac   :  { %v137_v27 = vsub.f32 %v121_v22, %v129_v11  ;;  %v1458_v28 = vpop.eup %1457  ;;  %v118_v31 = vpop.xlane.xlu1 %117  ;;  %v1691_v33 = vmul.f32 %v1456_v24, %v152_v23  ;;  %v309_v23 = vld [vmem:[%s2209_s1 + $0x8] sm:$0xff]  ;;  %v340_v24 = vld [vmem:[%s2210_s2] sm:$0xff] }
  0xad   :  { %v115_v32 = vpop.xlane.xlu0 %114  ;;  %v146_v34 = vmax.f32 %v138_v26, 0.0  ;;  %v126_v5 = vmul.f32 0.125, %v118_v31  ;;  %v1699_v35 = vmul.f32 %v1458_v28, %v151_v29  ;;  %v308_v26 = vld [vmem:[%s2209_s1] sm:$0xff]  ;;  %v389_v28 = vld [vmem:[%s2211_s4 + $0x8] sm:$0xff]  ;;  %v311_v29 = vld [vmem:[%s2209_s1 + $0x18] sm:$0xff] }
  0xae   :  { %v145_v36 = vmax.f32 %v137_v27, 0.0  ;;  %v125_v37 = vmul.f32 0.125, %v115_v32  ;;  %v186_v1 = vsel %vm53_vm0, %v1691_v33, 0.0  ;;  %v225_v20 = vmul.f32 %v1691_v33, %v1691_v33  ;;  %v310_v27 = vld [vmem:[%s2209_s1 + $0x10] sm:$0xff]  ;;  %v391_v32 = vld [vmem:[%s2211_s4 + $0x18] sm:$0xff] }
  0xaf   :  { %v1460_v40 = vpop.eup %1459  ;;  %v162_v43 = vadd.f32 0.001, %v146_v34  ;;  %v142_v45 = vsub.f32 %v126_v5, %v134_v30  ;;  %187 = vadd.xlane.f32.xlu1 %v186_v1  ;;  %v183_v48 = vsel %vm53_vm0, %v1699_v35, 0.0  ;;  %v224_v6 = vmul.f32 %v1699_v35, %v1699_v35  ;;  %v342_v30 = vld [vmem:[%s2210_s2 + $0x10] sm:$0xff]  ;;  %v343_v5 = vld [vmem:[%s2210_s2 + $0x18] sm:$0xff] }
  0xb0   :  { %v161_v44 = vadd.f32 0.001, %v145_v36  ;;  %v141_v46 = vsub.f32 %v125_v37, %v133_v25  ;;  %v1462_v47 = vpop.eup %1461  ;;  %v1703_v49 = vmul.f32 %v1460_v40, %v156_v39  ;;  %184 = vadd.xlane.f32.xlu0 %v183_v48  ;;  %v235_v7 = vsel %vm53_vm0, %v225_v20, 0.0  ;;  %v341_v25 = vld [vmem:[%s2210_s2 + $0x8] sm:$0xff]  ;;  %v390_v31 = vld [vmem:[%s2211_s4 + $0x10] sm:$0xff]  ;;  %v388_v37 = vld [vmem:[%s2211_s4] sm:$0xff] }
  0xb1   :  { %1463 = vrsqrt.f32 %v162_v43  ;;  %v150_v0 = vmax.f32 %v142_v45, 0.0  ;;  %v1705_v41 = vmul.f32 %v1462_v47, %v155_v38  ;;  %v232_v9 = vsel %vm53_vm0, %v224_v6, 0.0  ;;  %v380_v43 = vld [vmem:[%s2212_s3] sm:$0xff] }
  0xb2   :  { %v149_v2 = vmax.f32 %v141_v46, 0.0  ;;  %1465 = vrsqrt.f32 %v161_v44  ;;  %v198_v42 = vsel %vm53_vm0, %v1703_v49, 0.0  ;;  %v229_v8 = vmul.f32 %v1703_v49, %v1703_v49  ;;  %v381_v44 = vld [vmem:[%s2212_s3 + $0x8] sm:$0xff] }
  0xb3   :  { %v166_v50 = vadd.f32 0.001, %v150_v0  ;;  %199 = vadd.xlane.f32.xlu1 %v198_v42  ;;  %v195_v52 = vsel %vm53_vm0, %v1705_v41, 0.0  ;;  %v228_v10 = vmul.f32 %v1705_v41, %v1705_v41  ;;  %v384_v45 = vpack.c.bf16 %v381_v44, %v380_v43 }
  0xb4   :  { %v165_v51 = vadd.f32 0.001, %v149_v2  ;;  %196 = vadd.xlane.f32.xlu0 %v195_v52  ;;  %v247_v12 = vsel %vm53_vm0, %v229_v8, 0.0 }
  0xb5   :  { %1467 = vrsqrt.f32 %v166_v50  ;;  %v244_v14 = vsel %vm53_vm0, %v228_v10, 0.0  ;;  %1410 = vmatprep.mubr.msk.bf16.mxu0 %vm412_vm1, %v384_v45  ;;  %1418 = vmatprep.mubr.msk.bf16.mxu1 %vm412_vm1, %v384_v45 }
  0xb6   :  { %1469 = vrsqrt.f32 %v165_v51 }
  0xbb   :  { %v1464_v55 = vpop.eup %1463 }
  0xbc   :  { %v1466_v56 = vpop.eup %1465  ;;  %v1714_v57 = vmul.f32 %v1464_v55, %v154_v54 }
  0xbd   :  { %v1718_v59 = vmul.f32 %v1466_v56, %v153_v53 }
  0xbe   :  { %v192_v61 = vsel %vm53_vm0, %v1714_v57, 0.0  ;;  %v227_v13 = vmul.f32 %v1714_v57, %v1714_v57 }
  0xbf   :  { %v1468_v62 = vpop.eup %1467  ;;  %193 = vadd.xlane.f32.xlu1 %v192_v61  ;;  %v189_v16 = vsel %vm53_vm0, %v1718_v59, 0.0  ;;  %v226_v11 = vmul.f32 %v1718_v59, %v1718_v59 }
  0xc0   :  { %v1470_v17 = vpop.eup %1469  ;;  %190 = vadd.xlane.f32.xlu0 %v189_v16  ;;  %v1726_v63 = vmul.f32 %v1468_v62, %v158_v60  ;;  %v241_v19 = vsel %vm53_vm0, %v227_v13, 0.0 }
  0xc1   :  { %v1728_v3 = vmul.f32 %v1470_v17, %v157_v58  ;;  %v238_v15 = vsel %vm53_vm0, %v226_v11, 0.0 }
  0xc2   :  { %v204_v21 = vsel %vm53_vm0, %v1726_v63, 0.0  ;;  %v231_v34 = vmul.f32 %v1726_v63, %v1726_v63 }
  0xc3   :  { %205 = vadd.xlane.f32.xlu1 %v204_v21  ;;  %v201_v4 = vsel %vm53_vm0, %v1728_v3, 0.0  ;;  %v230_v18 = vmul.f32 %v1728_v3, %v1728_v3 }
  0xc4   :  { %202 = vadd.xlane.f32.xlu0 %v201_v4  ;;  %v253_v36 = vsel %vm53_vm0, %v231_v34, 0.0 }
  0xc5   :  { %v250_v22 = vsel %vm53_vm0, %v230_v18, 0.0 }
  0xc7   :  { %236 = vadd.xlane.f32.xlu1 %v235_v7 }
  0xc8   :  { %233 = vadd.xlane.f32.xlu0 %v232_v9 }
  0xcb   :  { %248 = vadd.xlane.f32.xlu1 %v247_v12 }
  0xcc   :  { %245 = vadd.xlane.f32.xlu0 %v244_v14 }
  0xcf   :  { %242 = vadd.xlane.f32.xlu1 %v241_v19 }
  0xd0   :  { %239 = vadd.xlane.f32.xlu0 %v238_v15 }
  0xd4   :  { %251 = vadd.xlane.f32.xlu0 %v250_v22 }
  0xe0   :  { %319 = vperm.xlu1 %1454, %v309_v23  }
  0xe4   :  { %346 = vperm.xlu1 %1454, %v340_v24  }
  0xe8   :  { %351 = vperm.xlu1 %1454, %v341_v25  }
  0xea   :  { %314 = vperm.xlu0 %1453, %v308_v26  }
  0xec   :  { %324 = vperm.xlu1 %1454, %v310_v27  }
  0xee   :  { %399 = vperm.xlu0 %1453, %v389_v28  }
  0xf0   :  { %329 = vperm.xlu1 %1454, %v311_v29  }
  0xf2   :  { %485 = vperm.xlu0 %1453, %v389_v28  }
  0xf4   :  { %356 = vperm.xlu1 %1454, %v342_v30  }
  0xf6   :  { %490 = vperm.xlu0 %1453, %v390_v31  }
  0xfa   :  { %495 = vperm.xlu0 %1453, %v391_v32  }
 0x118   :  { %254 = vadd.xlane.f32.xlu1 %v253_v36 }
 0x129   :  { %361 = vperm.xlu1 %1454, %v343_v5  }
 0x12d   :  { %394 = vperm.xlu1 %1454, %v388_v37  }
 0x131   :  { %480 = vperm.xlu1 %1454, %v388_v37  }
 0x135   :  { %404 = vperm.xlu1 %1454, %v390_v31  }
 0x139   :  { %409 = vperm.xlu1 %1454, %v391_v32  }
 0x13c   :  { %v188_v38 = vpop.xlane.xlu1 %187 }
 0x13d   :  { %v185_v39 = vpop.xlane.xlu0 %184  ;;  %v208_v54 = vmul.f32 0.125, %v188_v38 }
 0x13e   :  { %v207_v56 = vmul.f32 0.125, %v185_v39 }
 0x140   :  { %v200_v1 = vpop.xlane.xlu1 %199 }
 0x141   :  { %v197_v40 = vpop.xlane.xlu0 %196  ;;  %v212_v2 = vmul.f32 0.125, %v200_v1 }
 0x142   :  { %v211_v52 = vmul.f32 0.125, %v197_v40 }
 0x143   :  { %v216_v61 = vadd.f32 %v212_v2, %v208_v54 }
 0x144   :  { %v215_v16 = vadd.f32 %v211_v52, %v207_v56 }
 0x145   :  { %v221_v21 = vmul.f32 0.5, %v216_v61 }
 0x146   :  { %v220_v7 = vmul.f32 0.5, %v215_v16 }
 0x147   :  { %v273_v12 = vmul.f32 %v221_v21, %v221_v21  ;;  %v285_v31 = vsub.f32 %v1691_v33, %v221_v21  ;;  %v289_v32 = vsub.f32 %v1703_v49, %v221_v21 }
 0x148   :  { %v272_v14 = vmul.f32 %v220_v7, %v220_v7  ;;  %v284_v36 = vsub.f32 %v1699_v35, %v220_v7  ;;  %v288_v5 = vsub.f32 %v1705_v41, %v220_v7 }
 0x14c   :  { %v194_v46 = vpop.xlane.xlu1 %193 }
 0x14d   :  { %v191_v47 = vpop.xlane.xlu0 %190  ;;  %v210_v42 = vmul.f32 0.125, %v194_v46 }
 0x14e   :  { %v209_v48 = vmul.f32 0.125, %v191_v47 }
 0x150   :  { %v206_v0 = vpop.xlane.xlu1 %205 }
 0x151   :  { %v214_v50 = vmul.f32 0.125, %v206_v0  ;;  %v203_v51 = vpop.xlane.xlu0 %202 }
 0x152   :  { %v213_v53 = vmul.f32 0.125, %v203_v51 }
 0x153   :  { %v1802_v55 = vadd.f32 %v214_v50, %v210_v42 }
 0x154   :  { %v1804_v58 = vadd.f32 %v213_v53, %v209_v48  ;;  %v237_v60 = vpop.xlane.xlu1 %236 }
 0x155   :  { %v234_v62 = vpop.xlane.xlu0 %233  ;;  %v257_v20 = vmul.f32 0.125, %v237_v60  ;;  %v223_v7 = vmul.f32 0.5, %v1802_v55 }
 0x156   :  { %v256_v8 = vmul.f32 0.125, %v234_v62  ;;  %v222_v61 = vmul.f32 0.5, %v1804_v58 }
 0x157   :  { %v287_v55 = vsub.f32 %v1714_v57, %v223_v7  ;;  %v382_v57 = vld [vmem:[%s2212_s3 + $0x10] sm:$0xff] }
 0x158   :  { %v249_v17 = vpop.xlane.xlu1 %248  ;;  %v274_v62 = vmul.f32 %v222_v61, %v222_v61 }
 0x159   :  { %v261_v4 = vmul.f32 0.125, %v249_v17  ;;  %v246_v6 = vpop.xlane.xlu0 %245 }
 0x15a   :  { %v260_v9 = vmul.f32 0.125, %v246_v6 }
 0x15b   :  { %v265_v10 = vadd.f32 %v261_v4, %v257_v20 }
 0x15c   :  { %v264_v11 = vadd.f32 %v260_v9, %v256_v8  ;;  %v243_v23 = vpop.xlane.xlu1 %242 }
 0x15d   :  { %v269_v13 = vmul.f32 0.5, %v265_v10  ;;  %v240_v27 = vpop.xlane.xlu0 %239  ;;  %v259_v8 = vmul.f32 0.125, %v243_v23  ;;  %v291_v23 = vsub.f32 %v1726_v63, %v223_v7  ;;  %v383_v63 = vld [vmem:[%s2212_s3 + $0x18] sm:$0xff] }
 0x15e   :  { %v268_v15 = vmul.f32 0.5, %v264_v11  ;;  %v258_v53 = vmul.f32 0.125, %v240_v27 }
 0x15f   :  { %v277_v18 = vsub.f32 %v269_v13, %v273_v12  ;;  %v275_v12 = vmul.f32 %v223_v7, %v223_v7 }
 0x160   :  { %v276_v19 = vsub.f32 %v268_v15, %v272_v14  ;;  %v320_v28 = vpop.permute.xlu1 %319 }
 0x161   :  { %v281_v22 = vmax.f32 %v277_v18, 0.0  ;;  %v252_v29 = vpop.xlane.xlu0 %251 }
 0x162   :  { %v280_v24 = vmax.f32 %v276_v19, 0.0  ;;  %v262_v54 = vmul.f32 0.125, %v252_v29  ;;  %v286_v19 = vsub.f32 %v1718_v59, %v222_v61 }
 0x163   :  { %v293_v25 = vadd.f32 1e-05, %v281_v22  ;;  %v290_v22 = vsub.f32 %v1728_v3, %v222_v61 }
 0x164   :  { %v292_v26 = vadd.f32 1e-05, %v280_v24  ;;  %v347_v30 = vpop.permute.xlu1 %346  ;;  %v266_v60 = vadd.f32 %v262_v54, %v258_v53 }
 0x165   :  { %1471 = vrsqrt.f32 %v293_v25 }
 0x166   :  { %1473 = vrsqrt.f32 %v292_v26  ;;  %v270_v16 = vmul.f32 0.5, %v266_v60 }
 0x168   :  { %v352_v46 = vpop.permute.xlu1 %351  ;;  %v278_v21 = vsub.f32 %v270_v16, %v274_v62 }
 0x169   :  { %v315_v1 = vpop.permute.xlu0 %314 }
 0x16a   :  { %v282_v4 = vmax.f32 %v278_v21, 0.0 }
 0x16c   :  { %v325_v56 = vpop.permute.xlu1 %324  ;;  %v294_v9 = vadd.f32 1e-05, %v282_v4 }
 0x16e   :  { %1475 = vrsqrt.f32 %v294_v9 }
 0x16f   :  { %v1472_v34 = vpop.eup %1471 }
 0x170   :  { %v1474_v37 = vpop.eup %1473  ;;  %v301_v38 = vmul.f32 %v1472_v34, %v285_v31  ;;  %v305_v39 = vmul.f32 %v1472_v34, %v289_v32  ;;  %v330_v17 = vpop.permute.xlu1 %329 }
 0x171   :  { %v300_v40 = vmul.f32 %v1474_v37, %v284_v36  ;;  %v304_v43 = vmul.f32 %v1474_v37, %v288_v5 }
 0x172   :  { %v333_v44 = vmul.f32 %v320_v28, %v301_v38  ;;  %v337_v45 = vmul.f32 %v320_v28, %v305_v39 }
 0x173   :  { %v332_v47 = vmul.f32 %v315_v1, %v300_v40  ;;  %v336_v48 = vmul.f32 %v315_v1, %v304_v43 }
 0x174   :  { %v365_v0 = vadd.f32 %v352_v46, %v333_v44  ;;  %v369_v33 = vadd.f32 %v352_v46, %v337_v45  ;;  %v357_v20 = vpop.permute.xlu1 %356  ;;  %v385_v44 = vpack.c.bf16 %v383_v63, %v382_v57  ;;  %v692_v45 = vld [vmem:[%s2213_s7] sm:$0xff] }
 0x175   :  { %v364_v2 = vadd.f32 %v347_v30, %v332_v47  ;;  %v368_v49 = vadd.f32 %v347_v30, %v336_v48  ;;  %v693_v46 = vpack.c.bf16 %v692_v45, %v692_v45 }
 0x176   :  { %v373_v42 = vmax.f32 %v365_v0, 0.0  ;;  %v377_v50 = vmax.f32 %v369_v33, 0.0  ;;  %v400_v0 = vpop.permute.xlu0 %399 }
 0x177   :  { %v372_v35 = vmax.f32 %v364_v2, 0.0  ;;  %v376_v51 = vmax.f32 %v368_v49, 0.0  ;;  %v703_v47 = vsel %vm53_vm0, %v693_v46, 0 }
 0x178   :  { %v1476_v58 = vpop.eup %1475 }
 0x179   :  { %v386_v41 = vpack.c.bf16 %v373_v42, %v372_v35  ;;  %v472_v52 = vpack.c.bf16 %v377_v50, %v376_v51  ;;  %v302_v24 = vmul.f32 %v1476_v58, %v286_v19  ;;  %v306_v25 = vmul.f32 %v1476_v58, %v290_v22 }
 0x17a   :  { %v486_v2 = vpop.permute.xlu0 %485 }
 0x17b   :  { %1406 = vmatprep.subr.bf16.mxu0 %v386_v41  ;;  %1414 = vmatprep.subr.bf16.mxu1 %v472_v52  ;;  %v334_v26 = vmul.f32 %v325_v56, %v302_v24  ;;  %v338_v27 = vmul.f32 %v325_v56, %v306_v25 }
 0x17c   :  { %1407 = vmatpush3.bf16.msra.mxu0 %v386_v41  ;;  %1415 = vmatpush3.bf16.msra.mxu1 %v472_v52 }
 0x17d   :  { %v366_v31 = vadd.f32 %v357_v20, %v334_v26  ;;  %v370_v32 = vadd.f32 %v357_v20, %v338_v27 }
 0x17e   :  { %v491_v42 = vpop.permute.xlu0 %490 }
 0x17f   :  { %v374_v38 = vmax.f32 %v366_v31, 0.0  ;;  %v378_v3 = vmax.f32 %v370_v32, 0.0 }
 0x182   :  { %v496_v35 = vpop.permute.xlu0 %495 }
 0x1a5   :  { %v255_v6 = vpop.xlane.xlu1 %254 }
 0x1a6   :  { %v263_v10 = vmul.f32 0.125, %v255_v6 }
 0x1a8   :  { %v267_v11 = vadd.f32 %v263_v10, %v259_v8 }
 0x1a9   :  { %v362_v5 = vpop.permute.xlu1 %361 }
 0x1aa   :  { %v271_v13 = vmul.f32 0.5, %v267_v11 }
 0x1ac   :  { %v279_v14 = vsub.f32 %v271_v13, %v275_v12 }
 0x1ad   :  { %v395_v48 = vpop.permute.xlu1 %394 }
 0x1ae   :  { %v283_v15 = vmax.f32 %v279_v14, 0.0 }
 0x1b0   :  { %v295_v18 = vadd.f32 1e-05, %v283_v15 }
 0x1b1   :  { %v481_v33 = vpop.permute.xlu1 %480 }
 0x1b2   :  { %1477 = vrsqrt.f32 %v295_v18 }
 0x1b5   :  { %v405_v49 = vpop.permute.xlu1 %404 }
 0x1b9   :  { %v410_v50 = vpop.permute.xlu1 %409 }
 0x1bc   :  { %v1478_v28 = vpop.eup %1477 }
 0x1bd   :  { %v303_v29 = vmul.f32 %v1478_v28, %v287_v55  ;;  %v307_v30 = vmul.f32 %v1478_v28, %v291_v23 }
 0x1bf   :  { %v335_v34 = vmul.f32 %v330_v17, %v303_v29  ;;  %v339_v36 = vmul.f32 %v330_v17, %v307_v30 }
 0x1c1   :  { %v367_v37 = vadd.f32 %v362_v5, %v335_v34  ;;  %v371_v59 = vadd.f32 %v362_v5, %v339_v36 }
 0x1c3   :  { %v375_v39 = vmax.f32 %v367_v37, 0.0  ;;  %v379_v1 = vmax.f32 %v371_v59, 0.0 }
 0x1c5   :  { %v387_v40 = vpack.c.bf16 %v375_v39, %v374_v38  ;;  %v473_v43 = vpack.c.bf16 %v379_v1, %v378_v3 }
 0x1c7   :  { %1408 = vmatprep.subr.bf16.mxu0 %v387_v40  ;;  %1416 = vmatprep.subr.bf16.mxu1 %v473_v43 }
 0x1c8   :  { %1409 = vmatpush3.bf16.msra.mxu0 %v387_v40  ;;  %1417 = vmatpush3.bf16.msra.mxu1 %v473_v43 }
 0x1c9   :  { %1450 = vmatprep.subr.msk.bf16.mxu0 %vm53_vm0, %v693_v46  ;;  %1451 = vmatprep.subr.msk.bf16.mxu1 %vm53_vm0, %v693_v46 }
 0x1cb   :  { %1411 = vmatmul.mubr.msk.bf16.vlgmr.msra.gmra.mrb[0].mxu0 %vm412_vm1, %v385_v44  ;;  %1419 = vmatmul.mubr.msk.bf16.vlgmr.msra.gmra.mrb[0].mxu1 %vm412_vm1, %v385_v44 }
 0x1d1   :  { %1423 = vmatpush3.bf16.xpose.msra.mxu0 %v703_v47  ;;  %1429 = vmatpush3.bf16.xpose.msra.mxu1 %v703_v47 }
 0x29e   :  { %v1412_v51 = vpop.f32.mrb[0].mxu0  ;;  %v1420_v41 = vpop.f32.mrb[0].mxu1 }
 0x29f   :  { %v462_v52 = vadd.f32 %v1412_v51, %v405_v49  ;;  %v541_v53 = vadd.f32 %v1420_v41, %v491_v42  ;;  %v453_v54 = vpop.f32.mrb[1].mxu0  ;;  %v532_v56 = vpop.f32.mrb[1].mxu1 }
 0x2a0   :  { %v454_v60 = vadd.f32 %v453_v54, %v395_v48  ;;  %v533_v61 = vadd.f32 %v532_v56, %v481_v33  ;;  %v1413_v62 = vpop.f32.mrb[2].mxu0  ;;  %v1421_v16 = vpop.f32.mrb[2].mxu1 }
 0x2a1   :  { %470 = vst.msk [vmem:[#allocation2 + $0x10] sm:$0xff] %vm53_vm0, %v462_v52  ;;  %550 = vst.msk [vmem:[#allocation2 + $0x30] sm:$0xff] %vm53_vm0, %v541_v53  ;;  %v465_v17 = vadd.f32 %v1413_v62, %v410_v50  ;;  %v544_v21 = vadd.f32 %v1421_v16, %v496_v35  ;;  %v456_v20 = vpop.f32.mrb[3].mxu0  ;;  %v535_v4 = vpop.f32.mrb[3].mxu1 }
 0x2a2   :  { %468 = vst.msk [vmem:[#allocation2] sm:$0xff] %vm53_vm0, %v454_v60  ;;  %548 = vst.msk [vmem:[#allocation2 + $0x20] sm:$0xff] %vm53_vm0, %v533_v61  ;;  %v457_v6 = vadd.f32 %v456_v20, %v400_v0  ;;  %v536_v7 = vadd.f32 %v535_v4, %v486_v2 }
 0x2a3   :  { %471 = vst.msk [vmem:[#allocation2 + $0x18] sm:$0xff] %vm53_vm0, %v465_v17  ;;  %551 = vst.msk [vmem:[#allocation2 + $0x38] sm:$0xff] %vm53_vm0, %v544_v21 }
 0x2a4   :  { %469 = vst.msk [vmem:[#allocation2 + $0x8] sm:$0xff] %vm53_vm0, %v457_v6  ;;  %549 = vst.msk [vmem:[#allocation2 + $0x28] sm:$0xff] %vm53_vm0, %v536_v7 }
 0x2a8   :  { %v1838_v8 = vld [vmem:[#allocation2 + $0x10] sm:$0xff] }
 0x2a9   :  { %v1840_v9 = vld [vmem:[#allocation2 + $0x30] sm:$0xff]  ;;  %v1842_v10 = vld [vmem:[#allocation2 + $0x20] sm:$0xff]  ;;  %v563_v25 = vsel %vm53_vm0, %v1838_v8, 0.0  ;;  %v595_v55 = vmul.f32 %v1838_v8, %v1838_v8 }
 0x2aa   :  { %v1844_v11 = vld [vmem:[#allocation2] sm:$0xff]  ;;  %v576_v12 = vsel %vm53_vm0, %v1840_v9, 0.0  ;;  %v597_v13 = vmul.f32 %v1842_v10, %v1842_v10  ;;  %v1850_v14 = vld [vmem:[#allocation2 + $0x38] sm:$0xff]  ;;  %v599_v18 = vmul.f32 %v1840_v9, %v1840_v9  ;;  %v573_v58 = vsel %vm53_vm0, %v1842_v10, 0.0 }
 0x2ab   :  { %v593_v15 = vmul.f32 %v1844_v11, %v1844_v11  ;;  %v1858_v19 = vld [vmem:[#allocation2 + $0x18] sm:$0xff]  ;;  %v1860_v22 = vld [vmem:[#allocation2 + $0x28] sm:$0xff]  ;;  %v560_v27 = vsel %vm53_vm0, %v1844_v11, 0.0  ;;  %v600_v29 = vmul.f32 %v1850_v14, %v1850_v14  ;;  %v578_v57 = vsel %vm53_vm0, %v1850_v14, 0.0 }
 0x2ac   :  { %v1862_v24 = vld [vmem:[#allocation2 + $0x8] sm:$0xff]  ;;  %v574_v23 = vsel %vm53_vm0, %v1860_v22, 0.0  ;;  %v598_v26 = vmul.f32 %v1860_v22, %v1860_v22  ;;  %v614_v34 = vsel %vm53_vm0, %v597_v13, 0.0  ;;  %v596_v5 = vmul.f32 %v1858_v19, %v1858_v19 }
 0x2ad   :  { %v561_v28 = vsel %vm53_vm0, %v1862_v24, 0.0  ;;  %v575_v30 = vadd.f32 %v574_v23, %v573_v58  ;;  %v594_v32 = vmul.f32 %v1862_v24, %v1862_v24  ;;  %v601_v37 = vsel %vm53_vm0, %v593_v15, 0.0 }
 0x2ae   :  { %v562_v31 = vadd.f32 %v561_v28, %v560_v27  ;;  %v615_v36 = vsel %vm53_vm0, %v598_v26, 0.0  ;;  %v617_v1 = vsel %vm53_vm0, %v599_v18, 0.0  ;;  %v565_v63 = vsel %vm53_vm0, %v1858_v19, 0.0 }
 0x2af   :  { %v577_v59 = vadd.f32 %v576_v12, %v575_v30  ;;  %v616_v38 = vadd.f32 %v615_v36, %v614_v34  ;;  %v602_v39 = vsel %vm53_vm0, %v594_v32, 0.0  ;;  %v604_v46 = vsel %vm53_vm0, %v595_v55, 0.0 }
 0x2b0   :  { %v564_v3 = vadd.f32 %v563_v25, %v562_v31  ;;  %v603_v40 = vadd.f32 %v602_v39, %v601_v37  ;;  %v619_v47 = vsel %vm53_vm0, %v600_v29, 0.0  ;;  %v606_v49 = vsel %vm53_vm0, %v596_v5, 0.0 }
 0x2b1   :  { %v579_v43 = vadd.f32 %v578_v57, %v577_v59  ;;  %v618_v44 = vadd.f32 %v617_v1, %v616_v38 }
 0x2b2   :  { %v566_v45 = vadd.f32 %v565_v63, %v564_v3  ;;  %v605_v48 = vadd.f32 %v604_v46, %v603_v40  ;;  %v1368_v63 = vld [vmem:[%s2214_s5] ss:$0 sm:$0xff] }
 0x2b3   :  { %v580_v0 = vrot.slane %v579_v43, 4  ;;  %v620_v33 = vadd.f32 %v619_v47, %v618_v44 }
 0x2b4   :  { %v567_v2 = vrot.slane %v566_v45, 4  ;;  %v607_v42 = vadd.f32 %v606_v49, %v605_v48 }
 0x2b5   :  { %v581_v50 = vadd.f32 %v580_v0, %v579_v43  ;;  %v621_v35 = vrot.slane %v620_v33, 4 }
 0x2b6   :  { %v568_v51 = vadd.f32 %v567_v2, %v566_v45  ;;  %v608_v41 = vrot.slane %v607_v42, 4 }
 0x2b7   :  { %v582_v52 = vrot.slane %v581_v50, 2  ;;  %v622_v53 = vadd.f32 %v621_v35, %v620_v33  ;;  %v1369_v33 = vld [vmem:[%s2215_s6] ss:$0 sm:$0xff] }
 0x2b8   :  { %v569_v54 = vrot.slane %v568_v51, 2  ;;  %v609_v56 = vadd.f32 %v608_v41, %v607_v42 }
 0x2b9   :  { %v623_v60 = vrot.slane %v622_v53, 2  ;;  %v583_v62 = vadd.f32 %v582_v52, %v581_v50 }
 0x2ba   :  { %v570_v61 = vadd.f32 %v569_v54, %v568_v51  ;;  %v610_v16 = vrot.slane %v609_v56, 2 }
 0x2bb   :  { %v584_v21 = vrot.slane %v583_v62, 1  ;;  %v624_v20 = vadd.f32 %v623_v60, %v622_v53 }
 0x2bc   :  { %v571_v17 = vrot.slane %v570_v61, 1  ;;  %v611_v4 = vadd.f32 %v610_v16, %v609_v56 }
 0x2bd   :  { %v585_v7 = vadd.f32 %v584_v21, %v583_v62  ;;  %v625_v12 = vrot.slane %v624_v20, 1 }
 0x2be   :  { %v572_v6 = vadd.f32 %v571_v17, %v570_v61  ;;  %v612_v13 = vrot.slane %v611_v4, 1 }
 0x2bf   :  { %v588_v18 = vmul.f32 0.03125, %v585_v7  ;;  %v626_v58 = vadd.f32 %v625_v12, %v624_v20 }
 0x2c0   :  { %v587_v15 = vmul.f32 0.03125, %v572_v6  ;;  %v613_v25 = vadd.f32 %v612_v13, %v611_v4 }
 0x2c1   :  { %v590_v23 = vsel %vm53_vm0, %v588_v18, 0.0  ;;  %v628_v26 = vmul.f32 0.03125, %v626_v58 }
 0x2c2   :  { %v589_v55 = vsel %vm53_vm0, %v587_v15, 0.0  ;;  %v627_v28 = vmul.f32 0.03125, %v613_v25 }
 0x2c3   :  { %v591_v27 = vadd.f32 %v590_v23, %v589_v55  ;;  %v630_v29 = vsel %vm53_vm0, %v628_v26, 0.0 }
 0x2c4   :  { %v629_v31 = vsel %vm53_vm0, %v627_v28, 0.0 }
 0x2c5   :  { %v592_v30 = vmul.f32 0.5, %v591_v27  ;;  %v631_v32 = vadd.f32 %v630_v29, %v629_v31 }
 0x2c7   :  { %v633_v34 = vmul.f32 %v592_v30, %v592_v30  ;;  %v632_v36 = vmul.f32 0.5, %v631_v32  ;;  %v636_v38 = vsub.f32 %v1844_v11, %v592_v30  ;;  %v637_v3 = vsub.f32 %v1862_v24, %v592_v30 }
 0x2c8   :  { %v640_v39 = vsub.f32 %v1842_v10, %v592_v30  ;;  %v641_v1 = vsub.f32 %v1860_v22, %v592_v30  ;;  %v638_v40 = vsub.f32 %v1838_v8, %v592_v30  ;;  %v639_v43 = vsub.f32 %v1858_v19, %v592_v30 }
 0x2c9   :  { %v634_v5 = vsub.f32 %v632_v36, %v633_v34  ;;  %v642_v44 = vsub.f32 %v1840_v9, %v592_v30  ;;  %v643_v45 = vsub.f32 %v1850_v14, %v592_v30  ;;  %v1372_v30 = vld [vmem:[%s2216_s8] ss:$0 sm:$0xff] }
 0x2cb   :  { %v635_v37 = vmax.f32 %v634_v5, 0.0 }
 0x2cd   :  { %v644_v59 = vadd.f32 1e-05, %v635_v37 }
 0x2cf   :  { %1479 = vrsqrt.f32 %v644_v59 }
 0x2d9   :  { %v1480_v57 = vpop.eup %1479 }
 0x2da   :  { %v646_v46 = vmul.f32 %v1480_v57, %v636_v38  ;;  %v647_v47 = vmul.f32 %v1480_v57, %v637_v3  ;;  %v650_v48 = vmul.f32 %v1480_v57, %v640_v39  ;;  %v651_v0 = vmul.f32 %v1480_v57, %v641_v1 }
 0x2db   :  { %v648_v2 = vmul.f32 %v1480_v57, %v638_v40  ;;  %v649_v49 = vmul.f32 %v1480_v57, %v639_v43  ;;  %v652_v42 = vmul.f32 %v1480_v57, %v642_v44  ;;  %v653_v50 = vmul.f32 %v1480_v57, %v643_v45 }
 0x2dc   :  { %v661_v35 = vmul.f32 %v1368_v63, %v646_v46  ;;  %v662_v51 = vmul.f32 %v1368_v63, %v647_v47  ;;  %v665_v41 = vmul.f32 %v1368_v63, %v650_v48  ;;  %v666_v52 = vmul.f32 %v1368_v63, %v651_v0 }
 0x2dd   :  { %v663_v53 = vmul.f32 %v1368_v63, %v648_v2  ;;  %v664_v54 = vmul.f32 %v1368_v63, %v649_v49  ;;  %v667_v56 = vmul.f32 %v1368_v63, %v652_v42  ;;  %v668_v60 = vmul.f32 %v1368_v63, %v653_v50 }
 0x2de   :  { %v676_v61 = vadd.f32 %v1369_v33, %v661_v35  ;;  %v677_v62 = vadd.f32 %v1369_v33, %v662_v51  ;;  %v680_v16 = vadd.f32 %v1369_v33, %v665_v41  ;;  %v681_v17 = vadd.f32 %v1369_v33, %v666_v52 }
 0x2df   :  { %v678_v21 = vadd.f32 %v1369_v33, %v663_v53  ;;  %v679_v20 = vadd.f32 %v1369_v33, %v664_v54  ;;  %v682_v4 = vadd.f32 %v1369_v33, %v667_v56  ;;  %v683_v6 = vadd.f32 %v1369_v33, %v668_v60 }
 0x2e0   :  { %v684_v7 = vmax.f32 %v676_v61, 0.0  ;;  %v685_v12 = vmax.f32 %v677_v62, 0.0  ;;  %v688_v13 = vmax.f32 %v680_v16, 0.0  ;;  %v689_v15 = vmax.f32 %v681_v17, 0.0 }
 0x2e1   :  { %v686_v18 = vmax.f32 %v678_v21, 0.0  ;;  %v687_v58 = vmax.f32 %v679_v20, 0.0  ;;  %v690_v25 = vmax.f32 %v682_v4, 0.0  ;;  %v691_v55 = vmax.f32 %v683_v6, 0.0 }
 0x2e2   :  { %v694_v23 = vpack.c.bf16 %v685_v12, %v684_v7  ;;  %v773_v26 = vpack.c.bf16 %v689_v15, %v688_v13 }
 0x2e3   :  { %v695_v27 = vpack.c.bf16 %v687_v58, %v686_v18  ;;  %v774_v28 = vpack.c.bf16 %v691_v55, %v690_v25  ;;  %v1110_v58 = vld [vmem:[%s2217_s9 + $0x8] sm:$0xff]  ;;  %v1141_v25 = vld [vmem:[%s2218_s10] sm:$0xff] }
 0x2e4   :  { %1424 = vmatprep.mubr.msk.bf16.mxu0 %vm53_vm0, %v694_v23  ;;  %1430 = vmatprep.mubr.msk.bf16.mxu1 %vm53_vm0, %v773_v26  ;;  %v1109_v55 = vld [vmem:[%s2217_s9] sm:$0xff] }
 0x2e5   :  { %1425 = vmatmul.mubr.msk.bf16.vlgmr.msra.gmra.mrb[4].mxu0 %vm53_vm0, %v695_v27  ;;  %1431 = vmatmul.mubr.msk.bf16.vlgmr.msra.gmra.mrb[4].mxu1 %vm53_vm0, %v774_v28 }
 0x3b8   :  { %v1426_v29 = vpop.f32.mrb[4].mxu0  ;;  %v1432_v31 = vpop.f32.mrb[4].mxu1 }
 0x3b9   :  { %v756_v32 = vadd.f32 %v1426_v29, %v1838_v8  ;;  %v832_v34 = vadd.f32 %v1432_v31, %v1840_v9  ;;  %v739_v36 = vpop.f32.mrb[5].mxu0  ;;  %v815_v5 = vpop.f32.mrb[5].mxu1 }
 0x3ba   :  { %v754_v37 = vadd.f32 %v739_v36, %v1844_v11  ;;  %v830_v59 = vadd.f32 %v815_v5, %v1842_v10  ;;  %v1427_v38 = vpop.f32.mrb[6].mxu0  ;;  %v1433_v3 = vpop.f32.mrb[6].mxu1 }
 0x3bb   :  { %v767_v39 = vadd.f32 %v1372_v30, %v756_v32  ;;  %v843_v1 = vadd.f32 %v1372_v30, %v832_v34  ;;  %v757_v57 = vadd.f32 %v1427_v38, %v1858_v19  ;;  %v833_v63 = vadd.f32 %v1433_v3, %v1850_v14  ;;  %v742_v40 = vpop.f32.mrb[7].mxu0  ;;  %v818_v43 = vpop.f32.mrb[7].mxu1 }
 0x3bc   :  { %v765_v44 = vadd.f32 %v1372_v30, %v754_v37  ;;  %v841_v8 = vadd.f32 %v1372_v30, %v830_v59  ;;  %v755_v9 = vadd.f32 %v742_v40, %v1862_v24  ;;  %v831_v45 = vadd.f32 %v818_v43, %v1860_v22 }
 0x3bd   :  { %771 = vst.msk [vmem:[#allocation2 + $0x10] sm:$0xff] %vm53_vm0, %v767_v39  ;;  %847 = vst.msk [vmem:[#allocation2 + $0x30] sm:$0xff] %vm53_vm0, %v843_v1  ;;  %v768_v10 = vadd.f32 %v1372_v30, %v757_v57  ;;  %v844_v11 = vadd.f32 %v1372_v30, %v833_v63 }
 0x3be   :  { %769 = vst.msk [vmem:[#allocation2] sm:$0xff] %vm53_vm0, %v765_v44  ;;  %845 = vst.msk [vmem:[#allocation2 + $0x20] sm:$0xff] %vm53_vm0, %v841_v8  ;;  %v766_v19 = vadd.f32 %v1372_v30, %v755_v9  ;;  %v842_v14 = vadd.f32 %v1372_v30, %v831_v45 }
 0x3bf   :  { %772 = vst.msk [vmem:[#allocation2 + $0x18] sm:$0xff] %vm53_vm0, %v768_v10  ;;  %848 = vst.msk [vmem:[#allocation2 + $0x38] sm:$0xff] %vm53_vm0, %v844_v11 }
 0x3c0   :  { %770 = vst.msk [vmem:[#allocation2 + $0x8] sm:$0xff] %vm53_vm0, %v766_v19  ;;  %846 = vst.msk [vmem:[#allocation2 + $0x28] sm:$0xff] %vm53_vm0, %v842_v14 }
 0x3c4   :  { %v1935_v22 = vld [vmem:[#allocation2 + $0x10] sm:$0xff] }
 0x3c5   :  { %v863_v24 = vsel %vm53_vm0, %v1935_v22, 0.0  ;;  %v1939_v46 = vld [vmem:[#allocation2] sm:$0xff]  ;;  %v1943_v48 = vld [vmem:[#allocation2 + $0x30] sm:$0xff]  ;;  %v891_v35 = vmul.f32 %v1935_v22, %v1935_v22 }
 0x3c6   :  { %864 = vadd.xlane.f32.xlu0 %v863_v24  ;;  %v857_v47 = vsel %vm53_vm0, %v1939_v46, 0.0  ;;  %v1945_v0 = vld [vmem:[#allocation2 + $0x18] sm:$0xff]  ;;  %v875_v33 = vsel %vm53_vm0, %v1943_v48, 0.0  ;;  %v1951_v49 = vld [vmem:[#allocation2 + $0x20] sm:$0xff]  ;;  %v889_v61 = vmul.f32 %v1939_v46, %v1939_v46  ;;  %v895_v7 = vmul.f32 %v1943_v48, %v1943_v48 }
 0x3c7   :  { %858 = vadd.xlane.f32.xlu1 %v857_v47  ;;  %v866_v2 = vsel %vm53_vm0, %v1945_v0, 0.0  ;;  %v1953_v42 = vld [vmem:[#allocation2 + $0x38] sm:$0xff]  ;;  %v869_v50 = vsel %vm53_vm0, %v1951_v49, 0.0  ;;  %v1961_v41 = vld [vmem:[#allocation2 + $0x28] sm:$0xff]  ;;  %v903_v52 = vsel %vm53_vm0, %v891_v35, 0.0  ;;  %v892_v56 = vmul.f32 %v1945_v0, %v1945_v0 }
 0x3c8   :  { %v878_v51 = vsel %vm53_vm0, %v1953_v42, 0.0  ;;  %v872_v53 = vsel %vm53_vm0, %v1961_v41, 0.0  ;;  %v1966_v54 = vld [vmem:[#allocation2 + $0x8] sm:$0xff]  ;;  %v897_v17 = vsel %vm53_vm0, %v889_v61, 0.0  ;;  %v893_v21 = vmul.f32 %v1951_v49, %v1951_v49 }
 0x3c9   :  { %v860_v60 = vsel %vm53_vm0, %v1966_v54, 0.0  ;;  %v906_v62 = vsel %vm53_vm0, %v892_v56, 0.0  ;;  %v890_v16 = vmul.f32 %v1966_v54, %v1966_v54  ;;  %v894_v4 = vmul.f32 %v1961_v41, %v1961_v41 }
 0x3ca   :  { %876 = vadd.xlane.f32.xlu0 %v875_v33  ;;  %v909_v6 = vsel %vm53_vm0, %v893_v21, 0.0  ;;  %v896_v13 = vmul.f32 %v1953_v42, %v1953_v42  ;;  %v915_v15 = vsel %vm53_vm0, %v895_v7, 0.0 }
 0x3cb   :  { %867 = vadd.xlane.f32.xlu1 %v866_v2  ;;  %v900_v20 = vsel %vm53_vm0, %v890_v16, 0.0  ;;  %v912_v12 = vsel %vm53_vm0, %v894_v4, 0.0 }
 0x3cc   :  { %v918_v18 = vsel %vm53_vm0, %v896_v13, 0.0 }
 0x3ce   :  { %870 = vadd.xlane.f32.xlu0 %v869_v50 }
 0x3cf   :  { %879 = vadd.xlane.f32.xlu1 %v878_v51 }
 0x3d2   :  { %904 = vadd.xlane.f32.xlu0 %v903_v52 }
 0x3d3   :  { %873 = vadd.xlane.f32.xlu1 %v872_v53 }
 0x3d6   :  { %861 = vadd.xlane.f32.xlu0 %v860_v60 }
 0x3d7   :  { %907 = vadd.xlane.f32.xlu1 %v906_v62 }
 0x3da   :  { %898 = vadd.xlane.f32.xlu0 %v897_v17 }
 0x3db   :  { %901 = vadd.xlane.f32.xlu1 %v900_v20 }
 0x3de   :  { %910 = vadd.xlane.f32.xlu0 %v909_v6 }
 0x3df   :  { %913 = vadd.xlane.f32.xlu1 %v912_v12 }
 0x3e2   :  { %916 = vadd.xlane.f32.xlu0 %v915_v15 }
 0x3e3   :  { %919 = vadd.xlane.f32.xlu1 %v918_v18 }
 0x3f4   :  { %1120 = vperm.xlu1 %1454, %v1110_v58  }
 0x3f8   :  { %1147 = vperm.xlu1 %1454, %v1141_v25   ;;  %1115 = vperm.xlu0 %1453, %v1109_v55  }
 0x453   :  { %v865_v23 = vpop.xlane.xlu0 %864 }
 0x454   :  { %v859_v26 = vpop.xlane.xlu1 %858  ;;  %v883_v30 = vmul.f32 0.125, %v865_v23 }
 0x455   :  { %v2002_v3 = vmul.f32 0.125, %v859_v26 }
 0x456   :  { %v931_v34 = vmul.f32 %v883_v30, %v883_v30  ;;  %v955_v12 = vsub.f32 %v1935_v22, %v883_v30 }
 0x457   :  { %v877_v27 = vpop.xlane.xlu0 %876  ;;  %v929_v9 = vmul.f32 %v2002_v3, %v2002_v3 }
 0x458   :  { %v868_v28 = vpop.xlane.xlu1 %867  ;;  %v887_v51 = vmul.f32 0.125, %v877_v27 }
 0x459   :  { %v2000_v37 = vmul.f32 0.125, %v868_v28 }
 0x45a   :  { %v935_v20 = vmul.f32 %v887_v51, %v887_v51 }
 0x45b   :  { %v871_v29 = vpop.xlane.xlu0 %870  ;;  %v932_v57 = vmul.f32 %v2000_v37, %v2000_v37  ;;  %v956_v22 = vsub.f32 %v1945_v0, %v2000_v37  ;;  %v959_v37 = vsub.f32 %v1943_v48, %v887_v51 }
 0x45c   :  { %v880_v31 = vpop.xlane.xlu1 %879  ;;  %v2012_v24 = vmul.f32 0.125, %v871_v29 }
 0x45d   :  { %v888_v56 = vmul.f32 0.125, %v880_v31 }
 0x45e   :  { %v933_v61 = vmul.f32 %v2012_v24, %v2012_v24 }
 0x45f   :  { %v905_v32 = vpop.xlane.xlu0 %904  ;;  %v936_v13 = vmul.f32 %v888_v56, %v888_v56 }
 0x460   :  { %v923_v36 = vmul.f32 0.125, %v905_v32  ;;  %v874_v5 = vpop.xlane.xlu1 %873 }
 0x461   :  { %v2014_v33 = vmul.f32 0.125, %v874_v5 }
 0x462   :  { %v939_v59 = vsub.f32 %v923_v36, %v931_v34 }
 0x463   :  { %v862_v38 = vpop.xlane.xlu0 %861  ;;  %v934_v16 = vmul.f32 %v2014_v33, %v2014_v33 }
 0x464   :  { %v947_v39 = vmax.f32 %v939_v59, 0.0  ;;  %v908_v1 = vpop.xlane.xlu1 %907  ;;  %v2006_v63 = vmul.f32 0.125, %v862_v38 }
 0x465   :  { %v924_v40 = vmul.f32 0.125, %v908_v1 }
 0x466   :  { %v963_v43 = vadd.f32 0.001, %v947_v39  ;;  %v930_v11 = vmul.f32 %v2006_v63, %v2006_v63 }
 0x467   :  { %v940_v44 = vsub.f32 %v924_v40, %v932_v57  ;;  %v899_v8 = vpop.xlane.xlu0 %898 }
 0x468   :  { %1481 = vrsqrt.f32 %v963_v43  ;;  %v921_v45 = vmul.f32 0.125, %v899_v8  ;;  %v902_v10 = vpop.xlane.xlu1 %901  ;;  %v960_v43 = vsub.f32 %v1953_v42, %v888_v56  ;;  %v953_v8 = vsub.f32 %v1939_v46, %v2002_v3 }
 0x469   :  { %v948_v19 = vmax.f32 %v940_v44, 0.0  ;;  %v922_v14 = vmul.f32 0.125, %v902_v10  ;;  %v957_v3 = vsub.f32 %v1951_v49, %v2012_v24 }
 0x46a   :  { %v937_v47 = vsub.f32 %v921_v45, %v929_v9  ;;  %v954_v45 = vsub.f32 %v1966_v54, %v2006_v63  ;;  %v958_v54 = vsub.f32 %v1961_v41, %v2014_v33 }
 0x46b   :  { %v964_v2 = vadd.f32 0.001, %v948_v19  ;;  %v938_v50 = vsub.f32 %v922_v14, %v930_v11  ;;  %v911_v35 = vpop.xlane.xlu0 %910 }
 0x46c   :  { %v925_v52 = vmul.f32 0.125, %v911_v35  ;;  %v914_v53 = vpop.xlane.xlu1 %913  ;;  %v945_v62 = vmax.f32 %v937_v47, 0.0 }
 0x46d   :  { %1483 = vrsqrt.f32 %v964_v2  ;;  %v926_v60 = vmul.f32 0.125, %v914_v53  ;;  %v946_v17 = vmax.f32 %v938_v50, 0.0 }
 0x46e   :  { %v941_v4 = vsub.f32 %v925_v52, %v933_v61  ;;  %v961_v25 = vadd.f32 0.001, %v945_v62 }
 0x46f   :  { %v917_v21 = vpop.xlane.xlu0 %916  ;;  %v942_v15 = vsub.f32 %v926_v60, %v934_v16  ;;  %v962_v23 = vadd.f32 0.001, %v946_v17 }
 0x470   :  { %v927_v6 = vmul.f32 0.125, %v917_v21  ;;  %v920_v7 = vpop.xlane.xlu1 %919  ;;  %v949_v28 = vmax.f32 %v941_v4, 0.0  ;;  %1485 = vrsqrt.f32 %v961_v25  ;;  %v1144_v25 = vld [vmem:[%s2218_s10 + $0x18] sm:$0xff] }
 0x471   :  { %v928_v18 = vmul.f32 0.125, %v920_v7  ;;  %v950_v31 = vmax.f32 %v942_v15, 0.0  ;;  %1487 = vrsqrt.f32 %v962_v23  ;;  %v1111_v7 = vld [vmem:[%s2217_s9 + $0x10] sm:$0xff]  ;;  %v1189_v15 = vld [vmem:[%s2219_s12] sm:$0xff]  ;;  %v1192_v23 = vld [vmem:[%s2219_s12 + $0x18] sm:$0xff] }
 0x472   :  { %v1482_v58 = vpop.eup %1481  ;;  %v943_v55 = vsub.f32 %v927_v6, %v935_v20  ;;  %v965_v59 = vadd.f32 0.001, %v949_v28  ;;  %v1182_v28 = vld [vmem:[%s2220_s11 + $0x8] sm:$0xff] }
 0x473   :  { %v944_v26 = vsub.f32 %v928_v18, %v936_v13  ;;  %v2021_v27 = vmul.f32 %v1482_v58, %v955_v12  ;;  %v966_v39 = vadd.f32 0.001, %v950_v31  ;;  %v1143_v12 = vld [vmem:[%s2218_s10 + $0x10] sm:$0xff]  ;;  %v1142_v13 = vld [vmem:[%s2218_s10 + $0x8] sm:$0xff]  ;;  %v1112_v18 = vld [vmem:[%s2217_s9 + $0x18] sm:$0xff] }
 0x474   :  { %v951_v29 = vmax.f32 %v943_v55, 0.0  ;;  %v1191_v58 = vld [vmem:[%s2219_s12 + $0x10] sm:$0xff]  ;;  %v1190_v55 = vld [vmem:[%s2219_s12 + $0x8] sm:$0xff]  ;;  %v2124_v31 = vpop.permute.xlu1 %1120 }
 0x475   :  { %v952_v32 = vmax.f32 %v944_v26, 0.0  ;;  %v991_v34 = vsel %vm53_vm0, %v2021_v27, 0.0  ;;  %v1027_v49 = vmul.f32 %v2021_v27, %v2021_v27  ;;  %v1181_v26 = vld [vmem:[%s2220_s11] sm:$0xff] }
 0x476   :  { %v967_v30 = vadd.f32 0.001, %v951_v29  ;;  %992 = vadd.xlane.f32.xlu0 %v991_v34  ;;  %v1185_v29 = vpack.c.bf16 %v1182_v28, %v1181_v26 }
 0x477   :  { %v1484_v36 = vpop.eup %1483  ;;  %v968_v5 = vadd.f32 0.001, %v952_v32  ;;  %v1039_v33 = vsel %vm53_vm0, %v1027_v49, 0.0  ;;  %v2126_v32 = vpop.permute.xlu0 %1115 }
 0x478   :  { %1489 = vrsqrt.f32 %v967_v30  ;;  %v2027_v38 = vmul.f32 %v1484_v36, %v956_v22  ;;  %1438 = vmatprep.mubr.msk.bf16.mxu0 %vm412_vm1, %v1185_v29  ;;  %1446 = vmatprep.mubr.msk.bf16.mxu1 %vm412_vm1, %v1185_v29  ;;  %v2128_v34 = vpop.permute.xlu1 %1147 }
 0x479   :  { %1491 = vrsqrt.f32 %v968_v5 }
 0x47a   :  { %v994_v1 = vsel %vm53_vm0, %v2027_v38, 0.0  ;;  %1493 = vrsqrt.f32 %v965_v59  ;;  %v1486_v57 = vpop.eup %1485  ;;  %v1028_v24 = vmul.f32 %v2027_v38, %v2027_v38 }
 0x47b   :  { %995 = vadd.xlane.f32.xlu1 %v994_v1  ;;  %1495 = vrsqrt.f32 %v966_v39  ;;  %v1488_v0 = vpop.eup %1487  ;;  %v2043_v19 = vmul.f32 %v1486_v57, %v953_v8 }
 0x47c   :  { %v2047_v14 = vmul.f32 %v1488_v0, %v954_v45  ;;  %v1042_v52 = vsel %vm53_vm0, %v1028_v24, 0.0 }
 0x47d   :  { %v985_v63 = vsel %vm53_vm0, %v2043_v19, 0.0  ;;  %v1025_v60 = vmul.f32 %v2043_v19, %v2043_v19 }
 0x47e   :  { %v988_v2 = vsel %vm53_vm0, %v2047_v14, 0.0  ;;  %v1026_v62 = vmul.f32 %v2047_v14, %v2047_v14 }
 0x47f   :  { %v1033_v16 = vsel %vm53_vm0, %v1025_v60, 0.0 }
 0x480   :  { %v1036_v21 = vsel %vm53_vm0, %v1026_v62, 0.0 }
 0x482   :  { %v1490_v40 = vpop.eup %1489 }
 0x483   :  { %v1492_v44 = vpop.eup %1491  ;;  %v2035_v9 = vmul.f32 %v1490_v40, %v959_v37 }
 0x484   :  { %v2039_v10 = vmul.f32 %v1492_v44, %v960_v43  ;;  %v1494_v48 = vpop.eup %1493 }
 0x485   :  { %v1003_v11 = vsel %vm53_vm0, %v2035_v9, 0.0  ;;  %v1496_v46 = vpop.eup %1495  ;;  %v2055_v47 = vmul.f32 %v1494_v48, %v957_v3  ;;  %v1031_v51 = vmul.f32 %v2035_v9, %v2035_v9 }
 0x486   :  { %1004 = vadd.xlane.f32.xlu0 %v1003_v11  ;;  %v1006_v42 = vsel %vm53_vm0, %v2039_v10, 0.0  ;;  %v2059_v50 = vmul.f32 %v1496_v46, %v958_v54  ;;  %v1032_v53 = vmul.f32 %v2039_v10, %v2039_v10 }
 0x487   :  { %1007 = vadd.xlane.f32.xlu1 %v1006_v42  ;;  %v997_v35 = vsel %vm53_vm0, %v2055_v47, 0.0  ;;  %v1051_v56 = vsel %vm53_vm0, %v1031_v51, 0.0  ;;  %v1029_v17 = vmul.f32 %v2055_v47, %v2055_v47 }
 0x488   :  { %v1000_v41 = vsel %vm53_vm0, %v2059_v50, 0.0  ;;  %v1054_v61 = vsel %vm53_vm0, %v1032_v53, 0.0  ;;  %v1030_v20 = vmul.f32 %v2059_v50, %v2059_v50 }
 0x489   :  { %v1045_v4 = vsel %vm53_vm0, %v1029_v17, 0.0 }
 0x48a   :  { %986 = vadd.xlane.f32.xlu0 %v985_v63  ;;  %v1048_v6 = vsel %vm53_vm0, %v1030_v20, 0.0 }
 0x48b   :  { %989 = vadd.xlane.f32.xlu1 %v988_v2 }
 0x48e   :  { %998 = vadd.xlane.f32.xlu0 %v997_v35 }
 0x48f   :  { %1001 = vadd.xlane.f32.xlu1 %v1000_v41 }
 0x492   :  { %1040 = vadd.xlane.f32.xlu0 %v1039_v33 }
 0x493   :  { %1043 = vadd.xlane.f32.xlu1 %v1042_v52 }
 0x496   :  { %1052 = vadd.xlane.f32.xlu0 %v1051_v56 }
 0x497   :  { %1055 = vadd.xlane.f32.xlu1 %v1054_v61 }
 0x49a   :  { %1034 = vadd.xlane.f32.xlu0 %v1033_v16 }
 0x49b   :  { %1037 = vadd.xlane.f32.xlu1 %v1036_v21 }
 0x49e   :  { %1046 = vadd.xlane.f32.xlu0 %v1045_v4 }
 0x49f   :  { %1049 = vadd.xlane.f32.xlu1 %v1048_v6 }
 0x4b0   :  { %1125 = vperm.xlu1 %1454, %v1111_v7  }
 0x4b4   :  { %1157 = vperm.xlu1 %1454, %v1143_v12   ;;  %1152 = vperm.xlu0 %1453, %v1142_v13  }
 0x4b8   :  { %1195 = vperm.xlu1 %1454, %v1189_v15   ;;  %1130 = vperm.xlu0 %1453, %v1112_v18  }
 0x4bc   :  { %1205 = vperm.xlu1 %1454, %v1191_v58   ;;  %1162 = vperm.xlu0 %1453, %v1144_v25  }
 0x4c0   :  { %1284 = vperm.xlu1 %1454, %v1189_v15   ;;  %1200 = vperm.xlu0 %1453, %v1190_v55  }
 0x4c4   :  { %1294 = vperm.xlu1 %1454, %v1191_v58   ;;  %1210 = vperm.xlu0 %1453, %v1192_v23  }
 0x4c8   :  { %1289 = vperm.xlu0 %1453, %v1190_v55  }
 0x4cc   :  { %1299 = vperm.xlu0 %1453, %v1192_v23  }
 0x503   :  { %v993_v22 = vpop.xlane.xlu0 %992 }
 0x504   :  { %v1011_v40 = vmul.f32 0.125, %v993_v22 }
 0x508   :  { %v996_v30 = vpop.xlane.xlu1 %995 }
 0x509   :  { %v1012_v43 = vmul.f32 0.125, %v996_v30 }
 0x513   :  { %v1005_v36 = vpop.xlane.xlu0 %1004 }
 0x514   :  { %v1008_v5 = vpop.xlane.xlu1 %1007  ;;  %v1015_v57 = vmul.f32 0.125, %v1005_v36 }
 0x515   :  { %v1016_v37 = vmul.f32 0.125, %v1008_v5 }
 0x516   :  { %v1019_v8 = vadd.f32 %v1015_v57, %v1011_v40 }
 0x517   :  { %v987_v59 = vpop.xlane.xlu0 %986  ;;  %v1020_v11 = vadd.f32 %v1016_v37, %v1012_v43 }
 0x518   :  { %v990_v39 = vpop.xlane.xlu1 %989  ;;  %v1023_v42 = vmul.f32 0.5, %v1019_v8  ;;  %v1009_v24 = vmul.f32 0.125, %v987_v59 }
 0x519   :  { %v1024_v2 = vmul.f32 0.5, %v1020_v11  ;;  %v1010_v51 = vmul.f32 0.125, %v990_v39 }
 0x51a   :  { %v1075_v60 = vmul.f32 %v1023_v42, %v1023_v42  ;;  %v1091_v11 = vsub.f32 %v2035_v9, %v1023_v42 }
 0x51b   :  { %v999_v1 = vpop.xlane.xlu0 %998  ;;  %v1076_v17 = vmul.f32 %v1024_v2, %v1024_v2 }
 0x51c   :  { %v1002_v0 = vpop.xlane.xlu1 %1001  ;;  %v1013_v46 = vmul.f32 0.125, %v999_v1 }
 0x51d   :  { %v1014_v35 = vmul.f32 0.125, %v1002_v0 }
 0x51e   :  { %v1017_v56 = vadd.f32 %v1013_v46, %v1009_v24  ;;  %v1092_v46 = vsub.f32 %v2039_v10, %v1024_v2 }
 0x51f   :  { %v1041_v44 = vpop.xlane.xlu0 %1040  ;;  %v1018_v16 = vadd.f32 %v1014_v35, %v1010_v51 }
 0x520   :  { %v1044_v45 = vpop.xlane.xlu1 %1043  ;;  %v1059_v3 = vmul.f32 0.125, %v1041_v44  ;;  %v1021_v7 = vmul.f32 0.5, %v1017_v56 }
 0x521   :  { %v1060_v49 = vmul.f32 0.125, %v1044_v45  ;;  %v1022_v58 = vmul.f32 0.5, %v1018_v16  ;;  %v1087_v45 = vsub.f32 %v2021_v27, %v1023_v42 }
 0x522   :  { %v1073_v30 = vmul.f32 %v1021_v7, %v1021_v7  ;;  %v1085_v24 = vsub.f32 %v2043_v19, %v1021_v7 }
 0x523   :  { %v1053_v48 = vpop.xlane.xlu0 %1052  ;;  %v1074_v5 = vmul.f32 %v1022_v58, %v1022_v58  ;;  %v1086_v27 = vsub.f32 %v2047_v14, %v1022_v58  ;;  %v1090_v9 = vsub.f32 %v2059_v50, %v1022_v58 }
 0x524   :  { %v1063_v54 = vmul.f32 0.125, %v1053_v48  ;;  %v1056_v63 = vpop.xlane.xlu1 %1055  ;;  %v1088_v48 = vsub.f32 %v2027_v38, %v1024_v2 }
 0x525   :  { %v1064_v41 = vmul.f32 0.125, %v1056_v63 }
 0x526   :  { %v1067_v33 = vadd.f32 %v1063_v54, %v1059_v3 }
 0x527   :  { %v1068_v52 = vadd.f32 %v1064_v41, %v1060_v49  ;;  %v1035_v53 = vpop.xlane.xlu0 %1034 }
 0x528   :  { %v1071_v61 = vmul.f32 0.5, %v1067_v33  ;;  %v1038_v62 = vpop.xlane.xlu1 %1037  ;;  %v1057_v13 = vmul.f32 0.125, %v1035_v53  ;;  %v1089_v33 = vsub.f32 %v2055_v47, %v1021_v7 }
 0x529   :  { %v1072_v21 = vmul.f32 0.5, %v1068_v52  ;;  %v1058_v55 = vmul.f32 0.125, %v1038_v62 }
 0x52a   :  { %v1079_v20 = vsub.f32 %v1071_v61, %v1075_v60 }
 0x52b   :  { %v1080_v4 = vsub.f32 %v1072_v21, %v1076_v17  ;;  %v1047_v6 = vpop.xlane.xlu0 %1046 }
 0x52c   :  { %v1083_v12 = vmax.f32 %v1079_v20, 0.0  ;;  %v1061_v15 = vmul.f32 0.125, %v1047_v6  ;;  %v1050_v18 = vpop.xlane.xlu1 %1049 }
 0x52d   :  { %v1084_v25 = vmax.f32 %v1080_v4, 0.0  ;;  %v1062_v23 = vmul.f32 0.125, %v1050_v18 }
 0x52e   :  { %v1095_v26 = vadd.f32 1e-05, %v1083_v12  ;;  %v1065_v28 = vadd.f32 %v1061_v15, %v1057_v13 }
 0x52f   :  { %v1096_v29 = vadd.f32 1e-05, %v1084_v25  ;;  %v1066_v22 = vadd.f32 %v1062_v23, %v1058_v55 }
 0x530   :  { %1497 = vrsqrt.f32 %v1095_v26  ;;  %v1069_v36 = vmul.f32 0.5, %v1065_v28  ;;  %v1126_v63 = vpop.permute.xlu1 %1125 }
 0x531   :  { %1499 = vrsqrt.f32 %v1096_v29  ;;  %v1070_v59 = vmul.f32 0.5, %v1066_v22 }
 0x532   :  { %v1077_v39 = vsub.f32 %v1069_v36, %v1073_v30  ;;  %v1184_v30 = vld [vmem:[%s2220_s11 + $0x18] sm:$0xff] }
 0x533   :  { %v1078_v1 = vsub.f32 %v1070_v59, %v1074_v5  ;;  %v1153_v43 = vpop.permute.xlu0 %1152 }
 0x534   :  { %v1081_v57 = vmax.f32 %v1077_v39, 0.0  ;;  %v1158_v62 = vpop.permute.xlu1 %1157 }
 0x535   :  { %v1082_v0 = vmax.f32 %v1078_v1, 0.0 }
 0x536   :  { %v1093_v37 = vadd.f32 1e-05, %v1081_v57 }
 0x537   :  { %v1094_v40 = vadd.f32 1e-05, %v1082_v0  ;;  %v1131_v41 = vpop.permute.xlu0 %1130 }
 0x538   :  { %1501 = vrsqrt.f32 %v1093_v37  ;;  %v1196_v5 = vpop.permute.xlu1 %1195 }
 0x539   :  { %1503 = vrsqrt.f32 %v1094_v40 }
 0x53a   :  { %v1498_v44 = vpop.eup %1497 }
 0x53b   :  { %v1500_v8 = vpop.eup %1499  ;;  %v1103_v3 = vmul.f32 %v1498_v44, %v1087_v45  ;;  %v1107_v54 = vmul.f32 %v1498_v44, %v1091_v11  ;;  %v1163_v19 = vpop.permute.xlu0 %1162 }
 0x53c   :  { %v1104_v35 = vmul.f32 %v1500_v8, %v1088_v48  ;;  %v1108_v49 = vmul.f32 %v1500_v8, %v1092_v46  ;;  %v1206_v39 = vpop.permute.xlu1 %1205 }
 0x53d   :  { %v1135_v51 = vmul.f32 %v1126_v63, %v1103_v3  ;;  %v1139_v52 = vmul.f32 %v1126_v63, %v1107_v54 }
 0x53e   :  { %v1136_v38 = vmul.f32 %v1131_v41, %v1104_v35  ;;  %v1140_v42 = vmul.f32 %v1131_v41, %v1108_v49  ;;  %v1505_v35 = vld [vmem:[%s2208_s0 + $0x10] sm:$0xff] }
 0x53f   :  { %v1167_v16 = vadd.f32 %v1158_v62, %v1135_v51  ;;  %v1171_v17 = vadd.f32 %v1158_v62, %v1139_v52  ;;  %v1201_v59 = vpop.permute.xlu0 %1200  ;;  %v1506_v41 = vld [vmem:[%s2208_s0 + $0x30] sm:$0xff] }
 0x540   :  { %v1168_v50 = vadd.f32 %v1163_v19, %v1136_v38  ;;  %v1172_v4 = vadd.f32 %v1163_v19, %v1140_v42  ;;  %v1285_v57 = vpop.permute.xlu1 %1284  ;;  %v1508_v38 = vld [vmem:[%s2208_s0 + $0x20] sm:$0xff]  ;;  %v1512_v19 = vld [vmem:[%s2208_s0 + $0x28] sm:$0xff] }
 0x541   :  { %v1175_v15 = vmax.f32 %v1167_v16, 0.0  ;;  %v1179_v18 = vmax.f32 %v1171_v17, 0.0  ;;  %v1511_v16 = vld [vmem:[%s2208_s0 + $0x8] sm:$0xff] }
 0x542   :  { %v1502_v53 = vpop.eup %1501  ;;  %v1176_v26 = vmax.f32 %v1168_v50, 0.0 }
 0x543   :  { %v1504_v10 = vpop.eup %1503  ;;  %v1101_v2 = vmul.f32 %v1502_v53, %v1085_v24  ;;  %v1105_v56 = vmul.f32 %v1502_v53, %v1089_v33  ;;  %v1211_v1 = vpop.permute.xlu0 %1210 }
 0x544   :  { %v1102_v60 = vmul.f32 %v1504_v10, %v1086_v27  ;;  %v1106_v61 = vmul.f32 %v1504_v10, %v1090_v9  ;;  %v1295_v37 = vpop.permute.xlu1 %1294  ;;  %v1507_v27 = vld [vmem:[%s2208_s0] sm:$0xff] }
 0x545   :  { %v1133_v47 = vmul.f32 %v2126_v32, %v1101_v2  ;;  %v1137_v21 = vmul.f32 %v2126_v32, %v1105_v56  ;;  %v1180_v32 = vmax.f32 %v1172_v4, 0.0  ;;  %v1509_v56 = vld [vmem:[%s2208_s0 + $0x18] sm:$0xff] }
 0x546   :  { %v1134_v20 = vmul.f32 %v2124_v31, %v1102_v60  ;;  %v1138_v14 = vmul.f32 %v2124_v31, %v1106_v61  ;;  %v1188_v31 = vpack.c.bf16 %v1176_v26, %v1175_v15  ;;  %v1510_v61 = vld [vmem:[%s2208_s0 + $0x38] sm:$0xff] }
 0x547   :  { %v1165_v6 = vadd.f32 %v2128_v34, %v1133_v47  ;;  %v1169_v7 = vadd.f32 %v2128_v34, %v1137_v21  ;;  %v1277_v22 = vpack.c.bf16 %v1180_v32, %v1179_v18  ;;  %v1183_v34 = vld [vmem:[%s2220_s11 + $0x10] sm:$0xff]  ;;  %v1290_v0 = vpop.permute.xlu0 %1289 }
 0x548   :  { %v1166_v12 = vadd.f32 %v1153_v43, %v1134_v20  ;;  %v1170_v13 = vadd.f32 %v1153_v43, %v1138_v14  ;;  %v1186_v36 = vpack.c.bf16 %v1184_v30, %v1183_v34 }
 0x549   :  { %v1173_v58 = vmax.f32 %v1165_v6, 0.0  ;;  %v1177_v25 = vmax.f32 %v1169_v7, 0.0 }
 0x54a   :  { %v1174_v55 = vmax.f32 %v1166_v12, 0.0  ;;  %v1178_v23 = vmax.f32 %v1170_v13, 0.0 }
 0x54b   :  { %v1300_v40 = vpop.permute.xlu0 %1299 }
 0x54c   :  { %v1187_v28 = vpack.c.bf16 %v1174_v55, %v1173_v58  ;;  %v1276_v29 = vpack.c.bf16 %v1178_v23, %v1177_v25 }
 0x54e   :  { %1434 = vmatprep.subr.bf16.mxu0 %v1187_v28  ;;  %1442 = vmatprep.subr.bf16.mxu1 %v1276_v29 }
 0x54f   :  { %1435 = vmatpush3.bf16.msra.mxu0 %v1187_v28  ;;  %1443 = vmatpush3.bf16.msra.mxu1 %v1276_v29 }
 0x550   :  { %1436 = vmatprep.subr.bf16.mxu0 %v1188_v31  ;;  %1444 = vmatprep.subr.bf16.mxu1 %v1277_v22 }
 0x553   :  { %1437 = vmatpush3.bf16.msra.mxu0 %v1188_v31  ;;  %1445 = vmatpush3.bf16.msra.mxu1 %v1277_v22 }
 0x556   :  { %1439 = vmatmul.mubr.msk.bf16.vlgmr.msra.gmra.mrb[8].mxu0 %vm412_vm1, %v1186_v36  ;;  %1447 = vmatmul.mubr.msk.bf16.vlgmr.msra.gmra.mrb[8].mxu1 %vm412_vm1, %v1186_v36 }
 0x629   :  { %v1440_v43 = vpop.f32.mrb[8].mxu0  ;;  %v1448_v44 = vpop.f32.mrb[8].mxu1 }
 0x62a   :  { %v1262_v8 = vadd.f32 %v1440_v43, %v1206_v39  ;;  %v1345_v45 = vadd.f32 %v1448_v44, %v1295_v37  ;;  %v1253_v11 = vpop.f32.mrb[9].mxu0  ;;  %v1336_v48 = vpop.f32.mrb[9].mxu1 }
 0x62b   :  { %v1254_v46 = vadd.f32 %v1253_v11, %v1196_v5  ;;  %v1337_v3 = vadd.f32 %v1336_v48, %v1285_v57  ;;  %v1441_v54 = vpop.f32.mrb[10].mxu0  ;;  %v1449_v63 = vpop.f32.mrb[10].mxu1 }
 0x62c   :  { %v1270_v49 = vadd.f32 %v1505_v35, %v1262_v8  ;;  %v1353_v24 = vadd.f32 %v1506_v41, %v1345_v45  ;;  %v1265_v33 = vadd.f32 %v1441_v54, %v1211_v1  ;;  %v1348_v51 = vadd.f32 %v1449_v63, %v1300_v40  ;;  %v1256_v52 = vpop.f32.mrb[11].mxu0  ;;  %v1339_v53 = vpop.f32.mrb[11].mxu1 }
 0x62d   :  { %v1268_v9 = vadd.f32 %v1507_v27, %v1254_v46  ;;  %v1351_v42 = vadd.f32 %v1508_v38, %v1337_v3  ;;  %v1257_v10 = vadd.f32 %v1256_v52, %v1201_v59  ;;  %v1340_v2 = vadd.f32 %v1339_v53, %v1290_v0 }
 0x62e   :  { %1274 = vst.msk [vmem:[%s2221_s13 + $0x10] sm:$0xff] %vm53_vm0, %v1270_v49  ;;  %1382 = vst.msk [vmem:[%s2221_s13 + $0x30] sm:$0xff] %vm53_vm0, %v1353_v24  ;;  %v1271_v60 = vadd.f32 %v1509_v56, %v1265_v33  ;;  %v1354_v62 = vadd.f32 %v1510_v61, %v1348_v51 }
 0x62f   :  { %1272 = vst.msk [vmem:[%s2221_s13] sm:$0xff] %vm53_vm0, %v1268_v9  ;;  %1380 = vst.msk [vmem:[%s2221_s13 + $0x20] sm:$0xff] %vm53_vm0, %v1351_v42  ;;  %v1269_v17 = vadd.f32 %v1511_v16, %v1257_v10  ;;  %v1352_v47 = vadd.f32 %v1512_v19, %v1340_v2 }
 0x630   :  { %1275 = vst.msk [vmem:[%s2221_s13 + $0x18] sm:$0xff] %vm53_vm0, %v1271_v60  ;;  %1383 = vst.msk [vmem:[%s2221_s13 + $0x38] sm:$0xff] %vm53_vm0, %v1354_v62 }
 0x631   :  { %1273 = vst.msk [vmem:[%s2221_s13 + $0x8] sm:$0xff] %vm53_vm0, %v1269_v17  ;;  %1381 = vst.msk [vmem:[%s2221_s13 + $0x28] sm:$0xff] %vm53_vm0, %v1352_v47 }

// kernel: oanblock_forward.23
= control target key start
LH: loop header
LB: loop body
LE: loop exit
PB: predicated region body
PF: predicated region fallthrough
CT: control target
= control target key end

     0   :  { %s1683_s0 = inlined_call_operand.vmem [shape: f32[2,64,1024], index: 0, kind: input, shape index: {}]   ;;  %s1684_s1 = inlined_call_operand.vmem [shape: f32[2,64,1], index: 1, kind: input, shape index: {}]   ;;  %s1685_s2 = inlined_call_operand.vmem [shape: f32[2,64,1], index: 2, kind: input, shape index: {}]   ;;  %s1686_s3 = inlined_call_operand.vmem [shape: f32[32,64], index: 3, kind: input, shape index: {}]   ;;  %s1687_s4 = inlined_call_operand.vmem [shape: f32[32,1], index: 4, kind: input, shape index: {}]   ;;  %s1688_s5 = inlined_call_operand.vmem [shape: f32[2,32,1024], index: 5, kind: output, shape index: {0}]   ;;  %s1689_s6 = inlined_call_operand.vmem [shape: f32[2,32,1], index: 6, kind: output, shape index: {1}]   ;;  %s1690_s7 = inlined_call_operand.vmem [shape: f32[2,32,1], index: 7, kind: output, shape index: {2}]  }
   0x1   :  { %1691 = sst [smem:[#allocation4_spill]] %s1683_s0 }
   0x2   :  { %s1352_s24 = smov 0   ;;  %s1354_s25 = smov 0  }
   0x3   :  { %s1356_s26 = smov 0   ;;  %s1358_s27 = smov 0  }
   0x4   :  { %s1360_s28 = smov 0   ;;  %s1362_s29 = smov 0  }
   0x5   :  { %s1364_s30 = smov 0  }
   0x6 LB: > { %s27_s8 = sadd.s32 1, %s1301_s28  ;;  %s30_s9 = sadd.s32 1, %s1305_s29  ;;  %s1309_s30 = sphi %s1364_s30, %s18_s30   ;;  %s1305_s29 = sphi %s1362_s29, %s1699_s29   ;;  %s1301_s28 = sphi %s1360_s28, %s1698_s28   ;;  %s1297_s27 = sphi %s1358_s27, %s1697_s27   ;;  %s1293_s26 = sphi %s1356_s26, %s1696_s26   ;;  %s1289_s25 = sphi %s1354_s25, %s1695_s25   ;;  %s1285_s24 = sphi %s1352_s24, %s1694_s24  }
   0x7   : > { %p28_p0 = scmp.ge.s32.totalorder %s27_s8, 2  ;;  %s1161_s10 = sadd.s32 4294967295, %s1309_s30  }
   0x8   : > { %p46_p1 = scmp.ne.s32.totalorder %s1289_s25, %s1285_s24  ;;  %p47_p2 = scmp.eq.s32.totalorder %s1309_s30, 0 }
   0x9   : > { %s1701_s8 = smov (%p28_p0, %s27_s8), 0  ;;  %s1703_s9 = smov (!%p28_p0, %s30_s9), %s1305_s29 }
   0xa   : > { %p32_p3 = scmp.ge.s32.totalorder %s1703_s9, 2  ;;  %p172_p4 = scmp.eq.s32.totalorder %s1161_s10, 3 }
   0xb   : > { %s35_s11 = ssub.s32 %s1301_s28, %s1701_s8  ;;  %p48_p5 = por %p47_p2, %p46_p1 }
   0xc   : > { %s1705_s9 = smov (%p32_p3, %s1703_s9), 0  ;;  %p1400_p6 = por %p172_p4, %p46_p1 }
   0xd   : > { %s34_s13 = ssub.s32 %s1305_s29, %s1705_s9  ;;  %s39_s15 = sadd.s32 1, %s1289_s25 }
   0xe   : > { %s36_s14 = sor.u32 %s35_s11, %s34_s13  ;;  %p1164_p8 = scmp.ge.s32.totalorder %s1309_s30, 4 }
   0xf   : > { %p37_p7 = scmp.eq.s32.totalorder %s36_s14, 0 }
  0x10   : > { %252 = sbr.rel (%p1164_p8) target bundleno = 49 (0x31), region = 24 }
  0x11   : > { %s1408_s16 = scalar_select %p37_p7, %s1289_s25, %s39_s15  }
  0x17   : > { %255 = sbr.rel (!%p48_p5) target bundleno = 49 (0x31), region = 28  ;;  %s257_s17 = sand.u32 (%p48_p5), 1, %s1289_s25  }
  0x18   : > { %s1166_s18 = sshll.u32 (%p48_p5), %s1301_s28, 2  ;;  %s1165_s19 = sshll.u32 (%p48_p5), %s257_s17, 8 }
  0x19   : > { %s1167_s20 = sshll.u32 (%p48_p5), %s1305_s29, 6  ;;  %s1693_s0 = sld [smem:[#allocation4_spill]] (%p48_p5) }
  0x1a   : > { %s262_s21 = sadd.s32 (%p48_p5), %s1167_s20, %s1166_s18  ;;  %s1422_s13 = scalar_lea.vmem (%p48_p5), [#allocation2], %s1165_s19 }
  0x1b   : > { %s1168_s22 = sshll.u32 (%p48_p5), %s262_s21, 3 }
  0x1f   : > { %s1417_s11 = scalar_lea.vmem %s1693_s0, %s1168_s22 }
  0x20   : > { %v277_v0 = vld [vmem:[%s1417_s11] sm:$0xff]  ;;  %v279_v1 = vld [vmem:[%s1417_s11 + $0x8] sm:$0xff]  ;;  %v281_v2 = vld [vmem:[%s1417_s11 + $0x10] sm:$0xff] }
  0x21   : > { %278 = vst [vmem:[%s1422_s13] sm:$0xff] %v277_v0  ;;  %280 = vst [vmem:[%s1422_s13 + $0x8] sm:$0xff] %v279_v1  ;;  %v283_v3 = vld [vmem:[%s1417_s11 + $0x18] sm:$0xff]  ;;  %v285_v4 = vld [vmem:[%s1417_s11 + $0x40] sm:$0xff] }
  0x22   : > { %282 = vst [vmem:[%s1422_s13 + $0x10] sm:$0xff] %v281_v2  ;;  %v287_v5 = vld [vmem:[%s1417_s11 + $0x48] sm:$0xff]  ;;  %284 = vst [vmem:[%s1422_s13 + $0x18] sm:$0xff] %v283_v3  ;;  %v289_v6 = vld [vmem:[%s1417_s11 + $0x50] sm:$0xff] }
  0x23   : > { %286 = vst [vmem:[%s1422_s13 + $0x20] sm:$0xff] %v285_v4  ;;  %288 = vst [vmem:[%s1422_s13 + $0x28] sm:$0xff] %v287_v5  ;;  %v291_v7 = vld [vmem:[%s1417_s11 + $0x58] sm:$0xff]  ;;  %v293_v8 = vld [vmem:[%s1417_s11 + $0x80] sm:$0xff] }
  0x24   : > { %290 = vst [vmem:[%s1422_s13 + $0x30] sm:$0xff] %v289_v6  ;;  %292 = vst [vmem:[%s1422_s13 + $0x38] sm:$0xff] %v291_v7  ;;  %v295_v9 = vld [vmem:[%s1417_s11 + $0x88] sm:$0xff]  ;;  %v297_v10 = vld [vmem:[%s1417_s11 + $0x90] sm:$0xff] }
  0x25   : > { %294 = vst [vmem:[%s1422_s13 + $0x40] sm:$0xff] %v293_v8  ;;  %v299_v11 = vld [vmem:[%s1417_s11 + $0x98] sm:$0xff]  ;;  %296 = vst [vmem:[%s1422_s13 + $0x48] sm:$0xff] %v295_v9  ;;  %v301_v12 = vld [vmem:[%s1417_s11 + $0xc0] sm:$0xff] }
  0x26   : > { %298 = vst [vmem:[%s1422_s13 + $0x50] sm:$0xff] %v297_v10  ;;  %300 = vst [vmem:[%s1422_s13 + $0x58] sm:$0xff] %v299_v11  ;;  %v303_v13 = vld [vmem:[%s1417_s11 + $0xc8] sm:$0xff]  ;;  %v305_v14 = vld [vmem:[%s1417_s11 + $0xd0] sm:$0xff] }
  0x27   : > { %302 = vst [vmem:[%s1422_s13 + $0x60] sm:$0xff] %v301_v12  ;;  %304 = vst [vmem:[%s1422_s13 + $0x68] sm:$0xff] %v303_v13  ;;  %v307_v15 = vld [vmem:[%s1417_s11 + $0xd8] sm:$0xff]  ;;  %v309_v16 = vld [vmem:[%s1417_s11 + $0x100] sm:$0xff] }
  0x28   : > { %306 = vst [vmem:[%s1422_s13 + $0x70] sm:$0xff] %v305_v14  ;;  %v311_v17 = vld [vmem:[%s1417_s11 + $0x108] sm:$0xff]  ;;  %308 = vst [vmem:[%s1422_s13 + $0x78] sm:$0xff] %v307_v15  ;;  %v313_v18 = vld [vmem:[%s1417_s11 + $0x110] sm:$0xff] }
  0x29   : > { %310 = vst [vmem:[%s1422_s13 + $0x80] sm:$0xff] %v309_v16  ;;  %312 = vst [vmem:[%s1422_s13 + $0x88] sm:$0xff] %v311_v17  ;;  %v315_v19 = vld [vmem:[%s1417_s11 + $0x118] sm:$0xff]  ;;  %v317_v20 = vld [vmem:[%s1417_s11 + $0x140] sm:$0xff] }
  0x2a   : > { %314 = vst [vmem:[%s1422_s13 + $0x90] sm:$0xff] %v313_v18  ;;  %316 = vst [vmem:[%s1422_s13 + $0x98] sm:$0xff] %v315_v19  ;;  %v319_v21 = vld [vmem:[%s1417_s11 + $0x148] sm:$0xff]  ;;  %v321_v22 = vld [vmem:[%s1417_s11 + $0x150] sm:$0xff] }
  0x2b   : > { %318 = vst [vmem:[%s1422_s13 + $0xa0] sm:$0xff] %v317_v20  ;;  %v323_v23 = vld [vmem:[%s1417_s11 + $0x158] sm:$0xff]  ;;  %320 = vst [vmem:[%s1422_s13 + $0xa8] sm:$0xff] %v319_v21  ;;  %v325_v24 = vld [vmem:[%s1417_s11 + $0x180] sm:$0xff] }
  0x2c   : > { %322 = vst [vmem:[%s1422_s13 + $0xb0] sm:$0xff] %v321_v22  ;;  %324 = vst [vmem:[%s1422_s13 + $0xb8] sm:$0xff] %v323_v23  ;;  %v327_v25 = vld [vmem:[%s1417_s11 + $0x188] sm:$0xff]  ;;  %v329_v26 = vld [vmem:[%s1417_s11 + $0x190] sm:$0xff] }
  0x2d   : > { %326 = vst [vmem:[%s1422_s13 + $0xc0] sm:$0xff] %v325_v24  ;;  %328 = vst [vmem:[%s1422_s13 + $0xc8] sm:$0xff] %v327_v25  ;;  %v331_v27 = vld [vmem:[%s1417_s11 + $0x198] sm:$0xff]  ;;  %v333_v28 = vld [vmem:[%s1417_s11 + $0x1c0] sm:$0xff] }
  0x2e   : > { %330 = vst [vmem:[%s1422_s13 + $0xd0] sm:$0xff] %v329_v26  ;;  %v335_v29 = vld [vmem:[%s1417_s11 + $0x1c8] sm:$0xff]  ;;  %332 = vst [vmem:[%s1422_s13 + $0xd8] sm:$0xff] %v331_v27  ;;  %v337_v30 = vld [vmem:[%s1417_s11 + $0x1d0] sm:$0xff] }
  0x2f   : > { %334 = vst [vmem:[%s1422_s13 + $0xe0] sm:$0xff] %v333_v28  ;;  %336 = vst [vmem:[%s1422_s13 + $0xe8] sm:$0xff] %v335_v29  ;;  %v339_v31 = vld [vmem:[%s1417_s11 + $0x1d8] sm:$0xff] }
  0x30   : > { %338 = vst [vmem:[%s1422_s13 + $0xf0] sm:$0xff] %v337_v30  ;;  %340 = vst [vmem:[%s1422_s13 + $0xf8] sm:$0xff] %v339_v31 }
  0x31 PF: > { %p1169_p9 = scmp.ge.s32.totalorder %s1309_s30, 1  ;;  %p361_p10 = scmp.lt.s32.totalorder %s1309_s30, 5 }
  0x33   : > { %p362_p11 = pnand %p1169_p9, %p361_p10 }
  0x34   : > { %p419_p12 = scmp.lt.s32.totalorder (!%p362_p11), %s1297_s27, 1  ;;  %v1311_v32 = vmov (!%p362_p11), 0   ;;  %v688_v49 = vld [vmem:[%s1687_s4 + $0x8] sm:$0xff] (!%p362_p11)  ;;  %v687_v50 = vld [vmem:[%s1687_s4] sm:$0xff] (!%p362_p11)  ;;  %v690_v51 = vld [vmem:[%s1687_s4 + $0x18] sm:$0xff] (!%p362_p11)  ;;  %vm711_vm0 = vcmask (!%p362_p11), 523264  }
  0x35   : > { %365 = sbr.rel (%p362_p11) target bundleno = 638 (0x27e), region = 59  ;;  %1254 = vset.pattern.permute.xlu1 (!%p362_p11), %v1311_v32  ;;  %1253 = vset.pattern.permute.xlu0 (!%p362_p11), %v1311_v32  ;;  %v689_v52 = vld [vmem:[%s1687_s4 + $0x10] sm:$0xff] (!%p362_p11)  ;;  %p1184_p13 = scmp.ne.s32.totalorder (!%p362_p11), %s1293_s26, 0 }
  0x36   : > { %750 = vmatprep.mubr.bf16.mxu0 (!%p362_p11), %v1311_v32  ;;  %803 = vmatprep.mubr.bf16.mxu1 (!%p362_p11), %v1311_v32 }
  0x3c   : > { %s420_s14 = scalar_select %p419_p12, %s1297_s27, 1 }
  0x3d   : > { %vm900_vm1 = vcmask (!%p1184_p13), 7168  }
  0x3e   : > { %s1192_s15 = sshll.u32 %s420_s14, 6  ;;  %s1194_s17 = sshll.u32 %s420_s14, 5 }
  0x3f   : > { %s1496_s20 = scalar_lea.vmem %s1685_s2, %s1192_s15  ;;  %s1501_s23 = scalar_lea.vmem %s1689_s6, %s1194_s17 }
  0x40   : > { %s1506_s13 = scalar_lea.vmem %s1690_s7, %s1194_s17  ;;  %v553_v33 = vld [vmem:[%s1496_s20] sm:$0xff]  ;;  %s423_s18 = scalar_lea.vmem %s1684_s1, %s1192_s15  ;;  %v554_v35 = vld [vmem:[%s1496_s20 + $0x8] sm:$0xff]  ;;  %v556_v39 = vld [vmem:[%s1496_s20 + $0x18] sm:$0xff] }
  0x41   : > { %563 = vperm.xlu1 %1254, %v553_v33   ;;  %v473_v34 = vld [vmem:[%s423_s18] sm:$0xff]  ;;  %v474_v36 = vld [vmem:[%s423_s18 + $0x8] sm:$0xff]  ;;  %v476_v37 = vld [vmem:[%s423_s18 + $0x18] sm:$0xff] }
  0x42   : > { %483 = vperm.xlu0 %1253, %v473_v34   ;;  %v475_v38 = vld [vmem:[%s423_s18 + $0x10] sm:$0xff]  ;;  %v478_v41 = vld [vmem:[%s423_s18 + $0x28] sm:$0xff]  ;;  %v477_v42 = vld [vmem:[%s423_s18 + $0x20] sm:$0xff] }
  0x43   : > { %v555_v40 = vld [vmem:[%s1496_s20 + $0x10] sm:$0xff]  ;;  %v558_v43 = vld [vmem:[%s1496_s20 + $0x28] sm:$0xff]  ;;  %v557_v44 = vld [vmem:[%s1496_s20 + $0x20] sm:$0xff] }
  0x44   : > { %v480_v45 = vld [vmem:[%s423_s18 + $0x38] sm:$0xff]  ;;  %v479_v46 = vld [vmem:[%s423_s18 + $0x30] sm:$0xff] }
  0x45   : > { %568 = vperm.xlu1 %1254, %v554_v35   ;;  %v560_v47 = vld [vmem:[%s1496_s20 + $0x38] sm:$0xff]  ;;  %v559_v48 = vld [vmem:[%s1496_s20 + $0x30] sm:$0xff]  ;;  %s368_s20 = sand.u32 1, %s1285_s24  }
  0x46   : > { %488 = vperm.xlu0 %1253, %v474_v36   ;;  %s1170_s14 = sshll.u32 %s368_s20, 8 }
  0x47   : > { %s1534_s18 = scalar_lea.vmem [#allocation2], %s1170_s14  ;;  %s1171_s14 = sshll.u32 %s368_s20, 7 }
  0x48   : > { %v441_v53 = vld [vmem:[%s1534_s18] sm:$0xff]  ;;  %v443_v54 = vld [vmem:[%s1534_s18 + $0x10] sm:$0xff]  ;;  %v442_v55 = vld [vmem:[%s1534_s18 + $0x8] sm:$0xff] }
  0x49   : > { %498 = vperm.xlu1 %1254, %v476_v37   ;;  %v444_v56 = vld [vmem:[%s1534_s18 + $0x18] sm:$0xff]  ;;  %v445_v63 = vld [vmem:[%s1534_s18 + $0x20] sm:$0xff]  ;;  %v447_v0 = vld [vmem:[%s1534_s18 + $0x30] sm:$0xff] }
  0x4a   : > { %493 = vperm.xlu0 %1253, %v475_v38   ;;  %v446_v1 = vld [vmem:[%s1534_s18 + $0x28] sm:$0xff]  ;;  %v448_v3 = vld [vmem:[%s1534_s18 + $0x38] sm:$0xff]  ;;  %v453_v11 = vld [vmem:[%s1534_s18 + $0x60] sm:$0xff] }
  0x4b   : > { %v454_v13 = vld [vmem:[%s1534_s18 + $0x68] sm:$0xff]  ;;  %v455_v14 = vld [vmem:[%s1534_s18 + $0x70] sm:$0xff]  ;;  %v456_v15 = vld [vmem:[%s1534_s18 + $0x78] sm:$0xff] }
  0x4c   : > { %v449_v18 = vld [vmem:[%s1534_s18 + $0x40] sm:$0xff]  ;;  %v450_v19 = vld [vmem:[%s1534_s18 + $0x48] sm:$0xff]  ;;  %v451_v24 = vld [vmem:[%s1534_s18 + $0x50] sm:$0xff] }
  0x4d   : > { %578 = vperm.xlu1 %1254, %v556_v39   ;;  %v452_v25 = vld [vmem:[%s1534_s18 + $0x58] sm:$0xff] }
  0x4e   : > { %573 = vperm.xlu0 %1253, %v555_v40  }
  0x51   : > { %508 = vperm.xlu1 %1254, %v478_v41  }
  0x52   : > { %503 = vperm.xlu0 %1253, %v477_v42  }
  0x55   : > { %588 = vperm.xlu1 %1254, %v558_v43  }
  0x56   : > { %583 = vperm.xlu0 %1253, %v557_v44  }
  0x59   : > { %518 = vperm.xlu1 %1254, %v480_v45  }
  0x5a   : > { %513 = vperm.xlu0 %1253, %v479_v46  }
  0x5d   : > { %598 = vperm.xlu1 %1254, %v560_v47  }
  0x5e   : > { %593 = vperm.xlu0 %1253, %v559_v48  }
  0x61   : > { %698 = vperm.xlu1 %1254, %v688_v49  }
  0x62   : > { %693 = vperm.xlu0 %1253, %v687_v50  }
  0x65   : > { %708 = vperm.xlu1 %1254, %v690_v51  }
  0x66   : > { %703 = vperm.xlu0 %1253, %v689_v52  }
  0xc0   : > { %v564_v57 = vpop.permute.xlu1 %563 }
  0xc1   : > { %v484_v58 = vpop.permute.xlu0 %483 }
  0xc2   : > { %v521_v59 = vmul.f32 %v484_v58, %v441_v53  ;;  %v523_v60 = vmul.f32 %v484_v58, %v443_v54  ;;  %v522_v61 = vmul.f32 %v484_v58, %v442_v55  ;;  %v524_v62 = vmul.f32 %v484_v58, %v444_v56  ;;  %v461_v53 = vld [vmem:[%s1534_s18 + $0xa0] sm:$0xff]  ;;  %v462_v54 = vld [vmem:[%s1534_s18 + $0xa8] sm:$0xff]  ;;  %v463_v55 = vld [vmem:[%s1534_s18 + $0xb0] sm:$0xff] }
  0xc4   : > { %v569_v2 = vpop.permute.xlu1 %568  ;;  %v602_v5 = vadd.f32 %v564_v57, %v522_v61  ;;  %v1544_v6 = vadd.f32 %v564_v57, %v524_v62  ;;  %v601_v7 = vadd.f32 %v564_v57, %v521_v59  ;;  %v603_v8 = vadd.f32 %v564_v57, %v523_v60  ;;  %v464_v60 = vld [vmem:[%s1534_s18 + $0xb8] sm:$0xff]  ;;  %v457_v61 = vld [vmem:[%s1534_s18 + $0x80] sm:$0xff]  ;;  %v458_v62 = vld [vmem:[%s1534_s18 + $0x88] sm:$0xff] }
  0xc5   : > { %v489_v4 = vpop.permute.xlu0 %488 }
  0xc6   : > { %v525_v9 = vmul.f32 %v489_v4, %v445_v63  ;;  %v527_v10 = vmul.f32 %v489_v4, %v447_v0  ;;  %v526_v12 = vmul.f32 %v489_v4, %v446_v1  ;;  %v528_v16 = vmul.f32 %v489_v4, %v448_v3  ;;  %v459_v0 = vld [vmem:[%s1534_s18 + $0x90] sm:$0xff] }
  0xc7   : > { %v634_v26 = vmax.f32 %v602_v5, 0.0  ;;  %v636_v27 = vmax.f32 %v1544_v6, 0.0  ;;  %v633_v28 = vmax.f32 %v601_v7, 0.0  ;;  %v635_v29 = vmax.f32 %v603_v8, 0.0 }
  0xc8   : > { %v499_v17 = vpop.permute.xlu1 %498  ;;  %v606_v20 = vadd.f32 %v569_v2, %v526_v12  ;;  %v605_v21 = vadd.f32 %v569_v2, %v525_v9  ;;  %v607_v22 = vadd.f32 %v569_v2, %v527_v10  ;;  %v608_v36 = vadd.f32 %v569_v2, %v528_v16  ;;  %v460_v9 = vld [vmem:[%s1534_s18 + $0x98] sm:$0xff] }
  0xc9   : > { %v494_v23 = vpop.permute.xlu0 %493  ;;  %v533_v30 = vmul.f32 %v499_v17, %v453_v11  ;;  %v534_v31 = vmul.f32 %v499_v17, %v454_v13  ;;  %v535_v33 = vmul.f32 %v499_v17, %v455_v14  ;;  %v536_v34 = vmul.f32 %v499_v17, %v456_v15 }
  0xca   : > { %v638_v35 = vmax.f32 %v606_v20, 0.0  ;;  %v637_v37 = vmax.f32 %v605_v21, 0.0  ;;  %v639_v38 = vmax.f32 %v607_v22, 0.0  ;;  %v529_v39 = vmul.f32 %v494_v23, %v449_v18 }
  0xcb   : > { %v530_v40 = vmul.f32 %v494_v23, %v450_v19  ;;  %v531_v41 = vmul.f32 %v494_v23, %v451_v24  ;;  %v532_v42 = vmul.f32 %v494_v23, %v452_v25  ;;  %v640_v57 = vmax.f32 %v608_v36, 0.0 }
  0xcc   : > { %v579_v43 = vpop.permute.xlu1 %578  ;;  %v672_v56 = vpack.c.bf16 %v638_v35, %v634_v26  ;;  %v671_v58 = vpack.c.bf16 %v637_v37, %v633_v28  ;;  %v673_v59 = vpack.c.bf16 %v639_v38, %v635_v29  ;;  %v471_v37 = vld [vmem:[%s1534_s18 + $0xf0] sm:$0xff]  ;;  %v472_v38 = vld [vmem:[%s1534_s18 + $0xf8] sm:$0xff] }
  0xcd   : > { %v613_v44 = vadd.f32 %v579_v43, %v533_v30  ;;  %v614_v45 = vadd.f32 %v579_v43, %v534_v31  ;;  %v615_v46 = vadd.f32 %v579_v43, %v535_v33  ;;  %v616_v47 = vadd.f32 %v579_v43, %v536_v34  ;;  %v574_v48 = vpop.permute.xlu0 %573  ;;  %v469_v31 = vld [vmem:[%s1534_s18 + $0xe0] sm:$0xff]  ;;  %v470_v33 = vld [vmem:[%s1534_s18 + $0xe8] sm:$0xff] }
  0xce   : > { %v609_v49 = vadd.f32 %v574_v48, %v529_v39  ;;  %v610_v50 = vadd.f32 %v574_v48, %v530_v40  ;;  %v611_v51 = vadd.f32 %v574_v48, %v531_v41  ;;  %v612_v52 = vadd.f32 %v574_v48, %v532_v42  ;;  %718 = vmatprep.subr.bf16.mxu0 %v672_v56  ;;  %v465_v39 = vld [vmem:[%s1534_s18 + $0xc0] sm:$0xff]  ;;  %v466_v42 = vld [vmem:[%s1534_s18 + $0xc8] sm:$0xff] }
  0xcf   : > { %v646_v2 = vmax.f32 %v614_v45, 0.0  ;;  %v648_v4 = vmax.f32 %v616_v47, 0.0  ;;  %v674_v5 = vpack.c.bf16 %v640_v57, %v636_v27  ;;  %719 = vmatpush1.bf16.msra.mxu0 %v671_v58  ;;  %v645_v20 = vmax.f32 %v613_v44, 0.0 }
  0xd0   : > { %v509_v63 = vpop.permute.xlu1 %508  ;;  %v642_v1 = vmax.f32 %v610_v50, 0.0  ;;  %v644_v3 = vmax.f32 %v612_v52, 0.0  ;;  %v641_v17 = vmax.f32 %v609_v49, 0.0  ;;  %v643_v21 = vmax.f32 %v611_v51, 0.0  ;;  %v467_v49 = vld [vmem:[%s1534_s18 + $0xd0] sm:$0xff]  ;;  %v468_v50 = vld [vmem:[%s1534_s18 + $0xd8] sm:$0xff] }
  0xd1   : > { %v541_v6 = vmul.f32 %v509_v63, %v461_v53  ;;  %v542_v7 = vmul.f32 %v509_v63, %v462_v54  ;;  %v504_v8 = vpop.permute.xlu0 %503  ;;  %v543_v10 = vmul.f32 %v509_v63, %v463_v55  ;;  %v544_v11 = vmul.f32 %v509_v63, %v464_v60  ;;  %771 = vmatprep.subr.bf16.mxu1 %v674_v5  ;;  %s1587_s18 = scalar_lea.vmem [#allocation3], %s1171_s14 }
  0xd2   : > { %v537_v12 = vmul.f32 %v504_v8, %v457_v61  ;;  %v538_v13 = vmul.f32 %v504_v8, %v458_v62  ;;  %v539_v14 = vmul.f32 %v504_v8, %v459_v0  ;;  %v676_v15 = vpack.c.bf16 %v646_v2, %v642_v1  ;;  %772 = vmatpush1.bf16.msra.mxu1 %v673_v59 }
  0xd3   : > { %v678_v16 = vpack.c.bf16 %v648_v4, %v644_v3  ;;  %v540_v18 = vmul.f32 %v504_v8, %v460_v9  ;;  %v647_v22 = vmax.f32 %v615_v46, 0.0  ;;  %v675_v35 = vpack.c.bf16 %v645_v20, %v641_v17  ;;  %v666_v20 = vld [vmem:[%s1686_s3 + $0x8] sm:$0xff] }
  0xd4   : > { %v589_v19 = vpop.permute.xlu1 %588  ;;  %720 = vmatprep.subr.bf16.mxu0 %v676_v15 }
  0xd5   : > { %773 = vmatprep.subr.bf16.mxu1 %v678_v16  ;;  %v621_v23 = vadd.f32 %v589_v19, %v541_v6  ;;  %v622_v24 = vadd.f32 %v589_v19, %v542_v7  ;;  %v623_v25 = vadd.f32 %v589_v19, %v543_v10  ;;  %v584_v26 = vpop.permute.xlu0 %583  ;;  %v624_v27 = vadd.f32 %v589_v19, %v544_v11  ;;  %v665_v19 = vld [vmem:[%s1686_s3] sm:$0xff] }
  0xd6   : > { %v617_v28 = vadd.f32 %v584_v26, %v537_v12  ;;  %v618_v29 = vadd.f32 %v584_v26, %v538_v13  ;;  %v619_v30 = vadd.f32 %v584_v26, %v539_v14  ;;  %v620_v34 = vadd.f32 %v584_v26, %v540_v18  ;;  %721 = vmatpush1.bf16.msra.mxu0 %v675_v35  ;;  %v667_v26 = vld [vmem:[%s1686_s3 + $0x10] sm:$0xff] }
  0xd7   : > { %v677_v36 = vpack.c.bf16 %v647_v22, %v643_v21  ;;  %v654_v40 = vmax.f32 %v622_v24, 0.0  ;;  %v656_v44 = vmax.f32 %v624_v27, 0.0  ;;  %v653_v46 = vmax.f32 %v621_v23, 0.0  ;;  %v668_v27 = vld [vmem:[%s1686_s3 + $0x18] sm:$0xff] }
  0xd8   : > { %v519_v41 = vpop.permute.xlu1 %518  ;;  %v650_v43 = vmax.f32 %v618_v29, 0.0  ;;  %v649_v45 = vmax.f32 %v617_v28, 0.0  ;;  %v652_v51 = vmax.f32 %v620_v34, 0.0  ;;  %v651_v63 = vmax.f32 %v619_v30, 0.0 }
  0xd9   : > { %774 = vmatpush1.bf16.msra.mxu1 %v677_v36  ;;  %v549_v47 = vmul.f32 %v519_v41, %v469_v31  ;;  %v514_v48 = vpop.permute.xlu0 %513  ;;  %v550_v52 = vmul.f32 %v519_v41, %v470_v33  ;;  %v551_v53 = vmul.f32 %v519_v41, %v471_v37  ;;  %v552_v54 = vmul.f32 %v519_v41, %v472_v38 }
  0xda   : > { %v545_v55 = vmul.f32 %v514_v48, %v465_v39  ;;  %v546_v56 = vmul.f32 %v514_v48, %v466_v42  ;;  %v680_v57 = vpack.c.bf16 %v654_v40, %v650_v43  ;;  %v682_v58 = vpack.c.bf16 %v656_v44, %v652_v51 }
  0xdb   : > { %v679_v59 = vpack.c.bf16 %v653_v46, %v649_v45  ;;  %v547_v60 = vmul.f32 %v514_v48, %v467_v49  ;;  %v548_v61 = vmul.f32 %v514_v48, %v468_v50  ;;  %v655_v0 = vmax.f32 %v623_v25, 0.0 }
  0xdc   : > { %v599_v62 = vpop.permute.xlu1 %598  ;;  %722 = vmatprep.subr.bf16.mxu0 %v680_v57  ;;  %775 = vmatprep.subr.bf16.mxu1 %v682_v58  ;;  %v669_v25 = vpack.c.bf16 %v666_v20, %v665_v19  ;;  %v670_v28 = vpack.c.bf16 %v668_v27, %v667_v26 }
  0xdd   : > { %v629_v1 = vadd.f32 %v599_v62, %v549_v47  ;;  %v630_v2 = vadd.f32 %v599_v62, %v550_v52  ;;  %v631_v3 = vadd.f32 %v599_v62, %v551_v53  ;;  %v594_v4 = vpop.permute.xlu0 %593  ;;  %v632_v5 = vadd.f32 %v599_v62, %v552_v54  ;;  %723 = vmatpush1.bf16.msra.mxu0 %v679_v59 }
  0xde   : > { %v625_v6 = vadd.f32 %v594_v4, %v545_v55  ;;  %v626_v7 = vadd.f32 %v594_v4, %v546_v56  ;;  %v627_v8 = vadd.f32 %v594_v4, %v547_v60  ;;  %v628_v9 = vadd.f32 %v594_v4, %v548_v61 }
  0xdf   : > { %v681_v10 = vpack.c.bf16 %v655_v0, %v651_v63  ;;  %v662_v11 = vmax.f32 %v630_v2, 0.0  ;;  %v661_v12 = vmax.f32 %v629_v1, 0.0  ;;  %v664_v14 = vmax.f32 %v632_v5, 0.0 }
  0xe0   : > { %v658_v13 = vmax.f32 %v626_v7, 0.0  ;;  %v657_v15 = vmax.f32 %v625_v6, 0.0  ;;  %v659_v16 = vmax.f32 %v627_v8, 0.0  ;;  %v660_v17 = vmax.f32 %v628_v9, 0.0  ;;  %v699_v29 = vpop.permute.xlu1 %698 }
  0xe1   : > { %776 = vmatpush1.bf16.msra.mxu1 %v681_v10  ;;  %v663_v18 = vmax.f32 %v631_v3, 0.0  ;;  %v694_v30 = vpop.permute.xlu0 %693 }
  0xe2   : > { %v684_v21 = vpack.c.bf16 %v662_v11, %v658_v13  ;;  %v683_v22 = vpack.c.bf16 %v661_v12, %v657_v15  ;;  %v686_v23 = vpack.c.bf16 %v664_v14, %v660_v17 }
  0xe3   : > { %v685_v24 = vpack.c.bf16 %v663_v18, %v659_v16 }
  0xe4   : > { %724 = vmatprep.subr.bf16.mxu0 %v684_v21  ;;  %777 = vmatprep.subr.bf16.mxu1 %v686_v23  ;;  %v709_v54 = vpop.permute.xlu1 %708 }
  0xe5   : > { %725 = vmatpush1.bf16.msra.mxu0 %v683_v22  ;;  %778 = vmatpush1.bf16.msra.mxu1 %v685_v24  ;;  %v704_v57 = vpop.permute.xlu0 %703 }
  0xe8   : > { %1180 = vmatmul.mubr.msk.bf16.vlgmr.msra.gmra.mrb[0].mxu0 %vm711_vm0, %v669_v25  ;;  %1182 = vmatmul.mubr.msk.bf16.vlgmr.msra.gmra.mrb[0].mxu1 %vm711_vm0, %v669_v25 }
  0xe9   : > { %760 = vmatprep.mubr.bf16.mxu0 %v1311_v32  ;;  %813 = vmatprep.mubr.bf16.mxu1 %v1311_v32 }
  0xf0   : > { %1181 = vmatmul.mubr.msk.bf16.gmra.mrb[4].mxu0 %vm711_vm0, %v670_v28  ;;  %1183 = vmatmul.mubr.msk.bf16.gmra.mrb[4].mxu1 %vm711_vm0, %v670_v28 }
 0x1bb   : > { %v752_v31 = vpop.f32.mrb[0].mxu0  ;;  %v805_v34 = vpop.f32.mrb[0].mxu1 }
 0x1bc   : > { %v753_v33 = vadd.f32 %v752_v31, %v694_v30  ;;  %v754_v35 = vpop.f32.mrb[1].mxu0  ;;  %v806_v36 = vadd.f32 %v805_v34, %v694_v30  ;;  %v807_v38 = vpop.f32.mrb[1].mxu1 }
 0x1bd   : > { %v755_v37 = vadd.f32 %v754_v35, %v694_v30  ;;  %v756_v39 = vpop.f32.mrb[2].mxu0  ;;  %v808_v40 = vadd.f32 %v807_v38, %v694_v30  ;;  %v809_v42 = vpop.f32.mrb[2].mxu1 }
 0x1be   : > { %824 = vst [vmem:[%s1587_s18] sm:$0xff] %v753_v33  ;;  %v860_v32 = vmul.f32 %v753_v33, %v753_v33  ;;  %v757_v41 = vadd.f32 %v756_v39, %v699_v29  ;;  %v758_v43 = vpop.f32.mrb[3].mxu0  ;;  %826 = vst [vmem:[%s1587_s18 + $0x10] sm:$0xff] %v806_v36  ;;  %v810_v46 = vadd.f32 %v809_v42, %v699_v29  ;;  %v811_v47 = vpop.f32.mrb[3].mxu1 }
 0x1bf   : > { %825 = vst [vmem:[%s1587_s18 + $0x8] sm:$0xff] %v755_v37  ;;  %v840_v44 = vadd.f32 %v755_v37, %v753_v33  ;;  %v861_v45 = vmul.f32 %v755_v37, %v755_v37  ;;  %827 = vst [vmem:[%s1587_s18 + $0x18] sm:$0xff] %v808_v40  ;;  %v759_v49 = vadd.f32 %v758_v43, %v699_v29 }
 0x1c0   : > { %828 = vst [vmem:[%s1587_s18 + $0x20] sm:$0xff] %v757_v41  ;;  %v864_v48 = vmul.f32 %v757_v41, %v757_v41  ;;  %v812_v50 = vadd.f32 %v811_v47, %v699_v29  ;;  %v862_v51 = vmul.f32 %v806_v36, %v806_v36  ;;  %830 = vst [vmem:[%s1587_s18 + $0x30] sm:$0xff] %v810_v46 }
 0x1c1   : > { %v841_v52 = vadd.f32 %v840_v44, %v806_v36  ;;  %v876_v53 = vadd.f32 %v861_v45, %v860_v32  ;;  %829 = vst [vmem:[%s1587_s18 + $0x28] sm:$0xff] %v759_v49  ;;  %v845_v55 = vadd.f32 %v759_v49, %v757_v41  ;;  %v865_v56 = vmul.f32 %v759_v49, %v759_v49 }
 0x1c2   : > { %831 = vst [vmem:[%s1587_s18 + $0x38] sm:$0xff] %v812_v50  ;;  %v863_v60 = vmul.f32 %v808_v40, %v808_v40  ;;  %v866_v3 = vmul.f32 %v810_v46, %v810_v46  ;;  %v867_v19 = vmul.f32 %v812_v50, %v812_v50 }
 0x1c3   : > { %v762_v58 = vpop.f32.mrb[4].mxu0  ;;  %v842_v59 = vadd.f32 %v841_v52, %v808_v40  ;;  %v877_v61 = vadd.f32 %v876_v53, %v862_v51  ;;  %v815_v63 = vpop.f32.mrb[4].mxu1  ;;  %v846_v1 = vadd.f32 %v845_v55, %v810_v46  ;;  %v881_v2 = vadd.f32 %v865_v56, %v864_v48 }
 0x1c4   : > { %v763_v62 = vadd.f32 %v762_v58, %v704_v57  ;;  %v764_v0 = vpop.f32.mrb[5].mxu0  ;;  %v816_v4 = vadd.f32 %v815_v63, %v704_v57  ;;  %v817_v6 = vpop.f32.mrb[5].mxu1 }
 0x1c5   : > { %v765_v5 = vadd.f32 %v764_v0, %v704_v57  ;;  %v766_v7 = vpop.f32.mrb[6].mxu0  ;;  %843 = vadd.xlane.f32.xlu0 %v842_v59  ;;  %v878_v8 = vadd.f32 %v877_v61, %v863_v60  ;;  %v818_v10 = vadd.f32 %v817_v6, %v704_v57  ;;  %v819_v12 = vpop.f32.mrb[6].mxu1  ;;  %v847_v14 = vadd.f32 %v846_v1, %v812_v50 }
 0x1c6   : > { %832 = vst [vmem:[%s1587_s18 + $0x40] sm:$0xff] %v763_v62  ;;  %v868_v9 = vmul.f32 %v763_v62, %v763_v62  ;;  %v767_v11 = vadd.f32 %v766_v7, %v709_v54  ;;  %v768_v13 = vpop.f32.mrb[7].mxu0  ;;  %834 = vst [vmem:[%s1587_s18 + $0x50] sm:$0xff] %v816_v4  ;;  %v820_v17 = vadd.f32 %v819_v12, %v709_v54  ;;  %v821_v18 = vpop.f32.mrb[7].mxu1 }
 0x1c7   : > { %833 = vst [vmem:[%s1587_s18 + $0x48] sm:$0xff] %v765_v5  ;;  %v850_v15 = vadd.f32 %v765_v5, %v763_v62  ;;  %v869_v16 = vmul.f32 %v765_v5, %v765_v5  ;;  %835 = vst [vmem:[%s1587_s18 + $0x58] sm:$0xff] %v818_v10  ;;  %v769_v21 = vadd.f32 %v768_v13, %v709_v54  ;;  %848 = vadd.xlane.f32.xlu1 %v847_v14 }
 0x1c8   : > { %836 = vst [vmem:[%s1587_s18 + $0x60] sm:$0xff] %v767_v11  ;;  %v872_v20 = vmul.f32 %v767_v11, %v767_v11  ;;  %v822_v22 = vadd.f32 %v821_v18, %v709_v54  ;;  %v882_v23 = vadd.f32 %v881_v2, %v866_v3  ;;  %v870_v24 = vmul.f32 %v816_v4, %v816_v4 }
 0x1c9   : > { %838 = vst [vmem:[%s1587_s18 + $0x70] sm:$0xff] %v820_v17  ;;  %v851_v25 = vadd.f32 %v850_v15, %v816_v4  ;;  %v886_v26 = vadd.f32 %v869_v16, %v868_v9  ;;  %837 = vst [vmem:[%s1587_s18 + $0x68] sm:$0xff] %v769_v21  ;;  %v855_v27 = vadd.f32 %v769_v21, %v767_v11 }
 0x1ca   : > { %v873_v28 = vmul.f32 %v769_v21, %v769_v21  ;;  %839 = vst [vmem:[%s1587_s18 + $0x78] sm:$0xff] %v822_v22  ;;  %v883_v29 = vadd.f32 %v882_v23, %v867_v19  ;;  %v871_v31 = vmul.f32 %v818_v10, %v818_v10  ;;  %v874_v34 = vmul.f32 %v820_v17, %v820_v17 }
 0x1cb   : > { %v852_v30 = vadd.f32 %v851_v25, %v818_v10  ;;  %v887_v33 = vadd.f32 %v886_v26, %v870_v24  ;;  %879 = vadd.xlane.f32.xlu1 %v878_v8  ;;  %v856_v35 = vadd.f32 %v855_v27, %v820_v17  ;;  %v875_v39 = vmul.f32 %v822_v22, %v822_v22 }
 0x1cc   : > { %884 = vadd.xlane.f32.xlu0 %v883_v29  ;;  %v891_v36 = vadd.f32 %v873_v28, %v872_v20 }
 0x1cd   : > { %v888_v37 = vadd.f32 %v887_v33, %v871_v31  ;;  %v857_v38 = vadd.f32 %v856_v35, %v822_v22 }
 0x1ce   : > { %v892_v32 = vadd.f32 %v891_v36, %v874_v34 }
 0x1cf   : > { %889 = vadd.xlane.f32.xlu1 %v888_v37 }
 0x1d0   : > { %853 = vadd.xlane.f32.xlu0 %v852_v30  ;;  %v893_v40 = vadd.f32 %v892_v32, %v875_v39 }
 0x1d4   : > { %858 = vadd.xlane.f32.xlu0 %v857_v38 }
 0x1d8   : > { %894 = vadd.xlane.f32.xlu0 %v893_v40 }
 0x252   : > { %v844_v41 = vpop.xlane.xlu0 %843 }
 0x253   : > { %901 = vst.msk [vmem:[%s1501_s23] sm:$0xff] (!%p1184_p13), %vm900_vm1, %v844_v41 }
 0x254   : > { %v849_v42 = vpop.xlane.xlu1 %848 }
 0x255   : > { %902 = vst.msk [vmem:[%s1501_s23 + $0x8] sm:$0xff] (!%p1184_p13), %vm900_vm1, %v849_v42 }
 0x258   : > { %v880_v44 = vpop.xlane.xlu1 %879 }
 0x259   : > { %v885_v43 = vpop.xlane.xlu0 %884  ;;  %905 = vst.msk [vmem:[%s1506_s13] sm:$0xff] (!%p1184_p13), %vm900_vm1, %v880_v44 }
 0x25a   : > { %906 = vst.msk [vmem:[%s1506_s13 + $0x8] sm:$0xff] (!%p1184_p13), %vm900_vm1, %v885_v43 }
 0x25c   : > { %v890_v46 = vpop.xlane.xlu1 %889 }
 0x25d   : > { %v854_v45 = vpop.xlane.xlu0 %853  ;;  %907 = vst.msk [vmem:[%s1506_s13 + $0x10] sm:$0xff] (!%p1184_p13), %vm900_vm1, %v890_v46 }
 0x25e   : > { %903 = vst.msk [vmem:[%s1501_s23 + $0x10] sm:$0xff] (!%p1184_p13), %vm900_vm1, %v854_v45 }
 0x25f   : > { %899 = sbr.rel (%p1184_p13) target bundleno = 615 (0x267), region = 67 }
 0x261   : > { %v859_v47 = vpop.xlane.xlu0 %858 }
 0x262   : > { %904 = vst.msk [vmem:[%s1501_s23 + $0x18] sm:$0xff] (!%p1184_p13), %vm900_vm1, %v859_v47 }
 0x265   : > { %v895_v48 = vpop.xlane.xlu0 %894 }
 0x266   : > { %908 = vst.msk [vmem:[%s1506_s13 + $0x18] sm:$0xff] %vm900_vm1, %v895_v48 }
 0x267 PF: > { %p1185_p0 = scmp.le.s32.totalorder %s1293_s26, 0 }
 0x268   : > { %v913_v49 = vld [vmem:[%s1501_s23] sm:$0xff] (!%p1185_p0)  ;;  %vm921_vm2 = vcmask (!%p1185_p0), 7168   ;;  %v914_v50 = vld [vmem:[%s1501_s23 + $0x8] sm:$0xff] (!%p1185_p0)  ;;  %v915_v51 = vld [vmem:[%s1501_s23 + $0x10] sm:$0xff] (!%p1185_p0) }
 0x269   : > { %912 = sbr.rel (%p1185_p0) target bundleno = 625 (0x271), region = 71  ;;  %v917_v52 = vadd.f32 (!%p1185_p0), %v913_v49, %v844_v41  ;;  %v918_v53 = vadd.f32 (!%p1185_p0), %v914_v50, %v849_v42  ;;  %v919_v54 = vadd.f32 (!%p1185_p0), %v915_v51, %v854_v45  ;;  %v926_v56 = vld [vmem:[%s1506_s13] sm:$0xff] (!%p1185_p0)  ;;  %v927_v57 = vld [vmem:[%s1506_s13 + $0x8] sm:$0xff] (!%p1185_p0)  ;;  %v928_v61 = vld [vmem:[%s1506_s13 + $0x10] sm:$0xff] (!%p1185_p0) }
 0x26a   : > { %v916_v55 = vld [vmem:[%s1501_s23 + $0x18] sm:$0xff] (!%p1185_p0)  ;;  %v930_v59 = vadd.f32 (!%p1185_p0), %v926_v56, %v880_v44  ;;  %v931_v60 = vadd.f32 (!%p1185_p0), %v927_v57, %v885_v43  ;;  %v932_v63 = vadd.f32 (!%p1185_p0), %v928_v61, %v890_v46 }
 0x26b   : > { %v920_v58 = vadd.f32 (!%p1185_p0), %v916_v55, %v859_v47  ;;  %922 = vst.msk [vmem:[%s1501_s23] sm:$0xff] (!%p1185_p0), %vm921_vm2, %v917_v52  ;;  %923 = vst.msk [vmem:[%s1501_s23 + $0x8] sm:$0xff] (!%p1185_p0), %vm921_vm2, %v918_v53 }
 0x26c   : > { %924 = vst.msk [vmem:[%s1501_s23 + $0x10] sm:$0xff] (!%p1185_p0), %vm921_vm2, %v919_v54  ;;  %934 = vst.msk [vmem:[%s1506_s13] sm:$0xff] (!%p1185_p0), %vm921_vm2, %v930_v59 }
 0x26d   : > { %v929_v62 = vld [vmem:[%s1506_s13 + $0x18] sm:$0xff] (!%p1185_p0)  ;;  %925 = vst.msk [vmem:[%s1501_s23 + $0x18] sm:$0xff] (!%p1185_p0), %vm921_vm2, %v920_v58  ;;  %935 = vst.msk [vmem:[%s1506_s13 + $0x8] sm:$0xff] (!%p1185_p0), %vm921_vm2, %v931_v60 }
 0x26e   : > { %v933_v0 = vadd.f32 (!%p1185_p0), %v929_v62, %v895_v48  ;;  %936 = vst.msk [vmem:[%s1506_s13 + $0x10] sm:$0xff] (!%p1185_p0), %vm921_vm2, %v932_v63 }
 0x270   : > { %937 = vst.msk [vmem:[%s1506_s13 + $0x18] sm:$0xff] %vm921_vm2, %v933_v0 }
 0x271 PF: > { %954 = sbr.rel (!%p1400_p6) target bundleno = 638 (0x27e), region = 75  ;;  %s1187_s24 = sshll.u32 (%p1400_p6), %s1293_s26, 2  ;;  %v972_v1 = vld [vmem:[%s1587_s18] sm:$0xff] (%p1400_p6)  ;;  %v974_v2 = vld [vmem:[%s1587_s18 + $0x8] sm:$0xff] (%p1400_p6)  ;;  %v976_v3 = vld [vmem:[%s1587_s18 + $0x10] sm:$0xff] (%p1400_p6) }
 0x272   : > { %s1188_s23 = sshll.u32 (%p1400_p6), %s1297_s27, 5  ;;  %v978_v4 = vld [vmem:[%s1587_s18 + $0x18] sm:$0xff] (%p1400_p6)  ;;  %v980_v5 = vld [vmem:[%s1587_s18 + $0x20] sm:$0xff] (%p1400_p6)  ;;  %v982_v6 = vld [vmem:[%s1587_s18 + $0x28] sm:$0xff] (%p1400_p6) }
 0x273   : > { %s957_s12 = sadd.s32 (%p1400_p6), %s1188_s23, %s1187_s24  ;;  %v984_v7 = vld [vmem:[%s1587_s18 + $0x30] sm:$0xff] (%p1400_p6)  ;;  %v986_v8 = vld [vmem:[%s1587_s18 + $0x38] sm:$0xff] (%p1400_p6)  ;;  %v988_v9 = vld [vmem:[%s1587_s18 + $0x40] sm:$0xff] (%p1400_p6) }
 0x274   : > { %s1189_s13 = sshll.u32 (%p1400_p6), %s957_s12, 3  ;;  %v990_v10 = vld [vmem:[%s1587_s18 + $0x48] sm:$0xff] (%p1400_p6)  ;;  %v992_v11 = vld [vmem:[%s1587_s18 + $0x50] sm:$0xff] (%p1400_p6)  ;;  %v994_v12 = vld [vmem:[%s1587_s18 + $0x58] sm:$0xff] (%p1400_p6) }
 0x275   : > { %s959_s15 = scalar_lea.vmem (%p1400_p6), %s1688_s5, %s1189_s13  ;;  %v996_v13 = vld [vmem:[%s1587_s18 + $0x60] sm:$0xff] (%p1400_p6)  ;;  %v998_v14 = vld [vmem:[%s1587_s18 + $0x68] sm:$0xff] (%p1400_p6)  ;;  %v1000_v15 = vld [vmem:[%s1587_s18 + $0x70] sm:$0xff] (%p1400_p6) }
 0x276   : > { %973 = vst [vmem:[%s959_s15] sm:$0xff] (%p1400_p6), %v972_v1  ;;  %975 = vst [vmem:[%s959_s15 + $0x8] sm:$0xff] (%p1400_p6), %v974_v2  ;;  %v1002_v16 = vld [vmem:[%s1587_s18 + $0x78] sm:$0xff] (%p1400_p6) }
 0x277   : > { %977 = vst [vmem:[%s959_s15 + $0x10] sm:$0xff] (%p1400_p6), %v976_v3  ;;  %979 = vst [vmem:[%s959_s15 + $0x18] sm:$0xff] (%p1400_p6), %v978_v4 }
 0x278   : > { %981 = vst [vmem:[%s959_s15 + $0x40] sm:$0xff] %v980_v5  ;;  %983 = vst [vmem:[%s959_s15 + $0x48] sm:$0xff] %v982_v6 }
 0x279   : > { %985 = vst [vmem:[%s959_s15 + $0x50] sm:$0xff] %v984_v7  ;;  %987 = vst [vmem:[%s959_s15 + $0x58] sm:$0xff] %v986_v8 }
 0x27a   : > { %989 = vst [vmem:[%s959_s15 + $0x80] sm:$0xff] %v988_v9  ;;  %991 = vst [vmem:[%s959_s15 + $0x88] sm:$0xff] %v990_v10 }
 0x27b   : > { %993 = vst [vmem:[%s959_s15 + $0x90] sm:$0xff] %v992_v11  ;;  %995 = vst [vmem:[%s959_s15 + $0x98] sm:$0xff] %v994_v12 }
 0x27c   : > { %997 = vst [vmem:[%s959_s15 + $0xc0] sm:$0xff] %v996_v13  ;;  %999 = vst [vmem:[%s959_s15 + $0xc8] sm:$0xff] %v998_v14 }
 0x27d   : > { %1001 = vst [vmem:[%s959_s15 + $0xd0] sm:$0xff] %v1000_v15  ;;  %1003 = vst [vmem:[%s959_s15 + $0xd8] sm:$0xff] %v1002_v16 }
 0x27e PF: > { %s18_s30 = sadd.s32 1, %s1309_s30   ;;  %s1694_s24 = smov %s1289_s25 }
 0x27f   : > { %p15_p1 = scmp.ge.s32.totalorder %s18_s30, 6   ;;  %s1695_s25 = smov %s1408_s16 }
 0x280   : > { %s1696_s26 = smov %s1301_s28  ;;  %s1697_s27 = smov %s1305_s29 }
 0x281   : > { %s1698_s28 = smov %s1701_s8  ;;  %s1699_s29 = smov %s1705_s9 }
 0x282   :  { %17 = sbr.rel (!%p15_p1) target bundleno = 6 (0x6), region = 159 }

// kernel: oanblock_forward.24
= control target key start
LH: loop header
LB: loop body
LE: loop exit
PB: predicated region body
PF: predicated region fallthrough
CT: control target
= control target key end

     0   :  { %s2107_s0 = inlined_call_operand.vmem [shape: f32[2,32,1024], index: 0, kind: input, shape index: {}]   ;;  %s2108_s1 = inlined_call_operand.vmem [shape: f32[2,32,1], index: 1, kind: input, shape index: {}]   ;;  %s2109_s2 = inlined_call_operand.vmem [shape: f32[2,32,1], index: 2, kind: input, shape index: {}]   ;;  %s2110_s3 = inlined_call_operand.vmem [shape: f32[32,32], index: 3, kind: input, shape index: {}]   ;;  %s2111_s4 = inlined_call_operand.vmem [shape: f32[32,1], index: 4, kind: input, shape index: {}]   ;;  %s2112_s5 = inlined_call_operand.vmem [shape: f32[2,64,1024], index: 5, kind: input, shape index: {}]   ;;  %s2113_s6 = inlined_call_operand.vmem [shape: f32[32,64], index: 6, kind: input, shape index: {}]   ;;  %s2114_s7 = inlined_call_operand.vmem [shape: f32[32,1], index: 7, kind: input, shape index: {}]   ;;  %s2115_s8 = inlined_call_operand.vmem [shape: f32[2,32,1024], index: 8, kind: output, shape index: {0}]   ;;  %s2116_s9 = inlined_call_operand.vmem [shape: f32[2,32,1], index: 9, kind: output, shape index: {1}]   ;;  %s2117_s10 = inlined_call_operand.vmem [shape: f32[2,32,1], index: 10, kind: output, shape index: {2}]  }
   0x1   :  { %2121 = sst [smem:[#allocation8_spill]] %s2107_s0 }
   0x2   :  { %2122 = sst [smem:[#allocation9_spill]] %s2112_s5 }
   0x3   :  { %s1688_s13 = smov 0   ;;  %s1690_s14 = smov 0  }
   0x4   :  { %s1692_s15 = smov 0   ;;  %s1694_s16 = smov 0  }
   0x5   :  { %s1696_s17 = smov 0   ;;  %s1698_s18 = smov 0  }
   0x6   :  { %s1700_s19 = smov 0  }
   0x7 LB: > { %2123 = sst [smem:[#allocation5_spill]] %s1626_s18  ;;  %s30_s20 = sadd.s32 1, %s1622_s17  ;;  %s1630_s19 = sphi %s1700_s19, %s21_s19   ;;  %s1626_s18 = sphi %s1698_s18, %s2132_s18   ;;  %s1622_s17 = sphi %s1696_s17, %s2136_s17   ;;  %s1618_s16 = sphi %s1694_s16, %s2130_s16   ;;  %s1614_s15 = sphi %s1692_s15, %s2135_s15   ;;  %s1610_s14 = sphi %s1690_s14, %s2134_s14   ;;  %s1606_s13 = sphi %s1688_s13, %s2133_s13  }
   0x8   : > { %p31_p0 = scmp.ge.s32.totalorder %s30_s20, 2  ;;  %s33_s21 = sadd.s32 1, %s1626_s18 }
   0x9   : > { %s1441_s22 = sadd.s32 4294967295, %s1630_s19   ;;  %p49_p1 = scmp.ne.s32.totalorder %s1610_s14, %s1606_s13 }
   0xa   : > { %s2138_s20 = smov (%p31_p0, %s30_s20), 0  ;;  %s2140_s21 = smov (!%p31_p0, %s33_s21), %s1626_s18 }
   0xb   : > { %2124 = sst [smem:[#allocation6_spill]] %s2138_s20  ;;  %p50_p2 = scmp.eq.s32.totalorder %s1630_s19, 0 }
   0xc   : > { %p35_p3 = scmp.ge.s32.totalorder %s2140_s21, 2  ;;  %p245_p4 = scmp.eq.s32.totalorder %s1441_s22, 3 }
   0xd   : > { %s38_s23 = ssub.s32 %s1622_s17, %s2138_s20  ;;  %p1734_p5 = por %p50_p2, %p49_p1 }
   0xe   : > { %s2142_s21 = smov (%p35_p3, %s2140_s21), 0  ;;  %p1740_p6 = por %p245_p4, %p49_p1 }
   0xf   : > { %2126 = sst [smem:[#allocation7_spill]] %s2142_s21  ;;  %s37_s26 = ssub.s32 %s1626_s18, %s2142_s21 }
  0x10   : > { %s39_s27 = sor.u32 %s38_s23, %s37_s26  ;;  %s42_s28 = sadd.s32 1, %s1610_s14 }
  0x11   : > { %p40_p7 = scmp.eq.s32.totalorder %s39_s27, 0  ;;  %p1444_p8 = scmp.ge.s32.totalorder %s1630_s19, 4 }
  0x13   : > { %s1748_s29 = scalar_select %p40_p7, %s1610_s14, %s42_s28  }
  0x14   : > { %331 = sbr.rel (%p1444_p8) target bundleno = 71 (0x47), region = 32 }
  0x1b   : > { %334 = sbr.rel (!%p1734_p5) target bundleno = 45 (0x2d), region = 36  ;;  %s336_s30 = sand.u32 (%p1734_p5), 1, %s1610_s14  }
  0x1c   : > { %s1446_s11 = sshll.u32 (%p1734_p5), %s1622_s17, 2  ;;  %s1445_s12 = sshll.u32 (%p1734_p5), %s336_s30, 7 }
  0x1d   : > { %s1447_s22 = sshll.u32 (%p1734_p5), %s1626_s18, 5  ;;  %s2128_s0 = sld [smem:[#allocation8_spill]] (%p1734_p5) }
  0x1e   : > { %s341_s20 = sadd.s32 (%p1734_p5), %s1447_s22, %s1446_s11  ;;  %s338_s28 = scalar_lea.vmem (%p1734_p5), [#allocation2], %s1445_s12 }
  0x1f   : > { %s1448_s21 = sshll.u32 (%p1734_p5), %s341_s20, 3 }
  0x23   : > { %s1759_s27 = scalar_lea.vmem %s2128_s0, %s1448_s21 }
  0x24   : > { %v356_v0 = vld [vmem:[%s1759_s27] sm:$0xff]  ;;  %v358_v1 = vld [vmem:[%s1759_s27 + $0x8] sm:$0xff]  ;;  %v360_v2 = vld [vmem:[%s1759_s27 + $0x10] sm:$0xff] }
  0x25   : > { %357 = vst [vmem:[%s338_s28] sm:$0xff] %v356_v0  ;;  %359 = vst [vmem:[%s338_s28 + $0x8] sm:$0xff] %v358_v1  ;;  %v362_v3 = vld [vmem:[%s1759_s27 + $0x18] sm:$0xff]  ;;  %v364_v4 = vld [vmem:[%s1759_s27 + $0x40] sm:$0xff] }
  0x26   : > { %361 = vst [vmem:[%s338_s28 + $0x10] sm:$0xff] %v360_v2  ;;  %v366_v5 = vld [vmem:[%s1759_s27 + $0x48] sm:$0xff]  ;;  %363 = vst [vmem:[%s338_s28 + $0x18] sm:$0xff] %v362_v3  ;;  %v368_v6 = vld [vmem:[%s1759_s27 + $0x50] sm:$0xff] }
  0x27   : > { %365 = vst [vmem:[%s338_s28 + $0x20] sm:$0xff] %v364_v4  ;;  %367 = vst [vmem:[%s338_s28 + $0x28] sm:$0xff] %v366_v5  ;;  %v370_v7 = vld [vmem:[%s1759_s27 + $0x58] sm:$0xff]  ;;  %v372_v8 = vld [vmem:[%s1759_s27 + $0x80] sm:$0xff] }
  0x28   : > { %369 = vst [vmem:[%s338_s28 + $0x30] sm:$0xff] %v368_v6  ;;  %371 = vst [vmem:[%s338_s28 + $0x38] sm:$0xff] %v370_v7  ;;  %v374_v9 = vld [vmem:[%s1759_s27 + $0x88] sm:$0xff]  ;;  %v376_v10 = vld [vmem:[%s1759_s27 + $0x90] sm:$0xff] }
  0x29   : > { %373 = vst [vmem:[%s338_s28 + $0x40] sm:$0xff] %v372_v8  ;;  %v378_v11 = vld [vmem:[%s1759_s27 + $0x98] sm:$0xff]  ;;  %375 = vst [vmem:[%s338_s28 + $0x48] sm:$0xff] %v374_v9  ;;  %v380_v12 = vld [vmem:[%s1759_s27 + $0xc0] sm:$0xff] }
  0x2a   : > { %377 = vst [vmem:[%s338_s28 + $0x50] sm:$0xff] %v376_v10  ;;  %379 = vst [vmem:[%s338_s28 + $0x58] sm:$0xff] %v378_v11  ;;  %v382_v13 = vld [vmem:[%s1759_s27 + $0xc8] sm:$0xff]  ;;  %v384_v14 = vld [vmem:[%s1759_s27 + $0xd0] sm:$0xff] }
  0x2b   : > { %381 = vst [vmem:[%s338_s28 + $0x60] sm:$0xff] %v380_v12  ;;  %383 = vst [vmem:[%s338_s28 + $0x68] sm:$0xff] %v382_v13  ;;  %v386_v15 = vld [vmem:[%s1759_s27 + $0xd8] sm:$0xff] }
  0x2c   : > { %385 = vst [vmem:[%s338_s28 + $0x70] sm:$0xff] %v384_v14  ;;  %387 = vst [vmem:[%s338_s28 + $0x78] sm:$0xff] %v386_v15 }
  0x2d PF: > { %409 = sbr.rel (!%p1734_p5) target bundleno = 71 (0x47), region = 67  ;;  %s411_s20 = sand.u32 (%p1734_p5), 1, %s1610_s14  }
  0x2e   : > { %s1450_s21 = sshll.u32 (%p1734_p5), %s1622_s17, 2  ;;  %s1449_s30 = sshll.u32 (%p1734_p5), %s411_s20, 8 }
  0x2f   : > { %s1451_s11 = sshll.u32 (%p1734_p5), %s1626_s18, 6  ;;  %s2129_s5 = sld [smem:[#allocation9_spill]] (%p1734_p5) }
  0x30   : > { %s416_s12 = sadd.s32 (%p1734_p5), %s1451_s11, %s1450_s21  ;;  %s1790_s24 = scalar_lea.vmem (%p1734_p5), [#allocation3], %s1449_s30 }
  0x31   : > { %s1452_s22 = sshll.u32 (%p1734_p5), %s416_s12, 3 }
  0x35   : > { %s1785_s0 = scalar_lea.vmem %s2129_s5, %s1452_s22 }
  0x36   : > { %v431_v16 = vld [vmem:[%s1785_s0] sm:$0xff]  ;;  %v433_v17 = vld [vmem:[%s1785_s0 + $0x8] sm:$0xff]  ;;  %v435_v18 = vld [vmem:[%s1785_s0 + $0x10] sm:$0xff] }
  0x37   : > { %432 = vst [vmem:[%s1790_s24] sm:$0xff] %v431_v16  ;;  %434 = vst [vmem:[%s1790_s24 + $0x8] sm:$0xff] %v433_v17  ;;  %v437_v19 = vld [vmem:[%s1785_s0 + $0x18] sm:$0xff]  ;;  %v439_v20 = vld [vmem:[%s1785_s0 + $0x40] sm:$0xff] }
  0x38   : > { %436 = vst [vmem:[%s1790_s24 + $0x10] sm:$0xff] %v435_v18  ;;  %v441_v21 = vld [vmem:[%s1785_s0 + $0x48] sm:$0xff]  ;;  %438 = vst [vmem:[%s1790_s24 + $0x18] sm:$0xff] %v437_v19  ;;  %v443_v22 = vld [vmem:[%s1785_s0 + $0x50] sm:$0xff] }
  0x39   : > { %440 = vst [vmem:[%s1790_s24 + $0x20] sm:$0xff] %v439_v20  ;;  %442 = vst [vmem:[%s1790_s24 + $0x28] sm:$0xff] %v441_v21  ;;  %v445_v23 = vld [vmem:[%s1785_s0 + $0x58] sm:$0xff]  ;;  %v447_v24 = vld [vmem:[%s1785_s0 + $0x80] sm:$0xff] }
  0x3a   : > { %444 = vst [vmem:[%s1790_s24 + $0x30] sm:$0xff] %v443_v22  ;;  %446 = vst [vmem:[%s1790_s24 + $0x38] sm:$0xff] %v445_v23  ;;  %v449_v25 = vld [vmem:[%s1785_s0 + $0x88] sm:$0xff]  ;;  %v451_v26 = vld [vmem:[%s1785_s0 + $0x90] sm:$0xff] }
  0x3b   : > { %448 = vst [vmem:[%s1790_s24 + $0x40] sm:$0xff] %v447_v24  ;;  %v453_v27 = vld [vmem:[%s1785_s0 + $0x98] sm:$0xff]  ;;  %450 = vst [vmem:[%s1790_s24 + $0x48] sm:$0xff] %v449_v25  ;;  %v455_v28 = vld [vmem:[%s1785_s0 + $0xc0] sm:$0xff] }
  0x3c   : > { %452 = vst [vmem:[%s1790_s24 + $0x50] sm:$0xff] %v451_v26  ;;  %454 = vst [vmem:[%s1790_s24 + $0x58] sm:$0xff] %v453_v27  ;;  %v457_v29 = vld [vmem:[%s1785_s0 + $0xc8] sm:$0xff]  ;;  %v459_v30 = vld [vmem:[%s1785_s0 + $0xd0] sm:$0xff] }
  0x3d   : > { %456 = vst [vmem:[%s1790_s24 + $0x60] sm:$0xff] %v455_v28  ;;  %458 = vst [vmem:[%s1790_s24 + $0x68] sm:$0xff] %v457_v29  ;;  %v461_v31 = vld [vmem:[%s1785_s0 + $0xd8] sm:$0xff]  ;;  %v463_v32 = vld [vmem:[%s1785_s0 + $0x100] sm:$0xff] }
  0x3e   : > { %460 = vst [vmem:[%s1790_s24 + $0x70] sm:$0xff] %v459_v30  ;;  %v465_v33 = vld [vmem:[%s1785_s0 + $0x108] sm:$0xff]  ;;  %462 = vst [vmem:[%s1790_s24 + $0x78] sm:$0xff] %v461_v31  ;;  %v467_v34 = vld [vmem:[%s1785_s0 + $0x110] sm:$0xff] }
  0x3f   : > { %464 = vst [vmem:[%s1790_s24 + $0x80] sm:$0xff] %v463_v32  ;;  %466 = vst [vmem:[%s1790_s24 + $0x88] sm:$0xff] %v465_v33  ;;  %v469_v35 = vld [vmem:[%s1785_s0 + $0x118] sm:$0xff]  ;;  %v471_v36 = vld [vmem:[%s1785_s0 + $0x140] sm:$0xff] }
  0x40   : > { %468 = vst [vmem:[%s1790_s24 + $0x90] sm:$0xff] %v467_v34  ;;  %470 = vst [vmem:[%s1790_s24 + $0x98] sm:$0xff] %v469_v35  ;;  %v473_v37 = vld [vmem:[%s1785_s0 + $0x148] sm:$0xff]  ;;  %v475_v38 = vld [vmem:[%s1785_s0 + $0x150] sm:$0xff] }
  0x41   : > { %472 = vst [vmem:[%s1790_s24 + $0xa0] sm:$0xff] %v471_v36  ;;  %v477_v39 = vld [vmem:[%s1785_s0 + $0x158] sm:$0xff]  ;;  %474 = vst [vmem:[%s1790_s24 + $0xa8] sm:$0xff] %v473_v37  ;;  %v479_v40 = vld [vmem:[%s1785_s0 + $0x180] sm:$0xff] }
  0x42   : > { %476 = vst [vmem:[%s1790_s24 + $0xb0] sm:$0xff] %v475_v38  ;;  %478 = vst [vmem:[%s1790_s24 + $0xb8] sm:$0xff] %v477_v39  ;;  %v481_v41 = vld [vmem:[%s1785_s0 + $0x188] sm:$0xff]  ;;  %v483_v42 = vld [vmem:[%s1785_s0 + $0x190] sm:$0xff] }
  0x43   : > { %480 = vst [vmem:[%s1790_s24 + $0xc0] sm:$0xff] %v479_v40  ;;  %482 = vst [vmem:[%s1790_s24 + $0xc8] sm:$0xff] %v481_v41  ;;  %v485_v43 = vld [vmem:[%s1785_s0 + $0x198] sm:$0xff]  ;;  %v487_v44 = vld [vmem:[%s1785_s0 + $0x1c0] sm:$0xff] }
  0x44   : > { %484 = vst [vmem:[%s1790_s24 + $0xd0] sm:$0xff] %v483_v42  ;;  %v489_v45 = vld [vmem:[%s1785_s0 + $0x1c8] sm:$0xff]  ;;  %486 = vst [vmem:[%s1790_s24 + $0xd8] sm:$0xff] %v485_v43  ;;  %v491_v46 = vld [vmem:[%s1785_s0 + $0x1d0] sm:$0xff] }
  0x45   : > { %488 = vst [vmem:[%s1790_s24 + $0xe0] sm:$0xff] %v487_v44  ;;  %490 = vst [vmem:[%s1790_s24 + $0xe8] sm:$0xff] %v489_v45  ;;  %v493_v47 = vld [vmem:[%s1785_s0 + $0x1d8] sm:$0xff] }
  0x46   : > { %492 = vst [vmem:[%s1790_s24 + $0xf0] sm:$0xff] %v491_v46  ;;  %494 = vst [vmem:[%s1790_s24 + $0xf8] sm:$0xff] %v493_v47 }
  0x47 PF: > { %p1453_p9 = scmp.ge.s32.totalorder %s1630_s19, 1  ;;  %p499_p10 = scmp.lt.s32.totalorder %s1630_s19, 5 }
  0x49   : > { %p500_p11 = pnand %p1453_p9, %p499_p10 }
  0x4a   : > { %p574_p12 = scmp.lt.s32.totalorder (!%p500_p11), %s1618_s16, 1  ;;  %v1632_v48 = vmov (!%p500_p11), 0   ;;  %v724_v57 = vld [vmem:[%s2111_s4 + $0x8] sm:$0xff] (!%p500_p11)  ;;  %v723_v58 = vld [vmem:[%s2111_s4] sm:$0xff] (!%p500_p11)  ;;  %v726_v59 = vld [vmem:[%s2111_s4 + $0x18] sm:$0xff] (!%p500_p11)  ;;  %s506_s20 = sand.u32 (!%p500_p11), 1, %s1606_s13  }
  0x4b   : > { %503 = sbr.rel (%p500_p11) target bundleno = 663 (0x297), region = 90  ;;  %1575 = vset.pattern.permute.xlu1 (!%p500_p11), %v1632_v48  ;;  %1574 = vset.pattern.permute.xlu0 (!%p500_p11), %v1632_v48  ;;  %v725_v60 = vld [vmem:[%s2111_s4 + $0x10] sm:$0xff] (!%p500_p11)  ;;  %v1044_v61 = vld [vmem:[%s2114_s7 + $0x8] sm:$0xff] (!%p500_p11)  ;;  %v1043_v62 = vld [vmem:[%s2114_s7] sm:$0xff] (!%p500_p11)  ;;  %vm747_vm0 = vcmask (!%p500_p11), 261120   ;;  %vm914_vm1 = vcmask (!%p500_p11), 523264  }
  0x4c   : > { %786 = vmatprep.mubr.bf16.mxu0 (!%p500_p11), %v1632_v48  ;;  %839 = vmatprep.mubr.bf16.mxu1 (!%p500_p11), %v1632_v48  ;;  %v1046_v63 = vld [vmem:[%s2114_s7 + $0x18] sm:$0xff] (!%p500_p11)  ;;  %v1045_v0 = vld [vmem:[%s2114_s7 + $0x10] sm:$0xff] (!%p500_p11)  ;;  %p1473_p13 = scmp.ne.s32.totalorder (!%p500_p11), %s1614_s15, 0 }
  0x52   : > { %s575_s27 = scalar_select %p574_p12, %s1618_s16, 1 }
  0x53   : > { %vm1159_vm2 = vcmask (!%p1473_p13), 7168  }
  0x54   : > { %s1481_s0 = sshll.u32 %s575_s27, 5 }
  0x55   : > { %s583_s21 = scalar_lea.vmem %s2109_s2, %s1481_s0  ;;  %s1867_s12 = scalar_lea.vmem %s2116_s9, %s1481_s0 }
  0x56   : > { %s1872_s26 = scalar_lea.vmem %s2117_s10, %s1481_s0  ;;  %v653_v49 = vld [vmem:[%s583_s21] sm:$0xff]  ;;  %s578_s18 = scalar_lea.vmem %s2108_s1, %s1481_s0  ;;  %v654_v51 = vld [vmem:[%s583_s21 + $0x8] sm:$0xff]  ;;  %v656_v55 = vld [vmem:[%s583_s21 + $0x18] sm:$0xff] }
  0x57   : > { %659 = vperm.xlu1 %1575, %v653_v49   ;;  %v613_v50 = vld [vmem:[%s578_s18] sm:$0xff]  ;;  %v614_v52 = vld [vmem:[%s578_s18 + $0x8] sm:$0xff]  ;;  %v616_v53 = vld [vmem:[%s578_s18 + $0x18] sm:$0xff] }
  0x58   : > { %619 = vperm.xlu0 %1574, %v613_v50   ;;  %v615_v54 = vld [vmem:[%s578_s18 + $0x10] sm:$0xff]  ;;  %s1904_s18 = sshll.u32 %s506_s20, 7 }
  0x59   : > { %v655_v56 = vld [vmem:[%s583_s21 + $0x10] sm:$0xff]  ;;  %s1907_s30 = scalar_lea.vmem [#allocation2], %s1904_s18  ;;  %s1927_s21 = sshll.u32 %s506_s20, 8 }
  0x5a   : > { %v597_v1 = vld [vmem:[%s1907_s30] sm:$0xff]  ;;  %v599_v2 = vld [vmem:[%s1907_s30 + $0x10] sm:$0xff]  ;;  %v598_v3 = vld [vmem:[%s1907_s30 + $0x8] sm:$0xff]  ;;  %s1930_s13 = scalar_lea.vmem [#allocation3], %s1927_s21  ;;  %s2003_s27 = scalar_lea.vmem [#allocation4], %s1904_s18 }
  0x5b   : > { %664 = vperm.xlu1 %1575, %v654_v51   ;;  %v600_v4 = vld [vmem:[%s1907_s30 + $0x18] sm:$0xff]  ;;  %v601_v11 = vld [vmem:[%s1907_s30 + $0x20] sm:$0xff]  ;;  %v603_v12 = vld [vmem:[%s1907_s30 + $0x30] sm:$0xff] }
  0x5c   : > { %624 = vperm.xlu0 %1574, %v614_v52   ;;  %v602_v13 = vld [vmem:[%s1907_s30 + $0x28] sm:$0xff]  ;;  %v604_v15 = vld [vmem:[%s1907_s30 + $0x38] sm:$0xff]  ;;  %v609_v23 = vld [vmem:[%s1907_s30 + $0x60] sm:$0xff] }
  0x5d   : > { %v610_v25 = vld [vmem:[%s1907_s30 + $0x68] sm:$0xff]  ;;  %v611_v26 = vld [vmem:[%s1907_s30 + $0x70] sm:$0xff]  ;;  %v612_v27 = vld [vmem:[%s1907_s30 + $0x78] sm:$0xff] }
  0x5e   : > { %v605_v30 = vld [vmem:[%s1907_s30 + $0x40] sm:$0xff]  ;;  %v606_v31 = vld [vmem:[%s1907_s30 + $0x48] sm:$0xff]  ;;  %v607_v36 = vld [vmem:[%s1907_s30 + $0x50] sm:$0xff] }
  0x5f   : > { %634 = vperm.xlu1 %1575, %v616_v53   ;;  %v608_v37 = vld [vmem:[%s1907_s30 + $0x58] sm:$0xff] }
  0x60   : > { %629 = vperm.xlu0 %1574, %v615_v54  }
  0x63   : > { %674 = vperm.xlu1 %1575, %v656_v55  }
  0x64   : > { %669 = vperm.xlu0 %1574, %v655_v56  }
  0x67   : > { %734 = vperm.xlu1 %1575, %v724_v57  }
  0x68   : > { %729 = vperm.xlu0 %1574, %v723_v58  }
  0x6b   : > { %744 = vperm.xlu1 %1575, %v726_v59  }
  0x6c   : > { %739 = vperm.xlu0 %1574, %v725_v60  }
  0x6f   : > { %1054 = vperm.xlu1 %1575, %v1044_v61  }
  0x70   : > { %1049 = vperm.xlu0 %1574, %v1043_v62  }
  0x73   : > { %1064 = vperm.xlu1 %1575, %v1046_v63  }
  0x74   : > { %1059 = vperm.xlu0 %1574, %v1045_v0  }
  0xd6   : > { %v660_v5 = vpop.permute.xlu1 %659 }
  0xd7   : > { %v620_v6 = vpop.permute.xlu0 %619 }
  0xd8   : > { %v637_v7 = vmul.f32 %v620_v6, %v597_v1  ;;  %v639_v8 = vmul.f32 %v620_v6, %v599_v2  ;;  %v638_v9 = vmul.f32 %v620_v6, %v598_v3  ;;  %v640_v10 = vmul.f32 %v620_v6, %v600_v4 }
  0xda   : > { %v665_v14 = vpop.permute.xlu1 %664  ;;  %v678_v17 = vadd.f32 %v660_v5, %v638_v9  ;;  %v680_v18 = vadd.f32 %v660_v5, %v640_v10  ;;  %v677_v19 = vadd.f32 %v660_v5, %v637_v7  ;;  %v679_v20 = vadd.f32 %v660_v5, %v639_v8  ;;  %v867_v9 = vld [vmem:[%s1930_s13 + $0x8] sm:$0xff] }
  0xdb   : > { %v625_v16 = vpop.permute.xlu0 %624  ;;  %v871_v10 = vld [vmem:[%s1930_s13 + $0x28] sm:$0xff] }
  0xdc   : > { %v641_v21 = vmul.f32 %v625_v16, %v601_v11  ;;  %v643_v22 = vmul.f32 %v625_v16, %v603_v12  ;;  %v642_v24 = vmul.f32 %v625_v16, %v602_v13  ;;  %v644_v28 = vmul.f32 %v625_v16, %v604_v15  ;;  %v709_v15 = vld [vmem:[%s2110_s3] sm:$0xff] }
  0xdd   : > { %v694_v38 = vmax.f32 %v678_v17, 0.0  ;;  %v696_v39 = vmax.f32 %v680_v18, 0.0  ;;  %v693_v40 = vmax.f32 %v677_v19, 0.0  ;;  %v695_v41 = vmax.f32 %v679_v20, 0.0  ;;  %v710_v19 = vld [vmem:[%s2110_s3 + $0x8] sm:$0xff]  ;;  %v869_v20 = vld [vmem:[%s1930_s13 + $0x18] sm:$0xff] }
  0xde   : > { %v635_v29 = vpop.permute.xlu1 %634  ;;  %v682_v32 = vadd.f32 %v665_v14, %v642_v24  ;;  %v681_v33 = vadd.f32 %v665_v14, %v641_v21  ;;  %v683_v34 = vadd.f32 %v665_v14, %v643_v22  ;;  %v684_v47 = vadd.f32 %v665_v14, %v644_v28  ;;  %v873_v21 = vld [vmem:[%s1930_s13 + $0x38] sm:$0xff]  ;;  %v866_v24 = vld [vmem:[%s1930_s13] sm:$0xff]  ;;  %v879_v28 = vld [vmem:[%s1930_s13 + $0x68] sm:$0xff] }
  0xdf   : > { %v630_v35 = vpop.permute.xlu0 %629  ;;  %v649_v42 = vmul.f32 %v635_v29, %v609_v23  ;;  %v650_v43 = vmul.f32 %v635_v29, %v610_v25  ;;  %v651_v44 = vmul.f32 %v635_v29, %v611_v26  ;;  %v652_v45 = vmul.f32 %v635_v29, %v612_v27  ;;  %v870_v25 = vld [vmem:[%s1930_s13 + $0x20] sm:$0xff]  ;;  %v875_v27 = vld [vmem:[%s1930_s13 + $0x48] sm:$0xff] }
  0xe0   : > { %v698_v46 = vmax.f32 %v682_v32, 0.0  ;;  %v697_v49 = vmax.f32 %v681_v33, 0.0  ;;  %v699_v50 = vmax.f32 %v683_v34, 0.0  ;;  %v645_v51 = vmul.f32 %v630_v35, %v605_v30  ;;  %v872_v32 = vld [vmem:[%s1930_s13 + $0x30] sm:$0xff]  ;;  %v877_v34 = vld [vmem:[%s1930_s13 + $0x58] sm:$0xff] }
  0xe1   : > { %v646_v52 = vmul.f32 %v630_v35, %v606_v31  ;;  %v647_v53 = vmul.f32 %v630_v35, %v607_v36  ;;  %v648_v54 = vmul.f32 %v630_v35, %v608_v37  ;;  %v700_v2 = vmax.f32 %v684_v47, 0.0  ;;  %v868_v31 = vld [vmem:[%s1930_s13 + $0x10] sm:$0xff]  ;;  %v881_v35 = vld [vmem:[%s1930_s13 + $0x78] sm:$0xff]  ;;  %v874_v37 = vld [vmem:[%s1930_s13 + $0x40] sm:$0xff] }
  0xe2   : > { %v675_v55 = vpop.permute.xlu1 %674  ;;  %v716_v1 = vpack.c.bf16 %v698_v46, %v694_v38  ;;  %v715_v3 = vpack.c.bf16 %v697_v49, %v693_v40  ;;  %v717_v4 = vpack.c.bf16 %v699_v50, %v695_v41  ;;  %v899_v23 = vpack.c.bf16 %v871_v10, %v867_v9  ;;  %v878_v38 = vld [vmem:[%s1930_s13 + $0x60] sm:$0xff]  ;;  %v883_v40 = vld [vmem:[%s1930_s13 + $0x88] sm:$0xff]  ;;  %v712_v47 = vld [vmem:[%s2110_s3 + $0x18] sm:$0xff] }
  0xe3   : > { %v689_v56 = vadd.f32 %v675_v55, %v649_v42  ;;  %v690_v57 = vadd.f32 %v675_v55, %v650_v43  ;;  %v691_v58 = vadd.f32 %v675_v55, %v651_v44  ;;  %v692_v59 = vadd.f32 %v675_v55, %v652_v45  ;;  %v670_v60 = vpop.permute.xlu0 %669  ;;  %v887_v41 = vld [vmem:[%s1930_s13 + $0xa8] sm:$0xff]  ;;  %v876_v43 = vld [vmem:[%s1930_s13 + $0x50] sm:$0xff]  ;;  %v885_v49 = vld [vmem:[%s1930_s13 + $0x98] sm:$0xff] }
  0xe4   : > { %v685_v61 = vadd.f32 %v670_v60, %v645_v51  ;;  %v686_v62 = vadd.f32 %v670_v60, %v646_v52  ;;  %v687_v63 = vadd.f32 %v670_v60, %v647_v53  ;;  %v688_v0 = vadd.f32 %v670_v60, %v648_v54  ;;  %754 = vmatprep.subr.bf16.mxu0 %v716_v1  ;;  %v880_v44 = vld [vmem:[%s1930_s13 + $0x70] sm:$0xff]  ;;  %v889_v50 = vld [vmem:[%s1930_s13 + $0xb8] sm:$0xff]  ;;  %v882_v52 = vld [vmem:[%s1930_s13 + $0x80] sm:$0xff] }
  0xe5   : > { %v706_v6 = vmax.f32 %v690_v57, 0.0  ;;  %v708_v8 = vmax.f32 %v692_v59, 0.0  ;;  %v718_v11 = vpack.c.bf16 %v700_v2, %v696_v39  ;;  %v705_v13 = vmax.f32 %v689_v56, 0.0  ;;  %755 = vmatpush1.bf16.msra.mxu0 %v715_v3  ;;  %v711_v45 = vld [vmem:[%s2110_s3 + $0x10] sm:$0xff]  ;;  %v886_v53 = vld [vmem:[%s1930_s13 + $0xa0] sm:$0xff]  ;;  %v891_v55 = vld [vmem:[%s1930_s13 + $0xc8] sm:$0xff] }
  0xe6   : > { %v702_v5 = vmax.f32 %v686_v62, 0.0  ;;  %v704_v7 = vmax.f32 %v688_v0, 0.0  ;;  %v701_v12 = vmax.f32 %v685_v61, 0.0  ;;  %v703_v14 = vmax.f32 %v687_v63, 0.0  ;;  %v895_v56 = vld [vmem:[%s1930_s13 + $0xe8] sm:$0xff]  ;;  %v884_v59 = vld [vmem:[%s1930_s13 + $0x90] sm:$0xff] }
  0xe7   : > { %v707_v18 = vmax.f32 %v691_v58, 0.0  ;;  %807 = vmatprep.subr.bf16.mxu1 %v718_v11  ;;  %v713_v29 = vpack.c.bf16 %v710_v19, %v709_v15  ;;  %v901_v30 = vpack.c.bf16 %v873_v21, %v869_v20  ;;  %v898_v33 = vpack.c.bf16 %v870_v25, %v866_v24  ;;  %v888_v60 = vld [vmem:[%s1930_s13 + $0xb0] sm:$0xff]  ;;  %v893_v62 = vld [vmem:[%s1930_s13 + $0xd8] sm:$0xff]  ;;  %v890_v1 = vld [vmem:[%s1930_s13 + $0xc0] sm:$0xff]  ;;  %v730_v15 = vpop.permute.xlu0 %729 }
  0xe8   : > { %v720_v16 = vpack.c.bf16 %v706_v6, %v702_v5  ;;  %v722_v17 = vpack.c.bf16 %v708_v8, %v704_v7  ;;  %v719_v22 = vpack.c.bf16 %v705_v13, %v701_v12  ;;  %808 = vmatpush1.bf16.msra.mxu1 %v717_v4  ;;  %v903_v36 = vpack.c.bf16 %v879_v28, %v875_v27  ;;  %v897_v63 = vld [vmem:[%s1930_s13 + $0xf8] sm:$0xff]  ;;  %v894_v2 = vld [vmem:[%s1930_s13 + $0xe0] sm:$0xff]  ;;  %v892_v5 = vld [vmem:[%s1930_s13 + $0xd0] sm:$0xff] }
  0xe9   : > { %v721_v26 = vpack.c.bf16 %v707_v18, %v703_v14  ;;  %v900_v39 = vpack.c.bf16 %v872_v32, %v868_v31  ;;  %v905_v42 = vpack.c.bf16 %v881_v35, %v877_v34  ;;  %v902_v46 = vpack.c.bf16 %v878_v38, %v874_v37  ;;  %v896_v6 = vld [vmem:[%s1930_s13 + $0xf0] sm:$0xff]  ;;  %v860_v8 = vld [vmem:[%s2113_s6] sm:$0xff]  ;;  %v861_v9 = vld [vmem:[%s2113_s6 + $0x8] sm:$0xff] }
  0xea   : > { %756 = vmatprep.subr.bf16.mxu0 %v720_v16  ;;  %809 = vmatprep.subr.bf16.mxu1 %v722_v17  ;;  %v907_v51 = vpack.c.bf16 %v887_v41, %v883_v40  ;;  %v904_v54 = vpack.c.bf16 %v880_v44, %v876_v43  ;;  %v714_v57 = vpack.c.bf16 %v712_v47, %v711_v45  ;;  %v862_v12 = vld [vmem:[%s2113_s6 + $0x10] sm:$0xff]  ;;  %v863_v13 = vld [vmem:[%s2113_s6 + $0x18] sm:$0xff]  ;;  %v735_v16 = vpop.permute.xlu1 %734 }
  0xeb   : > { %757 = vmatpush1.bf16.msra.mxu0 %v719_v22  ;;  %v909_v58 = vpack.c.bf16 %v889_v50, %v885_v49  ;;  %v906_v61 = vpack.c.bf16 %v886_v53, %v882_v52  ;;  %v911_v0 = vpack.c.bf16 %v895_v56, %v891_v55  ;;  %v908_v3 = vpack.c.bf16 %v888_v60, %v884_v59  ;;  %v1998_v17 = vpop.permute.xlu0 %739 }
  0xec   : > { %921 = vmatprep.subr.bf16.mxu0 %v899_v23  ;;  %810 = vmatpush1.bf16.msra.mxu1 %v721_v26  ;;  %v913_v4 = vpack.c.bf16 %v897_v63, %v893_v62  ;;  %v910_v7 = vpack.c.bf16 %v894_v2, %v890_v1  ;;  %v912_v10 = vpack.c.bf16 %v896_v6, %v892_v5 }
  0xed   : > { %974 = vmatprep.subr.bf16.mxu1 %v901_v30  ;;  %v864_v11 = vpack.c.bf16 %v861_v9, %v860_v8  ;;  %v865_v14 = vpack.c.bf16 %v863_v13, %v862_v12 }
  0xee   : > { %1465 = vmatmul.mubr.msk.bf16.vlgmr.msra.gmra.mrb[0].mxu0 %vm747_vm0, %v713_v29  ;;  %v2000_v18 = vpop.permute.xlu1 %744 }
  0xef   : > { %922 = vmatpush1.bf16.msra.mxu0 %v898_v33  ;;  %796 = vmatprep.mubr.bf16.mxu0 %v1632_v48  ;;  %v1050_v20 = vpop.permute.xlu0 %1049 }
  0xf0   : > { %1467 = vmatmul.mubr.msk.bf16.vlgmr.msra.gmra.mrb[0].mxu1 %vm747_vm0, %v713_v29  ;;  %923 = vmatprep.subr.bf16.mxu0 %v903_v36 }
  0xf1   : > { %975 = vmatpush1.bf16.msra.mxu1 %v900_v39  ;;  %849 = vmatprep.mubr.bf16.mxu1 %v1632_v48 }
  0xf2   : > { %976 = vmatprep.subr.bf16.mxu1 %v905_v42  ;;  %v1055_v30 = vpop.permute.xlu1 %1054 }
  0xf3   : > { %924 = vmatpush1.bf16.msra.mxu0 %v902_v46 }
  0xf4   : > { %925 = vmatprep.subr.bf16.mxu0 %v907_v51 }
  0xf5   : > { %977 = vmatpush1.bf16.msra.mxu1 %v904_v54  ;;  %v1060_v54 = vpop.permute.xlu0 %1059 }
  0xf6   : > { %1466 = vmatmul.mubr.msk.bf16.gmra.mrb[4].mxu0 %vm747_vm0, %v714_v57  ;;  %978 = vmatprep.subr.bf16.mxu1 %v909_v58  ;;  %v1065_v8 = vpop.permute.xlu1 %1064 }
  0xf7   : > { %926 = vmatpush1.bf16.msra.mxu0 %v906_v61  ;;  %953 = vmatprep.mubr.bf16.mxu0 %v1632_v48 }
  0xf8   : > { %1468 = vmatmul.mubr.msk.bf16.gmra.mrb[4].mxu1 %vm747_vm0, %v714_v57  ;;  %927 = vmatprep.subr.bf16.mxu0 %v911_v0 }
  0xf9   : > { %979 = vmatpush1.bf16.msra.mxu1 %v908_v3  ;;  %1006 = vmatprep.mubr.bf16.mxu1 %v1632_v48 }
  0xfa   : > { %980 = vmatprep.subr.bf16.mxu1 %v913_v4 }
  0xfb   : > { %928 = vmatpush1.bf16.msra.mxu0 %v910_v7 }
  0xfd   : > { %981 = vmatpush1.bf16.msra.mxu1 %v912_v10 }
  0xfe   : > { %1469 = vmatmul.mubr.msk.bf16.vlgmr.msra.gmra.mrb[0].mxu0 %vm914_vm1, %v864_v11 }
  0xff   : > { %963 = vmatprep.mubr.bf16.mxu0 %v1632_v48 }
 0x100   : > { %1471 = vmatmul.mubr.msk.bf16.vlgmr.msra.gmra.mrb[0].mxu1 %vm914_vm1, %v864_v11 }
 0x101   : > { %1016 = vmatprep.mubr.bf16.mxu1 %v1632_v48 }
 0x106   : > { %1470 = vmatmul.mubr.msk.bf16.gmra.mrb[4].mxu0 %vm914_vm1, %v865_v14 }
 0x108   : > { %1472 = vmatmul.mubr.msk.bf16.gmra.mrb[4].mxu1 %vm914_vm1, %v865_v14 }
 0x1d1   : > { %v955_v19 = vpop.f32.mrb[0].mxu0 }
 0x1d2   : > { %v1485_v21 = vadd.f32 %v955_v19, %v730_v15  ;;  %v957_v22 = vpop.f32.mrb[1].mxu0 }
 0x1d3   : > { %v1008_v23 = vpop.f32.mrb[0].mxu1  ;;  %v1486_v24 = vadd.f32 %v957_v22, %v730_v15  ;;  %v959_v25 = vpop.f32.mrb[2].mxu0 }
 0x1d4   : > { %v1067_v26 = vadd.f32 %v1485_v21, %v1050_v20  ;;  %v1493_v27 = vadd.f32 %v1008_v23, %v730_v15  ;;  %v1010_v48 = vpop.f32.mrb[1].mxu1  ;;  %v1487_v28 = vadd.f32 %v959_v25, %v735_v16  ;;  %v961_v29 = vpop.f32.mrb[3].mxu0 }
 0x1d5   : > { %v1068_v31 = vadd.f32 %v1486_v24, %v1050_v20  ;;  %v1494_v32 = vadd.f32 %v1010_v48, %v730_v15  ;;  %v1012_v33 = vpop.f32.mrb[2].mxu1  ;;  %v1488_v34 = vadd.f32 %v961_v29, %v735_v16 }
 0x1d6   : > { %1083 = vst [vmem:[%s2003_s27] sm:$0xff] %v1067_v26  ;;  %v1119_v35 = vmul.f32 %v1067_v26, %v1067_v26  ;;  %v1069_v36 = vadd.f32 %v1493_v27, %v1050_v20  ;;  %v1071_v37 = vadd.f32 %v1487_v28, %v1055_v30  ;;  %v1495_v38 = vadd.f32 %v1012_v33, %v735_v16  ;;  %v1014_v39 = vpop.f32.mrb[3].mxu1 }
 0x1d7   : > { %1084 = vst [vmem:[%s2003_s27 + $0x8] sm:$0xff] %v1068_v31  ;;  %v1120_v40 = vmul.f32 %v1068_v31, %v1068_v31  ;;  %v1070_v41 = vadd.f32 %v1494_v32, %v1050_v20  ;;  %v1072_v42 = vadd.f32 %v1488_v34, %v1055_v30  ;;  %v1496_v43 = vadd.f32 %v1014_v39, %v735_v16 }
 0x1d8   : > { %1085 = vst [vmem:[%s2003_s27 + $0x10] sm:$0xff] %v1069_v36  ;;  %1087 = vst [vmem:[%s2003_s27 + $0x20] sm:$0xff] %v1071_v37  ;;  %v1123_v44 = vmul.f32 %v1071_v37, %v1071_v37  ;;  %v1073_v45 = vadd.f32 %v1495_v38, %v1055_v30  ;;  %v1099_v46 = vadd.f32 %v1068_v31, %v1067_v26 }
 0x1d9   : > { %v1121_v47 = vmul.f32 %v1069_v36, %v1069_v36  ;;  %1086 = vst [vmem:[%s2003_s27 + $0x18] sm:$0xff] %v1070_v41  ;;  %1088 = vst [vmem:[%s2003_s27 + $0x28] sm:$0xff] %v1072_v42  ;;  %v1124_v49 = vmul.f32 %v1072_v42, %v1072_v42  ;;  %v1074_v50 = vadd.f32 %v1496_v43, %v1055_v30  ;;  %v965_v51 = vpop.f32.mrb[4].mxu0 }
 0x1da   : > { %v1104_v52 = vadd.f32 %v1072_v42, %v1071_v37  ;;  %v1122_v53 = vmul.f32 %v1070_v41, %v1070_v41  ;;  %1089 = vst [vmem:[%s2003_s27 + $0x30] sm:$0xff] %v1073_v45  ;;  %v1489_v55 = vadd.f32 %v965_v51, %v1998_v17  ;;  %v967_v56 = vpop.f32.mrb[5].mxu0  ;;  %v1100_v57 = vadd.f32 %v1099_v46, %v1069_v36 }
 0x1db   : > { %v1125_v58 = vmul.f32 %v1073_v45, %v1073_v45  ;;  %v1135_v59 = vadd.f32 %v1120_v40, %v1119_v35  ;;  %1090 = vst [vmem:[%s2003_s27 + $0x38] sm:$0xff] %v1074_v50  ;;  %v1018_v60 = vpop.f32.mrb[4].mxu1  ;;  %v1490_v61 = vadd.f32 %v967_v56, %v1998_v17  ;;  %v969_v62 = vpop.f32.mrb[6].mxu0  ;;  %v1126_v0 = vmul.f32 %v1074_v50, %v1074_v50 }
 0x1dc   : > { %v1105_v63 = vadd.f32 %v1104_v52, %v1073_v45  ;;  %v1140_v1 = vadd.f32 %v1124_v49, %v1123_v44  ;;  %v1075_v2 = vadd.f32 %v1489_v55, %v1060_v54  ;;  %v1497_v3 = vadd.f32 %v1018_v60, %v1998_v17  ;;  %v1020_v4 = vpop.f32.mrb[5].mxu1  ;;  %v971_v6 = vpop.f32.mrb[7].mxu0 }
 0x1dd   : > { %v1491_v5 = vadd.f32 %v969_v62, %v2000_v18  ;;  %v1101_v7 = vadd.f32 %v1100_v57, %v1070_v41  ;;  %v1076_v9 = vadd.f32 %v1490_v61, %v1060_v54  ;;  %v1498_v10 = vadd.f32 %v1020_v4, %v1998_v17  ;;  %v1022_v11 = vpop.f32.mrb[6].mxu1 }
 0x1de   : > { %v1492_v12 = vadd.f32 %v971_v6, %v2000_v18  ;;  %v1106_v13 = vadd.f32 %v1105_v63, %v1074_v50  ;;  %1091 = vst [vmem:[%s2003_s27 + $0x40] sm:$0xff] %v1075_v2  ;;  %v1127_v14 = vmul.f32 %v1075_v2, %v1075_v2  ;;  %v1077_v15 = vadd.f32 %v1497_v3, %v1060_v54  ;;  %v1024_v20 = vpop.f32.mrb[7].mxu1 }
 0x1df   : > { %v1079_v16 = vadd.f32 %v1491_v5, %v1065_v8  ;;  %v1499_v19 = vadd.f32 %v1022_v11, %v2000_v18  ;;  %1102 = vadd.xlane.f32.xlu0 %v1101_v7  ;;  %1092 = vst [vmem:[%s2003_s27 + $0x48] sm:$0xff] %v1076_v9  ;;  %v1128_v21 = vmul.f32 %v1076_v9, %v1076_v9 }
 0x1e0   : > { %v1078_v17 = vadd.f32 %v1498_v10, %v1060_v54  ;;  %v1080_v22 = vadd.f32 %v1492_v12, %v1065_v8  ;;  %v1500_v23 = vadd.f32 %v1024_v20, %v2000_v18  ;;  %1107 = vadd.xlane.f32.xlu1 %v1106_v13  ;;  %1093 = vst [vmem:[%s2003_s27 + $0x50] sm:$0xff] %v1077_v15 }
 0x1e1   : > { %1095 = vst [vmem:[%s2003_s27 + $0x60] sm:$0xff] %v1079_v16  ;;  %v1131_v24 = vmul.f32 %v1079_v16, %v1079_v16  ;;  %v1081_v25 = vadd.f32 %v1499_v19, %v1065_v8  ;;  %v1141_v26 = vadd.f32 %v1140_v1, %v1125_v58  ;;  %v1136_v27 = vadd.f32 %v1135_v59, %v1121_v47 }
 0x1e2   : > { %1094 = vst [vmem:[%s2003_s27 + $0x58] sm:$0xff] %v1078_v17  ;;  %1096 = vst [vmem:[%s2003_s27 + $0x68] sm:$0xff] %v1080_v22  ;;  %v1132_v48 = vmul.f32 %v1080_v22, %v1080_v22  ;;  %v1082_v28 = vadd.f32 %v1500_v23, %v1065_v8  ;;  %v1109_v29 = vadd.f32 %v1076_v9, %v1075_v2 }
 0x1e3   : > { %1097 = vst [vmem:[%s2003_s27 + $0x70] sm:$0xff] %v1081_v25  ;;  %v1142_v30 = vadd.f32 %v1141_v26, %v1126_v0  ;;  %v1137_v31 = vadd.f32 %v1136_v27, %v1122_v53  ;;  %v1129_v32 = vmul.f32 %v1077_v15, %v1077_v15  ;;  %v1145_v33 = vadd.f32 %v1128_v21, %v1127_v14 }
 0x1e4   : > { %1098 = vst [vmem:[%s2003_s27 + $0x78] sm:$0xff] %v1082_v28  ;;  %v1110_v18 = vadd.f32 %v1109_v29, %v1077_v15  ;;  %v1130_v34 = vmul.f32 %v1078_v17, %v1078_v17  ;;  %v1114_v35 = vadd.f32 %v1080_v22, %v1079_v16  ;;  %v1133_v37 = vmul.f32 %v1081_v25, %v1081_v25 }
 0x1e5   : > { %1143 = vadd.xlane.f32.xlu0 %v1142_v30  ;;  %1138 = vadd.xlane.f32.xlu1 %v1137_v31  ;;  %v1146_v36 = vadd.f32 %v1145_v33, %v1129_v32  ;;  %v1150_v38 = vadd.f32 %v1132_v48, %v1131_v24  ;;  %v1134_v42 = vmul.f32 %v1082_v28, %v1082_v28 }
 0x1e6   : > { %v1111_v39 = vadd.f32 %v1110_v18, %v1078_v17  ;;  %v1115_v40 = vadd.f32 %v1114_v35, %v1081_v25 }
 0x1e7   : > { %v1147_v41 = vadd.f32 %v1146_v36, %v1130_v34  ;;  %v1151_v43 = vadd.f32 %v1150_v38, %v1133_v37 }
 0x1e8   : > { %v1116_v44 = vadd.f32 %v1115_v40, %v1082_v28 }
 0x1e9   : > { %1112 = vadd.xlane.f32.xlu0 %v1111_v39  ;;  %1148 = vadd.xlane.f32.xlu1 %v1147_v41  ;;  %v1152_v45 = vadd.f32 %v1151_v43, %v1134_v42 }
 0x1ed   : > { %1117 = vadd.xlane.f32.xlu0 %v1116_v44 }
 0x1f1   : > { %1153 = vadd.xlane.f32.xlu0 %v1152_v45 }
 0x26c   : > { %v1103_v46 = vpop.xlane.xlu0 %1102 }
 0x26d   : > { %v1108_v47 = vpop.xlane.xlu1 %1107  ;;  %1160 = vst.msk [vmem:[%s1867_s12] sm:$0xff] (!%p1473_p13), %vm1159_vm2, %v1103_v46 }
 0x26e   : > { %1161 = vst.msk [vmem:[%s1867_s12 + $0x8] sm:$0xff] (!%p1473_p13), %vm1159_vm2, %v1108_v47 }
 0x272   : > { %v1144_v49 = vpop.xlane.xlu0 %1143  ;;  %v1139_v50 = vpop.xlane.xlu1 %1138 }
 0x273   : > { %1164 = vst.msk [vmem:[%s1872_s26] sm:$0xff] (!%p1473_p13), %vm1159_vm2, %v1139_v50  ;;  %1165 = vst.msk [vmem:[%s1872_s26 + $0x8] sm:$0xff] (!%p1473_p13), %vm1159_vm2, %v1144_v49 }
 0x276   : > { %v1113_v51 = vpop.xlane.xlu0 %1112  ;;  %v1149_v52 = vpop.xlane.xlu1 %1148 }
 0x277   : > { %1162 = vst.msk [vmem:[%s1867_s12 + $0x10] sm:$0xff] (!%p1473_p13), %vm1159_vm2, %v1113_v51  ;;  %1166 = vst.msk [vmem:[%s1872_s26 + $0x10] sm:$0xff] (!%p1473_p13), %vm1159_vm2, %v1149_v52 }
 0x278   : > { %1158 = sbr.rel (%p1473_p13) target bundleno = 640 (0x280), region = 102 }
 0x27a   : > { %v1118_v53 = vpop.xlane.xlu0 %1117 }
 0x27b   : > { %1163 = vst.msk [vmem:[%s1867_s12 + $0x18] sm:$0xff] (!%p1473_p13), %vm1159_vm2, %v1118_v53 }
 0x27e   : > { %v1154_v54 = vpop.xlane.xlu0 %1153 }
 0x27f   : > { %1167 = vst.msk [vmem:[%s1872_s26 + $0x18] sm:$0xff] %vm1159_vm2, %v1154_v54 }
 0x280 PF: > { %p1474_p0 = scmp.le.s32.totalorder %s1614_s15, 0 }
 0x281   : > { %v1172_v55 = vld [vmem:[%s1867_s12] sm:$0xff] (!%p1474_p0)  ;;  %vm1180_vm3 = vcmask (!%p1474_p0), 7168   ;;  %v1173_v56 = vld [vmem:[%s1867_s12 + $0x8] sm:$0xff] (!%p1474_p0)  ;;  %v1174_v57 = vld [vmem:[%s1867_s12 + $0x10] sm:$0xff] (!%p1474_p0) }
 0x282   : > { %1171 = sbr.rel (%p1474_p0) target bundleno = 650 (0x28a), region = 106  ;;  %v1176_v58 = vadd.f32 (!%p1474_p0), %v1172_v55, %v1103_v46  ;;  %v1177_v59 = vadd.f32 (!%p1474_p0), %v1173_v56, %v1108_v47  ;;  %v1178_v60 = vadd.f32 (!%p1474_p0), %v1174_v57, %v1113_v51  ;;  %v1185_v62 = vld [vmem:[%s1872_s26] sm:$0xff] (!%p1474_p0)  ;;  %v1186_v63 = vld [vmem:[%s1872_s26 + $0x8] sm:$0xff] (!%p1474_p0)  ;;  %v1187_v3 = vld [vmem:[%s1872_s26 + $0x10] sm:$0xff] (!%p1474_p0) }
 0x283   : > { %v1175_v61 = vld [vmem:[%s1867_s12 + $0x18] sm:$0xff] (!%p1474_p0)  ;;  %v1189_v1 = vadd.f32 (!%p1474_p0), %v1185_v62, %v1139_v50  ;;  %v1190_v2 = vadd.f32 (!%p1474_p0), %v1186_v63, %v1144_v49  ;;  %v1191_v5 = vadd.f32 (!%p1474_p0), %v1187_v3, %v1149_v52 }
 0x284   : > { %v1179_v0 = vadd.f32 (!%p1474_p0), %v1175_v61, %v1118_v53  ;;  %1181 = vst.msk [vmem:[%s1867_s12] sm:$0xff] (!%p1474_p0), %vm1180_vm3, %v1176_v58  ;;  %1182 = vst.msk [vmem:[%s1867_s12 + $0x8] sm:$0xff] (!%p1474_p0), %vm1180_vm3, %v1177_v59 }
 0x285   : > { %1183 = vst.msk [vmem:[%s1867_s12 + $0x10] sm:$0xff] (!%p1474_p0), %vm1180_vm3, %v1178_v60  ;;  %1193 = vst.msk [vmem:[%s1872_s26] sm:$0xff] (!%p1474_p0), %vm1180_vm3, %v1189_v1 }
 0x286   : > { %v1188_v4 = vld [vmem:[%s1872_s26 + $0x18] sm:$0xff] (!%p1474_p0)  ;;  %1184 = vst.msk [vmem:[%s1867_s12 + $0x18] sm:$0xff] (!%p1474_p0), %vm1180_vm3, %v1179_v0  ;;  %1194 = vst.msk [vmem:[%s1872_s26 + $0x8] sm:$0xff] (!%p1474_p0), %vm1180_vm3, %v1190_v2 }
 0x287   : > { %v1192_v6 = vadd.f32 (!%p1474_p0), %v1188_v4, %v1154_v54  ;;  %1195 = vst.msk [vmem:[%s1872_s26 + $0x10] sm:$0xff] (!%p1474_p0), %vm1180_vm3, %v1191_v5 }
 0x289   : > { %1196 = vst.msk [vmem:[%s1872_s26 + $0x18] sm:$0xff] %vm1180_vm3, %v1192_v6 }
 0x28a PF: > { %1213 = sbr.rel (!%p1740_p6) target bundleno = 663 (0x297), region = 110  ;;  %s1476_s12 = sshll.u32 (%p1740_p6), %s1614_s15, 2  ;;  %v1231_v7 = vld [vmem:[%s2003_s27] sm:$0xff] (%p1740_p6)  ;;  %v1233_v8 = vld [vmem:[%s2003_s27 + $0x8] sm:$0xff] (%p1740_p6)  ;;  %v1235_v9 = vld [vmem:[%s2003_s27 + $0x10] sm:$0xff] (%p1740_p6) }
 0x28b   : > { %s1477_s26 = sshll.u32 (%p1740_p6), %s1618_s16, 5  ;;  %v1237_v10 = vld [vmem:[%s2003_s27 + $0x18] sm:$0xff] (%p1740_p6)  ;;  %v1239_v11 = vld [vmem:[%s2003_s27 + $0x20] sm:$0xff] (%p1740_p6)  ;;  %v1241_v12 = vld [vmem:[%s2003_s27 + $0x28] sm:$0xff] (%p1740_p6) }
 0x28c   : > { %s1216_s25 = sadd.s32 (%p1740_p6), %s1477_s26, %s1476_s12  ;;  %v1243_v13 = vld [vmem:[%s2003_s27 + $0x30] sm:$0xff] (%p1740_p6)  ;;  %v1245_v14 = vld [vmem:[%s2003_s27 + $0x38] sm:$0xff] (%p1740_p6)  ;;  %v1247_v15 = vld [vmem:[%s2003_s27 + $0x40] sm:$0xff] (%p1740_p6) }
 0x28d   : > { %s1478_s18 = sshll.u32 (%p1740_p6), %s1216_s25, 3  ;;  %v1249_v16 = vld [vmem:[%s2003_s27 + $0x48] sm:$0xff] (%p1740_p6)  ;;  %v1251_v19 = vld [vmem:[%s2003_s27 + $0x50] sm:$0xff] (%p1740_p6)  ;;  %v1253_v20 = vld [vmem:[%s2003_s27 + $0x58] sm:$0xff] (%p1740_p6) }
 0x28e   : > { %s1218_s0 = scalar_lea.vmem (%p1740_p6), %s2115_s8, %s1478_s18  ;;  %v1255_v21 = vld [vmem:[%s2003_s27 + $0x60] sm:$0xff] (%p1740_p6)  ;;  %v1257_v17 = vld [vmem:[%s2003_s27 + $0x68] sm:$0xff] (%p1740_p6)  ;;  %v1259_v22 = vld [vmem:[%s2003_s27 + $0x70] sm:$0xff] (%p1740_p6) }
 0x28f   : > { %1232 = vst [vmem:[%s1218_s0] sm:$0xff] (%p1740_p6), %v1231_v7  ;;  %1234 = vst [vmem:[%s1218_s0 + $0x8] sm:$0xff] (%p1740_p6), %v1233_v8  ;;  %v1261_v23 = vld [vmem:[%s2003_s27 + $0x78] sm:$0xff] (%p1740_p6) }
 0x290   : > { %1236 = vst [vmem:[%s1218_s0 + $0x10] sm:$0xff] (%p1740_p6), %v1235_v9  ;;  %1238 = vst [vmem:[%s1218_s0 + $0x18] sm:$0xff] (%p1740_p6), %v1237_v10 }
 0x291   : > { %1240 = vst [vmem:[%s1218_s0 + $0x40] sm:$0xff] %v1239_v11  ;;  %1242 = vst [vmem:[%s1218_s0 + $0x48] sm:$0xff] %v1241_v12 }
 0x292   : > { %1244 = vst [vmem:[%s1218_s0 + $0x50] sm:$0xff] %v1243_v13  ;;  %1246 = vst [vmem:[%s1218_s0 + $0x58] sm:$0xff] %v1245_v14 }
 0x293   : > { %1248 = vst [vmem:[%s1218_s0 + $0x80] sm:$0xff] %v1247_v15  ;;  %1250 = vst [vmem:[%s1218_s0 + $0x88] sm:$0xff] %v1249_v16 }
 0x294   : > { %1252 = vst [vmem:[%s1218_s0 + $0x90] sm:$0xff] %v1251_v19  ;;  %1254 = vst [vmem:[%s1218_s0 + $0x98] sm:$0xff] %v1253_v20 }
 0x295   : > { %1256 = vst [vmem:[%s1218_s0 + $0xc0] sm:$0xff] %v1255_v21  ;;  %1258 = vst [vmem:[%s1218_s0 + $0xc8] sm:$0xff] %v1257_v17 }
 0x296   : > { %1260 = vst [vmem:[%s1218_s0 + $0xd0] sm:$0xff] %v1259_v22  ;;  %1262 = vst [vmem:[%s1218_s0 + $0xd8] sm:$0xff] %v1261_v23 }
 0x297 PF: > { %s21_s19 = sadd.s32 1, %s1630_s19   ;;  %s2130_s16 = sld [smem:[#allocation5_spill]] }
 0x298   : > { %p18_p1 = scmp.ge.s32.totalorder %s21_s19, 6   ;;  %s2131_s20 = sld [smem:[#allocation6_spill]] }
 0x299   : > { %s2132_s18 = sld [smem:[#allocation7_spill]]  ;;  %s2133_s13 = smov %s1610_s14 }
 0x29a   : > { %s2134_s14 = smov %s1748_s29  ;;  %s2135_s15 = smov %s1622_s17 }
 0x29b   :  { %20 = sbr.rel (!%p18_p1) target bundleno = 7 (0x7), region = 202 }
 0x29e   : > { %s2136_s17 = smov %s2131_s20 }

// kernel: oanblock_forward.27
= control target key start
LH: loop header
LB: loop body
LE: loop exit
PB: predicated region body
PF: predicated region fallthrough
CT: control target
= control target key end

     0   :  { %s1237_s0 = inlined_call_operand.vmem [shape: f32[2,32,1024], index: 0, kind: input, shape index: {}]   ;;  %s1238_s1 = inlined_call_operand.vmem [shape: f32[1,32], index: 1, kind: input, shape index: {}]   ;;  %s1239_s2 = inlined_call_operand.<no memory space> [shape: f32[1,1], index: 2, kind: input, shape index: {}]   ;;  %s1240_s3 = inlined_call_operand.vmem [shape: f32[2,1,1024], index: 3, kind: output, shape index: {0}]   ;;  %s1241_s4 = inlined_call_operand.hbm [shape: f32[2,1,1], index: 4, kind: output, shape index: {1}]   ;;  %s1242_s5 = inlined_call_operand.hbm [shape: f32[2,1,1], index: 5, kind: output, shape index: {2}]  }
   0x1   :  { %1244 = sst [smem:[#allocation10_spill]] %s1237_s0  ;;  %v11_v0 = vstv %s1239_s2 }
   0x2   :  { %1245 = sst [smem:[#allocation11_spill]] %s1238_s1  ;;  %12 = vst [vmem:[#allocation2] sm:$0x1] %v11_v0 }
   0x3   :  { %1246 = sst [smem:[#allocation12_spill]] %s1240_s3 }
   0x4   :  { %13 = vsyncpa [#allocation5], 0 }
   0x5   :  { %15 = vsyncpa [#allocation5 + $0x1], 0 }
   0x6   :  { %16 = vsyncpa [#allocation7], 0 }
   0x7   :  { %18 = vsyncpa [#allocation7 + $0x1], 0  ;;  %s993_s20 = smov 0   ;;  %s995_s21 = smov 0  }
   0x8   :  { %s997_s22 = smov 0   ;;  %s999_s23 = smov 0  }
   0x9   :  { %s1001_s24 = smov 0   ;;  %s1003_s25 = smov 0  }
   0xa   :  { %s1005_s26 = smov 0   ;;  %s1007_s2 = smov 0  }
   0xb   :  { %s1009_s27 = smov 0   ;;  %s1011_s28 = smov 0  }
   0xc LB: > { %s697_s29 = sadd.s32 4294967295, %s954_s28   ;;  %s698_s30 = sadd.s32 4294967294, %s954_s28   ;;  %s954_s28 = sphi %s1011_s28, %s24_s28   ;;  %s950_s27 = sphi %s1009_s27, %s1263_s27   ;;  %s946_s2 = sphi %s1007_s2, %s1262_s2   ;;  %s942_s26 = sphi %s1005_s26, %s1261_s26   ;;  %s938_s25 = sphi %s1003_s25, %s1260_s25   ;;  %s934_s24 = sphi %s1001_s24, %s1259_s24   ;;  %s930_s23 = sphi %s999_s23, %s1258_s23   ;;  %s926_s22 = sphi %s997_s22, %s1257_s22   ;;  %s922_s21 = sphi %s995_s21, %s1256_s21   ;;  %s918_s20 = sphi %s993_s20, %s1255_s20  }
   0xd   : > { %s33_s6 = sadd.s32 1, %s946_s2  ;;  %s36_s7 = sadd.s32 1, %s950_s27 }
   0xe   : > { %p34_p0 = scmp.ge.s32.totalorder %s33_s6, 2  ;;  %s45_s8 = sadd.s32 1, %s934_s24 }
   0xf   : > { %p52_p1 = scmp.ne.s32.totalorder %s934_s24, %s930_s23  ;;  %p53_p2 = scmp.eq.s32.totalorder %s954_s28, 0 }
  0x10   : > { %s1265_s6 = smov (%p34_p0, %s33_s6), 0  ;;  %s1267_s7 = smov (!%p34_p0, %s36_s7), %s950_s27 }
  0x11   : > { %s41_s9 = ssub.s32 %s946_s2, %s1265_s6  ;;  %p1056_p3 = por %p53_p2, %p52_p1 }
  0x12   : > { %p38_p4 = scmp.ge.s32.totalorder %s1267_s7, 2  ;;  %s141_s11 = sadd.s32 1, %s926_s22 }
  0x13   : > { %p151_p5 = scmp.ne.s32.totalorder %s926_s22, %s922_s21  ;;  %p152_p6 = scmp.eq.s32.totalorder %s697_s29, 3 }
  0x14   : > { %s1269_s7 = smov (%p38_p4, %s1267_s7), 0  ;;  %p157_p8 = scmp.ne.s32.totalorder %s922_s21, %s918_s20 }
  0x15   : > { %p1065_p7 = por %p152_p6, %p151_p5  ;;  %s40_s13 = ssub.s32 %s950_s27, %s1269_s7 }
  0x16   : > { %p158_p9 = scmp.eq.s32.totalorder %s698_s30, 3  ;;  %s42_s14 = sor.u32 %s41_s9, %s40_s13 }
  0x17   : > { %p139_p10 = scmp.eq.s32.totalorder %s40_s13, 0  ;;  %p43_p11 = scmp.eq.s32.totalorder %s42_s14, 0 }
  0x18   : > { %p1073_p12 = por %p158_p9, %p157_p8  ;;  %p700_p13 = scmp.ge.s32.totalorder %s954_s28, 4 }
  0x19   : > { %s1078_s16 = scalar_select %p139_p10, %s926_s22, %s141_s11  }
  0x1a   : > { %s1081_s17 = scalar_select %p43_p11, %s934_s24, %s45_s8  }
  0x1b   : > { %206 = sbr.rel (%p700_p13) target bundleno = 52 (0x34), region = 24 }
  0x22   : > { %209 = sbr.rel (!%p1056_p3) target bundleno = 52 (0x34), region = 28  ;;  %s211_s18 = sand.u32 (%p1056_p3), 1, %s934_s24  }
  0x23   : > { %s702_s19 = sshll.u32 (%p1056_p3), %s946_s2, 2  ;;  %s701_s29 = sshll.u32 (%p1056_p3), %s211_s18, 7 }
  0x24   : > { %s703_s30 = sshll.u32 (%p1056_p3), %s950_s27, 5  ;;  %s1250_s0 = sld [smem:[#allocation10_spill]] (%p1056_p3) }
  0x25   : > { %s216_s9 = sadd.s32 (%p1056_p3), %s703_s30, %s702_s19  ;;  %s213_s10 = scalar_lea.vmem (%p1056_p3), [#allocation3], %s701_s29 }
  0x26   : > { %s704_s13 = sshll.u32 (%p1056_p3), %s216_s9, 3 }
  0x2a   : > { %s1092_s8 = scalar_lea.vmem %s1250_s0, %s704_s13 }
  0x2b   : > { %v231_v1 = vld [vmem:[%s1092_s8] sm:$0xff]  ;;  %v233_v2 = vld [vmem:[%s1092_s8 + $0x8] sm:$0xff]  ;;  %v235_v3 = vld [vmem:[%s1092_s8 + $0x10] sm:$0xff] }
  0x2c   : > { %232 = vst [vmem:[%s213_s10] sm:$0xff] %v231_v1  ;;  %234 = vst [vmem:[%s213_s10 + $0x8] sm:$0xff] %v233_v2  ;;  %v237_v4 = vld [vmem:[%s1092_s8 + $0x18] sm:$0xff]  ;;  %v239_v5 = vld [vmem:[%s1092_s8 + $0x40] sm:$0xff] }
  0x2d   : > { %236 = vst [vmem:[%s213_s10 + $0x10] sm:$0xff] %v235_v3  ;;  %v241_v6 = vld [vmem:[%s1092_s8 + $0x48] sm:$0xff]  ;;  %238 = vst [vmem:[%s213_s10 + $0x18] sm:$0xff] %v237_v4  ;;  %v243_v7 = vld [vmem:[%s1092_s8 + $0x50] sm:$0xff] }
  0x2e   : > { %240 = vst [vmem:[%s213_s10 + $0x20] sm:$0xff] %v239_v5  ;;  %242 = vst [vmem:[%s213_s10 + $0x28] sm:$0xff] %v241_v6  ;;  %v245_v8 = vld [vmem:[%s1092_s8 + $0x58] sm:$0xff]  ;;  %v247_v9 = vld [vmem:[%s1092_s8 + $0x80] sm:$0xff] }
  0x2f   : > { %244 = vst [vmem:[%s213_s10 + $0x30] sm:$0xff] %v243_v7  ;;  %246 = vst [vmem:[%s213_s10 + $0x38] sm:$0xff] %v245_v8  ;;  %v249_v10 = vld [vmem:[%s1092_s8 + $0x88] sm:$0xff]  ;;  %v251_v11 = vld [vmem:[%s1092_s8 + $0x90] sm:$0xff] }
  0x30   : > { %248 = vst [vmem:[%s213_s10 + $0x40] sm:$0xff] %v247_v9  ;;  %v253_v12 = vld [vmem:[%s1092_s8 + $0x98] sm:$0xff]  ;;  %250 = vst [vmem:[%s213_s10 + $0x48] sm:$0xff] %v249_v10  ;;  %v255_v13 = vld [vmem:[%s1092_s8 + $0xc0] sm:$0xff] }
  0x31   : > { %252 = vst [vmem:[%s213_s10 + $0x50] sm:$0xff] %v251_v11  ;;  %254 = vst [vmem:[%s213_s10 + $0x58] sm:$0xff] %v253_v12  ;;  %v257_v14 = vld [vmem:[%s1092_s8 + $0xc8] sm:$0xff]  ;;  %v259_v15 = vld [vmem:[%s1092_s8 + $0xd0] sm:$0xff] }
  0x32   : > { %256 = vst [vmem:[%s213_s10 + $0x60] sm:$0xff] %v255_v13  ;;  %258 = vst [vmem:[%s213_s10 + $0x68] sm:$0xff] %v257_v14  ;;  %v261_v16 = vld [vmem:[%s1092_s8 + $0xd8] sm:$0xff] }
  0x33   : > { %260 = vst [vmem:[%s213_s10 + $0x70] sm:$0xff] %v259_v15  ;;  %262 = vst [vmem:[%s213_s10 + $0x78] sm:$0xff] %v261_v16 }
  0x34 PF: > { %p705_p0 = scmp.ge.s32.totalorder %s954_s28, 1  ;;  %p267_p1 = scmp.lt.s32.totalorder %s954_s28, 5 }
  0x36   : > { %p268_p2 = pnand %p705_p0, %p267_p1 }
  0x37   : > { %s274_s18 = sand.u32 (!%p268_p2), 1, %s930_s23   ;;  %s1114_s19 = sand.u32 (!%p268_p2), 1, %s922_s21   ;;  %v956_v17 = vmov (!%p268_p2), 0   ;;  %v349_v18 = vld [vmem:[#allocation2] sm:$0x1] (!%p268_p2)  ;;  %vm359_vm0 = vcmask (!%p268_p2), 261120   ;;  %v355_v45 = vlaneseq (!%p268_p2) }
  0x38   : > { %271 = sbr.rel (%p268_p2) target bundleno = 495 (0x1ef), region = 51  ;;  %s706_s29 = sshll.u32 (!%p268_p2), %s274_s18, 7  ;;  %395 = vmatprep.mubr.bf16.mxu0 (!%p268_p2), %v956_v17  ;;  %436 = vmatprep.mubr.bf16.mxu1 (!%p268_p2), %v956_v17  ;;  %v957_v48 = vmov (!%p268_p2), 1966171168   ;;  %vm479_vm1 = vcmask (!%p268_p2), 1040384  }
  0x39   : > { %811 = vset.pattern.permute.xlu0 (!%p268_p2), %v956_v17  ;;  %s276_s30 = scalar_lea.vmem (!%p268_p2), [#allocation3], %s706_s29  ;;  %s1251_s1 = sld [smem:[#allocation11_spill]] (!%p268_p2)  ;;  %v356_v46 = vshrl.u32 (!%p268_p2), %v355_v45, 7  ;;  %v452_v49 = vunpack.c.l.s4 (!%p268_p2), %v957_v48  ;;  %vm476_vm2 = vcmp.lt.s32.totalorder (!%p268_p2), %v355_v45, 512 }
  0x3a   : > { %v324_v19 = vld [vmem:[%s276_s30 + $0x8] sm:$0xff] (!%p268_p2)  ;;  %v326_v21 = vld [vmem:[%s276_s30 + $0x18] sm:$0xff] (!%p268_p2)  ;;  %352 = vperm.xlu0 (!%p268_p2), %811, %v349_v18   ;;  %v323_v24 = vld [vmem:[%s276_s30] sm:$0xff] (!%p268_p2)  ;;  %s707_s13 = sshll.u32 (!%p268_p2), %s938_s25, 2  ;;  %p314_p3 = scmp.lt.s32.totalorder (!%p268_p2), %s942_s26, 1 }
  0x3b   : > { %v328_v20 = vld [vmem:[%s276_s30 + $0x28] sm:$0xff] (!%p268_p2)  ;;  %v330_v23 = vld [vmem:[%s276_s30 + $0x38] sm:$0xff] (!%p268_p2)  ;;  %v327_v25 = vld [vmem:[%s276_s30 + $0x20] sm:$0xff] (!%p268_p2)  ;;  %v357_v47 = vsub.s32 (!%p268_p2), 0, %v356_v46  ;;  %v453_v52 = vunpack.c.0.s8 (!%p268_p2), %v452_v49  ;;  %p1121_p4 = scmp.lt.s32.totalorder (!%p268_p2), %s707_s13, 7  ;;  %s1253_s3 = sld [smem:[#allocation12_spill]] (!%p268_p2) }
  0x3c   : > { %v342_v22 = vpack.c.bf16 (!%p268_p2), %v328_v20, %v324_v19  ;;  %v344_v26 = vpack.c.bf16 (!%p268_p2), %v330_v23, %v326_v21  ;;  %v341_v27 = vpack.c.bf16 (!%p268_p2), %v327_v25, %v323_v24  ;;  %v325_v28 = vld [vmem:[%s276_s30 + $0x10] sm:$0xff] (!%p268_p2)  ;;  %v332_v30 = vld [vmem:[%s276_s30 + $0x48] sm:$0xff] (!%p268_p2)  ;;  %v334_v34 = vld [vmem:[%s276_s30 + $0x58] sm:$0xff] (!%p268_p2)  ;;  %s305_s23 = scalar_lea.vmem (!%p268_p2), [#allocation4], %s1114_s19  ;;  %s1144_s9 = scalar_lea.vmem (!%p268_p2), [#allocation6], %s1114_s19 }
  0x3d   : > { %v329_v29 = vld [vmem:[%s276_s30 + $0x30] sm:$0xff] (!%p268_p2)  ;;  %v336_v33 = vld [vmem:[%s276_s30 + $0x68] sm:$0xff] (!%p268_p2)  ;;  %v338_v35 = vld [vmem:[%s276_s30 + $0x78] sm:$0xff] (!%p268_p2)  ;;  %v456_v57 = vsub.s32 (!%p268_p2), %v453_v52, %v356_v46  ;;  %p711_p5 = scmp.ne.s32.totalorder (!%p268_p2), %s938_s25, 0 }
  0x3e   : > { %363 = vmatprep.subr.bf16.mxu0 (!%p268_p2), %v342_v22  ;;  %v343_v32 = vpack.c.bf16 (!%p268_p2), %v329_v29, %v325_v28  ;;  %404 = vmatprep.subr.bf16.mxu1 (!%p268_p2), %v344_v26  ;;  %v346_v36 = vpack.c.bf16 (!%p268_p2), %v336_v33, %v332_v30  ;;  %v348_v37 = vpack.c.bf16 (!%p268_p2), %v338_v35, %v334_v34  ;;  %v331_v38 = vld [vmem:[%s276_s30 + $0x40] sm:$0xff] (!%p268_p2)  ;;  %v333_v40 = vld [vmem:[%s276_s30 + $0x50] sm:$0xff] (!%p268_p2) }
  0x3f   : > { %v339_v31 = vld [vmem:[%s1251_s1] sm:$0x1]  ;;  %364 = vmatpush1.bf16.msra.mxu0 %v341_v27  ;;  %v335_v39 = vld [vmem:[%s276_s30 + $0x60] sm:$0xff]  ;;  %v337_v42 = vld [vmem:[%s276_s30 + $0x70] sm:$0xff]  ;;  %s1126_s11 = scalar_select %p314_p3, %s942_s26, 1 }
  0x40   : > { %405 = vmatpush1.bf16.msra.mxu1 %v343_v32  ;;  %v345_v41 = vpack.c.bf16 %v335_v39, %v331_v38  ;;  %365 = vmatprep.subr.bf16.mxu0 %v346_v36  ;;  %v347_v43 = vpack.c.bf16 %v337_v42, %v333_v40  ;;  %v340_v44 = vpack.c.bf16 %v339_v31, %v339_v31  ;;  %s1271_s13 = smov (!%p1121_p4, %s707_s13), 7  ;;  %vm506_vm3 = vcmask (!%p711_p5), 0  }
  0x41   : > { %406 = vmatprep.subr.bf16.mxu1 %v348_v37  ;;  %s708_s8 = sshll.u32 %s1126_s11, 3 }
  0x42   : > { %s319_s10 = sadd.s32 %s708_s8, %s1271_s13 }
  0x43   : > { %366 = vmatpush1.bf16.msra.mxu0 %v345_v41  ;;  %s320_s30 = scalar_lea.vmem %s1253_s3, %s319_s10 }
  0x44   : > { %407 = vmatpush1.bf16.msra.mxu1 %v347_v43 }
  0x46   : > { %709 = vmatmul.mubr.msk.bf16.vlgmr.msra.gmra.mrb[0].mxu0 %vm359_vm0, %v340_v44 }
  0x47   : > { %710 = vmatmul.mubr.msk.bf16.vlgmr.msra.gmra.mrb[0].mxu1 %vm359_vm0, %v340_v44 }
  0xb9   : > { %v353_v50 = vpop.permute.xlu0 %352 }
  0xba   : > { %v358_v51 = vrot.slane %v353_v50, %v357_v47 }
 0x119   : > { %v397_v53 = vpop.f32.mrb[0].mxu0 }
 0x11a   : > { %v398_v54 = vadd.f32 %v397_v53, %v358_v51  ;;  %v438_v55 = vpop.f32.mrb[0].mxu1  ;;  %v399_v56 = vpop.f32.mrb[1].mxu0 }
 0x11b   : > { %v439_v58 = vadd.f32 %v438_v55, %v358_v51  ;;  %v400_v59 = vadd.f32 %v399_v56, %v358_v51  ;;  %v440_v60 = vpop.f32.mrb[1].mxu1  ;;  %v401_v61 = vpop.f32.mrb[2].mxu0 }
 0x11c   : > { %v480_v62 = vsel %vm479_vm1, %v398_v54, 0.0  ;;  %v489_v63 = vmul.f32 %v398_v54, %v398_v54  ;;  %v441_v0 = vadd.f32 %v440_v60, %v358_v51  ;;  %v442_v1 = vpop.f32.mrb[2].mxu1  ;;  %v402_v2 = vpop.f32.mrb[3].mxu0 }
 0x11d   : > { %v449_v3 = vcombine.low %v398_v54, %v400_v59  ;;  %v481_v4 = vsel %vm479_vm1, %v400_v59, 0.0  ;;  %v490_v5 = vmul.f32 %v400_v59, %v400_v59  ;;  %v443_v6 = vpop.f32.mrb[3].mxu1  ;;  %v483_v9 = vsel %vm479_vm1, %v439_v58, 0.0 }
 0x11e   : > { %v450_v7 = vcombine.low %v439_v58, %v441_v0  ;;  %v482_v8 = vadd.f32 %v481_v4, %v480_v62  ;;  %v491_v10 = vmul.f32 %v439_v58, %v439_v58  ;;  %v492_v12 = vmul.f32 %v441_v0, %v441_v0 }
 0x11f   : > { %v457_v11 = vrot.slane %v449_v3, %v456_v57  ;;  %v493_v13 = vsel %vm479_vm1, %v489_v63, 0.0  ;;  %v494_v14 = vsel %vm479_vm1, %v490_v5, 0.0  ;;  %v485_v18 = vsel %vm479_vm1, %v441_v0, 0.0 }
 0x120   : > { %v464_v15 = vrot.slane %v450_v7, %v456_v57  ;;  %v484_v16 = vadd.f32 %v483_v9, %v482_v8  ;;  %v495_v17 = vadd.f32 %v494_v14, %v493_v13  ;;  %v496_v19 = vsel %vm479_vm1, %v491_v10, 0.0 }
 0x121   : > { %v498_v23 = vsel %vm479_vm1, %v492_v12, 0.0 }
 0x122   : > { %v465_v20 = vcombine.low %v457_v11, %v464_v15  ;;  %v486_v21 = vadd.f32 %v485_v18, %v484_v16  ;;  %v497_v22 = vadd.f32 %v496_v19, %v495_v17 }
 0x124   : > { %v472_v24 = vrot.slane %v465_v20, %v456_v57  ;;  %487 = vadd.xlane.f32.xlu0 %v486_v21  ;;  %v499_v25 = vadd.f32 %v498_v23, %v497_v22 }
 0x126   : > { %478 = vst.msk [vmem:[%s320_s30] sm:$0xf] %vm476_vm2, %v472_v24  ;;  %500 = vadd.xlane.f32.xlu1 %v499_v25 }
 0x1ad   : > { %505 = sbr.rel (%p711_p5) target bundleno = 437 (0x1b5), region = 59 }
 0x1b1   : > { %v488_v26 = vpop.xlane.xlu0 %487 }
 0x1b2   : > { %507 = vst.msk [vmem:[%s305_s23] sm:$0x1] (!%p711_p5), %vm506_vm3, %v488_v26 }
 0x1b3   : > { %v501_v27 = vpop.xlane.xlu1 %500 }
 0x1b4   : > { %508 = vst.msk [vmem:[%s1144_s9] sm:$0x1] %vm506_vm3, %v501_v27 }
 0x1b5 PF: > { %p712_p6 = scmp.le.s32.totalorder %s938_s25, 0 }
 0x1b6   : > { %vm515_vm4 = vcmask (!%p712_p6), 0  }
 0x1b7   : > { %512 = sbr.rel (%p712_p6) target bundleno = 447 (0x1bf), region = 63 }
 0x1ba   : > { %v513_v28 = vld [vmem:[%s305_s23] sm:$0x1] (!%p712_p6) }
 0x1bb   : > { %v517_v29 = vld [vmem:[%s1144_s9] sm:$0x1] (!%p712_p6)  ;;  %v514_v30 = vadd.f32 (!%p712_p6), %v513_v28, %v488_v26 }
 0x1bc   : > { %v518_v31 = vadd.f32 (!%p712_p6), %v517_v29, %v501_v27 }
 0x1bd   : > { %516 = vst.msk [vmem:[%s305_s23] sm:$0x1] (!%p712_p6), %vm515_vm4, %v514_v30 }
 0x1be   : > { %519 = vst.msk [vmem:[%s1144_s9] sm:$0x1] %vm515_vm4, %v518_v31 }
 0x1bf PF: > { %s1243_s13 = sshll.u32 %s942_s26, 4  ;;  %s549_s8 = sshll.u32 %s305_s23, 4  ;;  %s550_s8 = int_to_ptr.vmem [resolvable:$true] %s549_s8 }
 0x1c0   : > { %s1157_s25 = scalar_lea.hbm %s1241_s4, %s1243_s13  ;;  %s529_s10 = scalar_lea.sflag [#allocation5], %s1114_s19 }
 0x1c1   : > { %s812_s18 = scalar_lea.vmem %s550_s8, 16  ;;  %s958_s29 = smov [#allocation4]  }
 0x1c2   : > { %p813_p8 = scmp.ne.s32.totalorder %s550_s8, %s812_s18  ;;  %s816_s30 = sshll.u32 %s958_s29, 4  ;;  %s817_s30 = int_to_ptr.vmem [resolvable:$false] %s816_s30 }
 0x1c3   : > { %s818_s0 = scalar_lea.vmem %s817_s30, 32  ;;  %p819_p11 = scmp.lt.s32.totalorder %s550_s8, %s817_s30 }
 0x1c4   : > { %p814_p9 = pnand %p813_p8, %p1065_p7  ;;  %p820_p13 = scmp.lt.s32.totalorder %s818_s0, %s812_s18 }
 0x1c6   : > { %p815_p10 = pneg %p814_p9  ;;  %p821_p0 = por %p820_p13, %p819_p11 }
 0x1c8   : > { %p822_p1 = pnand %p821_p0, %p815_p10 }
 0x1ca   : > { %825 = shalt.err (!%p822_p1)
}
 0x1cb   : > { %s826_s23 = scalar_lea.hbm %s1157_s25, 16  ;;  %s830_s29 = scalar_lea.hbm %s1241_s4, 32 }
 0x1cc   : > { %p827_p2 = scmp.ne.s32.totalorder %s1157_s25, %s826_s23  ;;  %p831_p5 = scmp.lt.u32.totalorder %s1157_s25, %s1241_s4 }
 0x1cd   : > { %p832_p6 = scmp.lt.u32.totalorder %s830_s29, %s826_s23  ;;  %p834_p9 = scmp.lt.u32.totalorder %s826_s23, %s1157_s25 }
 0x1ce   : > { %p828_p3 = pnand %p827_p2, %p1065_p7 }
 0x1cf   : > { %p833_p8 = por %p832_p6, %p831_p5 }
 0x1d0   : > { %p829_p4 = pneg %p828_p3 }
 0x1d1   : > { %p835_p10 = por %p834_p9, %p833_p8 }
 0x1d3   : > { %p836_p11 = pnand %p835_p10, %p829_p4 }
 0x1d5   : > { %839 = shalt.err (!%p836_p11)
}
 0x1d6   : > { %717 = dma.vmem_to_hbm [thread:$0]  (%p1065_p7), %s550_s8, 16, %s1157_s25, %s529_s10  }
 0x1d7   : > { %s1254_s0 = sshll.u32 %s942_s26, 4  ;;  %s562_s11 = sshll.u32 %s1144_s9, 4  ;;  %s563_s11 = int_to_ptr.vmem [resolvable:$true] %s562_s11 }
 0x1d8   : > { %s1182_s13 = scalar_lea.hbm %s1242_s5, %s1254_s0  ;;  %s533_s23 = scalar_lea.sflag [#allocation7], %s1114_s19 }
 0x1d9   : > { %s840_s29 = scalar_lea.vmem %s563_s11, 16  ;;  %s959_s30 = smov [#allocation6]  }
 0x1da   : > { %p841_p13 = scmp.ne.s32.totalorder %s563_s11, %s840_s29  ;;  %s844_s1 = sshll.u32 %s959_s30, 4  ;;  %s845_s1 = int_to_ptr.vmem [resolvable:$false] %s844_s1 }
 0x1db   : > { %s846_s3 = scalar_lea.vmem %s845_s1, 32  ;;  %p847_p2 = scmp.lt.s32.totalorder %s563_s11, %s845_s1 }
 0x1dc   : > { %p842_p0 = pnand %p841_p13, %p1065_p7  ;;  %p848_p3 = scmp.lt.s32.totalorder %s846_s3, %s840_s29 }
 0x1de   : > { %p843_p1 = pneg %p842_p0  ;;  %p849_p4 = por %p848_p3, %p847_p2 }
 0x1e0   : > { %p850_p5 = pnand %p849_p4, %p843_p1 }
 0x1e2   : > { %853 = shalt.err (!%p850_p5)
}
 0x1e3   : > { %s854_s26 = scalar_lea.hbm %s1182_s13, 16  ;;  %s858_s25 = scalar_lea.hbm %s1242_s5, 32 }
 0x1e4   : > { %p855_p6 = scmp.ne.s32.totalorder %s1182_s13, %s854_s26  ;;  %p859_p10 = scmp.lt.u32.totalorder %s1182_s13, %s1242_s5 }
 0x1e5   : > { %p860_p11 = scmp.lt.u32.totalorder %s858_s25, %s854_s26  ;;  %p862_p0 = scmp.lt.u32.totalorder %s854_s26, %s1182_s13 }
 0x1e6   : > { %p856_p8 = pnand %p855_p6, %p1065_p7 }
 0x1e7   : > { %p861_p13 = por %p860_p11, %p859_p10 }
 0x1e8   : > { %p857_p9 = pneg %p856_p8 }
 0x1e9   : > { %p863_p1 = por %p862_p0, %p861_p13 }
 0x1eb   : > { %p864_p2 = pnand %p863_p1, %p857_p9 }
 0x1ed   : > { %867 = shalt.err (!%p864_p2)
}
 0x1ee   : > { %718 = dma.vmem_to_hbm [thread:$0]  (%p1065_p7), %s563_s11, 16, %s1182_s13, %s533_s23  }
 0x1ef PF: > { %p728_p3 = scmp.ge.s32.totalorder %s954_s28, 2  ;;  %s585_s3 = sand.u32 1, %s918_s20  }
 0x1f0   : > { %s586_s10 = scalar_lea.sflag [#allocation5], %s585_s3 }
 0x1f1   : > { %p722_p4 = pnand %p728_p3, %p1073_p12 }
 0x1f3   : > { %909 = dma.done.wait (!%p722_p4), %s586_s10, 16  }
 0x1f4   : > { %911 = vsyncadd (!%p722_p4), %s586_s10, 4294967280  ;;  %s594_s0 = scalar_lea.sflag [#allocation7], %s585_s3 }
 0x1f5   : > { %913 = dma.done.wait (!%p722_p4), %s594_s0, 16  }
 0x1f6   : > { %915 = vsyncadd (!%p722_p4), %s594_s0, 4294967280  ;;  %s24_s28 = sadd.s32 1, %s954_s28   ;;  %s1255_s20 = smov %s922_s21 }
 0x1f7   : > { %p21_p5 = scmp.ge.s32.totalorder %s24_s28, 6   ;;  %s1256_s21 = smov %s926_s22 }
 0x1f8   : > { %s1257_s22 = smov %s1078_s16  ;;  %s1258_s23 = smov %s934_s24 }
 0x1f9   : > { %s1259_s24 = smov %s1081_s17  ;;  %s1260_s25 = smov %s946_s2 }
 0x1fa   : > { %s1261_s26 = smov %s950_s27  ;;  %s1262_s2 = smov %s1265_s6 }
 0x1fb   : > { %s1263_s27 = smov %s1269_s7  ;;  %23 = sbr.rel (!%p21_p5) target bundleno = 12 (0xc), region = 132 }
 0x202   :  { %598 = vsyncpa [#allocation5], 1 }
 0x203   :  { %600 = vsyncpa [#allocation5 + $0x1], 1 }
 0x204   :  { %601 = vsyncpa [#allocation7], 1 }
 0x205   :  { %603 = vsyncpa [#allocation7 + $0x1], 1 }

// kernel: oanblock_forward.26
= control target key start
LH: loop header
LB: loop body
LE: loop exit
PB: predicated region body
PF: predicated region fallthrough
CT: control target
= control target key end

     0   :  { %s1960_s0 = inlined_call_operand.vmem [shape: f32[2,32,1024], index: 0, kind: input, shape index: {}]   ;;  %s1961_s1 = inlined_call_operand.vmem [shape: f32[2,32,1], index: 1, kind: input, shape index: {}]   ;;  %s1962_s2 = inlined_call_operand.vmem [shape: f32[2,32,1], index: 2, kind: input, shape index: {}]   ;;  %s1963_s3 = inlined_call_operand.vmem [shape: f32[32,32], index: 3, kind: input, shape index: {}]   ;;  %s1964_s4 = inlined_call_operand.vmem [shape: f32[32,1], index: 4, kind: input, shape index: {}]   ;;  %s1965_s5 = inlined_call_operand.vmem [shape: f32[2,32,1024], index: 5, kind: input, shape index: {}]   ;;  %s1966_s6 = inlined_call_operand.vmem [shape: f32[2,32,1024], index: 6, kind: output, shape index: {0}]   ;;  %s1967_s7 = inlined_call_operand.hbm [shape: f32[2,32,1], index: 7, kind: output, shape index: {1}]   ;;  %s1968_s8 = inlined_call_operand.hbm [shape: f32[2,32,1], index: 8, kind: output, shape index: {2}]  }
   0x1   :  { %1973 = sst [smem:[#allocation16_spill]] %s1960_s0 }
   0x2   :  { %1974 = sst [smem:[#allocation17_spill]] %s1961_s1 }
   0x3   :  { %1975 = sst [smem:[#allocation18_spill]] %s1968_s8 }
   0x4   :  { %14 = vsyncpa [#allocation6], 0 }
   0x5   :  { %16 = vsyncpa [#allocation6 + $0x1], 0 }
   0x6   :  { %17 = vsyncpa [#allocation8], 0 }
   0x7   :  { %19 = vsyncpa [#allocation8 + $0x1], 0  ;;  %s1535_s27 = smov 0   ;;  %s1537_s28 = smov 0  }
   0x8   :  { %s1539_s29 = smov 0   ;;  %s1541_s30 = smov 0  }
   0x9   :  { %s1543_s9 = smov 0   ;;  %s1545_s10 = smov 0  }
   0xa   :  { %s1547_s11 = smov 0   ;;  %s1549_s12 = smov 0  }
   0xb   :  { %s1551_s13 = smov 0   ;;  %s1553_s14 = smov 0  }
   0xc LB: > { %1976 = sst [smem:[#allocation11_spill]] %s1455_s29  ;;  %s1200_s15 = sadd.s32 4294967295, %s1483_s14   ;;  %s1483_s14 = sphi %s1553_s14, %s25_s14   ;;  %s1479_s13 = sphi %s1551_s13, %s2001_s13   ;;  %s1475_s12 = sphi %s1549_s12, %s2000_s12   ;;  %s1471_s11 = sphi %s1547_s11, %s1999_s11   ;;  %s1467_s10 = sphi %s1545_s10, %s1998_s10   ;;  %s1463_s9 = sphi %s1543_s9, %s1997_s9   ;;  %s1459_s30 = sphi %s1541_s30, %s1996_s30   ;;  %s1455_s29 = sphi %s1539_s29, %s1990_s29   ;;  %s1451_s28 = sphi %s1537_s28, %s1995_s28   ;;  %s1447_s27 = sphi %s1535_s27, %s1994_s27  }
   0xd   : > { %s1201_s16 = sadd.s32 4294967294, %s1483_s14   ;;  %s34_s17 = sadd.s32 1, %s1475_s12 }
   0xe   : > { %s37_s18 = sadd.s32 1, %s1479_s13  ;;  %p35_p0 = scmp.ge.s32.totalorder %s34_s17, 2 }
   0xf   : > { %s46_s19 = sadd.s32 1, %s1463_s9  ;;  %p53_p1 = scmp.ne.s32.totalorder %s1463_s9, %s1459_s30 }
  0x10   : > { %p54_p2 = scmp.eq.s32.totalorder %s1483_s14, 0  ;;  %s2003_s17 = smov (%p35_p0, %s34_s17), 0 }
  0x11   : > { %1977 = sst [smem:[#allocation12_spill]] %s2003_s17  ;;  %s2005_s18 = smov (!%p35_p0, %s37_s18), %s1479_s13 }
  0x12   : > { %s42_s20 = ssub.s32 %s1475_s12, %s2003_s17  ;;  %p1598_p3 = por %p54_p2, %p53_p1 }
  0x13   : > { %p39_p4 = scmp.ge.s32.totalorder %s2005_s18, 2  ;;  %p207_p5 = scmp.eq.s32.totalorder %s1200_s15, 3 }
  0x14   : > { %s222_s22 = sadd.s32 1, %s1455_s29  ;;  %p232_p6 = scmp.ne.s32.totalorder %s1455_s29, %s1451_s28 }
  0x15   : > { %s2007_s18 = smov (%p39_p4, %s2005_s18), 0  ;;  %p1607_p7 = por %p207_p5, %p53_p1 }
  0x16   : > { %1979 = sst [smem:[#allocation13_spill]] %s2007_s18  ;;  %p1611_p8 = por %p232_p6, %p207_p5 }
  0x17   : > { %s41_s25 = ssub.s32 %s1479_s13, %s2007_s18  ;;  %p238_p9 = scmp.ne.s32.totalorder %s1451_s28, %s1447_s27 }
  0x18   : > { %s43_s26 = sor.u32 %s42_s20, %s41_s25  ;;  %p220_p10 = scmp.eq.s32.totalorder %s41_s25, 0 }
  0x19   : > { %p44_p11 = scmp.eq.s32.totalorder %s43_s26, 0  ;;  %p239_p12 = scmp.eq.s32.totalorder %s1201_s16, 3 }
  0x1a   : > { %s1620_s15 = scalar_select %p220_p10, %s1455_s29, %s222_s22  }
  0x1b   : > { %s1623_s17 = scalar_select %p44_p11, %s1463_s9, %s46_s19  }
  0x1c   : > { %1982 = sst [smem:[#allocation14_spill]] %s1620_s15  ;;  %p1625_p13 = por %p239_p12, %p238_p9 }
  0x1d   : > { %1983 = sst [smem:[#allocation15_spill]] %s1623_s17  ;;  %p1203_p0 = scmp.ge.s32.totalorder %s1483_s14, 4 }
  0x1f   : > { %287 = sbr.rel (%p1203_p0) target bundleno = 71 (0x47), region = 24 }
  0x26   : > { %290 = sbr.rel (!%p1598_p3) target bundleno = 56 (0x38), region = 28  ;;  %s292_s20 = sand.u32 (%p1598_p3), 1, %s1463_s9  }
  0x27   : > { %s1205_s25 = sshll.u32 (%p1598_p3), %s1475_s12, 2  ;;  %s1204_s16 = sshll.u32 (%p1598_p3), %s292_s20, 7 }
  0x28   : > { %s1206_s22 = sshll.u32 (%p1598_p3), %s1479_s13, 5  ;;  %s1985_s0 = sld [smem:[#allocation16_spill]] (%p1598_p3) }
  0x29   : > { %s297_s26 = sadd.s32 (%p1598_p3), %s1206_s22, %s1205_s25  ;;  %s294_s20 = scalar_lea.vmem (%p1598_p3), [#allocation2], %s1204_s16 }
  0x2a   : > { %s1207_s19 = sshll.u32 (%p1598_p3), %s297_s26, 3 }
  0x2e   : > { %s1638_s15 = scalar_lea.vmem %s1985_s0, %s1207_s19 }
  0x2f   : > { %v312_v0 = vld [vmem:[%s1638_s15] sm:$0xff]  ;;  %v314_v1 = vld [vmem:[%s1638_s15 + $0x8] sm:$0xff]  ;;  %v316_v2 = vld [vmem:[%s1638_s15 + $0x10] sm:$0xff] }
  0x30   : > { %313 = vst [vmem:[%s294_s20] sm:$0xff] %v312_v0  ;;  %315 = vst [vmem:[%s294_s20 + $0x8] sm:$0xff] %v314_v1  ;;  %v318_v3 = vld [vmem:[%s1638_s15 + $0x18] sm:$0xff]  ;;  %v320_v4 = vld [vmem:[%s1638_s15 + $0x40] sm:$0xff] }
  0x31   : > { %317 = vst [vmem:[%s294_s20 + $0x10] sm:$0xff] %v316_v2  ;;  %v322_v5 = vld [vmem:[%s1638_s15 + $0x48] sm:$0xff]  ;;  %319 = vst [vmem:[%s294_s20 + $0x18] sm:$0xff] %v318_v3  ;;  %v324_v6 = vld [vmem:[%s1638_s15 + $0x50] sm:$0xff] }
  0x32   : > { %321 = vst [vmem:[%s294_s20 + $0x20] sm:$0xff] %v320_v4  ;;  %323 = vst [vmem:[%s294_s20 + $0x28] sm:$0xff] %v322_v5  ;;  %v326_v7 = vld [vmem:[%s1638_s15 + $0x58] sm:$0xff]  ;;  %v328_v8 = vld [vmem:[%s1638_s15 + $0x80] sm:$0xff] }
  0x33   : > { %325 = vst [vmem:[%s294_s20 + $0x30] sm:$0xff] %v324_v6  ;;  %327 = vst [vmem:[%s294_s20 + $0x38] sm:$0xff] %v326_v7  ;;  %v330_v9 = vld [vmem:[%s1638_s15 + $0x88] sm:$0xff]  ;;  %v332_v10 = vld [vmem:[%s1638_s15 + $0x90] sm:$0xff] }
  0x34   : > { %329 = vst [vmem:[%s294_s20 + $0x40] sm:$0xff] %v328_v8  ;;  %v334_v11 = vld [vmem:[%s1638_s15 + $0x98] sm:$0xff]  ;;  %331 = vst [vmem:[%s294_s20 + $0x48] sm:$0xff] %v330_v9  ;;  %v336_v12 = vld [vmem:[%s1638_s15 + $0xc0] sm:$0xff] }
  0x35   : > { %333 = vst [vmem:[%s294_s20 + $0x50] sm:$0xff] %v332_v10  ;;  %335 = vst [vmem:[%s294_s20 + $0x58] sm:$0xff] %v334_v11  ;;  %v338_v13 = vld [vmem:[%s1638_s15 + $0xc8] sm:$0xff]  ;;  %v340_v14 = vld [vmem:[%s1638_s15 + $0xd0] sm:$0xff] }
  0x36   : > { %337 = vst [vmem:[%s294_s20 + $0x60] sm:$0xff] %v336_v12  ;;  %339 = vst [vmem:[%s294_s20 + $0x68] sm:$0xff] %v338_v13  ;;  %v342_v15 = vld [vmem:[%s1638_s15 + $0xd8] sm:$0xff] }
  0x37   : > { %341 = vst [vmem:[%s294_s20 + $0x70] sm:$0xff] %v340_v14  ;;  %343 = vst [vmem:[%s294_s20 + $0x78] sm:$0xff] %v342_v15 }
  0x38 PF: > { %365 = sbr.rel (!%p1598_p3) target bundleno = 71 (0x47), region = 59  ;;  %s367_s17 = sand.u32 (%p1598_p3), 1, %s1463_s9  }
  0x39   : > { %s1209_s18 = sshll.u32 (%p1598_p3), %s1475_s12, 2  ;;  %s1208_s25 = sshll.u32 (%p1598_p3), %s367_s17, 7 }
  0x3a   : > { %s1210_s16 = sshll.u32 (%p1598_p3), %s1479_s13, 5  ;;  %s369_s21 = scalar_lea.vmem (%p1598_p3), [#allocation3], %s1208_s25 }
  0x3b   : > { %s372_s22 = sadd.s32 (%p1598_p3), %s1210_s16, %s1209_s18 }
  0x3c   : > { %s1211_s26 = sshll.u32 (%p1598_p3), %s372_s22, 3 }
  0x3d   : > { %s1664_s29 = scalar_lea.vmem (%p1598_p3), %s1965_s5, %s1211_s26 }
  0x3e   : > { %v387_v16 = vld [vmem:[%s1664_s29] sm:$0xff] (%p1598_p3)  ;;  %v389_v17 = vld [vmem:[%s1664_s29 + $0x8] sm:$0xff] (%p1598_p3)  ;;  %v391_v18 = vld [vmem:[%s1664_s29 + $0x10] sm:$0xff] (%p1598_p3) }
  0x3f   : > { %388 = vst [vmem:[%s369_s21] sm:$0xff] %v387_v16  ;;  %390 = vst [vmem:[%s369_s21 + $0x8] sm:$0xff] %v389_v17  ;;  %v393_v19 = vld [vmem:[%s1664_s29 + $0x18] sm:$0xff]  ;;  %v395_v20 = vld [vmem:[%s1664_s29 + $0x40] sm:$0xff] }
  0x40   : > { %392 = vst [vmem:[%s369_s21 + $0x10] sm:$0xff] %v391_v18  ;;  %v397_v21 = vld [vmem:[%s1664_s29 + $0x48] sm:$0xff]  ;;  %394 = vst [vmem:[%s369_s21 + $0x18] sm:$0xff] %v393_v19  ;;  %v399_v22 = vld [vmem:[%s1664_s29 + $0x50] sm:$0xff] }
  0x41   : > { %396 = vst [vmem:[%s369_s21 + $0x20] sm:$0xff] %v395_v20  ;;  %398 = vst [vmem:[%s369_s21 + $0x28] sm:$0xff] %v397_v21  ;;  %v401_v23 = vld [vmem:[%s1664_s29 + $0x58] sm:$0xff]  ;;  %v403_v24 = vld [vmem:[%s1664_s29 + $0x80] sm:$0xff] }
  0x42   : > { %400 = vst [vmem:[%s369_s21 + $0x30] sm:$0xff] %v399_v22  ;;  %402 = vst [vmem:[%s369_s21 + $0x38] sm:$0xff] %v401_v23  ;;  %v405_v25 = vld [vmem:[%s1664_s29 + $0x88] sm:$0xff]  ;;  %v407_v26 = vld [vmem:[%s1664_s29 + $0x90] sm:$0xff] }
  0x43   : > { %404 = vst [vmem:[%s369_s21 + $0x40] sm:$0xff] %v403_v24  ;;  %v409_v27 = vld [vmem:[%s1664_s29 + $0x98] sm:$0xff]  ;;  %406 = vst [vmem:[%s369_s21 + $0x48] sm:$0xff] %v405_v25  ;;  %v411_v28 = vld [vmem:[%s1664_s29 + $0xc0] sm:$0xff] }
  0x44   : > { %408 = vst [vmem:[%s369_s21 + $0x50] sm:$0xff] %v407_v26  ;;  %410 = vst [vmem:[%s369_s21 + $0x58] sm:$0xff] %v409_v27  ;;  %v413_v29 = vld [vmem:[%s1664_s29 + $0xc8] sm:$0xff]  ;;  %v415_v30 = vld [vmem:[%s1664_s29 + $0xd0] sm:$0xff] }
  0x45   : > { %412 = vst [vmem:[%s369_s21 + $0x60] sm:$0xff] %v411_v28  ;;  %414 = vst [vmem:[%s369_s21 + $0x68] sm:$0xff] %v413_v29  ;;  %v417_v31 = vld [vmem:[%s1664_s29 + $0xd8] sm:$0xff] }
  0x46   : > { %416 = vst [vmem:[%s369_s21 + $0x70] sm:$0xff] %v415_v30  ;;  %418 = vst [vmem:[%s369_s21 + $0x78] sm:$0xff] %v417_v31 }
  0x47 PF: > { %p1212_p1 = scmp.ge.s32.totalorder %s1483_s14, 1  ;;  %p423_p2 = scmp.lt.s32.totalorder %s1483_s14, 5 }
  0x49   : > { %p424_p3 = pnand %p1212_p1, %p423_p2 }
  0x4a   : > { %p494_p4 = scmp.lt.s32.totalorder (!%p424_p3), %s1471_s11, 1  ;;  %v1485_v32 = vmov (!%p424_p3), 0   ;;  %s1986_s1 = sld [smem:[#allocation17_spill]] (!%p424_p3)  ;;  %v634_v41 = vld [vmem:[%s1964_s4 + $0x8] sm:$0xff] (!%p424_p3)  ;;  %v633_v42 = vld [vmem:[%s1964_s4] sm:$0xff] (!%p424_p3)  ;;  %v636_v43 = vld [vmem:[%s1964_s4 + $0x18] sm:$0xff] (!%p424_p3) }
  0x4b   : > { %427 = sbr.rel (%p424_p3) target bundleno = 698 (0x2ba), region = 82  ;;  %1340 = vset.pattern.permute.xlu1 (!%p424_p3), %v1485_v32  ;;  %1339 = vset.pattern.permute.xlu0 (!%p424_p3), %v1485_v32  ;;  %v635_v44 = vld [vmem:[%s1964_s4 + $0x10] sm:$0xff] (!%p424_p3)  ;;  %s430_s25 = sand.u32 (!%p424_p3), 1, %s1459_s30   ;;  %vm657_vm0 = vcmask (!%p424_p3), 261120  }
  0x4c   : > { %696 = vmatprep.mubr.bf16.mxu0 (!%p424_p3), %v1485_v32  ;;  %749 = vmatprep.mubr.bf16.mxu1 (!%p424_p3), %v1485_v32  ;;  %p1226_p5 = scmp.ne.s32.totalorder (!%p424_p3), %s1467_s10, 0 }
  0x52   : > { %s495_s0 = scalar_select %p494_p4, %s1471_s11, 1 }
  0x53   : > { %vm878_vm1 = vcmask (!%p1226_p5), 7168  }
  0x54   : > { %s1240_s29 = sshll.u32 %s495_s0, 5  ;;  %s1703_s0 = sand.u32 1, %s1451_s28  }
  0x55   : > { %s503_s17 = scalar_lea.vmem %s1962_s2, %s1240_s29  ;;  %s498_s16 = scalar_lea.vmem %s1986_s1, %s1240_s29 }
  0x56   : > { %v563_v33 = vld [vmem:[%s503_s17] sm:$0xff]  ;;  %v564_v35 = vld [vmem:[%s503_s17 + $0x8] sm:$0xff]  ;;  %v526_v37 = vld [vmem:[%s498_s16 + $0x18] sm:$0xff]  ;;  %s1216_s29 = sshll.u32 %s1703_s0, 5 }
  0x57   : > { %v523_v34 = vld [vmem:[%s498_s16] sm:$0xff]  ;;  %569 = vperm.xlu1 %1340, %v563_v33   ;;  %v524_v36 = vld [vmem:[%s498_s16 + $0x8] sm:$0xff]  ;;  %v525_v38 = vld [vmem:[%s498_s16 + $0x10] sm:$0xff]  ;;  %s1713_s16 = sshll.u32 %s430_s25, 7  ;;  %s1792_s30 = scalar_lea.vmem [#allocation7], %s1216_s29 }
  0x58   : > { %529 = vperm.xlu0 %1339, %v523_v34   ;;  %v566_v39 = vld [vmem:[%s503_s17 + $0x18] sm:$0xff]  ;;  %v565_v40 = vld [vmem:[%s503_s17 + $0x10] sm:$0xff]  ;;  %s1716_s22 = scalar_lea.vmem [#allocation2], %s1713_s16  ;;  %s1749_s25 = scalar_lea.vmem [#allocation3], %s1713_s16 }
  0x59   : > { %v507_v45 = vld [vmem:[%s1716_s22] sm:$0xff]  ;;  %v509_v46 = vld [vmem:[%s1716_s22 + $0x10] sm:$0xff]  ;;  %v508_v47 = vld [vmem:[%s1716_s22 + $0x8] sm:$0xff] }
  0x5a   : > { %v510_v48 = vld [vmem:[%s1716_s22 + $0x18] sm:$0xff]  ;;  %v511_v55 = vld [vmem:[%s1716_s22 + $0x20] sm:$0xff]  ;;  %v513_v56 = vld [vmem:[%s1716_s22 + $0x30] sm:$0xff] }
  0x5b   : > { %574 = vperm.xlu1 %1340, %v564_v35   ;;  %v512_v57 = vld [vmem:[%s1716_s22 + $0x28] sm:$0xff]  ;;  %v514_v58 = vld [vmem:[%s1716_s22 + $0x38] sm:$0xff]  ;;  %v519_v4 = vld [vmem:[%s1716_s22 + $0x60] sm:$0xff] }
  0x5c   : > { %534 = vperm.xlu0 %1339, %v524_v36   ;;  %v520_v6 = vld [vmem:[%s1716_s22 + $0x68] sm:$0xff]  ;;  %v521_v7 = vld [vmem:[%s1716_s22 + $0x70] sm:$0xff]  ;;  %v522_v8 = vld [vmem:[%s1716_s22 + $0x78] sm:$0xff] }
  0x5d   : > { %v515_v14 = vld [vmem:[%s1716_s22 + $0x40] sm:$0xff]  ;;  %v516_v15 = vld [vmem:[%s1716_s22 + $0x48] sm:$0xff]  ;;  %v517_v17 = vld [vmem:[%s1716_s22 + $0x50] sm:$0xff] }
  0x5e   : > { %v518_v18 = vld [vmem:[%s1716_s22 + $0x58] sm:$0xff]  ;;  %s1760_s22 = scalar_lea.vmem [#allocation4], %s1713_s16  ;;  %s1788_s16 = scalar_lea.vmem [#allocation5], %s1216_s29 }
  0x5f   : > { %544 = vperm.xlu1 %1340, %v526_v37  }
  0x60   : > { %539 = vperm.xlu0 %1339, %v525_v38  }
  0x63   : > { %584 = vperm.xlu1 %1340, %v566_v39  }
  0x64   : > { %579 = vperm.xlu0 %1339, %v565_v40  }
  0x67   : > { %644 = vperm.xlu1 %1340, %v634_v41  }
  0x68   : > { %639 = vperm.xlu0 %1339, %v633_v42  }
  0x6b   : > { %654 = vperm.xlu1 %1340, %v636_v43  }
  0x6c   : > { %649 = vperm.xlu0 %1339, %v635_v44  }
  0xd6   : > { %v570_v49 = vpop.permute.xlu1 %569 }
  0xd7   : > { %v530_v50 = vpop.permute.xlu0 %529 }
  0xd8   : > { %v547_v51 = vmul.f32 %v530_v50, %v507_v45  ;;  %v549_v52 = vmul.f32 %v530_v50, %v509_v46  ;;  %v548_v53 = vmul.f32 %v530_v50, %v508_v47  ;;  %v550_v54 = vmul.f32 %v530_v50, %v510_v48 }
  0xda   : > { %v575_v59 = vpop.permute.xlu1 %574  ;;  %v588_v61 = vadd.f32 %v570_v49, %v548_v53  ;;  %v590_v62 = vadd.f32 %v570_v49, %v550_v54  ;;  %v587_v63 = vadd.f32 %v570_v49, %v547_v51  ;;  %v589_v3 = vadd.f32 %v570_v49, %v549_v52 }
  0xdb   : > { %v535_v60 = vpop.permute.xlu0 %534 }
  0xdc   : > { %v551_v0 = vmul.f32 %v535_v60, %v511_v55  ;;  %v553_v1 = vmul.f32 %v535_v60, %v513_v56  ;;  %v552_v2 = vmul.f32 %v535_v60, %v512_v57  ;;  %v554_v5 = vmul.f32 %v535_v60, %v514_v58  ;;  %v619_v60 = vld [vmem:[%s1963_s3] sm:$0xff] }
  0xdd   : > { %v604_v19 = vmax.f32 %v588_v61, 0.0  ;;  %v606_v20 = vmax.f32 %v590_v62, 0.0  ;;  %v603_v21 = vmax.f32 %v587_v63, 0.0  ;;  %v605_v22 = vmax.f32 %v589_v3, 0.0  ;;  %v620_v61 = vld [vmem:[%s1963_s3 + $0x8] sm:$0xff] }
  0xde   : > { %v592_v9 = vadd.f32 %v575_v59, %v552_v2  ;;  %v591_v10 = vadd.f32 %v575_v59, %v551_v0  ;;  %v593_v11 = vadd.f32 %v575_v59, %v553_v1  ;;  %v545_v12 = vpop.permute.xlu1 %544  ;;  %v594_v16 = vadd.f32 %v575_v59, %v554_v5  ;;  %v621_v1 = vld [vmem:[%s1963_s3 + $0x10] sm:$0xff]  ;;  %v622_v2 = vld [vmem:[%s1963_s3 + $0x18] sm:$0xff] }
  0xdf   : > { %v540_v13 = vpop.permute.xlu0 %539  ;;  %v559_v23 = vmul.f32 %v545_v12, %v519_v4  ;;  %v560_v24 = vmul.f32 %v545_v12, %v520_v6  ;;  %v561_v25 = vmul.f32 %v545_v12, %v521_v7  ;;  %v562_v26 = vmul.f32 %v545_v12, %v522_v8  ;;  %v772_v8 = vld [vmem:[%s1749_s25 + $0x10] sm:$0xff]  ;;  %v771_v12 = vld [vmem:[%s1749_s25 + $0x8] sm:$0xff] }
  0xe0   : > { %v608_v27 = vmax.f32 %v592_v9, 0.0  ;;  %v610_v28 = vmax.f32 %v594_v16, 0.0  ;;  %v607_v29 = vmax.f32 %v591_v10, 0.0  ;;  %v609_v30 = vmax.f32 %v593_v11, 0.0 }
  0xe1   : > { %v555_v31 = vmul.f32 %v540_v13, %v515_v14  ;;  %v556_v33 = vmul.f32 %v540_v13, %v516_v15  ;;  %v557_v34 = vmul.f32 %v540_v13, %v517_v17  ;;  %v558_v35 = vmul.f32 %v540_v13, %v518_v18  ;;  %v773_v14 = vld [vmem:[%s1749_s25 + $0x18] sm:$0xff]  ;;  %v774_v18 = vld [vmem:[%s1749_s25 + $0x20] sm:$0xff] }
  0xe2   : > { %v585_v36 = vpop.permute.xlu1 %584  ;;  %v626_v46 = vpack.c.bf16 %v608_v27, %v604_v19  ;;  %v628_v47 = vpack.c.bf16 %v610_v28, %v606_v20  ;;  %v625_v48 = vpack.c.bf16 %v607_v29, %v603_v21  ;;  %v627_v49 = vpack.c.bf16 %v609_v30, %v605_v22  ;;  %v776_v20 = vld [vmem:[%s1749_s25 + $0x30] sm:$0xff]  ;;  %v777_v28 = vld [vmem:[%s1749_s25 + $0x38] sm:$0xff] }
  0xe3   : > { %v580_v37 = vpop.permute.xlu0 %579  ;;  %v599_v38 = vadd.f32 %v585_v36, %v559_v23  ;;  %v600_v39 = vadd.f32 %v585_v36, %v560_v24  ;;  %v601_v40 = vadd.f32 %v585_v36, %v561_v25  ;;  %v602_v41 = vadd.f32 %v585_v36, %v562_v26  ;;  %v775_v26 = vld [vmem:[%s1749_s25 + $0x28] sm:$0xff] }
  0xe4   : > { %v595_v42 = vadd.f32 %v580_v37, %v555_v31  ;;  %v596_v43 = vadd.f32 %v580_v37, %v556_v33  ;;  %v597_v44 = vadd.f32 %v580_v37, %v557_v34  ;;  %v598_v45 = vadd.f32 %v580_v37, %v558_v35  ;;  %664 = vmatprep.subr.bf16.mxu0 %v626_v46  ;;  %v778_v46 = vld [vmem:[%s1749_s25 + $0x40] sm:$0xff] }
  0xe5   : > { %v616_v51 = vmax.f32 %v600_v39, 0.0  ;;  %v618_v53 = vmax.f32 %v602_v41, 0.0  ;;  %717 = vmatprep.subr.bf16.mxu1 %v628_v47  ;;  %v615_v55 = vmax.f32 %v599_v38, 0.0  ;;  %v617_v57 = vmax.f32 %v601_v40, 0.0  ;;  %665 = vmatpush1.bf16.msra.mxu0 %v625_v48  ;;  %v780_v48 = vld [vmem:[%s1749_s25 + $0x50] sm:$0xff] }
  0xe6   : > { %v612_v50 = vmax.f32 %v596_v43, 0.0  ;;  %v614_v52 = vmax.f32 %v598_v45, 0.0  ;;  %v611_v54 = vmax.f32 %v595_v42, 0.0  ;;  %v613_v56 = vmax.f32 %v597_v44, 0.0  ;;  %718 = vmatpush1.bf16.msra.mxu1 %v627_v49  ;;  %v645_v4 = vpop.permute.xlu1 %644 }
  0xe7   : > { %v623_v0 = vpack.c.bf16 %v620_v61, %v619_v60  ;;  %v624_v3 = vpack.c.bf16 %v622_v2, %v621_v1  ;;  %v640_v5 = vpop.permute.xlu0 %639  ;;  %v784_v2 = vld [vmem:[%s1749_s25 + $0x70] sm:$0xff] }
  0xe8   : > { %v630_v58 = vpack.c.bf16 %v616_v51, %v612_v50  ;;  %v632_v59 = vpack.c.bf16 %v618_v53, %v614_v52  ;;  %v629_v62 = vpack.c.bf16 %v615_v55, %v611_v54  ;;  %v631_v63 = vpack.c.bf16 %v617_v57, %v613_v56  ;;  %v779_v57 = vld [vmem:[%s1749_s25 + $0x48] sm:$0xff] }
  0xea   : > { %666 = vmatprep.subr.bf16.mxu0 %v630_v58  ;;  %719 = vmatprep.subr.bf16.mxu1 %v632_v59  ;;  %v655_v41 = vpop.permute.xlu1 %654  ;;  %v781_v59 = vld [vmem:[%s1749_s25 + $0x58] sm:$0xff] }
  0xeb   : > { %667 = vmatpush1.bf16.msra.mxu0 %v629_v62  ;;  %720 = vmatpush1.bf16.msra.mxu1 %v631_v63  ;;  %v650_v42 = vpop.permute.xlu0 %649 }
  0xee   : > { %1222 = vmatmul.mubr.msk.bf16.vlgmr.msra.gmra.mrb[0].mxu0 %vm657_vm0, %v623_v0  ;;  %1224 = vmatmul.mubr.msk.bf16.vlgmr.msra.gmra.mrb[0].mxu1 %vm657_vm0, %v623_v0  ;;  %v782_v0 = vld [vmem:[%s1749_s25 + $0x60] sm:$0xff] }
  0xef   : > { %706 = vmatprep.mubr.bf16.mxu0 %v1485_v32  ;;  %759 = vmatprep.mubr.bf16.mxu1 %v1485_v32  ;;  %v770_v32 = vld [vmem:[%s1749_s25] sm:$0xff] }
  0xf6   : > { %1223 = vmatmul.mubr.msk.bf16.gmra.mrb[4].mxu0 %vm657_vm0, %v624_v3  ;;  %1225 = vmatmul.mubr.msk.bf16.gmra.mrb[4].mxu1 %vm657_vm0, %v624_v3 }
 0x1c1   : > { %v698_v6 = vpop.f32.mrb[0].mxu0  ;;  %v751_v7 = vpop.f32.mrb[0].mxu1 }
 0x1c2   : > { %v699_v9 = vadd.f32 %v698_v6, %v640_v5  ;;  %v752_v10 = vadd.f32 %v751_v7, %v640_v5  ;;  %v700_v11 = vpop.f32.mrb[1].mxu0  ;;  %v753_v13 = vpop.f32.mrb[1].mxu1 }
 0x1c3   : > { %v701_v15 = vadd.f32 %v700_v11, %v640_v5  ;;  %v754_v16 = vadd.f32 %v753_v13, %v640_v5  ;;  %v702_v17 = vpop.f32.mrb[2].mxu0  ;;  %v755_v19 = vpop.f32.mrb[2].mxu1  ;;  %v785_v11 = vld [vmem:[%s1749_s25 + $0x78] sm:$0xff] }
 0x1c4   : > { %v786_v21 = vadd.f32 %v770_v32, %v699_v9  ;;  %v788_v22 = vadd.f32 %v772_v8, %v752_v10  ;;  %v703_v23 = vadd.f32 %v702_v17, %v645_v4  ;;  %v756_v24 = vadd.f32 %v755_v19, %v645_v4  ;;  %v704_v25 = vpop.f32.mrb[3].mxu0  ;;  %v757_v27 = vpop.f32.mrb[3].mxu1  ;;  %v783_v9 = vld [vmem:[%s1749_s25 + $0x68] sm:$0xff] }
 0x1c5   : > { %v787_v29 = vadd.f32 %v771_v12, %v701_v15  ;;  %v789_v30 = vadd.f32 %v773_v14, %v754_v16  ;;  %v705_v31 = vadd.f32 %v704_v25, %v645_v4  ;;  %v758_v33 = vadd.f32 %v757_v27, %v645_v4 }
 0x1c6   : > { %802 = vst [vmem:[%s1760_s22] sm:$0xff] %v786_v21  ;;  %v838_v34 = vmul.f32 %v786_v21, %v786_v21  ;;  %804 = vst [vmem:[%s1760_s22 + $0x10] sm:$0xff] %v788_v22  ;;  %v790_v35 = vadd.f32 %v774_v18, %v703_v23  ;;  %v792_v36 = vadd.f32 %v776_v20, %v756_v24 }
 0x1c7   : > { %803 = vst [vmem:[%s1760_s22 + $0x8] sm:$0xff] %v787_v29  ;;  %v839_v37 = vmul.f32 %v787_v29, %v787_v29  ;;  %805 = vst [vmem:[%s1760_s22 + $0x18] sm:$0xff] %v789_v30  ;;  %v791_v38 = vadd.f32 %v775_v26, %v705_v31  ;;  %v793_v39 = vadd.f32 %v777_v28, %v758_v33 }
 0x1c8   : > { %v818_v40 = vadd.f32 %v787_v29, %v786_v21  ;;  %806 = vst [vmem:[%s1760_s22 + $0x20] sm:$0xff] %v790_v35  ;;  %v842_v43 = vmul.f32 %v790_v35, %v790_v35  ;;  %808 = vst [vmem:[%s1760_s22 + $0x30] sm:$0xff] %v792_v36  ;;  %v840_v44 = vmul.f32 %v788_v22, %v788_v22 }
 0x1c9   : > { %807 = vst [vmem:[%s1760_s22 + $0x28] sm:$0xff] %v791_v38  ;;  %809 = vst [vmem:[%s1760_s22 + $0x38] sm:$0xff] %v793_v39  ;;  %v708_v45 = vpop.f32.mrb[4].mxu0  ;;  %v761_v47 = vpop.f32.mrb[4].mxu1  ;;  %v823_v50 = vadd.f32 %v791_v38, %v790_v35  ;;  %v844_v51 = vmul.f32 %v792_v36, %v792_v36  ;;  %v841_v52 = vmul.f32 %v789_v30, %v789_v30 }
 0x1ca   : > { %v819_v49 = vadd.f32 %v818_v40, %v788_v22  ;;  %v843_v53 = vmul.f32 %v791_v38, %v791_v38  ;;  %v709_v54 = vadd.f32 %v708_v45, %v650_v42  ;;  %v762_v55 = vadd.f32 %v761_v47, %v650_v42  ;;  %v710_v56 = vpop.f32.mrb[5].mxu0  ;;  %v763_v58 = vpop.f32.mrb[5].mxu1 }
 0x1cb   : > { %v854_v60 = vadd.f32 %v839_v37, %v838_v34  ;;  %v711_v61 = vadd.f32 %v710_v56, %v650_v42  ;;  %v764_v62 = vadd.f32 %v763_v58, %v650_v42  ;;  %v712_v63 = vpop.f32.mrb[6].mxu0  ;;  %v765_v1 = vpop.f32.mrb[6].mxu1  ;;  %v824_v4 = vadd.f32 %v823_v50, %v792_v36 }
 0x1cc   : > { %v820_v3 = vadd.f32 %v819_v49, %v789_v30  ;;  %v794_v5 = vadd.f32 %v778_v46, %v709_v54  ;;  %v796_v6 = vadd.f32 %v780_v48, %v762_v55  ;;  %v713_v32 = vadd.f32 %v712_v63, %v655_v41  ;;  %v714_v8 = vpop.f32.mrb[7].mxu0  ;;  %v767_v10 = vpop.f32.mrb[7].mxu1 }
 0x1cd   : > { %v766_v7 = vadd.f32 %v765_v1, %v655_v41  ;;  %v795_v12 = vadd.f32 %v779_v57, %v711_v61  ;;  %v797_v13 = vadd.f32 %v781_v59, %v764_v62  ;;  %v715_v14 = vadd.f32 %v714_v8, %v655_v41 }
 0x1ce   : > { %v768_v15 = vadd.f32 %v767_v10, %v655_v41  ;;  %821 = vadd.xlane.f32.xlu0 %v820_v3  ;;  %810 = vst [vmem:[%s1760_s22 + $0x40] sm:$0xff] %v794_v5  ;;  %v846_v16 = vmul.f32 %v794_v5, %v794_v5  ;;  %812 = vst [vmem:[%s1760_s22 + $0x50] sm:$0xff] %v796_v6  ;;  %v798_v17 = vadd.f32 %v782_v0, %v713_v32 }
 0x1cf   : > { %v800_v18 = vadd.f32 %v784_v2, %v766_v7  ;;  %v825_v19 = vadd.f32 %v824_v4, %v793_v39  ;;  %811 = vst [vmem:[%s1760_s22 + $0x48] sm:$0xff] %v795_v12  ;;  %v847_v20 = vmul.f32 %v795_v12, %v795_v12  ;;  %813 = vst [vmem:[%s1760_s22 + $0x58] sm:$0xff] %v797_v13 }
 0x1d0   : > { %v799_v21 = vadd.f32 %v783_v9, %v715_v14  ;;  %v801_v22 = vadd.f32 %v785_v11, %v768_v15  ;;  %v859_v23 = vadd.f32 %v843_v53, %v842_v43  ;;  %814 = vst [vmem:[%s1760_s22 + $0x60] sm:$0xff] %v798_v17  ;;  %v850_v24 = vmul.f32 %v798_v17, %v798_v17 }
 0x1d1   : > { %816 = vst [vmem:[%s1760_s22 + $0x70] sm:$0xff] %v800_v18  ;;  %826 = vadd.xlane.f32.xlu1 %v825_v19  ;;  %v845_v25 = vmul.f32 %v793_v39, %v793_v39  ;;  %v855_v26 = vadd.f32 %v854_v60, %v840_v44  ;;  %v828_v27 = vadd.f32 %v795_v12, %v794_v5 }
 0x1d2   : > { %815 = vst [vmem:[%s1760_s22 + $0x68] sm:$0xff] %v799_v21  ;;  %v851_v28 = vmul.f32 %v799_v21, %v799_v21  ;;  %817 = vst [vmem:[%s1760_s22 + $0x78] sm:$0xff] %v801_v22  ;;  %v860_v29 = vadd.f32 %v859_v23, %v844_v51  ;;  %v848_v30 = vmul.f32 %v796_v6, %v796_v6 }
 0x1d3   : > { %v864_v31 = vadd.f32 %v847_v20, %v846_v16  ;;  %v856_v33 = vadd.f32 %v855_v26, %v841_v52  ;;  %v829_v34 = vadd.f32 %v828_v27, %v796_v6  ;;  %v849_v35 = vmul.f32 %v797_v13, %v797_v13 }
 0x1d4   : > { %v833_v36 = vadd.f32 %v799_v21, %v798_v17  ;;  %v861_v37 = vadd.f32 %v860_v29, %v845_v25  ;;  %v852_v40 = vmul.f32 %v800_v18, %v800_v18  ;;  %v869_v41 = vadd.f32 %v851_v28, %v850_v24 }
 0x1d5   : > { %v865_v38 = vadd.f32 %v864_v31, %v848_v30  ;;  %857 = vadd.xlane.f32.xlu1 %v856_v33  ;;  %v830_v42 = vadd.f32 %v829_v34, %v797_v13  ;;  %v853_v44 = vmul.f32 %v801_v22, %v801_v22 }
 0x1d6   : > { %v834_v43 = vadd.f32 %v833_v36, %v800_v18  ;;  %862 = vadd.xlane.f32.xlu0 %v861_v37  ;;  %v870_v45 = vadd.f32 %v869_v41, %v852_v40 }
 0x1d7   : > { %v866_v39 = vadd.f32 %v865_v38, %v849_v35 }
 0x1d8   : > { %v835_v46 = vadd.f32 %v834_v43, %v801_v22  ;;  %v871_v47 = vadd.f32 %v870_v45, %v853_v44 }
 0x1d9   : > { %867 = vadd.xlane.f32.xlu1 %v866_v39 }
 0x1da   : > { %831 = vadd.xlane.f32.xlu0 %v830_v42 }
 0x1de   : > { %836 = vadd.xlane.f32.xlu0 %v835_v46 }
 0x1e2   : > { %872 = vadd.xlane.f32.xlu0 %v871_v47 }
 0x25b   : > { %v822_v48 = vpop.xlane.xlu0 %821 }
 0x25c   : > { %879 = vst.msk [vmem:[%s1788_s16] sm:$0xff] (!%p1226_p5), %vm878_vm1, %v822_v48 }
 0x25e   : > { %v827_v49 = vpop.xlane.xlu1 %826 }
 0x25f   : > { %880 = vst.msk [vmem:[%s1788_s16 + $0x8] sm:$0xff] (!%p1226_p5), %vm878_vm1, %v827_v49 }
 0x262   : > { %v858_v50 = vpop.xlane.xlu1 %857 }
 0x263   : > { %v863_v51 = vpop.xlane.xlu0 %862  ;;  %883 = vst.msk [vmem:[%s1792_s30] sm:$0xff] (!%p1226_p5), %vm878_vm1, %v858_v50 }
 0x264   : > { %884 = vst.msk [vmem:[%s1792_s30 + $0x8] sm:$0xff] (!%p1226_p5), %vm878_vm1, %v863_v51 }
 0x266   : > { %v868_v52 = vpop.xlane.xlu1 %867 }
 0x267   : > { %v832_v53 = vpop.xlane.xlu0 %831  ;;  %885 = vst.msk [vmem:[%s1792_s30 + $0x10] sm:$0xff] (!%p1226_p5), %vm878_vm1, %v868_v52 }
 0x268   : > { %881 = vst.msk [vmem:[%s1788_s16 + $0x10] sm:$0xff] (!%p1226_p5), %vm878_vm1, %v832_v53 }
 0x269   : > { %877 = sbr.rel (%p1226_p5) target bundleno = 625 (0x271), region = 94 }
 0x26b   : > { %v837_v54 = vpop.xlane.xlu0 %836 }
 0x26c   : > { %882 = vst.msk [vmem:[%s1788_s16 + $0x18] sm:$0xff] (!%p1226_p5), %vm878_vm1, %v837_v54 }
 0x26f   : > { %v873_v55 = vpop.xlane.xlu0 %872 }
 0x270   : > { %886 = vst.msk [vmem:[%s1792_s30 + $0x18] sm:$0xff] %vm878_vm1, %v873_v55 }
 0x271 PF: > { %p1227_p6 = scmp.le.s32.totalorder %s1467_s10, 0 }
 0x272   : > { %v891_v56 = vld [vmem:[%s1788_s16] sm:$0xff] (!%p1227_p6)  ;;  %vm899_vm2 = vcmask (!%p1227_p6), 7168   ;;  %v892_v57 = vld [vmem:[%s1788_s16 + $0x8] sm:$0xff] (!%p1227_p6)  ;;  %v893_v58 = vld [vmem:[%s1788_s16 + $0x10] sm:$0xff] (!%p1227_p6) }
 0x273   : > { %890 = sbr.rel (%p1227_p6) target bundleno = 635 (0x27b), region = 98  ;;  %v895_v59 = vadd.f32 (!%p1227_p6), %v891_v56, %v822_v48  ;;  %v896_v60 = vadd.f32 (!%p1227_p6), %v892_v57, %v827_v49  ;;  %v897_v61 = vadd.f32 (!%p1227_p6), %v893_v58, %v832_v53  ;;  %v904_v63 = vld [vmem:[%s1792_s30] sm:$0xff] (!%p1227_p6)  ;;  %v905_v0 = vld [vmem:[%s1792_s30 + $0x8] sm:$0xff] (!%p1227_p6)  ;;  %v906_v4 = vld [vmem:[%s1792_s30 + $0x10] sm:$0xff] (!%p1227_p6) }
 0x274   : > { %v894_v62 = vld [vmem:[%s1788_s16 + $0x18] sm:$0xff] (!%p1227_p6)  ;;  %v908_v2 = vadd.f32 (!%p1227_p6), %v904_v63, %v858_v50  ;;  %v909_v3 = vadd.f32 (!%p1227_p6), %v905_v0, %v863_v51  ;;  %v910_v6 = vadd.f32 (!%p1227_p6), %v906_v4, %v868_v52 }
 0x275   : > { %v898_v1 = vadd.f32 (!%p1227_p6), %v894_v62, %v837_v54  ;;  %900 = vst.msk [vmem:[%s1788_s16] sm:$0xff] (!%p1227_p6), %vm899_vm2, %v895_v59  ;;  %901 = vst.msk [vmem:[%s1788_s16 + $0x8] sm:$0xff] (!%p1227_p6), %vm899_vm2, %v896_v60 }
 0x276   : > { %902 = vst.msk [vmem:[%s1788_s16 + $0x10] sm:$0xff] (!%p1227_p6), %vm899_vm2, %v897_v61  ;;  %912 = vst.msk [vmem:[%s1792_s30] sm:$0xff] (!%p1227_p6), %vm899_vm2, %v908_v2 }
 0x277   : > { %v907_v5 = vld [vmem:[%s1792_s30 + $0x18] sm:$0xff] (!%p1227_p6)  ;;  %903 = vst.msk [vmem:[%s1788_s16 + $0x18] sm:$0xff] (!%p1227_p6), %vm899_vm2, %v898_v1  ;;  %913 = vst.msk [vmem:[%s1792_s30 + $0x8] sm:$0xff] (!%p1227_p6), %vm899_vm2, %v909_v3 }
 0x278   : > { %v911_v32 = vadd.f32 (!%p1227_p6), %v907_v5, %v873_v55  ;;  %914 = vst.msk [vmem:[%s1792_s30 + $0x10] sm:$0xff] (!%p1227_p6), %vm899_vm2, %v910_v6 }
 0x27a   : > { %915 = vst.msk [vmem:[%s1792_s30 + $0x18] sm:$0xff] %vm899_vm2, %v911_v32 }
 0x27b PF: > { %s921_s29 = scalar_lea.sflag [#allocation6], %s1703_s0  ;;  %932 = sbr.rel (!%p1607_p7) target bundleno = 648 (0x288), region = 102  ;;  %v950_v7 = vld [vmem:[%s1760_s22] sm:$0xff] (%p1607_p7)  ;;  %v952_v8 = vld [vmem:[%s1760_s22 + $0x8] sm:$0xff] (%p1607_p7)  ;;  %v954_v9 = vld [vmem:[%s1760_s22 + $0x10] sm:$0xff] (%p1607_p7) }
 0x27c   : > { %s1231_s19 = sshll.u32 (%p1607_p7), %s1467_s10, 2  ;;  %s1232_s21 = sshll.u32 (%p1607_p7), %s1471_s11, 5  ;;  %v956_v10 = vld [vmem:[%s1760_s22 + $0x18] sm:$0xff] (%p1607_p7)  ;;  %v958_v11 = vld [vmem:[%s1760_s22 + $0x20] sm:$0xff] (%p1607_p7)  ;;  %v960_v12 = vld [vmem:[%s1760_s22 + $0x28] sm:$0xff] (%p1607_p7) }
 0x27d   : > { %s935_s23 = sadd.s32 (%p1607_p7), %s1232_s21, %s1231_s19  ;;  %v962_v13 = vld [vmem:[%s1760_s22 + $0x30] sm:$0xff] (%p1607_p7)  ;;  %v964_v14 = vld [vmem:[%s1760_s22 + $0x38] sm:$0xff] (%p1607_p7)  ;;  %v966_v15 = vld [vmem:[%s1760_s22 + $0x40] sm:$0xff] (%p1607_p7) }
 0x27e   : > { %s1233_s15 = sshll.u32 (%p1607_p7), %s935_s23, 3  ;;  %v968_v16 = vld [vmem:[%s1760_s22 + $0x48] sm:$0xff] (%p1607_p7)  ;;  %v970_v17 = vld [vmem:[%s1760_s22 + $0x50] sm:$0xff] (%p1607_p7)  ;;  %v972_v18 = vld [vmem:[%s1760_s22 + $0x58] sm:$0xff] (%p1607_p7) }
 0x27f   : > { %s937_s18 = scalar_lea.vmem (%p1607_p7), %s1966_s6, %s1233_s15  ;;  %v974_v19 = vld [vmem:[%s1760_s22 + $0x60] sm:$0xff] (%p1607_p7)  ;;  %v976_v20 = vld [vmem:[%s1760_s22 + $0x68] sm:$0xff] (%p1607_p7)  ;;  %v978_v21 = vld [vmem:[%s1760_s22 + $0x70] sm:$0xff] (%p1607_p7) }
 0x280   : > { %951 = vst [vmem:[%s937_s18] sm:$0xff] (%p1607_p7), %v950_v7  ;;  %953 = vst [vmem:[%s937_s18 + $0x8] sm:$0xff] (%p1607_p7), %v952_v8  ;;  %v980_v22 = vld [vmem:[%s1760_s22 + $0x78] sm:$0xff] (%p1607_p7) }
 0x281   : > { %955 = vst [vmem:[%s937_s18 + $0x10] sm:$0xff] (%p1607_p7), %v954_v9  ;;  %957 = vst [vmem:[%s937_s18 + $0x18] sm:$0xff] (%p1607_p7), %v956_v10 }
 0x282   : > { %959 = vst [vmem:[%s937_s18 + $0x40] sm:$0xff] %v958_v11  ;;  %961 = vst [vmem:[%s937_s18 + $0x48] sm:$0xff] %v960_v12 }
 0x283   : > { %963 = vst [vmem:[%s937_s18 + $0x50] sm:$0xff] %v962_v13  ;;  %965 = vst [vmem:[%s937_s18 + $0x58] sm:$0xff] %v964_v14 }
 0x284   : > { %967 = vst [vmem:[%s937_s18 + $0x80] sm:$0xff] %v966_v15  ;;  %969 = vst [vmem:[%s937_s18 + $0x88] sm:$0xff] %v968_v16 }
 0x285   : > { %971 = vst [vmem:[%s937_s18 + $0x90] sm:$0xff] %v970_v17  ;;  %973 = vst [vmem:[%s937_s18 + $0x98] sm:$0xff] %v972_v18 }
 0x286   : > { %975 = vst [vmem:[%s937_s18 + $0xc0] sm:$0xff] %v974_v19  ;;  %977 = vst [vmem:[%s937_s18 + $0xc8] sm:$0xff] %v976_v20 }
 0x287   : > { %979 = vst [vmem:[%s937_s18 + $0xd0] sm:$0xff] %v978_v21  ;;  %981 = vst [vmem:[%s937_s18 + $0xd8] sm:$0xff] %v980_v22 }
 0x288 PF: > { %s1242_s10 = sshll.u32 %s1471_s11, 9  ;;  %s994_s25 = sshll.u32 %s1788_s16, 4  ;;  %s1862_s25 = int_to_ptr.vmem [resolvable:$true] %s994_s25 }
 0x289   : > { %s1860_s23 = scalar_lea.hbm %s1967_s7, %s1242_s10  ;;  %s1341_s22 = scalar_lea.vmem %s1862_s25, 512 }
 0x28a   : > { %p1342_p7 = scmp.ne.s32.totalorder %s1862_s25, %s1341_s22  ;;  %s1486_s15 = smov [#allocation5]  }
 0x28b   : > { %s1345_s20 = sshll.u32 %s1486_s15, 4  ;;  %s1346_s20 = int_to_ptr.vmem [resolvable:$false] %s1345_s20 }
 0x28c   : > { %p1343_p9 = pnand %p1342_p7, %p1611_p8  ;;  %s1347_s16 = scalar_lea.vmem %s1346_s20, 1024 }
 0x28d   : > { %p1348_p11 = scmp.lt.s32.totalorder %s1862_s25, %s1346_s20  ;;  %p1349_p12 = scmp.lt.s32.totalorder %s1347_s16, %s1341_s22 }
 0x28e   : > { %p1344_p10 = pneg %p1343_p9 }
 0x28f   : > { %p1350_p0 = por %p1349_p12, %p1348_p11 }
 0x291   : > { %p1351_p1 = pnand %p1350_p0, %p1344_p10 }
 0x293   : > { %1354 = shalt.err (!%p1351_p1)
}
 0x294   : > { %s1355_s17 = scalar_lea.hbm %s1860_s23, 512  ;;  %s1359_s21 = scalar_lea.hbm %s1967_s7, 1024 }
 0x295   : > { %p1356_p2 = scmp.ne.s32.totalorder %s1860_s23, %s1355_s17  ;;  %p1360_p5 = scmp.lt.u32.totalorder %s1860_s23, %s1967_s7 }
 0x296   : > { %p1361_p6 = scmp.lt.u32.totalorder %s1359_s21, %s1355_s17  ;;  %p1363_p9 = scmp.lt.u32.totalorder %s1355_s17, %s1860_s23 }
 0x297   : > { %p1357_p3 = pnand %p1356_p2, %p1611_p8 }
 0x298   : > { %p1362_p7 = por %p1361_p6, %p1360_p5 }
 0x299   : > { %p1358_p4 = pneg %p1357_p3 }
 0x29a   : > { %p1364_p10 = por %p1363_p9, %p1362_p7 }
 0x29c   : > { %p1365_p11 = pnand %p1364_p10, %p1358_p4 }
 0x29e   : > { %1368 = shalt.err (!%p1365_p11)
}
 0x29f   : > { %s1487_s22 = smov 128   ;;  %s1488_s16 = smov 8  }
 0x2a0   : > { %1244 = dma.vmem_to_hbm [thread:$0]  (%p1611_p8), %s1862_s25, 512, %s1860_s23, %s921_s29, %s1487_s22, %s1487_s22, %s1488_s16  }
 0x2a1   : > { %s1987_s19 = sld [smem:[#allocation18_spill]]  ;;  %s1010_s15 = sshll.u32 %s1792_s30, 4  ;;  %s1898_s15 = int_to_ptr.vmem [resolvable:$true] %s1010_s15 }
 0x2a2   : > { %s1369_s20 = scalar_lea.vmem %s1898_s15, 512  ;;  %s1489_s26 = smov [#allocation7]  }
 0x2a3   : > { %p1370_p12 = scmp.ne.s32.totalorder %s1898_s15, %s1369_s20  ;;  %s1373_s1 = sshll.u32 %s1489_s26, 4  ;;  %s1374_s1 = int_to_ptr.vmem [resolvable:$false] %s1373_s1 }
 0x2a4   : > { %s1375_s11 = scalar_lea.vmem %s1374_s1, 1024  ;;  %p1376_p2 = scmp.lt.s32.totalorder %s1898_s15, %s1374_s1 }
 0x2a5   : > { %p1371_p0 = pnand %p1370_p12, %p1611_p8  ;;  %p1377_p3 = scmp.lt.s32.totalorder %s1375_s11, %s1369_s20 }
 0x2a7   : > { %s1895_s21 = scalar_lea.hbm %s1987_s19, %s1242_s10  ;;  %p1372_p1 = pneg %p1371_p0 }
 0x2a8   : > { %p1378_p4 = por %p1377_p3, %p1376_p2 }
 0x2aa   : > { %p1379_p5 = pnand %p1378_p4, %p1372_p1 }
 0x2ac   : > { %1382 = shalt.err (!%p1379_p5)
}
 0x2ad   : > { %s1383_s30 = scalar_lea.hbm %s1895_s21, 512  ;;  %s1387_s26 = scalar_lea.hbm %s1987_s19, 1024 }
 0x2ae   : > { %p1384_p6 = scmp.ne.s32.totalorder %s1895_s21, %s1383_s30  ;;  %p1388_p10 = scmp.lt.u32.totalorder %s1895_s21, %s1987_s19 }
 0x2af   : > { %p1389_p11 = scmp.lt.u32.totalorder %s1387_s26, %s1383_s30  ;;  %p1391_p0 = scmp.lt.u32.totalorder %s1383_s30, %s1895_s21 }
 0x2b0   : > { %p1385_p7 = pnand %p1384_p6, %p1611_p8 }
 0x2b1   : > { %p1390_p12 = por %p1389_p11, %p1388_p10 }
 0x2b2   : > { %p1386_p9 = pneg %p1385_p7 }
 0x2b3   : > { %p1392_p1 = por %p1391_p0, %p1390_p12 }
 0x2b5   : > { %p1393_p2 = pnand %p1392_p1, %p1386_p9 }
 0x2b7   : > { %1396 = shalt.err (!%p1393_p2)
}
 0x2b8   : > { %s1988_s23 = scalar_lea.sflag [#allocation8], %s1703_s0 }
 0x2b9   : > { %1245 = dma.vmem_to_hbm [thread:$0]  (%p1611_p8), %s1898_s15, 512, %s1895_s21, %s1988_s23, %s1487_s22, %s1487_s22, %s1488_s16  }
 0x2ba PF: > { %p1255_p3 = scmp.ge.s32.totalorder %s1483_s14, 2  ;;  %s1032_s17 = sand.u32 1, %s1447_s27  }
 0x2bb   : > { %s1033_s18 = scalar_lea.sflag [#allocation6], %s1032_s17 }
 0x2bc   : > { %p1249_p4 = pnand %p1255_p3, %p1625_p13 }
 0x2be   : > { %1438 = dma.done.wait (!%p1249_p4), %s1033_s18, 512  }
 0x2bf   : > { %1440 = vsyncadd (!%p1249_p4), %s1033_s18, 4294966784  ;;  %s1042_s24 = scalar_lea.sflag [#allocation8], %s1032_s17 }
 0x2c0   : > { %1442 = dma.done.wait (!%p1249_p4), %s1042_s24, 512  }
 0x2c1   : > { %1444 = vsyncadd (!%p1249_p4), %s1042_s24, 4294966784  ;;  %s25_s14 = sadd.s32 1, %s1483_s14   ;;  %s1989_s0 = sld [smem:[#allocation11_spill]] }
 0x2c2   : > { %p22_p5 = scmp.ge.s32.totalorder %s25_s14, 6   ;;  %s1990_s29 = sld [smem:[#allocation14_spill]] }
 0x2c3   : > { %s1991_s22 = sld [smem:[#allocation15_spill]]  ;;  %s1992_s16 = sld [smem:[#allocation12_spill]] }
 0x2c4   : > { %s1993_s21 = sld [smem:[#allocation13_spill]]  ;;  %s1994_s27 = smov %s1451_s28 }
 0x2c5   : > { %s1996_s30 = smov %s1463_s9  ;;  %s1998_s10 = smov %s1475_s12 }
 0x2c6   : > { %s1999_s11 = smov %s1479_s13  ;;  %24 = sbr.rel (!%p22_p5) target bundleno = 12 (0xc), region = 204 }
 0x2c7   : > { %s1995_s28 = smov %s1989_s0 }
 0x2c9   : > { %s1997_s9 = smov %s1991_s22  ;;  %s2000_s12 = smov %s1992_s16 }
 0x2ca   : > { %s2001_s13 = smov %s1993_s21 }
 0x2cd   :  { %1047 = vsyncpa [#allocation6], 1 }
 0x2ce   :  { %1049 = vsyncpa [#allocation6 + $0x1], 1 }
 0x2cf   :  { %1050 = vsyncpa [#allocation8], 1 }
 0x2d0   :  { %1052 = vsyncpa [#allocation8 + $0x1], 1 }

</bundles_post_ra>
